<compile_context>
chip_gen: v7x
topology: tpu7x:2x2x1
jax: 0.10.0
libtpu: 0.0.40
codegen_flags: <defaults>
</compile_context>

<pallas_src>
import functools
import math

import jax
import jax.numpy as jnp
from jax.experimental import pallas as pl
from jax.experimental.pallas import tpu as pltpu


# --------------------------- in-kernel math helpers ---------------------------

def _gelu_tanh(x):
    # tanh-approximate GELU (tanh runs on the EUP slot).
    c = 0.7978845608028654  # sqrt(2/pi)
    return 0.5 * x * (1.0 + jnp.tanh(c * (x + 0.044715 * x * x * x)))


def _layernorm(x, g, b, eps):
    mu = jnp.mean(x, axis=-1, keepdims=True)
    d = x - mu
    var = jnp.mean(d * d, axis=-1, keepdims=True)
    return d * jax.lax.rsqrt(var + eps) * g + b


def _fullspec(shape):
    n = len(shape)
    return pl.BlockSpec(shape, lambda *_: (0,) * n)


# ----------------------- in-kernel transformer encoder ------------------------

def _encoder_stack(x, key_bias_wide, attn_sc, stack, *, B, T, H, D, eps):
    """Post-norm TransformerEncoder, statically unrolled over layers.

    x:             (B*T, D) f32 activations.
    key_bias_wide: (B, H*T) f32 additive key-padding bias (already head-tiled)
                   or None (no mask).
    attn_sc:       VMEM scratch ref with >= B*T rows, D lanes (f32).
    stack:         12 layer-stacked weight refs (leading axis = layer).
    """
    (wqkv, bqkv, wout, bout, ln1g, ln1b,
     wff1, bff1, wff2, bff2, ln2g, ln2b) = stack
    L = wqkv.shape[0]
    dh = D // H
    HT = H * T
    bf16 = jnp.bfloat16

    # Stacked per-head lane mask (HT, D): rows h*T .. h*T+T-1 keep head h lanes.
    row = jax.lax.broadcasted_iota(jnp.int32, (HT, D), 0)
    lane = jax.lax.broadcasted_iota(jnp.int32, (HT, D), 1)
    mask_stack = jnp.zeros((HT, D), jnp.float32)
    for h in range(H):
        sel = ((row >= h * T) & (row < (h + 1) * T) &
               (lane >= h * dh) & (lane < (h + 1) * dh))
        mask_stack = mask_stack + jnp.where(sel, 1.0, 0.0)

    # Block-diagonal (HT, HT) segment-sum matrix: e @ seg gives each head's
    # softmax denominator broadcast back onto that head's T columns.
    ri = jax.lax.broadcasted_iota(jnp.int32, (HT, HT), 0)
    ci = jax.lax.broadcasted_iota(jnp.int32, (HT, HT), 1)
    seg = jnp.zeros((HT, HT), jnp.float32)
    for h in range(H):
        blk = ((ri >= h * T) & (ri < (h + 1) * T) &
               (ci >= h * T) & (ci < (h + 1) * T))
        seg = seg + jnp.where(blk, 1.0, 0.0)

    for l in range(L):
        x_bf = x.astype(bf16)
        qkv = jnp.dot(x_bf, wqkv[l],
                      preferred_element_type=jnp.float32) + bqkv[l]      # (B*T, 3D)

        # ---- multi-head self-attention, all heads batched per batch element ----
        for b in range(B):
            q = qkv[b * T:(b + 1) * T, 0:D].astype(bf16)                 # (T, D)
            k = qkv[b * T:(b + 1) * T, D:2 * D]                          # (T, D)
            v = qkv[b * T:(b + 1) * T, 2 * D:3 * D]                      # (T, D)
            k_stack = (jnp.broadcast_to(k[None], (H, T, D)).reshape(HT, D)
                       * mask_stack).astype(bf16)                        # (HT, D)
            v_stack = (jnp.broadcast_to(v[None], (H, T, D)).reshape(HT, D)
                       * mask_stack).astype(bf16)                        # (HT, D)
            # scores for all heads in one GEMM: s[t, h*T + j] = q_h[t] . k_h[j]
            s = jax.lax.dot_general(q, k_stack, (((1,), (1,)), ((), ())),
                                    preferred_element_type=jnp.float32)  # (T, HT)
            if key_bias_wide is not None:
                s = s + key_bias_wide[b:b + 1, :]
            # Row-global max is constant within every head segment, so it is a
            # valid softmax stabiliser and needs no per-segment reduction.
            s = s - jnp.max(s, axis=-1, keepdims=True)
            e = jnp.exp(s)
            den = jnp.dot(e, seg, preferred_element_type=jnp.float32)    # (T, HT)
            p = (e * pl.reciprocal(den, approx=True)).astype(bf16)
            attn_sc[b * T:(b + 1) * T, :] = jnp.dot(
                p, v_stack, preferred_element_type=jnp.float32)          # (T, D)

        attn = attn_sc[0:B * T, :]
        proj = jnp.dot(attn.astype(bf16), wout[l],
                       preferred_element_type=jnp.float32) + bout[l]
        h1 = _layernorm(x + proj, ln1g[l], ln1b[l], eps)                 # norm1(src+attn)

        ff = _gelu_tanh(jnp.dot(h1.astype(bf16), wff1[l],
                                preferred_element_type=jnp.float32) + bff1[l])
        ff = jnp.dot(ff.astype(bf16), wff2[l],
                     preferred_element_type=jnp.float32) + bff2[l]
        x = _layernorm(h1 + ff, ln2g[l], ln2b[l], eps)                   # norm2(src+ffn)
    return x


# ------------------------------ the fused kernel -------------------------------

def _teacher_kernel(*refs, B, Ts, Ta, Hs, Ha, D, eps):
    (skel_x_ref, skel_w_ref, skel_b_ref, skel_pos_ref) = refs[0:4]
    skel_stack = tuple(refs[4:16])
    (acc_x_ref, acc_t_ref, t2v_w_ref, t2v_b_ref, acc_wa_ref, acc_wlin_ref,
     acc_wper_ref, acc_bprj_ref, acc_bias_ref, acc_valid_ref) = refs[16:26]
    accel_stack = tuple(refs[26:38])
    (fus_ws_ref, fus_wa_ref, fus_b_ref, fus_lng_ref, fus_lnb_ref,
     cls_w_ref, cls_b_ref) = refs[38:45]
    logits_ref, accel_feat_ref, attn_sc = refs[45], refs[46], refs[47]
    bf16 = jnp.bfloat16

    # -------- skeleton branch: embed + positional + encoder + mean pooling --------
    xs = jnp.dot(skel_x_ref[...], skel_w_ref[...],
                 preferred_element_type=jnp.float32) + skel_b_ref[...]       # (B*Ts, D)
    xs = (xs.reshape(B, Ts, D) + skel_pos_ref[...][None, :, :]).reshape(B * Ts, D)
    xs = _encoder_stack(xs, None, attn_sc, skel_stack, B=B, T=Ts, H=Hs, D=D, eps=eps)
    rb = jax.lax.broadcasted_iota(jnp.int32, (B, B * Ts), 0)
    cj = jax.lax.broadcasted_iota(jnp.int32, (B, B * Ts), 1)
    p_mean = jnp.where((cj >= rb * Ts) & (cj < (rb + 1) * Ts), 1.0 / Ts, 0.0)
    skel_feat = jnp.dot(p_mean, xs, preferred_element_type=jnp.float32)      # (B, D)

    # -------- accel branch: Time2Vec + proj + GELU + encoder + masked mean --------
    t = acc_t_ref[...]                                                       # (B*Ta, 1)
    per = jnp.sin(t * t2v_w_ref[...] + t2v_b_ref[...])                       # (B*Ta, t2v-1)
    xa = jnp.dot(acc_x_ref[...], acc_wa_ref[...], preferred_element_type=jnp.float32)
    xa = xa + t * acc_wlin_ref[...]                                          # folded linear channel
    xa = xa + jnp.dot(per, acc_wper_ref[...], preferred_element_type=jnp.float32)
    xa = _gelu_tanh(xa + acc_bprj_ref[...])                                  # (B*Ta, D)
    xa = _encoder_stack(xa, acc_bias_ref[...], attn_sc, accel_stack,
                        B=B, T=Ta, H=Ha, D=D, eps=eps)
    valid = acc_valid_ref[...]                                               # (B, Ta)
    rb = jax.lax.broadcasted_iota(jnp.int32, (B, B * Ta), 0)
    cj = jax.lax.broadcasted_iota(jnp.int32, (B, B * Ta), 1)
    blk = jnp.where((cj >= rb * Ta) & (cj < (rb + 1) * Ta), 1.0, 0.0)
    v_pool = blk * jnp.tile(valid, (1, B))                                   # (B, B*Ta)
    num = jnp.dot(v_pool, xa, preferred_element_type=jnp.float32)            # (B, D)
    den = jnp.maximum(jnp.sum(valid, axis=-1, keepdims=True), 1.0)           # clamp(min=1)
    accel_feat = num / den
    accel_feat_ref[...] = accel_feat

    # -------- fusion Linear (split concat) + LayerNorm + GELU + classifier --------
    fused = (jnp.dot(skel_feat.astype(bf16), fus_ws_ref[...],
                     preferred_element_type=jnp.float32)
             + jnp.dot(accel_feat.astype(bf16), fus_wa_ref[...],
                       preferred_element_type=jnp.float32)
             + fus_b_ref[...])
    fused = _gelu_tanh(_layernorm(fused, fus_lng_ref[...], fus_lnb_ref[...], eps))
    logits_ref[...] = jnp.dot(fused.astype(bf16), cls_w_ref[...],
                              preferred_element_type=jnp.float32) + cls_b_ref[...]


# --------------------------- model forward (JAX glue) --------------------------

def transformer_teacher_forward(model, skel_seq, accel_seq, accel_time,
                                accel_mask=None, skeleton_heads=4, accel_heads=4,
                                eps=1e-5):
    B, Ts, J = skel_seq.shape
    _, Ta, A = accel_seq.shape
    D = model["skel_embed_w"].shape[1]
    C = model["cls_b"].shape[-1]

    if accel_mask is not None:   # True = padded (torch key_padding_mask semantics)
        acc_bias = jnp.where(accel_mask, -1e9, 0.0).astype(jnp.float32)
        acc_valid = (~accel_mask).astype(jnp.float32)
    else:
        acc_bias = jnp.zeros((B, Ta), jnp.float32)
        acc_valid = jnp.ones((B, Ta), jnp.float32)
    acc_bias_wide = jnp.tile(acc_bias, (1, accel_heads))                 # (B, Ha*Ta)

    stack_keys = ("w_qkv", "b_qkv", "w_out", "b_out", "ln1_g", "ln1_b",
                  "w_ff1", "b_ff1", "w_ff2", "b_ff2", "ln2_g", "ln2_b")
    sl, al = model["skel_layers"], model["accel_layers"]
    args = [
        skel_seq.reshape(B * Ts, J),
        model["skel_embed_w"], model["skel_embed_b"], model["skel_pos"][:Ts],
        *[sl[k] for k in stack_keys],
        accel_seq.reshape(B * Ta, A), accel_time.reshape(B * Ta, 1),
        model["t2v_w"], model["t2v_b"],
        model["accel_w_a"], model["accel_w_lin"], model["accel_w_per"], model["accel_b"],
        acc_bias_wide, acc_valid,
        *[al[k] for k in stack_keys],
        model["fusion_w_s"], model["fusion_w_a"], model["fusion_b"],
        model["fusion_ln_g"], model["fusion_ln_b"],
        model["cls_w"], model["cls_b"],
    ]

    kernel = functools.partial(_teacher_kernel, B=B, Ts=Ts, Ta=Ta,
                               Hs=skeleton_heads, Ha=accel_heads, D=D, eps=eps)
    logits, accel_feat = pl.pallas_call(
        kernel,
        out_shape=(jax.ShapeDtypeStruct((B, C), jnp.float32),
                   jax.ShapeDtypeStruct((B, D), jnp.float32)),
        grid=(1,),
        in_specs=[_fullspec(a.shape) for a in args],
        out_specs=(_fullspec((B, C)), _fullspec((B, D))),
        scratch_shapes=[pltpu.VMEM((max(B * Ts, B * Ta), D), jnp.float32)],
        compiler_params=pltpu.CompilerParams(
            dimension_semantics=("arbitrary",),
            vmem_limit_bytes=32 * 1024 * 1024),
    )(*args)
    return {"logits": logits, "accel_feat": accel_feat}


# ------------------------------ parameter init ---------------------------------

def _init_linear(key, fan_in, fan_out):
    kw, kb = jax.random.split(key)
    bound = 1.0 / math.sqrt(fan_in)
    w = jax.random.uniform(kw, (fan_in, fan_out), jnp.float32, -bound, bound)
    b = jax.random.uniform(kb, (1, fan_out), jnp.float32, -bound, bound)
    return w, b


def _init_encoder_layer(key, d_model, dim_ff):
    ks = jax.random.split(key, 4)
    w_qkv, b_qkv = _init_linear(ks[0], d_model, 3 * d_model)
    w_out, b_out = _init_linear(ks[1], d_model, d_model)
    w_ff1, b_ff1 = _init_linear(ks[2], d_model, dim_ff)
    w_ff2, b_ff2 = _init_linear(ks[3], dim_ff, d_model)
    return dict(
        w_qkv=w_qkv, b_qkv=b_qkv, w_out=w_out, b_out=b_out,
        ln1_g=jnp.ones((1, d_model), jnp.float32), ln1_b=jnp.zeros((1, d_model), jnp.float32),
        w_ff1=w_ff1, b_ff1=b_ff1, w_ff2=w_ff2, b_ff2=b_ff2,
        ln2_g=jnp.ones((1, d_model), jnp.float32), ln2_b=jnp.zeros((1, d_model), jnp.float32),
    )


def init_params(key, *, num_joints=32, joint_dim=3, hidden_skel=128, accel_dim=3,
                time2vec_dim=8, hidden_accel=128, accel_layers=3, skeleton_layers=2,
                fusion_hidden=256, num_classes=2, dim_feedforward=256):
    keys = jax.random.split(key, 10)
    skel_w, skel_b = _init_linear(keys[0], num_joints * joint_dim, hidden_skel)
    skel_pos = 0.02 * jax.random.normal(keys[1], (1, 120, hidden_skel), jnp.float32)
    skel_layers = [_init_encoder_layer(k, hidden_skel, dim_feedforward)
                   for k in jax.random.split(keys[2], skeleton_layers)]
    t2v_w0 = jax.random.normal(keys[3], (1, 1), jnp.float32)
    t2v_b0 = jax.random.normal(keys[4], (1, 1), jnp.float32)
    t2v_w = jax.random.normal(keys[5], (1, time2vec_dim - 1), jnp.float32)
    t2v_b = jax.random.normal(keys[6], (1, time2vec_dim - 1), jnp.float32)
    accel_w, accel_b = _init_linear(keys[7], accel_dim + time2vec_dim, hidden_accel)
    accel_layers_p = [_init_encoder_layer(k, hidden_accel, 2 * dim_feedforward)
                      for k in jax.random.split(keys[8], accel_layers)]
    k_fuse, k_cls = jax.random.split(keys[9])
    fusion_w, fusion_b = _init_linear(k_fuse, hidden_skel + hidden_accel, fusion_hidden)
    cls_w, cls_b = _init_linear(k_cls, fusion_hidden, num_classes)
    return dict(
        skel_embed_w=skel_w, skel_embed_b=skel_b, skel_pos=skel_pos,
        skel_layers=skel_layers,
        t2v_w0=t2v_w0, t2v_b0=t2v_b0, t2v_w=t2v_w, t2v_b=t2v_b,
        accel_proj_w=accel_w, accel_proj_b=accel_b, accel_layers=accel_layers_p,
        fusion_w=fusion_w, fusion_b=fusion_b,
        fusion_ln_g=jnp.ones((1, fusion_hidden), jnp.float32),
        fusion_ln_b=jnp.zeros((1, fusion_hidden), jnp.float32),
        cls_w=cls_w, cls_b=cls_b,
    )


def prepare_params(p, *, skeleton_heads=4, accel_heads=4, accel_dim=3):
    """Kernel-ready params: stack per-layer weights along a leading layer axis,
    fold the attention scale into W_q/b_q, fold the Time2Vec linear channel into
    the accel projection, split the fusion weight, and pre-cast matmul weights
    to bf16 (biases / LayerNorm params stay f32)."""
    bf16 = jnp.bfloat16

    def stack_layers(layers, num_heads):
        d = layers[0]["w_qkv"].shape[0]
        scale = 1.0 / math.sqrt(d // num_heads)
        def fold_w(l):
            w = l["w_qkv"]
            return jnp.concatenate([w[:, :d] * scale, w[:, d:]], axis=1)
        def fold_b(l):
            b = l["b_qkv"]
            return jnp.concatenate([b[:, :d] * scale, b[:, d:]], axis=1)
        return dict(
            w_qkv=jnp.stack([fold_w(l) for l in layers]).astype(bf16),
            b_qkv=jnp.stack([fold_b(l) for l in layers]),
            w_out=jnp.stack([l["w_out"] for l in layers]).astype(bf16),
            b_out=jnp.stack([l["b_out"] for l in layers]),
            ln1_g=jnp.stack([l["ln1_g"] for l in layers]),
            ln1_b=jnp.stack([l["ln1_b"] for l in layers]),
            w_ff1=jnp.stack([l["w_ff1"] for l in layers]).astype(bf16),
            b_ff1=jnp.stack([l["b_ff1"] for l in layers]),
            w_ff2=jnp.stack([l["w_ff2"] for l in layers]).astype(bf16),
            b_ff2=jnp.stack([l["b_ff2"] for l in layers]),
            ln2_g=jnp.stack([l["ln2_g"] for l in layers]),
            ln2_b=jnp.stack([l["ln2_b"] for l in layers]),
        )

    aw = p["accel_proj_w"]              # rows: [accel(3) | t2v linear(1) | t2v periodic(7)]
    w0 = p["t2v_w0"][0, 0]
    b0 = p["t2v_b0"][0, 0]
    hs = p["skel_embed_w"].shape[1]
    return dict(
        skel_embed_w=p["skel_embed_w"], skel_embed_b=p["skel_embed_b"],
        skel_pos=p["skel_pos"][0],                              # (120, D)
        skel_layers=stack_layers(p["skel_layers"], skeleton_heads),
        accel_w_a=aw[0:accel_dim, :],
        accel_w_lin=w0 * aw[accel_dim:accel_dim + 1, :],
        accel_w_per=aw[accel_dim + 1:, :],
        accel_b=p["accel_proj_b"] + b0 * aw[accel_dim:accel_dim + 1, :],
        t2v_w=p["t2v_w"], t2v_b=p["t2v_b"],
        accel_layers=stack_layers(p["accel_layers"], accel_heads),
        fusion_w_s=p["fusion_w"][:hs].astype(bf16),
        fusion_w_a=p["fusion_w"][hs:].astype(bf16),
        fusion_b=p["fusion_b"],
        fusion_ln_g=p["fusion_ln_g"], fusion_ln_b=p["fusion_ln_b"],
        cls_w=p["cls_w"].astype(bf16), cls_b=p["cls_b"],
    )


# ----------------------------------- main ---------------------------------------

if __name__ == "__main__":
    key = jax.random.PRNGKey(0)
    pkey, k1, k2 = jax.random.split(key, 3)
    raw = init_params(pkey)
    model = prepare_params(raw)

    B, Ts, Ta = 2, 8, 8
    skel_seq = jax.random.normal(k1, (B, Ts, 32 * 3), jnp.float32)
    accel_seq = jax.random.normal(k2, (B, Ta, 3), jnp.float32)
    accel_time = jnp.tile(jnp.arange(Ta, dtype=jnp.float32)[None, :], (B, 1)) * 0.02
    # batch 0: all valid; batch 1: last 3 timesteps padded (True = padded)
    accel_mask = jnp.array([[False] * Ta, [False] * (Ta - 3) + [True] * 3])

    fwd = jax.jit(transformer_teacher_forward)
    out = fwd(model, skel_seq, accel_seq, accel_time, accel_mask)
    jax.block_until_ready(out)

    assert out["logits"].shape == (B, 2)
    assert out["accel_feat"].shape == (B, 128)
    assert bool(jnp.all(jnp.isfinite(out["logits"])))
    assert bool(jnp.all(jnp.isfinite(out["accel_feat"])))
    print("KERNEL_OK")
</pallas_src>

<mosaic_0001>
module attributes {stable_mosaic.version = 11 : i64} {
  func.func @_teacher_kernel(%arg0: i32, %arg1: memref<16x96xf32, #tpu.memory_space<vmem>>, %arg2: memref<96x128xf32, #tpu.memory_space<vmem>>, %arg3: memref<1x128xf32, #tpu.memory_space<vmem>>, %arg4: memref<8x128xf32, #tpu.memory_space<vmem>>, %arg5: memref<2x128x384xbf16, #tpu.memory_space<vmem>>, %arg6: memref<2x1x384xf32, #tpu.memory_space<vmem>>, %arg7: memref<2x128x128xbf16, #tpu.memory_space<vmem>>, %arg8: memref<2x1x128xf32, #tpu.memory_space<vmem>>, %arg9: memref<2x1x128xf32, #tpu.memory_space<vmem>>, %arg10: memref<2x1x128xf32, #tpu.memory_space<vmem>>, %arg11: memref<2x128x256xbf16, #tpu.memory_space<vmem>>, %arg12: memref<2x1x256xf32, #tpu.memory_space<vmem>>, %arg13: memref<2x256x128xbf16, #tpu.memory_space<vmem>>, %arg14: memref<2x1x128xf32, #tpu.memory_space<vmem>>, %arg15: memref<2x1x128xf32, #tpu.memory_space<vmem>>, %arg16: memref<2x1x128xf32, #tpu.memory_space<vmem>>, %arg17: memref<16x3xf32, #tpu.memory_space<vmem>>, %arg18: memref<16x1xf32, #tpu.memory_space<vmem>>, %arg19: memref<1x7xf32, #tpu.memory_space<vmem>>, %arg20: memref<1x7xf32, #tpu.memory_space<vmem>>, %arg21: memref<3x128xf32, #tpu.memory_space<vmem>>, %arg22: memref<1x128xf32, #tpu.memory_space<vmem>>, %arg23: memref<7x128xf32, #tpu.memory_space<vmem>>, %arg24: memref<1x128xf32, #tpu.memory_space<vmem>>, %arg25: memref<2x32xf32, #tpu.memory_space<vmem>>, %arg26: memref<2x8xf32, #tpu.memory_space<vmem>>, %arg27: memref<3x128x384xbf16, #tpu.memory_space<vmem>>, %arg28: memref<3x1x384xf32, #tpu.memory_space<vmem>>, %arg29: memref<3x128x128xbf16, #tpu.memory_space<vmem>>, %arg30: memref<3x1x128xf32, #tpu.memory_space<vmem>>, %arg31: memref<3x1x128xf32, #tpu.memory_space<vmem>>, %arg32: memref<3x1x128xf32, #tpu.memory_space<vmem>>, %arg33: memref<3x128x512xbf16, #tpu.memory_space<vmem>>, %arg34: memref<3x1x512xf32, #tpu.memory_space<vmem>>, %arg35: memref<3x512x128xbf16, #tpu.memory_space<vmem>>, %arg36: memref<3x1x128xf32, #tpu.memory_space<vmem>>, %arg37: memref<3x1x128xf32, #tpu.memory_space<vmem>>, %arg38: memref<3x1x128xf32, #tpu.memory_space<vmem>>, %arg39: memref<128x256xbf16, #tpu.memory_space<vmem>>, %arg40: memref<128x256xbf16, #tpu.memory_space<vmem>>, %arg41: memref<1x256xf32, #tpu.memory_space<vmem>>, %arg42: memref<1x256xf32, #tpu.memory_space<vmem>>, %arg43: memref<1x256xf32, #tpu.memory_space<vmem>>, %arg44: memref<256x2xbf16, #tpu.memory_space<vmem>>, %arg45: memref<1x2xf32, #tpu.memory_space<vmem>>, %arg46: memref<2x2xf32, #tpu.memory_space<vmem>>, %arg47: memref<2x128xf32, #tpu.memory_space<vmem>>, %arg48: memref<16x128xf32, #tpu.memory_space<vmem>>) attributes {dimension_semantics = [#tpu.dimension_semantics<arbitrary>], iteration_bounds = array<i64: 1>, scalar_prefetch = 0 : i64, scratch_operands = 1 : i64, tpu.core_type = #tpu.core_type<tc>, window_params = [{pipeline_mode = #tpu.pipeline_mode<synchronous>, transform_indices = @transform_0, window_bounds = array<i64: 16, 96>}, {pipeline_mode = #tpu.pipeline_mode<synchronous>, transform_indices = @transform_1, window_bounds = array<i64: 96, 128>}, {pipeline_mode = #tpu.pipeline_mode<synchronous>, transform_indices = @transform_2, window_bounds = array<i64: 1, 128>}, {pipeline_mode = #tpu.pipeline_mode<synchronous>, transform_indices = @transform_3, window_bounds = array<i64: 8, 128>}, {pipeline_mode = #tpu.pipeline_mode<synchronous>, transform_indices = @transform_4, window_bounds = array<i64: 2, 128, 384>}, {pipeline_mode = #tpu.pipeline_mode<synchronous>, transform_indices = @transform_5, window_bounds = array<i64: 2, 1, 384>}, {pipeline_mode = #tpu.pipeline_mode<synchronous>, transform_indices = @transform_6, window_bounds = array<i64: 2, 128, 128>}, {pipeline_mode = #tpu.pipeline_mode<synchronous>, transform_indices = @transform_7, window_bounds = array<i64: 2, 1, 128>}, {pipeline_mode = #tpu.pipeline_mode<synchronous>, transform_indices = @transform_8, window_bounds = array<i64: 2, 1, 128>}, {pipeline_mode = #tpu.pipeline_mode<synchronous>, transform_indices = @transform_9, window_bounds = array<i64: 2, 1, 128>}, {pipeline_mode = #tpu.pipeline_mode<synchronous>, transform_indices = @transform_10, window_bounds = array<i64: 2, 128, 256>}, {pipeline_mode = #tpu.pipeline_mode<synchronous>, transform_indices = @transform_11, window_bounds = array<i64: 2, 1, 256>}, {pipeline_mode = #tpu.pipeline_mode<synchronous>, transform_indices = @transform_12, window_bounds = array<i64: 2, 256, 128>}, {pipeline_mode = #tpu.pipeline_mode<synchronous>, transform_indices = @transform_13, window_bounds = array<i64: 2, 1, 128>}, {pipeline_mode = #tpu.pipeline_mode<synchronous>, transform_indices = @transform_14, window_bounds = array<i64: 2, 1, 128>}, {pipeline_mode = #tpu.pipeline_mode<synchronous>, transform_indices = @transform_15, window_bounds = array<i64: 2, 1, 128>}, {pipeline_mode = #tpu.pipeline_mode<synchronous>, transform_indices = @transform_16, window_bounds = array<i64: 16, 3>}, {pipeline_mode = #tpu.pipeline_mode<synchronous>, transform_indices = @transform_17, window_bounds = array<i64: 16, 1>}, {pipeline_mode = #tpu.pipeline_mode<synchronous>, transform_indices = @transform_18, window_bounds = array<i64: 1, 7>}, {pipeline_mode = #tpu.pipeline_mode<synchronous>, transform_indices = @transform_19, window_bounds = array<i64: 1, 7>}, {pipeline_mode = #tpu.pipeline_mode<synchronous>, transform_indices = @transform_20, window_bounds = array<i64: 3, 128>}, {pipeline_mode = #tpu.pipeline_mode<synchronous>, transform_indices = @transform_21, window_bounds = array<i64: 1, 128>}, {pipeline_mode = #tpu.pipeline_mode<synchronous>, transform_indices = @transform_22, window_bounds = array<i64: 7, 128>}, {pipeline_mode = #tpu.pipeline_mode<synchronous>, transform_indices = @transform_23, window_bounds = array<i64: 1, 128>}, {pipeline_mode = #tpu.pipeline_mode<synchronous>, transform_indices = @transform_24, window_bounds = array<i64: 2, 32>}, {pipeline_mode = #tpu.pipeline_mode<synchronous>, transform_indices = @transform_25, window_bounds = array<i64: 2, 8>}, {pipeline_mode = #tpu.pipeline_mode<synchronous>, transform_indices = @transform_26, window_bounds = array<i64: 3, 128, 384>}, {pipeline_mode = #tpu.pipeline_mode<synchronous>, transform_indices = @transform_27, window_bounds = array<i64: 3, 1, 384>}, {pipeline_mode = #tpu.pipeline_mode<synchronous>, transform_indices = @transform_28, window_bounds = array<i64: 3, 128, 128>}, {pipeline_mode = #tpu.pipeline_mode<synchronous>, transform_indices = @transform_29, window_bounds = array<i64: 3, 1, 128>}, {pipeline_mode = #tpu.pipeline_mode<synchronous>, transform_indices = @transform_30, window_bounds = array<i64: 3, 1, 128>}, {pipeline_mode = #tpu.pipeline_mode<synchronous>, transform_indices = @transform_31, window_bounds = array<i64: 3, 1, 128>}, {pipeline_mode = #tpu.pipeline_mode<synchronous>, transform_indices = @transform_32, window_bounds = array<i64: 3, 128, 512>}, {pipeline_mode = #tpu.pipeline_mode<synchronous>, transform_indices = @transform_33, window_bounds = array<i64: 3, 1, 512>}, {pipeline_mode = #tpu.pipeline_mode<synchronous>, transform_indices = @transform_34, window_bounds = array<i64: 3, 512, 128>}, {pipeline_mode = #tpu.pipeline_mode<synchronous>, transform_indices = @transform_35, window_bounds = array<i64: 3, 1, 128>}, {pipeline_mode = #tpu.pipeline_mode<synchronous>, transform_indices = @transform_36, window_bounds = array<i64: 3, 1, 128>}, {pipeline_mode = #tpu.pipeline_mode<synchronous>, transform_indices = @transform_37, window_bounds = array<i64: 3, 1, 128>}, {pipeline_mode = #tpu.pipeline_mode<synchronous>, transform_indices = @transform_38, window_bounds = array<i64: 128, 256>}, {pipeline_mode = #tpu.pipeline_mode<synchronous>, transform_indices = @transform_39, window_bounds = array<i64: 128, 256>}, {pipeline_mode = #tpu.pipeline_mode<synchronous>, transform_indices = @transform_40, window_bounds = array<i64: 1, 256>}, {pipeline_mode = #tpu.pipeline_mode<synchronous>, transform_indices = @transform_41, window_bounds = array<i64: 1, 256>}, {pipeline_mode = #tpu.pipeline_mode<synchronous>, transform_indices = @transform_42, window_bounds = array<i64: 1, 256>}, {pipeline_mode = #tpu.pipeline_mode<synchronous>, transform_indices = @transform_43, window_bounds = array<i64: 256, 2>}, {pipeline_mode = #tpu.pipeline_mode<synchronous>, transform_indices = @transform_44, window_bounds = array<i64: 1, 2>}, {pipeline_mode = #tpu.pipeline_mode<synchronous>, transform_indices = @transform_45, window_bounds = array<i64: 2, 2>}, {pipeline_mode = #tpu.pipeline_mode<synchronous>, transform_indices = @transform_46, window_bounds = array<i64: 2, 128>}]} {
    %c0 = arith.constant 0 : index
    %c0_0 = arith.constant 0 : index
    %0 = vector.load %arg1[%c0, %c0_0] : memref<16x96xf32, #tpu.memory_space<vmem>>, vector<16x96xf32>
    %c0_1 = arith.constant 0 : index
    %c0_2 = arith.constant 0 : index
    %1 = vector.load %arg2[%c0_1, %c0_2] : memref<96x128xf32, #tpu.memory_space<vmem>>, vector<96x128xf32>
    %cst = arith.constant dense<0.000000e+00> : vector<16x128xf32>
    %2 = tpu.matmul %0, %1, %cst {dimension_numbers = #tpu.dot_dimension_numbers<[1], [0], [0], [1], [0, 0, 1, 1], [], []>} : vector<16x96xf32>, vector<96x128xf32>, vector<16x128xf32> -> vector<16x128xf32>
    %c0_3 = arith.constant 0 : index
    %c0_4 = arith.constant 0 : index
    %3 = vector.load %arg3[%c0_3, %c0_4] : memref<1x128xf32, #tpu.memory_space<vmem>>, vector<1x128xf32>
    %4 = vector.broadcast %3 : vector<1x128xf32> to vector<16x128xf32>
    %5 = arith.addf %2, %4 : vector<16x128xf32>
    %6 = vector.shape_cast %5 : vector<16x128xf32> to vector<2x8x128xf32>
    %c0_5 = arith.constant 0 : index
    %c0_6 = arith.constant 0 : index
    %7 = vector.load %arg4[%c0_5, %c0_6] : memref<8x128xf32, #tpu.memory_space<vmem>>, vector<8x128xf32>
    %8 = vector.shape_cast %7 : vector<8x128xf32> to vector<1x8x128xf32>
    %9 = vector.broadcast %8 : vector<1x8x128xf32> to vector<2x8x128xf32>
    %10 = arith.addf %6, %9 : vector<2x8x128xf32>
    %11 = vector.shape_cast %10 : vector<2x8x128xf32> to vector<16x128xf32>
    %12 = tpu.iota {dimensions = array<i32: 0>} : vector<32x128xi32>
    %13 = tpu.iota {dimensions = array<i32: 1>} : vector<32x128xi32>
    %cst_7 = arith.constant 0.000000e+00 : f32
    %14 = vector.broadcast %cst_7 : f32 to vector<32x128xf32>
    %c0_i32 = arith.constant 0 : i32
    %15 = vector.broadcast %c0_i32 : i32 to vector<32x128xi32>
    %16 = arith.cmpi sge, %12, %15 : vector<32x128xi32>
    %c8_i32 = arith.constant 8 : i32
    %17 = vector.broadcast %c8_i32 : i32 to vector<32x128xi32>
    %18 = arith.cmpi slt, %12, %17 : vector<32x128xi32>
    %19 = arith.andi %16, %18 : vector<32x128xi1>
    %c0_i32_8 = arith.constant 0 : i32
    %20 = vector.broadcast %c0_i32_8 : i32 to vector<32x128xi32>
    %21 = arith.cmpi sge, %13, %20 : vector<32x128xi32>
    %22 = arith.andi %19, %21 : vector<32x128xi1>
    %c32_i32 = arith.constant 32 : i32
    %23 = vector.broadcast %c32_i32 : i32 to vector<32x128xi32>
    %24 = arith.cmpi slt, %13, %23 : vector<32x128xi32>
    %25 = arith.andi %22, %24 : vector<32x128xi1>
    %cst_9 = arith.constant 1.000000e+00 : f32
    %cst_10 = arith.constant 0.000000e+00 : f32
    %26 = vector.broadcast %cst_9 : f32 to vector<32x128xf32>
    %27 = vector.broadcast %cst_10 : f32 to vector<32x128xf32>
    %28 = arith.select %25, %26, %27 : vector<32x128xi1>, vector<32x128xf32>
    %29 = arith.addf %14, %28 : vector<32x128xf32>
    %c8_i32_11 = arith.constant 8 : i32
    %30 = vector.broadcast %c8_i32_11 : i32 to vector<32x128xi32>
    %31 = arith.cmpi sge, %12, %30 : vector<32x128xi32>
    %c16_i32 = arith.constant 16 : i32
    %32 = vector.broadcast %c16_i32 : i32 to vector<32x128xi32>
    %33 = arith.cmpi slt, %12, %32 : vector<32x128xi32>
    %34 = arith.andi %31, %33 : vector<32x128xi1>
    %c32_i32_12 = arith.constant 32 : i32
    %35 = vector.broadcast %c32_i32_12 : i32 to vector<32x128xi32>
    %36 = arith.cmpi sge, %13, %35 : vector<32x128xi32>
    %37 = arith.andi %34, %36 : vector<32x128xi1>
    %c64_i32 = arith.constant 64 : i32
    %38 = vector.broadcast %c64_i32 : i32 to vector<32x128xi32>
    %39 = arith.cmpi slt, %13, %38 : vector<32x128xi32>
    %40 = arith.andi %37, %39 : vector<32x128xi1>
    %cst_13 = arith.constant 1.000000e+00 : f32
    %cst_14 = arith.constant 0.000000e+00 : f32
    %41 = vector.broadcast %cst_13 : f32 to vector<32x128xf32>
    %42 = vector.broadcast %cst_14 : f32 to vector<32x128xf32>
    %43 = arith.select %40, %41, %42 : vector<32x128xi1>, vector<32x128xf32>
    %44 = arith.addf %29, %43 : vector<32x128xf32>
    %c16_i32_15 = arith.constant 16 : i32
    %45 = vector.broadcast %c16_i32_15 : i32 to vector<32x128xi32>
    %46 = arith.cmpi sge, %12, %45 : vector<32x128xi32>
    %c24_i32 = arith.constant 24 : i32
    %47 = vector.broadcast %c24_i32 : i32 to vector<32x128xi32>
    %48 = arith.cmpi slt, %12, %47 : vector<32x128xi32>
    %49 = arith.andi %46, %48 : vector<32x128xi1>
    %c64_i32_16 = arith.constant 64 : i32
    %50 = vector.broadcast %c64_i32_16 : i32 to vector<32x128xi32>
    %51 = arith.cmpi sge, %13, %50 : vector<32x128xi32>
    %52 = arith.andi %49, %51 : vector<32x128xi1>
    %c96_i32 = arith.constant 96 : i32
    %53 = vector.broadcast %c96_i32 : i32 to vector<32x128xi32>
    %54 = arith.cmpi slt, %13, %53 : vector<32x128xi32>
    %55 = arith.andi %52, %54 : vector<32x128xi1>
    %cst_17 = arith.constant 1.000000e+00 : f32
    %cst_18 = arith.constant 0.000000e+00 : f32
    %56 = vector.broadcast %cst_17 : f32 to vector<32x128xf32>
    %57 = vector.broadcast %cst_18 : f32 to vector<32x128xf32>
    %58 = arith.select %55, %56, %57 : vector<32x128xi1>, vector<32x128xf32>
    %59 = arith.addf %44, %58 : vector<32x128xf32>
    %c24_i32_19 = arith.constant 24 : i32
    %60 = vector.broadcast %c24_i32_19 : i32 to vector<32x128xi32>
    %61 = arith.cmpi sge, %12, %60 : vector<32x128xi32>
    %c32_i32_20 = arith.constant 32 : i32
    %62 = vector.broadcast %c32_i32_20 : i32 to vector<32x128xi32>
    %63 = arith.cmpi slt, %12, %62 : vector<32x128xi32>
    %64 = arith.andi %61, %63 : vector<32x128xi1>
    %c96_i32_21 = arith.constant 96 : i32
    %65 = vector.broadcast %c96_i32_21 : i32 to vector<32x128xi32>
    %66 = arith.cmpi sge, %13, %65 : vector<32x128xi32>
    %67 = arith.andi %64, %66 : vector<32x128xi1>
    %c128_i32 = arith.constant 128 : i32
    %68 = vector.broadcast %c128_i32 : i32 to vector<32x128xi32>
    %69 = arith.cmpi slt, %13, %68 : vector<32x128xi32>
    %70 = arith.andi %67, %69 : vector<32x128xi1>
    %cst_22 = arith.constant 1.000000e+00 : f32
    %cst_23 = arith.constant 0.000000e+00 : f32
    %71 = vector.broadcast %cst_22 : f32 to vector<32x128xf32>
    %72 = vector.broadcast %cst_23 : f32 to vector<32x128xf32>
    %73 = arith.select %70, %71, %72 : vector<32x128xi1>, vector<32x128xf32>
    %74 = arith.addf %59, %73 : vector<32x128xf32>
    %75 = tpu.iota {dimensions = array<i32: 0>} : vector<32x32xi32>
    %76 = tpu.iota {dimensions = array<i32: 1>} : vector<32x32xi32>
    %cst_24 = arith.constant 0.000000e+00 : f32
    %77 = vector.broadcast %cst_24 : f32 to vector<32x32xf32>
    %c0_i32_25 = arith.constant 0 : i32
    %78 = vector.broadcast %c0_i32_25 : i32 to vector<32x32xi32>
    %79 = arith.cmpi sge, %75, %78 : vector<32x32xi32>
    %c8_i32_26 = arith.constant 8 : i32
    %80 = vector.broadcast %c8_i32_26 : i32 to vector<32x32xi32>
    %81 = arith.cmpi slt, %75, %80 : vector<32x32xi32>
    %82 = arith.andi %79, %81 : vector<32x32xi1>
    %c0_i32_27 = arith.constant 0 : i32
    %83 = vector.broadcast %c0_i32_27 : i32 to vector<32x32xi32>
    %84 = arith.cmpi sge, %76, %83 : vector<32x32xi32>
    %85 = arith.andi %82, %84 : vector<32x32xi1>
    %c8_i32_28 = arith.constant 8 : i32
    %86 = vector.broadcast %c8_i32_28 : i32 to vector<32x32xi32>
    %87 = arith.cmpi slt, %76, %86 : vector<32x32xi32>
    %88 = arith.andi %85, %87 : vector<32x32xi1>
    %cst_29 = arith.constant 1.000000e+00 : f32
    %cst_30 = arith.constant 0.000000e+00 : f32
    %89 = vector.broadcast %cst_29 : f32 to vector<32x32xf32>
    %90 = vector.broadcast %cst_30 : f32 to vector<32x32xf32>
    %91 = arith.select %88, %89, %90 : vector<32x32xi1>, vector<32x32xf32>
    %92 = arith.addf %77, %91 : vector<32x32xf32>
    %c8_i32_31 = arith.constant 8 : i32
    %93 = vector.broadcast %c8_i32_31 : i32 to vector<32x32xi32>
    %94 = arith.cmpi sge, %75, %93 : vector<32x32xi32>
    %c16_i32_32 = arith.constant 16 : i32
    %95 = vector.broadcast %c16_i32_32 : i32 to vector<32x32xi32>
    %96 = arith.cmpi slt, %75, %95 : vector<32x32xi32>
    %97 = arith.andi %94, %96 : vector<32x32xi1>
    %c8_i32_33 = arith.constant 8 : i32
    %98 = vector.broadcast %c8_i32_33 : i32 to vector<32x32xi32>
    %99 = arith.cmpi sge, %76, %98 : vector<32x32xi32>
    %100 = arith.andi %97, %99 : vector<32x32xi1>
    %c16_i32_34 = arith.constant 16 : i32
    %101 = vector.broadcast %c16_i32_34 : i32 to vector<32x32xi32>
    %102 = arith.cmpi slt, %76, %101 : vector<32x32xi32>
    %103 = arith.andi %100, %102 : vector<32x32xi1>
    %cst_35 = arith.constant 1.000000e+00 : f32
    %cst_36 = arith.constant 0.000000e+00 : f32
    %104 = vector.broadcast %cst_35 : f32 to vector<32x32xf32>
    %105 = vector.broadcast %cst_36 : f32 to vector<32x32xf32>
    %106 = arith.select %103, %104, %105 : vector<32x32xi1>, vector<32x32xf32>
    %107 = arith.addf %92, %106 : vector<32x32xf32>
    %c16_i32_37 = arith.constant 16 : i32
    %108 = vector.broadcast %c16_i32_37 : i32 to vector<32x32xi32>
    %109 = arith.cmpi sge, %75, %108 : vector<32x32xi32>
    %c24_i32_38 = arith.constant 24 : i32
    %110 = vector.broadcast %c24_i32_38 : i32 to vector<32x32xi32>
    %111 = arith.cmpi slt, %75, %110 : vector<32x32xi32>
    %112 = arith.andi %109, %111 : vector<32x32xi1>
    %c16_i32_39 = arith.constant 16 : i32
    %113 = vector.broadcast %c16_i32_39 : i32 to vector<32x32xi32>
    %114 = arith.cmpi sge, %76, %113 : vector<32x32xi32>
    %115 = arith.andi %112, %114 : vector<32x32xi1>
    %c24_i32_40 = arith.constant 24 : i32
    %116 = vector.broadcast %c24_i32_40 : i32 to vector<32x32xi32>
    %117 = arith.cmpi slt, %76, %116 : vector<32x32xi32>
    %118 = arith.andi %115, %117 : vector<32x32xi1>
    %cst_41 = arith.constant 1.000000e+00 : f32
    %cst_42 = arith.constant 0.000000e+00 : f32
    %119 = vector.broadcast %cst_41 : f32 to vector<32x32xf32>
    %120 = vector.broadcast %cst_42 : f32 to vector<32x32xf32>
    %121 = arith.select %118, %119, %120 : vector<32x32xi1>, vector<32x32xf32>
    %122 = arith.addf %107, %121 : vector<32x32xf32>
    %c24_i32_43 = arith.constant 24 : i32
    %123 = vector.broadcast %c24_i32_43 : i32 to vector<32x32xi32>
    %124 = arith.cmpi sge, %75, %123 : vector<32x32xi32>
    %c32_i32_44 = arith.constant 32 : i32
    %125 = vector.broadcast %c32_i32_44 : i32 to vector<32x32xi32>
    %126 = arith.cmpi slt, %75, %125 : vector<32x32xi32>
    %127 = arith.andi %124, %126 : vector<32x32xi1>
    %c24_i32_45 = arith.constant 24 : i32
    %128 = vector.broadcast %c24_i32_45 : i32 to vector<32x32xi32>
    %129 = arith.cmpi sge, %76, %128 : vector<32x32xi32>
    %130 = arith.andi %127, %129 : vector<32x32xi1>
    %c32_i32_46 = arith.constant 32 : i32
    %131 = vector.broadcast %c32_i32_46 : i32 to vector<32x32xi32>
    %132 = arith.cmpi slt, %76, %131 : vector<32x32xi32>
    %133 = arith.andi %130, %132 : vector<32x32xi1>
    %cst_47 = arith.constant 1.000000e+00 : f32
    %cst_48 = arith.constant 0.000000e+00 : f32
    %134 = vector.broadcast %cst_47 : f32 to vector<32x32xf32>
    %135 = vector.broadcast %cst_48 : f32 to vector<32x32xf32>
    %136 = arith.select %133, %134, %135 : vector<32x32xi1>, vector<32x32xf32>
    %137 = arith.addf %122, %136 : vector<32x32xf32>
    %138 = arith.truncf %11 : vector<16x128xf32> to vector<16x128xbf16>
    %c0_49 = arith.constant 0 : index
    %c0_50 = arith.constant 0 : index
    %c0_51 = arith.constant 0 : index
    %139 = vector.load %arg5[%c0_49, %c0_50, %c0_51] : memref<2x128x384xbf16, #tpu.memory_space<vmem>>, vector<1x128x384xbf16>
    %140 = vector.shape_cast %139 : vector<1x128x384xbf16> to vector<128x384xbf16>
    %cst_52 = arith.constant dense<0.000000e+00> : vector<16x384xf32>
    %141 = tpu.matmul %138, %140, %cst_52 {dimension_numbers = #tpu.dot_dimension_numbers<[1], [0], [0], [1], [0, 0, 1, 1], [], []>} : vector<16x128xbf16>, vector<128x384xbf16>, vector<16x384xf32> -> vector<16x384xf32>
    %c0_53 = arith.constant 0 : index
    %c0_54 = arith.constant 0 : index
    %c0_55 = arith.constant 0 : index
    %142 = vector.load %arg6[%c0_53, %c0_54, %c0_55] : memref<2x1x384xf32, #tpu.memory_space<vmem>>, vector<1x1x384xf32>
    %143 = vector.shape_cast %142 : vector<1x1x384xf32> to vector<1x384xf32>
    %144 = vector.broadcast %143 : vector<1x384xf32> to vector<16x384xf32>
    %145 = arith.addf %141, %144 : vector<16x384xf32>
    %146 = vector.extract_strided_slice %145 {offsets = [0, 0], sizes = [8, 128], strides = [1, 1]} : vector<16x384xf32> to vector<8x128xf32>
    %147 = arith.truncf %146 : vector<8x128xf32> to vector<8x128xbf16>
    %148 = vector.extract_strided_slice %145 {offsets = [0, 128], sizes = [8, 128], strides = [1, 1]} : vector<16x384xf32> to vector<8x128xf32>
    %149 = vector.extract_strided_slice %145 {offsets = [0, 256], sizes = [8, 128], strides = [1, 1]} : vector<16x384xf32> to vector<8x128xf32>
    %150 = vector.shape_cast %148 : vector<8x128xf32> to vector<1x8x128xf32>
    %151 = vector.shape_cast %150 : vector<1x8x128xf32> to vector<1x8x128xf32>
    %152 = vector.broadcast %151 : vector<1x8x128xf32> to vector<4x8x128xf32>
    %153 = vector.shape_cast %152 : vector<4x8x128xf32> to vector<32x128xf32>
    %154 = arith.mulf %153, %74 : vector<32x128xf32>
    %155 = arith.truncf %154 : vector<32x128xf32> to vector<32x128xbf16>
    %156 = vector.shape_cast %149 : vector<8x128xf32> to vector<1x8x128xf32>
    %157 = vector.shape_cast %156 : vector<1x8x128xf32> to vector<1x8x128xf32>
    %158 = vector.broadcast %157 : vector<1x8x128xf32> to vector<4x8x128xf32>
    %159 = vector.shape_cast %158 : vector<4x8x128xf32> to vector<32x128xf32>
    %160 = arith.mulf %159, %74 : vector<32x128xf32>
    %161 = arith.truncf %160 : vector<32x128xf32> to vector<32x128xbf16>
    %cst_56 = arith.constant dense<0.000000e+00> : vector<8x32xf32>
    %162 = tpu.matmul %147, %155, %cst_56 {dimension_numbers = #tpu.dot_dimension_numbers<[1], [1], [0], [0], [0, 0, 1, 0], [], []>} : vector<8x128xbf16>, vector<32x128xbf16>, vector<8x32xf32> -> vector<8x32xf32>
    %cst_57 = arith.constant dense<0xFF800000> : vector<8xf32>
    %163 = vector.multi_reduction <maximumf>, %162, %cst_57 [1] : vector<8x32xf32> to vector<8xf32>
    %164 = vector.shape_cast %163 : vector<8xf32> to vector<8x1xf32>
    %165 = vector.broadcast %164 : vector<8x1xf32> to vector<8x32xf32>
    %166 = arith.subf %162, %165 : vector<8x32xf32>
    %167 = math.exp %166 : vector<8x32xf32>
    %cst_58 = arith.constant dense<0.000000e+00> : vector<8x32xf32>
    %168 = tpu.matmul %167, %137, %cst_58 {dimension_numbers = #tpu.dot_dimension_numbers<[1], [0], [0], [1], [0, 0, 1, 1], [], []>} : vector<8x32xf32>, vector<32x32xf32>, vector<8x32xf32> -> vector<8x32xf32>
    %169 = tpu.reciprocal %168 {approx = true} : vector<8x32xf32> -> vector<8x32xf32>
    %170 = arith.mulf %167, %169 : vector<8x32xf32>
    %171 = arith.truncf %170 : vector<8x32xf32> to vector<8x32xbf16>
    %cst_59 = arith.constant dense<0.000000e+00> : vector<8x128xf32>
    %172 = tpu.matmul %171, %161, %cst_59 {dimension_numbers = #tpu.dot_dimension_numbers<[1], [0], [0], [1], [0, 0, 1, 1], [], []>} : vector<8x32xbf16>, vector<32x128xbf16>, vector<8x128xf32> -> vector<8x128xf32>
    %c0_60 = arith.constant 0 : index
    %c0_61 = arith.constant 0 : index
    %173 = vector.load %arg48[%c0_60, %c0_61] : memref<16x128xf32, #tpu.memory_space<vmem>>, vector<8x128xf32>
    tpu.vector_store %arg48[%c0_60, %c0_61], %172 {strides = array<i32>} : memref<16x128xf32, #tpu.memory_space<vmem>>, vector<8x128xf32>,
    %174 = vector.extract_strided_slice %145 {offsets = [8, 0], sizes = [8, 128], strides = [1, 1]} : vector<16x384xf32> to vector<8x128xf32>
    %175 = arith.truncf %174 : vector<8x128xf32> to vector<8x128xbf16>
    %176 = vector.extract_strided_slice %145 {offsets = [8, 128], sizes = [8, 128], strides = [1, 1]} : vector<16x384xf32> to vector<8x128xf32>
    %177 = vector.extract_strided_slice %145 {offsets = [8, 256], sizes = [8, 128], strides = [1, 1]} : vector<16x384xf32> to vector<8x128xf32>
    %178 = vector.shape_cast %176 : vector<8x128xf32> to vector<1x8x128xf32>
    %179 = vector.shape_cast %178 : vector<1x8x128xf32> to vector<1x8x128xf32>
    %180 = vector.broadcast %179 : vector<1x8x128xf32> to vector<4x8x128xf32>
    %181 = vector.shape_cast %180 : vector<4x8x128xf32> to vector<32x128xf32>
    %182 = arith.mulf %181, %74 : vector<32x128xf32>
    %183 = arith.truncf %182 : vector<32x128xf32> to vector<32x128xbf16>
    %184 = vector.shape_cast %177 : vector<8x128xf32> to vector<1x8x128xf32>
    %185 = vector.shape_cast %184 : vector<1x8x128xf32> to vector<1x8x128xf32>
    %186 = vector.broadcast %185 : vector<1x8x128xf32> to vector<4x8x128xf32>
    %187 = vector.shape_cast %186 : vector<4x8x128xf32> to vector<32x128xf32>
    %188 = arith.mulf %187, %74 : vector<32x128xf32>
    %189 = arith.truncf %188 : vector<32x128xf32> to vector<32x128xbf16>
    %cst_62 = arith.constant dense<0.000000e+00> : vector<8x32xf32>
    %190 = tpu.matmul %175, %183, %cst_62 {dimension_numbers = #tpu.dot_dimension_numbers<[1], [1], [0], [0], [0, 0, 1, 0], [], []>} : vector<8x128xbf16>, vector<32x128xbf16>, vector<8x32xf32> -> vector<8x32xf32>
    %cst_63 = arith.constant dense<0xFF800000> : vector<8xf32>
    %191 = vector.multi_reduction <maximumf>, %190, %cst_63 [1] : vector<8x32xf32> to vector<8xf32>
    %192 = vector.shape_cast %191 : vector<8xf32> to vector<8x1xf32>
    %193 = vector.broadcast %192 : vector<8x1xf32> to vector<8x32xf32>
    %194 = arith.subf %190, %193 : vector<8x32xf32>
    %195 = math.exp %194 : vector<8x32xf32>
    %cst_64 = arith.constant dense<0.000000e+00> : vector<8x32xf32>
    %196 = tpu.matmul %195, %137, %cst_64 {dimension_numbers = #tpu.dot_dimension_numbers<[1], [0], [0], [1], [0, 0, 1, 1], [], []>} : vector<8x32xf32>, vector<32x32xf32>, vector<8x32xf32> -> vector<8x32xf32>
    %197 = tpu.reciprocal %196 {approx = true} : vector<8x32xf32> -> vector<8x32xf32>
    %198 = arith.mulf %195, %197 : vector<8x32xf32>
    %199 = arith.truncf %198 : vector<8x32xf32> to vector<8x32xbf16>
    %cst_65 = arith.constant dense<0.000000e+00> : vector<8x128xf32>
    %200 = tpu.matmul %199, %189, %cst_65 {dimension_numbers = #tpu.dot_dimension_numbers<[1], [0], [0], [1], [0, 0, 1, 1], [], []>} : vector<8x32xbf16>, vector<32x128xbf16>, vector<8x128xf32> -> vector<8x128xf32>
    %c8 = arith.constant 8 : index
    %c0_66 = arith.constant 0 : index
    %201 = vector.load %arg48[%c8, %c0_66] : memref<16x128xf32, #tpu.memory_space<vmem>>, vector<8x128xf32>
    tpu.vector_store %arg48[%c8, %c0_66], %200 {strides = array<i32>} : memref<16x128xf32, #tpu.memory_space<vmem>>, vector<8x128xf32>,
    %c0_67 = arith.constant 0 : index
    %c0_68 = arith.constant 0 : index
    %202 = vector.load %arg48[%c0_67, %c0_68] : memref<16x128xf32, #tpu.memory_space<vmem>>, vector<16x128xf32>
    %203 = arith.truncf %202 : vector<16x128xf32> to vector<16x128xbf16>
    %c0_69 = arith.constant 0 : index
    %c0_70 = arith.constant 0 : index
    %c0_71 = arith.constant 0 : index
    %204 = vector.load %arg7[%c0_69, %c0_70, %c0_71] : memref<2x128x128xbf16, #tpu.memory_space<vmem>>, vector<1x128x128xbf16>
    %205 = vector.shape_cast %204 : vector<1x128x128xbf16> to vector<128x128xbf16>
    %cst_72 = arith.constant dense<0.000000e+00> : vector<16x128xf32>
    %206 = tpu.matmul %203, %205, %cst_72 {dimension_numbers = #tpu.dot_dimension_numbers<[1], [0], [0], [1], [0, 0, 1, 1], [], []>} : vector<16x128xbf16>, vector<128x128xbf16>, vector<16x128xf32> -> vector<16x128xf32>
    %c0_73 = arith.constant 0 : index
    %c0_74 = arith.constant 0 : index
    %c0_75 = arith.constant 0 : index
    %207 = vector.load %arg8[%c0_73, %c0_74, %c0_75] : memref<2x1x128xf32, #tpu.memory_space<vmem>>, vector<1x1x128xf32>
    %208 = vector.shape_cast %207 : vector<1x1x128xf32> to vector<1x128xf32>
    %209 = vector.broadcast %208 : vector<1x128xf32> to vector<16x128xf32>
    %210 = arith.addf %206, %209 : vector<16x128xf32>
    %211 = arith.addf %11, %210 : vector<16x128xf32>
    %c0_76 = arith.constant 0 : index
    %c0_77 = arith.constant 0 : index
    %c0_78 = arith.constant 0 : index
    %212 = vector.load %arg9[%c0_76, %c0_77, %c0_78] : memref<2x1x128xf32, #tpu.memory_space<vmem>>, vector<1x1x128xf32>
    %213 = vector.shape_cast %212 : vector<1x1x128xf32> to vector<1x128xf32>
    %c0_79 = arith.constant 0 : index
    %c0_80 = arith.constant 0 : index
    %c0_81 = arith.constant 0 : index
    %214 = vector.load %arg10[%c0_79, %c0_80, %c0_81] : memref<2x1x128xf32, #tpu.memory_space<vmem>>, vector<1x1x128xf32>
    %215 = vector.shape_cast %214 : vector<1x1x128xf32> to vector<1x128xf32>
    %cst_82 = arith.constant dense<0.000000e+00> : vector<16xf32>
    %216 = vector.multi_reduction <add>, %211, %cst_82 [1] : vector<16x128xf32> to vector<16xf32>
    %217 = vector.shape_cast %216 : vector<16xf32> to vector<16x1xf32>
    %cst_83 = arith.constant 1.280000e+02 : f32
    %218 = vector.broadcast %cst_83 : f32 to vector<16x1xf32>
    %219 = arith.divf %217, %218 : vector<16x1xf32>
    %220 = vector.broadcast %219 : vector<16x1xf32> to vector<16x128xf32>
    %221 = arith.subf %211, %220 : vector<16x128xf32>
    %222 = arith.mulf %221, %221 : vector<16x128xf32>
    %cst_84 = arith.constant dense<0.000000e+00> : vector<16xf32>
    %223 = vector.multi_reduction <add>, %222, %cst_84 [1] : vector<16x128xf32> to vector<16xf32>
    %224 = vector.shape_cast %223 : vector<16xf32> to vector<16x1xf32>
    %cst_85 = arith.constant 1.280000e+02 : f32
    %225 = vector.broadcast %cst_85 : f32 to vector<16x1xf32>
    %226 = arith.divf %224, %225 : vector<16x1xf32>
    %cst_86 = arith.constant 9.99999974E-6 : f32
    %227 = vector.broadcast %cst_86 : f32 to vector<16x1xf32>
    %228 = arith.addf %226, %227 : vector<16x1xf32>
    %229 = math.rsqrt %228 : vector<16x1xf32>
    %230 = vector.broadcast %229 : vector<16x1xf32> to vector<16x128xf32>
    %231 = arith.mulf %221, %230 : vector<16x128xf32>
    %232 = vector.broadcast %213 : vector<1x128xf32> to vector<16x128xf32>
    %233 = arith.mulf %231, %232 : vector<16x128xf32>
    %234 = vector.broadcast %215 : vector<1x128xf32> to vector<16x128xf32>
    %235 = arith.addf %233, %234 : vector<16x128xf32>
    %236 = arith.truncf %235 : vector<16x128xf32> to vector<16x128xbf16>
    %c0_87 = arith.constant 0 : index
    %c0_88 = arith.constant 0 : index
    %c0_89 = arith.constant 0 : index
    %237 = vector.load %arg11[%c0_87, %c0_88, %c0_89] : memref<2x128x256xbf16, #tpu.memory_space<vmem>>, vector<1x128x256xbf16>
    %238 = vector.shape_cast %237 : vector<1x128x256xbf16> to vector<128x256xbf16>
    %cst_90 = arith.constant dense<0.000000e+00> : vector<16x256xf32>
    %239 = tpu.matmul %236, %238, %cst_90 {dimension_numbers = #tpu.dot_dimension_numbers<[1], [0], [0], [1], [0, 0, 1, 1], [], []>} : vector<16x128xbf16>, vector<128x256xbf16>, vector<16x256xf32> -> vector<16x256xf32>
    %c0_91 = arith.constant 0 : index
    %c0_92 = arith.constant 0 : index
    %c0_93 = arith.constant 0 : index
    %240 = vector.load %arg12[%c0_91, %c0_92, %c0_93] : memref<2x1x256xf32, #tpu.memory_space<vmem>>, vector<1x1x256xf32>
    %241 = vector.shape_cast %240 : vector<1x1x256xf32> to vector<1x256xf32>
    %242 = vector.broadcast %241 : vector<1x256xf32> to vector<16x256xf32>
    %243 = arith.addf %239, %242 : vector<16x256xf32>
    %cst_94 = arith.constant 5.000000e-01 : f32
    %244 = vector.broadcast %cst_94 : f32 to vector<16x256xf32>
    %245 = arith.mulf %244, %243 : vector<16x256xf32>
    %cst_95 = arith.constant 4.471500e-02 : f32
    %246 = vector.broadcast %cst_95 : f32 to vector<16x256xf32>
    %247 = arith.mulf %246, %243 : vector<16x256xf32>
    %248 = arith.mulf %247, %243 : vector<16x256xf32>
    %249 = arith.mulf %248, %243 : vector<16x256xf32>
    %250 = arith.addf %243, %249 : vector<16x256xf32>
    %cst_96 = arith.constant 0.797884583 : f32
    %251 = vector.broadcast %cst_96 : f32 to vector<16x256xf32>
    %252 = arith.mulf %251, %250 : vector<16x256xf32>
    %253 = math.tanh %252 : vector<16x256xf32>
    %cst_97 = arith.constant 1.000000e+00 : f32
    %254 = vector.broadcast %cst_97 : f32 to vector<16x256xf32>
    %255 = arith.addf %254, %253 : vector<16x256xf32>
    %256 = arith.mulf %245, %255 : vector<16x256xf32>
    %257 = arith.truncf %256 : vector<16x256xf32> to vector<16x256xbf16>
    %c0_98 = arith.constant 0 : index
    %c0_99 = arith.constant 0 : index
    %c0_100 = arith.constant 0 : index
    %258 = vector.load %arg13[%c0_98, %c0_99, %c0_100] : memref<2x256x128xbf16, #tpu.memory_space<vmem>>, vector<1x256x128xbf16>
    %259 = vector.shape_cast %258 : vector<1x256x128xbf16> to vector<256x128xbf16>
    %cst_101 = arith.constant dense<0.000000e+00> : vector<16x128xf32>
    %260 = tpu.matmul %257, %259, %cst_101 {dimension_numbers = #tpu.dot_dimension_numbers<[1], [0], [0], [1], [0, 0, 1, 1], [], []>} : vector<16x256xbf16>, vector<256x128xbf16>, vector<16x128xf32> -> vector<16x128xf32>
    %c0_102 = arith.constant 0 : index
    %c0_103 = arith.constant 0 : index
    %c0_104 = arith.constant 0 : index
    %261 = vector.load %arg14[%c0_102, %c0_103, %c0_104] : memref<2x1x128xf32, #tpu.memory_space<vmem>>, vector<1x1x128xf32>
    %262 = vector.shape_cast %261 : vector<1x1x128xf32> to vector<1x128xf32>
    %263 = vector.broadcast %262 : vector<1x128xf32> to vector<16x128xf32>
    %264 = arith.addf %260, %263 : vector<16x128xf32>
    %265 = arith.addf %235, %264 : vector<16x128xf32>
    %c0_105 = arith.constant 0 : index
    %c0_106 = arith.constant 0 : index
    %c0_107 = arith.constant 0 : index
    %266 = vector.load %arg15[%c0_105, %c0_106, %c0_107] : memref<2x1x128xf32, #tpu.memory_space<vmem>>, vector<1x1x128xf32>
    %267 = vector.shape_cast %266 : vector<1x1x128xf32> to vector<1x128xf32>
    %c0_108 = arith.constant 0 : index
    %c0_109 = arith.constant 0 : index
    %c0_110 = arith.constant 0 : index
    %268 = vector.load %arg16[%c0_108, %c0_109, %c0_110] : memref<2x1x128xf32, #tpu.memory_space<vmem>>, vector<1x1x128xf32>
    %269 = vector.shape_cast %268 : vector<1x1x128xf32> to vector<1x128xf32>
    %cst_111 = arith.constant dense<0.000000e+00> : vector<16xf32>
    %270 = vector.multi_reduction <add>, %265, %cst_111 [1] : vector<16x128xf32> to vector<16xf32>
    %271 = vector.shape_cast %270 : vector<16xf32> to vector<16x1xf32>
    %cst_112 = arith.constant 1.280000e+02 : f32
    %272 = vector.broadcast %cst_112 : f32 to vector<16x1xf32>
    %273 = arith.divf %271, %272 : vector<16x1xf32>
    %274 = vector.broadcast %273 : vector<16x1xf32> to vector<16x128xf32>
    %275 = arith.subf %265, %274 : vector<16x128xf32>
    %276 = arith.mulf %275, %275 : vector<16x128xf32>
    %cst_113 = arith.constant dense<0.000000e+00> : vector<16xf32>
    %277 = vector.multi_reduction <add>, %276, %cst_113 [1] : vector<16x128xf32> to vector<16xf32>
    %278 = vector.shape_cast %277 : vector<16xf32> to vector<16x1xf32>
    %cst_114 = arith.constant 1.280000e+02 : f32
    %279 = vector.broadcast %cst_114 : f32 to vector<16x1xf32>
    %280 = arith.divf %278, %279 : vector<16x1xf32>
    %cst_115 = arith.constant 9.99999974E-6 : f32
    %281 = vector.broadcast %cst_115 : f32 to vector<16x1xf32>
    %282 = arith.addf %280, %281 : vector<16x1xf32>
    %283 = math.rsqrt %282 : vector<16x1xf32>
    %284 = vector.broadcast %283 : vector<16x1xf32> to vector<16x128xf32>
    %285 = arith.mulf %275, %284 : vector<16x128xf32>
    %286 = vector.broadcast %267 : vector<1x128xf32> to vector<16x128xf32>
    %287 = arith.mulf %285, %286 : vector<16x128xf32>
    %288 = vector.broadcast %269 : vector<1x128xf32> to vector<16x128xf32>
    %289 = arith.addf %287, %288 : vector<16x128xf32>
    %290 = arith.truncf %289 : vector<16x128xf32> to vector<16x128xbf16>
    %c1 = arith.constant 1 : index
    %c0_116 = arith.constant 0 : index
    %c0_117 = arith.constant 0 : index
    %291 = vector.load %arg5[%c1, %c0_116, %c0_117] : memref<2x128x384xbf16, #tpu.memory_space<vmem>>, vector<1x128x384xbf16>
    %292 = vector.shape_cast %291 : vector<1x128x384xbf16> to vector<128x384xbf16>
    %cst_118 = arith.constant dense<0.000000e+00> : vector<16x384xf32>
    %293 = tpu.matmul %290, %292, %cst_118 {dimension_numbers = #tpu.dot_dimension_numbers<[1], [0], [0], [1], [0, 0, 1, 1], [], []>} : vector<16x128xbf16>, vector<128x384xbf16>, vector<16x384xf32> -> vector<16x384xf32>
    %c1_119 = arith.constant 1 : index
    %c0_120 = arith.constant 0 : index
    %c0_121 = arith.constant 0 : index
    %294 = vector.load %arg6[%c1_119, %c0_120, %c0_121] : memref<2x1x384xf32, #tpu.memory_space<vmem>>, vector<1x1x384xf32>
    %295 = vector.shape_cast %294 : vector<1x1x384xf32> to vector<1x384xf32>
    %296 = vector.broadcast %295 : vector<1x384xf32> to vector<16x384xf32>
    %297 = arith.addf %293, %296 : vector<16x384xf32>
    %298 = vector.extract_strided_slice %297 {offsets = [0, 0], sizes = [8, 128], strides = [1, 1]} : vector<16x384xf32> to vector<8x128xf32>
    %299 = arith.truncf %298 : vector<8x128xf32> to vector<8x128xbf16>
    %300 = vector.extract_strided_slice %297 {offsets = [0, 128], sizes = [8, 128], strides = [1, 1]} : vector<16x384xf32> to vector<8x128xf32>
    %301 = vector.extract_strided_slice %297 {offsets = [0, 256], sizes = [8, 128], strides = [1, 1]} : vector<16x384xf32> to vector<8x128xf32>
    %302 = vector.shape_cast %300 : vector<8x128xf32> to vector<1x8x128xf32>
    %303 = vector.shape_cast %302 : vector<1x8x128xf32> to vector<1x8x128xf32>
    %304 = vector.broadcast %303 : vector<1x8x128xf32> to vector<4x8x128xf32>
    %305 = vector.shape_cast %304 : vector<4x8x128xf32> to vector<32x128xf32>
    %306 = arith.mulf %305, %74 : vector<32x128xf32>
    %307 = arith.truncf %306 : vector<32x128xf32> to vector<32x128xbf16>
    %308 = vector.shape_cast %301 : vector<8x128xf32> to vector<1x8x128xf32>
    %309 = vector.shape_cast %308 : vector<1x8x128xf32> to vector<1x8x128xf32>
    %310 = vector.broadcast %309 : vector<1x8x128xf32> to vector<4x8x128xf32>
    %311 = vector.shape_cast %310 : vector<4x8x128xf32> to vector<32x128xf32>
    %312 = arith.mulf %311, %74 : vector<32x128xf32>
    %313 = arith.truncf %312 : vector<32x128xf32> to vector<32x128xbf16>
    %cst_122 = arith.constant dense<0.000000e+00> : vector<8x32xf32>
    %314 = tpu.matmul %299, %307, %cst_122 {dimension_numbers = #tpu.dot_dimension_numbers<[1], [1], [0], [0], [0, 0, 1, 0], [], []>} : vector<8x128xbf16>, vector<32x128xbf16>, vector<8x32xf32> -> vector<8x32xf32>
    %cst_123 = arith.constant dense<0xFF800000> : vector<8xf32>
    %315 = vector.multi_reduction <maximumf>, %314, %cst_123 [1] : vector<8x32xf32> to vector<8xf32>
    %316 = vector.shape_cast %315 : vector<8xf32> to vector<8x1xf32>
    %317 = vector.broadcast %316 : vector<8x1xf32> to vector<8x32xf32>
    %318 = arith.subf %314, %317 : vector<8x32xf32>
    %319 = math.exp %318 : vector<8x32xf32>
    %cst_124 = arith.constant dense<0.000000e+00> : vector<8x32xf32>
    %320 = tpu.matmul %319, %137, %cst_124 {dimension_numbers = #tpu.dot_dimension_numbers<[1], [0], [0], [1], [0, 0, 1, 1], [], []>} : vector<8x32xf32>, vector<32x32xf32>, vector<8x32xf32> -> vector<8x32xf32>
    %321 = tpu.reciprocal %320 {approx = true} : vector<8x32xf32> -> vector<8x32xf32>
    %322 = arith.mulf %319, %321 : vector<8x32xf32>
    %323 = arith.truncf %322 : vector<8x32xf32> to vector<8x32xbf16>
    %cst_125 = arith.constant dense<0.000000e+00> : vector<8x128xf32>
    %324 = tpu.matmul %323, %313, %cst_125 {dimension_numbers = #tpu.dot_dimension_numbers<[1], [0], [0], [1], [0, 0, 1, 1], [], []>} : vector<8x32xbf16>, vector<32x128xbf16>, vector<8x128xf32> -> vector<8x128xf32>
    %c0_126 = arith.constant 0 : index
    %c0_127 = arith.constant 0 : index
    %325 = vector.load %arg48[%c0_126, %c0_127] : memref<16x128xf32, #tpu.memory_space<vmem>>, vector<8x128xf32>
    tpu.vector_store %arg48[%c0_126, %c0_127], %324 {strides = array<i32>} : memref<16x128xf32, #tpu.memory_space<vmem>>, vector<8x128xf32>,
    %326 = vector.extract_strided_slice %297 {offsets = [8, 0], sizes = [8, 128], strides = [1, 1]} : vector<16x384xf32> to vector<8x128xf32>
    %327 = arith.truncf %326 : vector<8x128xf32> to vector<8x128xbf16>
    %328 = vector.extract_strided_slice %297 {offsets = [8, 128], sizes = [8, 128], strides = [1, 1]} : vector<16x384xf32> to vector<8x128xf32>
    %329 = vector.extract_strided_slice %297 {offsets = [8, 256], sizes = [8, 128], strides = [1, 1]} : vector<16x384xf32> to vector<8x128xf32>
    %330 = vector.shape_cast %328 : vector<8x128xf32> to vector<1x8x128xf32>
    %331 = vector.shape_cast %330 : vector<1x8x128xf32> to vector<1x8x128xf32>
    %332 = vector.broadcast %331 : vector<1x8x128xf32> to vector<4x8x128xf32>
    %333 = vector.shape_cast %332 : vector<4x8x128xf32> to vector<32x128xf32>
    %334 = arith.mulf %333, %74 : vector<32x128xf32>
    %335 = arith.truncf %334 : vector<32x128xf32> to vector<32x128xbf16>
    %336 = vector.shape_cast %329 : vector<8x128xf32> to vector<1x8x128xf32>
    %337 = vector.shape_cast %336 : vector<1x8x128xf32> to vector<1x8x128xf32>
    %338 = vector.broadcast %337 : vector<1x8x128xf32> to vector<4x8x128xf32>
    %339 = vector.shape_cast %338 : vector<4x8x128xf32> to vector<32x128xf32>
    %340 = arith.mulf %339, %74 : vector<32x128xf32>
    %341 = arith.truncf %340 : vector<32x128xf32> to vector<32x128xbf16>
    %cst_128 = arith.constant dense<0.000000e+00> : vector<8x32xf32>
    %342 = tpu.matmul %327, %335, %cst_128 {dimension_numbers = #tpu.dot_dimension_numbers<[1], [1], [0], [0], [0, 0, 1, 0], [], []>} : vector<8x128xbf16>, vector<32x128xbf16>, vector<8x32xf32> -> vector<8x32xf32>
    %cst_129 = arith.constant dense<0xFF800000> : vector<8xf32>
    %343 = vector.multi_reduction <maximumf>, %342, %cst_129 [1] : vector<8x32xf32> to vector<8xf32>
    %344 = vector.shape_cast %343 : vector<8xf32> to vector<8x1xf32>
    %345 = vector.broadcast %344 : vector<8x1xf32> to vector<8x32xf32>
    %346 = arith.subf %342, %345 : vector<8x32xf32>
    %347 = math.exp %346 : vector<8x32xf32>
    %cst_130 = arith.constant dense<0.000000e+00> : vector<8x32xf32>
    %348 = tpu.matmul %347, %137, %cst_130 {dimension_numbers = #tpu.dot_dimension_numbers<[1], [0], [0], [1], [0, 0, 1, 1], [], []>} : vector<8x32xf32>, vector<32x32xf32>, vector<8x32xf32> -> vector<8x32xf32>
    %349 = tpu.reciprocal %348 {approx = true} : vector<8x32xf32> -> vector<8x32xf32>
    %350 = arith.mulf %347, %349 : vector<8x32xf32>
    %351 = arith.truncf %350 : vector<8x32xf32> to vector<8x32xbf16>
    %cst_131 = arith.constant dense<0.000000e+00> : vector<8x128xf32>
    %352 = tpu.matmul %351, %341, %cst_131 {dimension_numbers = #tpu.dot_dimension_numbers<[1], [0], [0], [1], [0, 0, 1, 1], [], []>} : vector<8x32xbf16>, vector<32x128xbf16>, vector<8x128xf32> -> vector<8x128xf32>
    %c8_132 = arith.constant 8 : index
    %c0_133 = arith.constant 0 : index
    %353 = vector.load %arg48[%c8_132, %c0_133] : memref<16x128xf32, #tpu.memory_space<vmem>>, vector<8x128xf32>
    tpu.vector_store %arg48[%c8_132, %c0_133], %352 {strides = array<i32>} : memref<16x128xf32, #tpu.memory_space<vmem>>, vector<8x128xf32>,
    %c0_134 = arith.constant 0 : index
    %c0_135 = arith.constant 0 : index
    %354 = vector.load %arg48[%c0_134, %c0_135] : memref<16x128xf32, #tpu.memory_space<vmem>>, vector<16x128xf32>
    %355 = arith.truncf %354 : vector<16x128xf32> to vector<16x128xbf16>
    %c1_136 = arith.constant 1 : index
    %c0_137 = arith.constant 0 : index
    %c0_138 = arith.constant 0 : index
    %356 = vector.load %arg7[%c1_136, %c0_137, %c0_138] : memref<2x128x128xbf16, #tpu.memory_space<vmem>>, vector<1x128x128xbf16>
    %357 = vector.shape_cast %356 : vector<1x128x128xbf16> to vector<128x128xbf16>
    %cst_139 = arith.constant dense<0.000000e+00> : vector<16x128xf32>
    %358 = tpu.matmul %355, %357, %cst_139 {dimension_numbers = #tpu.dot_dimension_numbers<[1], [0], [0], [1], [0, 0, 1, 1], [], []>} : vector<16x128xbf16>, vector<128x128xbf16>, vector<16x128xf32> -> vector<16x128xf32>
    %c1_140 = arith.constant 1 : index
    %c0_141 = arith.constant 0 : index
    %c0_142 = arith.constant 0 : index
    %359 = vector.load %arg8[%c1_140, %c0_141, %c0_142] : memref<2x1x128xf32, #tpu.memory_space<vmem>>, vector<1x1x128xf32>
    %360 = vector.shape_cast %359 : vector<1x1x128xf32> to vector<1x128xf32>
    %361 = vector.broadcast %360 : vector<1x128xf32> to vector<16x128xf32>
    %362 = arith.addf %358, %361 : vector<16x128xf32>
    %363 = arith.addf %289, %362 : vector<16x128xf32>
    %c1_143 = arith.constant 1 : index
    %c0_144 = arith.constant 0 : index
    %c0_145 = arith.constant 0 : index
    %364 = vector.load %arg9[%c1_143, %c0_144, %c0_145] : memref<2x1x128xf32, #tpu.memory_space<vmem>>, vector<1x1x128xf32>
    %365 = vector.shape_cast %364 : vector<1x1x128xf32> to vector<1x128xf32>
    %c1_146 = arith.constant 1 : index
    %c0_147 = arith.constant 0 : index
    %c0_148 = arith.constant 0 : index
    %366 = vector.load %arg10[%c1_146, %c0_147, %c0_148] : memref<2x1x128xf32, #tpu.memory_space<vmem>>, vector<1x1x128xf32>
    %367 = vector.shape_cast %366 : vector<1x1x128xf32> to vector<1x128xf32>
    %cst_149 = arith.constant dense<0.000000e+00> : vector<16xf32>
    %368 = vector.multi_reduction <add>, %363, %cst_149 [1] : vector<16x128xf32> to vector<16xf32>
    %369 = vector.shape_cast %368 : vector<16xf32> to vector<16x1xf32>
    %cst_150 = arith.constant 1.280000e+02 : f32
    %370 = vector.broadcast %cst_150 : f32 to vector<16x1xf32>
    %371 = arith.divf %369, %370 : vector<16x1xf32>
    %372 = vector.broadcast %371 : vector<16x1xf32> to vector<16x128xf32>
    %373 = arith.subf %363, %372 : vector<16x128xf32>
    %374 = arith.mulf %373, %373 : vector<16x128xf32>
    %cst_151 = arith.constant dense<0.000000e+00> : vector<16xf32>
    %375 = vector.multi_reduction <add>, %374, %cst_151 [1] : vector<16x128xf32> to vector<16xf32>
    %376 = vector.shape_cast %375 : vector<16xf32> to vector<16x1xf32>
    %cst_152 = arith.constant 1.280000e+02 : f32
    %377 = vector.broadcast %cst_152 : f32 to vector<16x1xf32>
    %378 = arith.divf %376, %377 : vector<16x1xf32>
    %cst_153 = arith.constant 9.99999974E-6 : f32
    %379 = vector.broadcast %cst_153 : f32 to vector<16x1xf32>
    %380 = arith.addf %378, %379 : vector<16x1xf32>
    %381 = math.rsqrt %380 : vector<16x1xf32>
    %382 = vector.broadcast %381 : vector<16x1xf32> to vector<16x128xf32>
    %383 = arith.mulf %373, %382 : vector<16x128xf32>
    %384 = vector.broadcast %365 : vector<1x128xf32> to vector<16x128xf32>
    %385 = arith.mulf %383, %384 : vector<16x128xf32>
    %386 = vector.broadcast %367 : vector<1x128xf32> to vector<16x128xf32>
    %387 = arith.addf %385, %386 : vector<16x128xf32>
    %388 = arith.truncf %387 : vector<16x128xf32> to vector<16x128xbf16>
    %c1_154 = arith.constant 1 : index
    %c0_155 = arith.constant 0 : index
    %c0_156 = arith.constant 0 : index
    %389 = vector.load %arg11[%c1_154, %c0_155, %c0_156] : memref<2x128x256xbf16, #tpu.memory_space<vmem>>, vector<1x128x256xbf16>
    %390 = vector.shape_cast %389 : vector<1x128x256xbf16> to vector<128x256xbf16>
    %cst_157 = arith.constant dense<0.000000e+00> : vector<16x256xf32>
    %391 = tpu.matmul %388, %390, %cst_157 {dimension_numbers = #tpu.dot_dimension_numbers<[1], [0], [0], [1], [0, 0, 1, 1], [], []>} : vector<16x128xbf16>, vector<128x256xbf16>, vector<16x256xf32> -> vector<16x256xf32>
    %c1_158 = arith.constant 1 : index
    %c0_159 = arith.constant 0 : index
    %c0_160 = arith.constant 0 : index
    %392 = vector.load %arg12[%c1_158, %c0_159, %c0_160] : memref<2x1x256xf32, #tpu.memory_space<vmem>>, vector<1x1x256xf32>
    %393 = vector.shape_cast %392 : vector<1x1x256xf32> to vector<1x256xf32>
    %394 = vector.broadcast %393 : vector<1x256xf32> to vector<16x256xf32>
    %395 = arith.addf %391, %394 : vector<16x256xf32>
    %cst_161 = arith.constant 5.000000e-01 : f32
    %396 = vector.broadcast %cst_161 : f32 to vector<16x256xf32>
    %397 = arith.mulf %396, %395 : vector<16x256xf32>
    %cst_162 = arith.constant 4.471500e-02 : f32
    %398 = vector.broadcast %cst_162 : f32 to vector<16x256xf32>
    %399 = arith.mulf %398, %395 : vector<16x256xf32>
    %400 = arith.mulf %399, %395 : vector<16x256xf32>
    %401 = arith.mulf %400, %395 : vector<16x256xf32>
    %402 = arith.addf %395, %401 : vector<16x256xf32>
    %cst_163 = arith.constant 0.797884583 : f32
    %403 = vector.broadcast %cst_163 : f32 to vector<16x256xf32>
    %404 = arith.mulf %403, %402 : vector<16x256xf32>
    %405 = math.tanh %404 : vector<16x256xf32>
    %cst_164 = arith.constant 1.000000e+00 : f32
    %406 = vector.broadcast %cst_164 : f32 to vector<16x256xf32>
    %407 = arith.addf %406, %405 : vector<16x256xf32>
    %408 = arith.mulf %397, %407 : vector<16x256xf32>
    %409 = arith.truncf %408 : vector<16x256xf32> to vector<16x256xbf16>
    %c1_165 = arith.constant 1 : index
    %c0_166 = arith.constant 0 : index
    %c0_167 = arith.constant 0 : index
    %410 = vector.load %arg13[%c1_165, %c0_166, %c0_167] : memref<2x256x128xbf16, #tpu.memory_space<vmem>>, vector<1x256x128xbf16>
    %411 = vector.shape_cast %410 : vector<1x256x128xbf16> to vector<256x128xbf16>
    %cst_168 = arith.constant dense<0.000000e+00> : vector<16x128xf32>
    %412 = tpu.matmul %409, %411, %cst_168 {dimension_numbers = #tpu.dot_dimension_numbers<[1], [0], [0], [1], [0, 0, 1, 1], [], []>} : vector<16x256xbf16>, vector<256x128xbf16>, vector<16x128xf32> -> vector<16x128xf32>
    %c1_169 = arith.constant 1 : index
    %c0_170 = arith.constant 0 : index
    %c0_171 = arith.constant 0 : index
    %413 = vector.load %arg14[%c1_169, %c0_170, %c0_171] : memref<2x1x128xf32, #tpu.memory_space<vmem>>, vector<1x1x128xf32>
    %414 = vector.shape_cast %413 : vector<1x1x128xf32> to vector<1x128xf32>
    %415 = vector.broadcast %414 : vector<1x128xf32> to vector<16x128xf32>
    %416 = arith.addf %412, %415 : vector<16x128xf32>
    %417 = arith.addf %387, %416 : vector<16x128xf32>
    %c1_172 = arith.constant 1 : index
    %c0_173 = arith.constant 0 : index
    %c0_174 = arith.constant 0 : index
    %418 = vector.load %arg15[%c1_172, %c0_173, %c0_174] : memref<2x1x128xf32, #tpu.memory_space<vmem>>, vector<1x1x128xf32>
    %419 = vector.shape_cast %418 : vector<1x1x128xf32> to vector<1x128xf32>
    %c1_175 = arith.constant 1 : index
    %c0_176 = arith.constant 0 : index
    %c0_177 = arith.constant 0 : index
    %420 = vector.load %arg16[%c1_175, %c0_176, %c0_177] : memref<2x1x128xf32, #tpu.memory_space<vmem>>, vector<1x1x128xf32>
    %421 = vector.shape_cast %420 : vector<1x1x128xf32> to vector<1x128xf32>
    %cst_178 = arith.constant dense<0.000000e+00> : vector<16xf32>
    %422 = vector.multi_reduction <add>, %417, %cst_178 [1] : vector<16x128xf32> to vector<16xf32>
    %423 = vector.shape_cast %422 : vector<16xf32> to vector<16x1xf32>
    %cst_179 = arith.constant 1.280000e+02 : f32
    %424 = vector.broadcast %cst_179 : f32 to vector<16x1xf32>
    %425 = arith.divf %423, %424 : vector<16x1xf32>
    %426 = vector.broadcast %425 : vector<16x1xf32> to vector<16x128xf32>
    %427 = arith.subf %417, %426 : vector<16x128xf32>
    %428 = arith.mulf %427, %427 : vector<16x128xf32>
    %cst_180 = arith.constant dense<0.000000e+00> : vector<16xf32>
    %429 = vector.multi_reduction <add>, %428, %cst_180 [1] : vector<16x128xf32> to vector<16xf32>
    %430 = vector.shape_cast %429 : vector<16xf32> to vector<16x1xf32>
    %cst_181 = arith.constant 1.280000e+02 : f32
    %431 = vector.broadcast %cst_181 : f32 to vector<16x1xf32>
    %432 = arith.divf %430, %431 : vector<16x1xf32>
    %cst_182 = arith.constant 9.99999974E-6 : f32
    %433 = vector.broadcast %cst_182 : f32 to vector<16x1xf32>
    %434 = arith.addf %432, %433 : vector<16x1xf32>
    %435 = math.rsqrt %434 : vector<16x1xf32>
    %436 = vector.broadcast %435 : vector<16x1xf32> to vector<16x128xf32>
    %437 = arith.mulf %427, %436 : vector<16x128xf32>
    %438 = vector.broadcast %419 : vector<1x128xf32> to vector<16x128xf32>
    %439 = arith.mulf %437, %438 : vector<16x128xf32>
    %440 = vector.broadcast %421 : vector<1x128xf32> to vector<16x128xf32>
    %441 = arith.addf %439, %440 : vector<16x128xf32>
    %442 = tpu.iota {dimensions = array<i32: 0>} : vector<2x16xi32>
    %443 = tpu.iota {dimensions = array<i32: 1>} : vector<2x16xi32>
    %c8_i32_183 = arith.constant 8 : i32
    %444 = vector.broadcast %c8_i32_183 : i32 to vector<2x16xi32>
    %445 = arith.muli %442, %444 : vector<2x16xi32>
    %446 = arith.cmpi sge, %443, %445 : vector<2x16xi32>
    %c1_i32 = arith.constant 1 : i32
    %447 = vector.broadcast %c1_i32 : i32 to vector<2x16xi32>
    %448 = arith.addi %442, %447 : vector<2x16xi32>
    %c8_i32_184 = arith.constant 8 : i32
    %449 = vector.broadcast %c8_i32_184 : i32 to vector<2x16xi32>
    %450 = arith.muli %448, %449 : vector<2x16xi32>
    %451 = arith.cmpi slt, %443, %450 : vector<2x16xi32>
    %452 = arith.andi %446, %451 : vector<2x16xi1>
    %cst_185 = arith.constant 1.250000e-01 : f32
    %cst_186 = arith.constant 0.000000e+00 : f32
    %453 = vector.broadcast %cst_185 : f32 to vector<2x16xf32>
    %454 = vector.broadcast %cst_186 : f32 to vector<2x16xf32>
    %455 = arith.select %452, %453, %454 : vector<2x16xi1>, vector<2x16xf32>
    %cst_187 = arith.constant dense<0.000000e+00> : vector<2x128xf32>
    %456 = tpu.matmul %455, %441, %cst_187 {dimension_numbers = #tpu.dot_dimension_numbers<[1], [0], [0], [1], [0, 0, 1, 1], [], []>} : vector<2x16xf32>, vector<16x128xf32>, vector<2x128xf32> -> vector<2x128xf32>
    %c0_188 = arith.constant 0 : index
    %c0_189 = arith.constant 0 : index
    %457 = vector.load %arg18[%c0_188, %c0_189] : memref<16x1xf32, #tpu.memory_space<vmem>>, vector<16x1xf32>
    %c0_190 = arith.constant 0 : index
    %c0_191 = arith.constant 0 : index
    %458 = vector.load %arg19[%c0_190, %c0_191] : memref<1x7xf32, #tpu.memory_space<vmem>>, vector<1x7xf32>
    %459 = vector.broadcast %457 : vector<16x1xf32> to vector<16x7xf32>
    %460 = vector.broadcast %458 : vector<1x7xf32> to vector<16x7xf32>
    %461 = arith.mulf %459, %460 : vector<16x7xf32>
    %c0_192 = arith.constant 0 : index
    %c0_193 = arith.constant 0 : index
    %462 = vector.load %arg20[%c0_192, %c0_193] : memref<1x7xf32, #tpu.memory_space<vmem>>, vector<1x7xf32>
    %463 = vector.broadcast %462 : vector<1x7xf32> to vector<16x7xf32>
    %464 = arith.addf %461, %463 : vector<16x7xf32>
    %465 = math.sin %464 : vector<16x7xf32>
    %c0_194 = arith.constant 0 : index
    %c0_195 = arith.constant 0 : index
    %466 = vector.load %arg17[%c0_194, %c0_195] : memref<16x3xf32, #tpu.memory_space<vmem>>, vector<16x3xf32>
    %c0_196 = arith.constant 0 : index
    %c0_197 = arith.constant 0 : index
    %467 = vector.load %arg21[%c0_196, %c0_197] : memref<3x128xf32, #tpu.memory_space<vmem>>, vector<3x128xf32>
    %cst_198 = arith.constant dense<0.000000e+00> : vector<16x128xf32>
    %468 = tpu.matmul %466, %467, %cst_198 {dimension_numbers = #tpu.dot_dimension_numbers<[1], [0], [0], [1], [0, 0, 1, 1], [], []>} : vector<16x3xf32>, vector<3x128xf32>, vector<16x128xf32> -> vector<16x128xf32>
    %c0_199 = arith.constant 0 : index
    %c0_200 = arith.constant 0 : index
    %469 = vector.load %arg22[%c0_199, %c0_200] : memref<1x128xf32, #tpu.memory_space<vmem>>, vector<1x128xf32>
    %470 = vector.broadcast %457 : vector<16x1xf32> to vector<16x128xf32>
    %471 = vector.broadcast %469 : vector<1x128xf32> to vector<16x128xf32>
    %472 = arith.mulf %470, %471 : vector<16x128xf32>
    %473 = arith.addf %468, %472 : vector<16x128xf32>
    %c0_201 = arith.constant 0 : index
    %c0_202 = arith.constant 0 : index
    %474 = vector.load %arg23[%c0_201, %c0_202] : memref<7x128xf32, #tpu.memory_space<vmem>>, vector<7x128xf32>
    %cst_203 = arith.constant dense<0.000000e+00> : vector<16x128xf32>
    %475 = tpu.matmul %465, %474, %cst_203 {dimension_numbers = #tpu.dot_dimension_numbers<[1], [0], [0], [1], [0, 0, 1, 1], [], []>} : vector<16x7xf32>, vector<7x128xf32>, vector<16x128xf32> -> vector<16x128xf32>
    %476 = arith.addf %473, %475 : vector<16x128xf32>
    %c0_204 = arith.constant 0 : index
    %c0_205 = arith.constant 0 : index
    %477 = vector.load %arg24[%c0_204, %c0_205] : memref<1x128xf32, #tpu.memory_space<vmem>>, vector<1x128xf32>
    %478 = vector.broadcast %477 : vector<1x128xf32> to vector<16x128xf32>
    %479 = arith.addf %476, %478 : vector<16x128xf32>
    %cst_206 = arith.constant 5.000000e-01 : f32
    %480 = vector.broadcast %cst_206 : f32 to vector<16x128xf32>
    %481 = arith.mulf %480, %479 : vector<16x128xf32>
    %cst_207 = arith.constant 4.471500e-02 : f32
    %482 = vector.broadcast %cst_207 : f32 to vector<16x128xf32>
    %483 = arith.mulf %482, %479 : vector<16x128xf32>
    %484 = arith.mulf %483, %479 : vector<16x128xf32>
    %485 = arith.mulf %484, %479 : vector<16x128xf32>
    %486 = arith.addf %479, %485 : vector<16x128xf32>
    %cst_208 = arith.constant 0.797884583 : f32
    %487 = vector.broadcast %cst_208 : f32 to vector<16x128xf32>
    %488 = arith.mulf %487, %486 : vector<16x128xf32>
    %489 = math.tanh %488 : vector<16x128xf32>
    %cst_209 = arith.constant 1.000000e+00 : f32
    %490 = vector.broadcast %cst_209 : f32 to vector<16x128xf32>
    %491 = arith.addf %490, %489 : vector<16x128xf32>
    %492 = arith.mulf %481, %491 : vector<16x128xf32>
    %c0_210 = arith.constant 0 : index
    %c0_211 = arith.constant 0 : index
    %493 = vector.load %arg25[%c0_210, %c0_211] : memref<2x32xf32, #tpu.memory_space<vmem>>, vector<2x32xf32>
    %494 = tpu.iota {dimensions = array<i32: 0>} : vector<32x128xi32>
    %495 = tpu.iota {dimensions = array<i32: 1>} : vector<32x128xi32>
    %cst_212 = arith.constant 0.000000e+00 : f32
    %496 = vector.broadcast %cst_212 : f32 to vector<32x128xf32>
    %c0_i32_213 = arith.constant 0 : i32
    %497 = vector.broadcast %c0_i32_213 : i32 to vector<32x128xi32>
    %498 = arith.cmpi sge, %494, %497 : vector<32x128xi32>
    %c8_i32_214 = arith.constant 8 : i32
    %499 = vector.broadcast %c8_i32_214 : i32 to vector<32x128xi32>
    %500 = arith.cmpi slt, %494, %499 : vector<32x128xi32>
    %501 = arith.andi %498, %500 : vector<32x128xi1>
    %c0_i32_215 = arith.constant 0 : i32
    %502 = vector.broadcast %c0_i32_215 : i32 to vector<32x128xi32>
    %503 = arith.cmpi sge, %495, %502 : vector<32x128xi32>
    %504 = arith.andi %501, %503 : vector<32x128xi1>
    %c32_i32_216 = arith.constant 32 : i32
    %505 = vector.broadcast %c32_i32_216 : i32 to vector<32x128xi32>
    %506 = arith.cmpi slt, %495, %505 : vector<32x128xi32>
    %507 = arith.andi %504, %506 : vector<32x128xi1>
    %cst_217 = arith.constant 1.000000e+00 : f32
    %cst_218 = arith.constant 0.000000e+00 : f32
    %508 = vector.broadcast %cst_217 : f32 to vector<32x128xf32>
    %509 = vector.broadcast %cst_218 : f32 to vector<32x128xf32>
    %510 = arith.select %507, %508, %509 : vector<32x128xi1>, vector<32x128xf32>
    %511 = arith.addf %496, %510 : vector<32x128xf32>
    %c8_i32_219 = arith.constant 8 : i32
    %512 = vector.broadcast %c8_i32_219 : i32 to vector<32x128xi32>
    %513 = arith.cmpi sge, %494, %512 : vector<32x128xi32>
    %c16_i32_220 = arith.constant 16 : i32
    %514 = vector.broadcast %c16_i32_220 : i32 to vector<32x128xi32>
    %515 = arith.cmpi slt, %494, %514 : vector<32x128xi32>
    %516 = arith.andi %513, %515 : vector<32x128xi1>
    %c32_i32_221 = arith.constant 32 : i32
    %517 = vector.broadcast %c32_i32_221 : i32 to vector<32x128xi32>
    %518 = arith.cmpi sge, %495, %517 : vector<32x128xi32>
    %519 = arith.andi %516, %518 : vector<32x128xi1>
    %c64_i32_222 = arith.constant 64 : i32
    %520 = vector.broadcast %c64_i32_222 : i32 to vector<32x128xi32>
    %521 = arith.cmpi slt, %495, %520 : vector<32x128xi32>
    %522 = arith.andi %519, %521 : vector<32x128xi1>
    %cst_223 = arith.constant 1.000000e+00 : f32
    %cst_224 = arith.constant 0.000000e+00 : f32
    %523 = vector.broadcast %cst_223 : f32 to vector<32x128xf32>
    %524 = vector.broadcast %cst_224 : f32 to vector<32x128xf32>
    %525 = arith.select %522, %523, %524 : vector<32x128xi1>, vector<32x128xf32>
    %526 = arith.addf %511, %525 : vector<32x128xf32>
    %c16_i32_225 = arith.constant 16 : i32
    %527 = vector.broadcast %c16_i32_225 : i32 to vector<32x128xi32>
    %528 = arith.cmpi sge, %494, %527 : vector<32x128xi32>
    %c24_i32_226 = arith.constant 24 : i32
    %529 = vector.broadcast %c24_i32_226 : i32 to vector<32x128xi32>
    %530 = arith.cmpi slt, %494, %529 : vector<32x128xi32>
    %531 = arith.andi %528, %530 : vector<32x128xi1>
    %c64_i32_227 = arith.constant 64 : i32
    %532 = vector.broadcast %c64_i32_227 : i32 to vector<32x128xi32>
    %533 = arith.cmpi sge, %495, %532 : vector<32x128xi32>
    %534 = arith.andi %531, %533 : vector<32x128xi1>
    %c96_i32_228 = arith.constant 96 : i32
    %535 = vector.broadcast %c96_i32_228 : i32 to vector<32x128xi32>
    %536 = arith.cmpi slt, %495, %535 : vector<32x128xi32>
    %537 = arith.andi %534, %536 : vector<32x128xi1>
    %cst_229 = arith.constant 1.000000e+00 : f32
    %cst_230 = arith.constant 0.000000e+00 : f32
    %538 = vector.broadcast %cst_229 : f32 to vector<32x128xf32>
    %539 = vector.broadcast %cst_230 : f32 to vector<32x128xf32>
    %540 = arith.select %537, %538, %539 : vector<32x128xi1>, vector<32x128xf32>
    %541 = arith.addf %526, %540 : vector<32x128xf32>
    %c24_i32_231 = arith.constant 24 : i32
    %542 = vector.broadcast %c24_i32_231 : i32 to vector<32x128xi32>
    %543 = arith.cmpi sge, %494, %542 : vector<32x128xi32>
    %c32_i32_232 = arith.constant 32 : i32
    %544 = vector.broadcast %c32_i32_232 : i32 to vector<32x128xi32>
    %545 = arith.cmpi slt, %494, %544 : vector<32x128xi32>
    %546 = arith.andi %543, %545 : vector<32x128xi1>
    %c96_i32_233 = arith.constant 96 : i32
    %547 = vector.broadcast %c96_i32_233 : i32 to vector<32x128xi32>
    %548 = arith.cmpi sge, %495, %547 : vector<32x128xi32>
    %549 = arith.andi %546, %548 : vector<32x128xi1>
    %c128_i32_234 = arith.constant 128 : i32
    %550 = vector.broadcast %c128_i32_234 : i32 to vector<32x128xi32>
    %551 = arith.cmpi slt, %495, %550 : vector<32x128xi32>
    %552 = arith.andi %549, %551 : vector<32x128xi1>
    %cst_235 = arith.constant 1.000000e+00 : f32
    %cst_236 = arith.constant 0.000000e+00 : f32
    %553 = vector.broadcast %cst_235 : f32 to vector<32x128xf32>
    %554 = vector.broadcast %cst_236 : f32 to vector<32x128xf32>
    %555 = arith.select %552, %553, %554 : vector<32x128xi1>, vector<32x128xf32>
    %556 = arith.addf %541, %555 : vector<32x128xf32>
    %557 = tpu.iota {dimensions = array<i32: 0>} : vector<32x32xi32>
    %558 = tpu.iota {dimensions = array<i32: 1>} : vector<32x32xi32>
    %cst_237 = arith.constant 0.000000e+00 : f32
    %559 = vector.broadcast %cst_237 : f32 to vector<32x32xf32>
    %c0_i32_238 = arith.constant 0 : i32
    %560 = vector.broadcast %c0_i32_238 : i32 to vector<32x32xi32>
    %561 = arith.cmpi sge, %557, %560 : vector<32x32xi32>
    %c8_i32_239 = arith.constant 8 : i32
    %562 = vector.broadcast %c8_i32_239 : i32 to vector<32x32xi32>
    %563 = arith.cmpi slt, %557, %562 : vector<32x32xi32>
    %564 = arith.andi %561, %563 : vector<32x32xi1>
    %c0_i32_240 = arith.constant 0 : i32
    %565 = vector.broadcast %c0_i32_240 : i32 to vector<32x32xi32>
    %566 = arith.cmpi sge, %558, %565 : vector<32x32xi32>
    %567 = arith.andi %564, %566 : vector<32x32xi1>
    %c8_i32_241 = arith.constant 8 : i32
    %568 = vector.broadcast %c8_i32_241 : i32 to vector<32x32xi32>
    %569 = arith.cmpi slt, %558, %568 : vector<32x32xi32>
    %570 = arith.andi %567, %569 : vector<32x32xi1>
    %cst_242 = arith.constant 1.000000e+00 : f32
    %cst_243 = arith.constant 0.000000e+00 : f32
    %571 = vector.broadcast %cst_242 : f32 to vector<32x32xf32>
    %572 = vector.broadcast %cst_243 : f32 to vector<32x32xf32>
    %573 = arith.select %570, %571, %572 : vector<32x32xi1>, vector<32x32xf32>
    %574 = arith.addf %559, %573 : vector<32x32xf32>
    %c8_i32_244 = arith.constant 8 : i32
    %575 = vector.broadcast %c8_i32_244 : i32 to vector<32x32xi32>
    %576 = arith.cmpi sge, %557, %575 : vector<32x32xi32>
    %c16_i32_245 = arith.constant 16 : i32
    %577 = vector.broadcast %c16_i32_245 : i32 to vector<32x32xi32>
    %578 = arith.cmpi slt, %557, %577 : vector<32x32xi32>
    %579 = arith.andi %576, %578 : vector<32x32xi1>
    %c8_i32_246 = arith.constant 8 : i32
    %580 = vector.broadcast %c8_i32_246 : i32 to vector<32x32xi32>
    %581 = arith.cmpi sge, %558, %580 : vector<32x32xi32>
    %582 = arith.andi %579, %581 : vector<32x32xi1>
    %c16_i32_247 = arith.constant 16 : i32
    %583 = vector.broadcast %c16_i32_247 : i32 to vector<32x32xi32>
    %584 = arith.cmpi slt, %558, %583 : vector<32x32xi32>
    %585 = arith.andi %582, %584 : vector<32x32xi1>
    %cst_248 = arith.constant 1.000000e+00 : f32
    %cst_249 = arith.constant 0.000000e+00 : f32
    %586 = vector.broadcast %cst_248 : f32 to vector<32x32xf32>
    %587 = vector.broadcast %cst_249 : f32 to vector<32x32xf32>
    %588 = arith.select %585, %586, %587 : vector<32x32xi1>, vector<32x32xf32>
    %589 = arith.addf %574, %588 : vector<32x32xf32>
    %c16_i32_250 = arith.constant 16 : i32
    %590 = vector.broadcast %c16_i32_250 : i32 to vector<32x32xi32>
    %591 = arith.cmpi sge, %557, %590 : vector<32x32xi32>
    %c24_i32_251 = arith.constant 24 : i32
    %592 = vector.broadcast %c24_i32_251 : i32 to vector<32x32xi32>
    %593 = arith.cmpi slt, %557, %592 : vector<32x32xi32>
    %594 = arith.andi %591, %593 : vector<32x32xi1>
    %c16_i32_252 = arith.constant 16 : i32
    %595 = vector.broadcast %c16_i32_252 : i32 to vector<32x32xi32>
    %596 = arith.cmpi sge, %558, %595 : vector<32x32xi32>
    %597 = arith.andi %594, %596 : vector<32x32xi1>
    %c24_i32_253 = arith.constant 24 : i32
    %598 = vector.broadcast %c24_i32_253 : i32 to vector<32x32xi32>
    %599 = arith.cmpi slt, %558, %598 : vector<32x32xi32>
    %600 = arith.andi %597, %599 : vector<32x32xi1>
    %cst_254 = arith.constant 1.000000e+00 : f32
    %cst_255 = arith.constant 0.000000e+00 : f32
    %601 = vector.broadcast %cst_254 : f32 to vector<32x32xf32>
    %602 = vector.broadcast %cst_255 : f32 to vector<32x32xf32>
    %603 = arith.select %600, %601, %602 : vector<32x32xi1>, vector<32x32xf32>
    %604 = arith.addf %589, %603 : vector<32x32xf32>
    %c24_i32_256 = arith.constant 24 : i32
    %605 = vector.broadcast %c24_i32_256 : i32 to vector<32x32xi32>
    %606 = arith.cmpi sge, %557, %605 : vector<32x32xi32>
    %c32_i32_257 = arith.constant 32 : i32
    %607 = vector.broadcast %c32_i32_257 : i32 to vector<32x32xi32>
    %608 = arith.cmpi slt, %557, %607 : vector<32x32xi32>
    %609 = arith.andi %606, %608 : vector<32x32xi1>
    %c24_i32_258 = arith.constant 24 : i32
    %610 = vector.broadcast %c24_i32_258 : i32 to vector<32x32xi32>
    %611 = arith.cmpi sge, %558, %610 : vector<32x32xi32>
    %612 = arith.andi %609, %611 : vector<32x32xi1>
    %c32_i32_259 = arith.constant 32 : i32
    %613 = vector.broadcast %c32_i32_259 : i32 to vector<32x32xi32>
    %614 = arith.cmpi slt, %558, %613 : vector<32x32xi32>
    %615 = arith.andi %612, %614 : vector<32x32xi1>
    %cst_260 = arith.constant 1.000000e+00 : f32
    %cst_261 = arith.constant 0.000000e+00 : f32
    %616 = vector.broadcast %cst_260 : f32 to vector<32x32xf32>
    %617 = vector.broadcast %cst_261 : f32 to vector<32x32xf32>
    %618 = arith.select %615, %616, %617 : vector<32x32xi1>, vector<32x32xf32>
    %619 = arith.addf %604, %618 : vector<32x32xf32>
    %620 = arith.truncf %492 : vector<16x128xf32> to vector<16x128xbf16>
    %c0_262 = arith.constant 0 : index
    %c0_263 = arith.constant 0 : index
    %c0_264 = arith.constant 0 : index
    %621 = vector.load %arg27[%c0_262, %c0_263, %c0_264] : memref<3x128x384xbf16, #tpu.memory_space<vmem>>, vector<1x128x384xbf16>
    %622 = vector.shape_cast %621 : vector<1x128x384xbf16> to vector<128x384xbf16>
    %cst_265 = arith.constant dense<0.000000e+00> : vector<16x384xf32>
    %623 = tpu.matmul %620, %622, %cst_265 {dimension_numbers = #tpu.dot_dimension_numbers<[1], [0], [0], [1], [0, 0, 1, 1], [], []>} : vector<16x128xbf16>, vector<128x384xbf16>, vector<16x384xf32> -> vector<16x384xf32>
    %c0_266 = arith.constant 0 : index
    %c0_267 = arith.constant 0 : index
    %c0_268 = arith.constant 0 : index
    %624 = vector.load %arg28[%c0_266, %c0_267, %c0_268] : memref<3x1x384xf32, #tpu.memory_space<vmem>>, vector<1x1x384xf32>
    %625 = vector.shape_cast %624 : vector<1x1x384xf32> to vector<1x384xf32>
    %626 = vector.broadcast %625 : vector<1x384xf32> to vector<16x384xf32>
    %627 = arith.addf %623, %626 : vector<16x384xf32>
    %628 = vector.extract_strided_slice %627 {offsets = [0, 0], sizes = [8, 128], strides = [1, 1]} : vector<16x384xf32> to vector<8x128xf32>
    %629 = arith.truncf %628 : vector<8x128xf32> to vector<8x128xbf16>
    %630 = vector.extract_strided_slice %627 {offsets = [0, 128], sizes = [8, 128], strides = [1, 1]} : vector<16x384xf32> to vector<8x128xf32>
    %631 = vector.extract_strided_slice %627 {offsets = [0, 256], sizes = [8, 128], strides = [1, 1]} : vector<16x384xf32> to vector<8x128xf32>
    %632 = vector.shape_cast %630 : vector<8x128xf32> to vector<1x8x128xf32>
    %633 = vector.shape_cast %632 : vector<1x8x128xf32> to vector<1x8x128xf32>
    %634 = vector.broadcast %633 : vector<1x8x128xf32> to vector<4x8x128xf32>
    %635 = vector.shape_cast %634 : vector<4x8x128xf32> to vector<32x128xf32>
    %636 = arith.mulf %635, %556 : vector<32x128xf32>
    %637 = arith.truncf %636 : vector<32x128xf32> to vector<32x128xbf16>
    %638 = vector.shape_cast %631 : vector<8x128xf32> to vector<1x8x128xf32>
    %639 = vector.shape_cast %638 : vector<1x8x128xf32> to vector<1x8x128xf32>
    %640 = vector.broadcast %639 : vector<1x8x128xf32> to vector<4x8x128xf32>
    %641 = vector.shape_cast %640 : vector<4x8x128xf32> to vector<32x128xf32>
    %642 = arith.mulf %641, %556 : vector<32x128xf32>
    %643 = arith.truncf %642 : vector<32x128xf32> to vector<32x128xbf16>
    %cst_269 = arith.constant dense<0.000000e+00> : vector<8x32xf32>
    %644 = tpu.matmul %629, %637, %cst_269 {dimension_numbers = #tpu.dot_dimension_numbers<[1], [1], [0], [0], [0, 0, 1, 0], [], []>} : vector<8x128xbf16>, vector<32x128xbf16>, vector<8x32xf32> -> vector<8x32xf32>
    %645 = vector.extract_strided_slice %493 {offsets = [0, 0], sizes = [1, 32], strides = [1, 1]} : vector<2x32xf32> to vector<1x32xf32>
    %646 = vector.broadcast %645 : vector<1x32xf32> to vector<8x32xf32>
    %647 = arith.addf %644, %646 : vector<8x32xf32>
    %cst_270 = arith.constant dense<0xFF800000> : vector<8xf32>
    %648 = vector.multi_reduction <maximumf>, %647, %cst_270 [1] : vector<8x32xf32> to vector<8xf32>
    %649 = vector.shape_cast %648 : vector<8xf32> to vector<8x1xf32>
    %650 = vector.broadcast %649 : vector<8x1xf32> to vector<8x32xf32>
    %651 = arith.subf %647, %650 : vector<8x32xf32>
    %652 = math.exp %651 : vector<8x32xf32>
    %cst_271 = arith.constant dense<0.000000e+00> : vector<8x32xf32>
    %653 = tpu.matmul %652, %619, %cst_271 {dimension_numbers = #tpu.dot_dimension_numbers<[1], [0], [0], [1], [0, 0, 1, 1], [], []>} : vector<8x32xf32>, vector<32x32xf32>, vector<8x32xf32> -> vector<8x32xf32>
    %654 = tpu.reciprocal %653 {approx = true} : vector<8x32xf32> -> vector<8x32xf32>
    %655 = arith.mulf %652, %654 : vector<8x32xf32>
    %656 = arith.truncf %655 : vector<8x32xf32> to vector<8x32xbf16>
    %cst_272 = arith.constant dense<0.000000e+00> : vector<8x128xf32>
    %657 = tpu.matmul %656, %643, %cst_272 {dimension_numbers = #tpu.dot_dimension_numbers<[1], [0], [0], [1], [0, 0, 1, 1], [], []>} : vector<8x32xbf16>, vector<32x128xbf16>, vector<8x128xf32> -> vector<8x128xf32>
    %c0_273 = arith.constant 0 : index
    %c0_274 = arith.constant 0 : index
    %658 = vector.load %arg48[%c0_273, %c0_274] : memref<16x128xf32, #tpu.memory_space<vmem>>, vector<8x128xf32>
    tpu.vector_store %arg48[%c0_273, %c0_274], %657 {strides = array<i32>} : memref<16x128xf32, #tpu.memory_space<vmem>>, vector<8x128xf32>,
    %659 = vector.extract_strided_slice %627 {offsets = [8, 0], sizes = [8, 128], strides = [1, 1]} : vector<16x384xf32> to vector<8x128xf32>
    %660 = arith.truncf %659 : vector<8x128xf32> to vector<8x128xbf16>
    %661 = vector.extract_strided_slice %627 {offsets = [8, 128], sizes = [8, 128], strides = [1, 1]} : vector<16x384xf32> to vector<8x128xf32>
    %662 = vector.extract_strided_slice %627 {offsets = [8, 256], sizes = [8, 128], strides = [1, 1]} : vector<16x384xf32> to vector<8x128xf32>
    %663 = vector.shape_cast %661 : vector<8x128xf32> to vector<1x8x128xf32>
    %664 = vector.shape_cast %663 : vector<1x8x128xf32> to vector<1x8x128xf32>
    %665 = vector.broadcast %664 : vector<1x8x128xf32> to vector<4x8x128xf32>
    %666 = vector.shape_cast %665 : vector<4x8x128xf32> to vector<32x128xf32>
    %667 = arith.mulf %666, %556 : vector<32x128xf32>
    %668 = arith.truncf %667 : vector<32x128xf32> to vector<32x128xbf16>
    %669 = vector.shape_cast %662 : vector<8x128xf32> to vector<1x8x128xf32>
    %670 = vector.shape_cast %669 : vector<1x8x128xf32> to vector<1x8x128xf32>
    %671 = vector.broadcast %670 : vector<1x8x128xf32> to vector<4x8x128xf32>
    %672 = vector.shape_cast %671 : vector<4x8x128xf32> to vector<32x128xf32>
    %673 = arith.mulf %672, %556 : vector<32x128xf32>
    %674 = arith.truncf %673 : vector<32x128xf32> to vector<32x128xbf16>
    %cst_275 = arith.constant dense<0.000000e+00> : vector<8x32xf32>
    %675 = tpu.matmul %660, %668, %cst_275 {dimension_numbers = #tpu.dot_dimension_numbers<[1], [1], [0], [0], [0, 0, 1, 0], [], []>} : vector<8x128xbf16>, vector<32x128xbf16>, vector<8x32xf32> -> vector<8x32xf32>
    %676 = vector.extract_strided_slice %493 {offsets = [1, 0], sizes = [1, 32], strides = [1, 1]} : vector<2x32xf32> to vector<1x32xf32>
    %677 = vector.broadcast %676 : vector<1x32xf32> to vector<8x32xf32>
    %678 = arith.addf %675, %677 : vector<8x32xf32>
    %cst_276 = arith.constant dense<0xFF800000> : vector<8xf32>
    %679 = vector.multi_reduction <maximumf>, %678, %cst_276 [1] : vector<8x32xf32> to vector<8xf32>
    %680 = vector.shape_cast %679 : vector<8xf32> to vector<8x1xf32>
    %681 = vector.broadcast %680 : vector<8x1xf32> to vector<8x32xf32>
    %682 = arith.subf %678, %681 : vector<8x32xf32>
    %683 = math.exp %682 : vector<8x32xf32>
    %cst_277 = arith.constant dense<0.000000e+00> : vector<8x32xf32>
    %684 = tpu.matmul %683, %619, %cst_277 {dimension_numbers = #tpu.dot_dimension_numbers<[1], [0], [0], [1], [0, 0, 1, 1], [], []>} : vector<8x32xf32>, vector<32x32xf32>, vector<8x32xf32> -> vector<8x32xf32>
    %685 = tpu.reciprocal %684 {approx = true} : vector<8x32xf32> -> vector<8x32xf32>
    %686 = arith.mulf %683, %685 : vector<8x32xf32>
    %687 = arith.truncf %686 : vector<8x32xf32> to vector<8x32xbf16>
    %cst_278 = arith.constant dense<0.000000e+00> : vector<8x128xf32>
    %688 = tpu.matmul %687, %674, %cst_278 {dimension_numbers = #tpu.dot_dimension_numbers<[1], [0], [0], [1], [0, 0, 1, 1], [], []>} : vector<8x32xbf16>, vector<32x128xbf16>, vector<8x128xf32> -> vector<8x128xf32>
    %c8_279 = arith.constant 8 : index
    %c0_280 = arith.constant 0 : index
    %689 = vector.load %arg48[%c8_279, %c0_280] : memref<16x128xf32, #tpu.memory_space<vmem>>, vector<8x128xf32>
    tpu.vector_store %arg48[%c8_279, %c0_280], %688 {strides = array<i32>} : memref<16x128xf32, #tpu.memory_space<vmem>>, vector<8x128xf32>,
    %c0_281 = arith.constant 0 : index
    %c0_282 = arith.constant 0 : index
    %690 = vector.load %arg48[%c0_281, %c0_282] : memref<16x128xf32, #tpu.memory_space<vmem>>, vector<16x128xf32>
    %691 = arith.truncf %690 : vector<16x128xf32> to vector<16x128xbf16>
    %c0_283 = arith.constant 0 : index
    %c0_284 = arith.constant 0 : index
    %c0_285 = arith.constant 0 : index
    %692 = vector.load %arg29[%c0_283, %c0_284, %c0_285] : memref<3x128x128xbf16, #tpu.memory_space<vmem>>, vector<1x128x128xbf16>
    %693 = vector.shape_cast %692 : vector<1x128x128xbf16> to vector<128x128xbf16>
    %cst_286 = arith.constant dense<0.000000e+00> : vector<16x128xf32>
    %694 = tpu.matmul %691, %693, %cst_286 {dimension_numbers = #tpu.dot_dimension_numbers<[1], [0], [0], [1], [0, 0, 1, 1], [], []>} : vector<16x128xbf16>, vector<128x128xbf16>, vector<16x128xf32> -> vector<16x128xf32>
    %c0_287 = arith.constant 0 : index
    %c0_288 = arith.constant 0 : index
    %c0_289 = arith.constant 0 : index
    %695 = vector.load %arg30[%c0_287, %c0_288, %c0_289] : memref<3x1x128xf32, #tpu.memory_space<vmem>>, vector<1x1x128xf32>
    %696 = vector.shape_cast %695 : vector<1x1x128xf32> to vector<1x128xf32>
    %697 = vector.broadcast %696 : vector<1x128xf32> to vector<16x128xf32>
    %698 = arith.addf %694, %697 : vector<16x128xf32>
    %699 = arith.addf %492, %698 : vector<16x128xf32>
    %c0_290 = arith.constant 0 : index
    %c0_291 = arith.constant 0 : index
    %c0_292 = arith.constant 0 : index
    %700 = vector.load %arg31[%c0_290, %c0_291, %c0_292] : memref<3x1x128xf32, #tpu.memory_space<vmem>>, vector<1x1x128xf32>
    %701 = vector.shape_cast %700 : vector<1x1x128xf32> to vector<1x128xf32>
    %c0_293 = arith.constant 0 : index
    %c0_294 = arith.constant 0 : index
    %c0_295 = arith.constant 0 : index
    %702 = vector.load %arg32[%c0_293, %c0_294, %c0_295] : memref<3x1x128xf32, #tpu.memory_space<vmem>>, vector<1x1x128xf32>
    %703 = vector.shape_cast %702 : vector<1x1x128xf32> to vector<1x128xf32>
    %cst_296 = arith.constant dense<0.000000e+00> : vector<16xf32>
    %704 = vector.multi_reduction <add>, %699, %cst_296 [1] : vector<16x128xf32> to vector<16xf32>
    %705 = vector.shape_cast %704 : vector<16xf32> to vector<16x1xf32>
    %cst_297 = arith.constant 1.280000e+02 : f32
    %706 = vector.broadcast %cst_297 : f32 to vector<16x1xf32>
    %707 = arith.divf %705, %706 : vector<16x1xf32>
    %708 = vector.broadcast %707 : vector<16x1xf32> to vector<16x128xf32>
    %709 = arith.subf %699, %708 : vector<16x128xf32>
    %710 = arith.mulf %709, %709 : vector<16x128xf32>
    %cst_298 = arith.constant dense<0.000000e+00> : vector<16xf32>
    %711 = vector.multi_reduction <add>, %710, %cst_298 [1] : vector<16x128xf32> to vector<16xf32>
    %712 = vector.shape_cast %711 : vector<16xf32> to vector<16x1xf32>
    %cst_299 = arith.constant 1.280000e+02 : f32
    %713 = vector.broadcast %cst_299 : f32 to vector<16x1xf32>
    %714 = arith.divf %712, %713 : vector<16x1xf32>
    %cst_300 = arith.constant 9.99999974E-6 : f32
    %715 = vector.broadcast %cst_300 : f32 to vector<16x1xf32>
    %716 = arith.addf %714, %715 : vector<16x1xf32>
    %717 = math.rsqrt %716 : vector<16x1xf32>
    %718 = vector.broadcast %717 : vector<16x1xf32> to vector<16x128xf32>
    %719 = arith.mulf %709, %718 : vector<16x128xf32>
    %720 = vector.broadcast %701 : vector<1x128xf32> to vector<16x128xf32>
    %721 = arith.mulf %719, %720 : vector<16x128xf32>
    %722 = vector.broadcast %703 : vector<1x128xf32> to vector<16x128xf32>
    %723 = arith.addf %721, %722 : vector<16x128xf32>
    %724 = arith.truncf %723 : vector<16x128xf32> to vector<16x128xbf16>
    %c0_301 = arith.constant 0 : index
    %c0_302 = arith.constant 0 : index
    %c0_303 = arith.constant 0 : index
    %725 = vector.load %arg33[%c0_301, %c0_302, %c0_303] : memref<3x128x512xbf16, #tpu.memory_space<vmem>>, vector<1x128x512xbf16>
    %726 = vector.shape_cast %725 : vector<1x128x512xbf16> to vector<128x512xbf16>
    %cst_304 = arith.constant dense<0.000000e+00> : vector<16x512xf32>
    %727 = tpu.matmul %724, %726, %cst_304 {dimension_numbers = #tpu.dot_dimension_numbers<[1], [0], [0], [1], [0, 0, 1, 1], [], []>} : vector<16x128xbf16>, vector<128x512xbf16>, vector<16x512xf32> -> vector<16x512xf32>
    %c0_305 = arith.constant 0 : index
    %c0_306 = arith.constant 0 : index
    %c0_307 = arith.constant 0 : index
    %728 = vector.load %arg34[%c0_305, %c0_306, %c0_307] : memref<3x1x512xf32, #tpu.memory_space<vmem>>, vector<1x1x512xf32>
    %729 = vector.shape_cast %728 : vector<1x1x512xf32> to vector<1x512xf32>
    %730 = vector.broadcast %729 : vector<1x512xf32> to vector<16x512xf32>
    %731 = arith.addf %727, %730 : vector<16x512xf32>
    %cst_308 = arith.constant 5.000000e-01 : f32
    %732 = vector.broadcast %cst_308 : f32 to vector<16x512xf32>
    %733 = arith.mulf %732, %731 : vector<16x512xf32>
    %cst_309 = arith.constant 4.471500e-02 : f32
    %734 = vector.broadcast %cst_309 : f32 to vector<16x512xf32>
    %735 = arith.mulf %734, %731 : vector<16x512xf32>
    %736 = arith.mulf %735, %731 : vector<16x512xf32>
    %737 = arith.mulf %736, %731 : vector<16x512xf32>
    %738 = arith.addf %731, %737 : vector<16x512xf32>
    %cst_310 = arith.constant 0.797884583 : f32
    %739 = vector.broadcast %cst_310 : f32 to vector<16x512xf32>
    %740 = arith.mulf %739, %738 : vector<16x512xf32>
    %741 = math.tanh %740 : vector<16x512xf32>
    %cst_311 = arith.constant 1.000000e+00 : f32
    %742 = vector.broadcast %cst_311 : f32 to vector<16x512xf32>
    %743 = arith.addf %742, %741 : vector<16x512xf32>
    %744 = arith.mulf %733, %743 : vector<16x512xf32>
    %745 = arith.truncf %744 : vector<16x512xf32> to vector<16x512xbf16>
    %c0_312 = arith.constant 0 : index
    %c0_313 = arith.constant 0 : index
    %c0_314 = arith.constant 0 : index
    %746 = vector.load %arg35[%c0_312, %c0_313, %c0_314] : memref<3x512x128xbf16, #tpu.memory_space<vmem>>, vector<1x512x128xbf16>
    %747 = vector.shape_cast %746 : vector<1x512x128xbf16> to vector<512x128xbf16>
    %cst_315 = arith.constant dense<0.000000e+00> : vector<16x128xf32>
    %748 = tpu.matmul %745, %747, %cst_315 {dimension_numbers = #tpu.dot_dimension_numbers<[1], [0], [0], [1], [0, 0, 1, 1], [], []>} : vector<16x512xbf16>, vector<512x128xbf16>, vector<16x128xf32> -> vector<16x128xf32>
    %c0_316 = arith.constant 0 : index
    %c0_317 = arith.constant 0 : index
    %c0_318 = arith.constant 0 : index
    %749 = vector.load %arg36[%c0_316, %c0_317, %c0_318] : memref<3x1x128xf32, #tpu.memory_space<vmem>>, vector<1x1x128xf32>
    %750 = vector.shape_cast %749 : vector<1x1x128xf32> to vector<1x128xf32>
    %751 = vector.broadcast %750 : vector<1x128xf32> to vector<16x128xf32>
    %752 = arith.addf %748, %751 : vector<16x128xf32>
    %753 = arith.addf %723, %752 : vector<16x128xf32>
    %c0_319 = arith.constant 0 : index
    %c0_320 = arith.constant 0 : index
    %c0_321 = arith.constant 0 : index
    %754 = vector.load %arg37[%c0_319, %c0_320, %c0_321] : memref<3x1x128xf32, #tpu.memory_space<vmem>>, vector<1x1x128xf32>
    %755 = vector.shape_cast %754 : vector<1x1x128xf32> to vector<1x128xf32>
    %c0_322 = arith.constant 0 : index
    %c0_323 = arith.constant 0 : index
    %c0_324 = arith.constant 0 : index
    %756 = vector.load %arg38[%c0_322, %c0_323, %c0_324] : memref<3x1x128xf32, #tpu.memory_space<vmem>>, vector<1x1x128xf32>
    %757 = vector.shape_cast %756 : vector<1x1x128xf32> to vector<1x128xf32>
    %cst_325 = arith.constant dense<0.000000e+00> : vector<16xf32>
    %758 = vector.multi_reduction <add>, %753, %cst_325 [1] : vector<16x128xf32> to vector<16xf32>
    %759 = vector.shape_cast %758 : vector<16xf32> to vector<16x1xf32>
    %cst_326 = arith.constant 1.280000e+02 : f32
    %760 = vector.broadcast %cst_326 : f32 to vector<16x1xf32>
    %761 = arith.divf %759, %760 : vector<16x1xf32>
    %762 = vector.broadcast %761 : vector<16x1xf32> to vector<16x128xf32>
    %763 = arith.subf %753, %762 : vector<16x128xf32>
    %764 = arith.mulf %763, %763 : vector<16x128xf32>
    %cst_327 = arith.constant dense<0.000000e+00> : vector<16xf32>
    %765 = vector.multi_reduction <add>, %764, %cst_327 [1] : vector<16x128xf32> to vector<16xf32>
    %766 = vector.shape_cast %765 : vector<16xf32> to vector<16x1xf32>
    %cst_328 = arith.constant 1.280000e+02 : f32
    %767 = vector.broadcast %cst_328 : f32 to vector<16x1xf32>
    %768 = arith.divf %766, %767 : vector<16x1xf32>
    %cst_329 = arith.constant 9.99999974E-6 : f32
    %769 = vector.broadcast %cst_329 : f32 to vector<16x1xf32>
    %770 = arith.addf %768, %769 : vector<16x1xf32>
    %771 = math.rsqrt %770 : vector<16x1xf32>
    %772 = vector.broadcast %771 : vector<16x1xf32> to vector<16x128xf32>
    %773 = arith.mulf %763, %772 : vector<16x128xf32>
    %774 = vector.broadcast %755 : vector<1x128xf32> to vector<16x128xf32>
    %775 = arith.mulf %773, %774 : vector<16x128xf32>
    %776 = vector.broadcast %757 : vector<1x128xf32> to vector<16x128xf32>
    %777 = arith.addf %775, %776 : vector<16x128xf32>
    %778 = arith.truncf %777 : vector<16x128xf32> to vector<16x128xbf16>
    %c1_330 = arith.constant 1 : index
    %c0_331 = arith.constant 0 : index
    %c0_332 = arith.constant 0 : index
    %779 = vector.load %arg27[%c1_330, %c0_331, %c0_332] : memref<3x128x384xbf16, #tpu.memory_space<vmem>>, vector<1x128x384xbf16>
    %780 = vector.shape_cast %779 : vector<1x128x384xbf16> to vector<128x384xbf16>
    %cst_333 = arith.constant dense<0.000000e+00> : vector<16x384xf32>
    %781 = tpu.matmul %778, %780, %cst_333 {dimension_numbers = #tpu.dot_dimension_numbers<[1], [0], [0], [1], [0, 0, 1, 1], [], []>} : vector<16x128xbf16>, vector<128x384xbf16>, vector<16x384xf32> -> vector<16x384xf32>
    %c1_334 = arith.constant 1 : index
    %c0_335 = arith.constant 0 : index
    %c0_336 = arith.constant 0 : index
    %782 = vector.load %arg28[%c1_334, %c0_335, %c0_336] : memref<3x1x384xf32, #tpu.memory_space<vmem>>, vector<1x1x384xf32>
    %783 = vector.shape_cast %782 : vector<1x1x384xf32> to vector<1x384xf32>
    %784 = vector.broadcast %783 : vector<1x384xf32> to vector<16x384xf32>
    %785 = arith.addf %781, %784 : vector<16x384xf32>
    %786 = vector.extract_strided_slice %785 {offsets = [0, 0], sizes = [8, 128], strides = [1, 1]} : vector<16x384xf32> to vector<8x128xf32>
    %787 = arith.truncf %786 : vector<8x128xf32> to vector<8x128xbf16>
    %788 = vector.extract_strided_slice %785 {offsets = [0, 128], sizes = [8, 128], strides = [1, 1]} : vector<16x384xf32> to vector<8x128xf32>
    %789 = vector.extract_strided_slice %785 {offsets = [0, 256], sizes = [8, 128], strides = [1, 1]} : vector<16x384xf32> to vector<8x128xf32>
    %790 = vector.shape_cast %788 : vector<8x128xf32> to vector<1x8x128xf32>
    %791 = vector.shape_cast %790 : vector<1x8x128xf32> to vector<1x8x128xf32>
    %792 = vector.broadcast %791 : vector<1x8x128xf32> to vector<4x8x128xf32>
    %793 = vector.shape_cast %792 : vector<4x8x128xf32> to vector<32x128xf32>
    %794 = arith.mulf %793, %556 : vector<32x128xf32>
    %795 = arith.truncf %794 : vector<32x128xf32> to vector<32x128xbf16>
    %796 = vector.shape_cast %789 : vector<8x128xf32> to vector<1x8x128xf32>
    %797 = vector.shape_cast %796 : vector<1x8x128xf32> to vector<1x8x128xf32>
    %798 = vector.broadcast %797 : vector<1x8x128xf32> to vector<4x8x128xf32>
    %799 = vector.shape_cast %798 : vector<4x8x128xf32> to vector<32x128xf32>
    %800 = arith.mulf %799, %556 : vector<32x128xf32>
    %801 = arith.truncf %800 : vector<32x128xf32> to vector<32x128xbf16>
    %cst_337 = arith.constant dense<0.000000e+00> : vector<8x32xf32>
    %802 = tpu.matmul %787, %795, %cst_337 {dimension_numbers = #tpu.dot_dimension_numbers<[1], [1], [0], [0], [0, 0, 1, 0], [], []>} : vector<8x128xbf16>, vector<32x128xbf16>, vector<8x32xf32> -> vector<8x32xf32>
    %803 = vector.extract_strided_slice %493 {offsets = [0, 0], sizes = [1, 32], strides = [1, 1]} : vector<2x32xf32> to vector<1x32xf32>
    %804 = vector.broadcast %803 : vector<1x32xf32> to vector<8x32xf32>
    %805 = arith.addf %802, %804 : vector<8x32xf32>
    %cst_338 = arith.constant dense<0xFF800000> : vector<8xf32>
    %806 = vector.multi_reduction <maximumf>, %805, %cst_338 [1] : vector<8x32xf32> to vector<8xf32>
    %807 = vector.shape_cast %806 : vector<8xf32> to vector<8x1xf32>
    %808 = vector.broadcast %807 : vector<8x1xf32> to vector<8x32xf32>
    %809 = arith.subf %805, %808 : vector<8x32xf32>
    %810 = math.exp %809 : vector<8x32xf32>
    %cst_339 = arith.constant dense<0.000000e+00> : vector<8x32xf32>
    %811 = tpu.matmul %810, %619, %cst_339 {dimension_numbers = #tpu.dot_dimension_numbers<[1], [0], [0], [1], [0, 0, 1, 1], [], []>} : vector<8x32xf32>, vector<32x32xf32>, vector<8x32xf32> -> vector<8x32xf32>
    %812 = tpu.reciprocal %811 {approx = true} : vector<8x32xf32> -> vector<8x32xf32>
    %813 = arith.mulf %810, %812 : vector<8x32xf32>
    %814 = arith.truncf %813 : vector<8x32xf32> to vector<8x32xbf16>
    %cst_340 = arith.constant dense<0.000000e+00> : vector<8x128xf32>
    %815 = tpu.matmul %814, %801, %cst_340 {dimension_numbers = #tpu.dot_dimension_numbers<[1], [0], [0], [1], [0, 0, 1, 1], [], []>} : vector<8x32xbf16>, vector<32x128xbf16>, vector<8x128xf32> -> vector<8x128xf32>
    %c0_341 = arith.constant 0 : index
    %c0_342 = arith.constant 0 : index
    %816 = vector.load %arg48[%c0_341, %c0_342] : memref<16x128xf32, #tpu.memory_space<vmem>>, vector<8x128xf32>
    tpu.vector_store %arg48[%c0_341, %c0_342], %815 {strides = array<i32>} : memref<16x128xf32, #tpu.memory_space<vmem>>, vector<8x128xf32>,
    %817 = vector.extract_strided_slice %785 {offsets = [8, 0], sizes = [8, 128], strides = [1, 1]} : vector<16x384xf32> to vector<8x128xf32>
    %818 = arith.truncf %817 : vector<8x128xf32> to vector<8x128xbf16>
    %819 = vector.extract_strided_slice %785 {offsets = [8, 128], sizes = [8, 128], strides = [1, 1]} : vector<16x384xf32> to vector<8x128xf32>
    %820 = vector.extract_strided_slice %785 {offsets = [8, 256], sizes = [8, 128], strides = [1, 1]} : vector<16x384xf32> to vector<8x128xf32>
    %821 = vector.shape_cast %819 : vector<8x128xf32> to vector<1x8x128xf32>
    %822 = vector.shape_cast %821 : vector<1x8x128xf32> to vector<1x8x128xf32>
    %823 = vector.broadcast %822 : vector<1x8x128xf32> to vector<4x8x128xf32>
    %824 = vector.shape_cast %823 : vector<4x8x128xf32> to vector<32x128xf32>
    %825 = arith.mulf %824, %556 : vector<32x128xf32>
    %826 = arith.truncf %825 : vector<32x128xf32> to vector<32x128xbf16>
    %827 = vector.shape_cast %820 : vector<8x128xf32> to vector<1x8x128xf32>
    %828 = vector.shape_cast %827 : vector<1x8x128xf32> to vector<1x8x128xf32>
    %829 = vector.broadcast %828 : vector<1x8x128xf32> to vector<4x8x128xf32>
    %830 = vector.shape_cast %829 : vector<4x8x128xf32> to vector<32x128xf32>
    %831 = arith.mulf %830, %556 : vector<32x128xf32>
    %832 = arith.truncf %831 : vector<32x128xf32> to vector<32x128xbf16>
    %cst_343 = arith.constant dense<0.000000e+00> : vector<8x32xf32>
    %833 = tpu.matmul %818, %826, %cst_343 {dimension_numbers = #tpu.dot_dimension_numbers<[1], [1], [0], [0], [0, 0, 1, 0], [], []>} : vector<8x128xbf16>, vector<32x128xbf16>, vector<8x32xf32> -> vector<8x32xf32>
    %834 = vector.extract_strided_slice %493 {offsets = [1, 0], sizes = [1, 32], strides = [1, 1]} : vector<2x32xf32> to vector<1x32xf32>
    %835 = vector.broadcast %834 : vector<1x32xf32> to vector<8x32xf32>
    %836 = arith.addf %833, %835 : vector<8x32xf32>
    %cst_344 = arith.constant dense<0xFF800000> : vector<8xf32>
    %837 = vector.multi_reduction <maximumf>, %836, %cst_344 [1] : vector<8x32xf32> to vector<8xf32>
    %838 = vector.shape_cast %837 : vector<8xf32> to vector<8x1xf32>
    %839 = vector.broadcast %838 : vector<8x1xf32> to vector<8x32xf32>
    %840 = arith.subf %836, %839 : vector<8x32xf32>
    %841 = math.exp %840 : vector<8x32xf32>
    %cst_345 = arith.constant dense<0.000000e+00> : vector<8x32xf32>
    %842 = tpu.matmul %841, %619, %cst_345 {dimension_numbers = #tpu.dot_dimension_numbers<[1], [0], [0], [1], [0, 0, 1, 1], [], []>} : vector<8x32xf32>, vector<32x32xf32>, vector<8x32xf32> -> vector<8x32xf32>
    %843 = tpu.reciprocal %842 {approx = true} : vector<8x32xf32> -> vector<8x32xf32>
    %844 = arith.mulf %841, %843 : vector<8x32xf32>
    %845 = arith.truncf %844 : vector<8x32xf32> to vector<8x32xbf16>
    %cst_346 = arith.constant dense<0.000000e+00> : vector<8x128xf32>
    %846 = tpu.matmul %845, %832, %cst_346 {dimension_numbers = #tpu.dot_dimension_numbers<[1], [0], [0], [1], [0, 0, 1, 1], [], []>} : vector<8x32xbf16>, vector<32x128xbf16>, vector<8x128xf32> -> vector<8x128xf32>
    %c8_347 = arith.constant 8 : index
    %c0_348 = arith.constant 0 : index
    %847 = vector.load %arg48[%c8_347, %c0_348] : memref<16x128xf32, #tpu.memory_space<vmem>>, vector<8x128xf32>
    tpu.vector_store %arg48[%c8_347, %c0_348], %846 {strides = array<i32>} : memref<16x128xf32, #tpu.memory_space<vmem>>, vector<8x128xf32>,
    %c0_349 = arith.constant 0 : index
    %c0_350 = arith.constant 0 : index
    %848 = vector.load %arg48[%c0_349, %c0_350] : memref<16x128xf32, #tpu.memory_space<vmem>>, vector<16x128xf32>
    %849 = arith.truncf %848 : vector<16x128xf32> to vector<16x128xbf16>
    %c1_351 = arith.constant 1 : index
    %c0_352 = arith.constant 0 : index
    %c0_353 = arith.constant 0 : index
    %850 = vector.load %arg29[%c1_351, %c0_352, %c0_353] : memref<3x128x128xbf16, #tpu.memory_space<vmem>>, vector<1x128x128xbf16>
    %851 = vector.shape_cast %850 : vector<1x128x128xbf16> to vector<128x128xbf16>
    %cst_354 = arith.constant dense<0.000000e+00> : vector<16x128xf32>
    %852 = tpu.matmul %849, %851, %cst_354 {dimension_numbers = #tpu.dot_dimension_numbers<[1], [0], [0], [1], [0, 0, 1, 1], [], []>} : vector<16x128xbf16>, vector<128x128xbf16>, vector<16x128xf32> -> vector<16x128xf32>
    %c1_355 = arith.constant 1 : index
    %c0_356 = arith.constant 0 : index
    %c0_357 = arith.constant 0 : index
    %853 = vector.load %arg30[%c1_355, %c0_356, %c0_357] : memref<3x1x128xf32, #tpu.memory_space<vmem>>, vector<1x1x128xf32>
    %854 = vector.shape_cast %853 : vector<1x1x128xf32> to vector<1x128xf32>
    %855 = vector.broadcast %854 : vector<1x128xf32> to vector<16x128xf32>
    %856 = arith.addf %852, %855 : vector<16x128xf32>
    %857 = arith.addf %777, %856 : vector<16x128xf32>
    %c1_358 = arith.constant 1 : index
    %c0_359 = arith.constant 0 : index
    %c0_360 = arith.constant 0 : index
    %858 = vector.load %arg31[%c1_358, %c0_359, %c0_360] : memref<3x1x128xf32, #tpu.memory_space<vmem>>, vector<1x1x128xf32>
    %859 = vector.shape_cast %858 : vector<1x1x128xf32> to vector<1x128xf32>
    %c1_361 = arith.constant 1 : index
    %c0_362 = arith.constant 0 : index
    %c0_363 = arith.constant 0 : index
    %860 = vector.load %arg32[%c1_361, %c0_362, %c0_363] : memref<3x1x128xf32, #tpu.memory_space<vmem>>, vector<1x1x128xf32>
    %861 = vector.shape_cast %860 : vector<1x1x128xf32> to vector<1x128xf32>
    %cst_364 = arith.constant dense<0.000000e+00> : vector<16xf32>
    %862 = vector.multi_reduction <add>, %857, %cst_364 [1] : vector<16x128xf32> to vector<16xf32>
    %863 = vector.shape_cast %862 : vector<16xf32> to vector<16x1xf32>
    %cst_365 = arith.constant 1.280000e+02 : f32
    %864 = vector.broadcast %cst_365 : f32 to vector<16x1xf32>
    %865 = arith.divf %863, %864 : vector<16x1xf32>
    %866 = vector.broadcast %865 : vector<16x1xf32> to vector<16x128xf32>
    %867 = arith.subf %857, %866 : vector<16x128xf32>
    %868 = arith.mulf %867, %867 : vector<16x128xf32>
    %cst_366 = arith.constant dense<0.000000e+00> : vector<16xf32>
    %869 = vector.multi_reduction <add>, %868, %cst_366 [1] : vector<16x128xf32> to vector<16xf32>
    %870 = vector.shape_cast %869 : vector<16xf32> to vector<16x1xf32>
    %cst_367 = arith.constant 1.280000e+02 : f32
    %871 = vector.broadcast %cst_367 : f32 to vector<16x1xf32>
    %872 = arith.divf %870, %871 : vector<16x1xf32>
    %cst_368 = arith.constant 9.99999974E-6 : f32
    %873 = vector.broadcast %cst_368 : f32 to vector<16x1xf32>
    %874 = arith.addf %872, %873 : vector<16x1xf32>
    %875 = math.rsqrt %874 : vector<16x1xf32>
    %876 = vector.broadcast %875 : vector<16x1xf32> to vector<16x128xf32>
    %877 = arith.mulf %867, %876 : vector<16x128xf32>
    %878 = vector.broadcast %859 : vector<1x128xf32> to vector<16x128xf32>
    %879 = arith.mulf %877, %878 : vector<16x128xf32>
    %880 = vector.broadcast %861 : vector<1x128xf32> to vector<16x128xf32>
    %881 = arith.addf %879, %880 : vector<16x128xf32>
    %882 = arith.truncf %881 : vector<16x128xf32> to vector<16x128xbf16>
    %c1_369 = arith.constant 1 : index
    %c0_370 = arith.constant 0 : index
    %c0_371 = arith.constant 0 : index
    %883 = vector.load %arg33[%c1_369, %c0_370, %c0_371] : memref<3x128x512xbf16, #tpu.memory_space<vmem>>, vector<1x128x512xbf16>
    %884 = vector.shape_cast %883 : vector<1x128x512xbf16> to vector<128x512xbf16>
    %cst_372 = arith.constant dense<0.000000e+00> : vector<16x512xf32>
    %885 = tpu.matmul %882, %884, %cst_372 {dimension_numbers = #tpu.dot_dimension_numbers<[1], [0], [0], [1], [0, 0, 1, 1], [], []>} : vector<16x128xbf16>, vector<128x512xbf16>, vector<16x512xf32> -> vector<16x512xf32>
    %c1_373 = arith.constant 1 : index
    %c0_374 = arith.constant 0 : index
    %c0_375 = arith.constant 0 : index
    %886 = vector.load %arg34[%c1_373, %c0_374, %c0_375] : memref<3x1x512xf32, #tpu.memory_space<vmem>>, vector<1x1x512xf32>
    %887 = vector.shape_cast %886 : vector<1x1x512xf32> to vector<1x512xf32>
    %888 = vector.broadcast %887 : vector<1x512xf32> to vector<16x512xf32>
    %889 = arith.addf %885, %888 : vector<16x512xf32>
    %cst_376 = arith.constant 5.000000e-01 : f32
    %890 = vector.broadcast %cst_376 : f32 to vector<16x512xf32>
    %891 = arith.mulf %890, %889 : vector<16x512xf32>
    %cst_377 = arith.constant 4.471500e-02 : f32
    %892 = vector.broadcast %cst_377 : f32 to vector<16x512xf32>
    %893 = arith.mulf %892, %889 : vector<16x512xf32>
    %894 = arith.mulf %893, %889 : vector<16x512xf32>
    %895 = arith.mulf %894, %889 : vector<16x512xf32>
    %896 = arith.addf %889, %895 : vector<16x512xf32>
    %cst_378 = arith.constant 0.797884583 : f32
    %897 = vector.broadcast %cst_378 : f32 to vector<16x512xf32>
    %898 = arith.mulf %897, %896 : vector<16x512xf32>
    %899 = math.tanh %898 : vector<16x512xf32>
    %cst_379 = arith.constant 1.000000e+00 : f32
    %900 = vector.broadcast %cst_379 : f32 to vector<16x512xf32>
    %901 = arith.addf %900, %899 : vector<16x512xf32>
    %902 = arith.mulf %891, %901 : vector<16x512xf32>
    %903 = arith.truncf %902 : vector<16x512xf32> to vector<16x512xbf16>
    %c1_380 = arith.constant 1 : index
    %c0_381 = arith.constant 0 : index
    %c0_382 = arith.constant 0 : index
    %904 = vector.load %arg35[%c1_380, %c0_381, %c0_382] : memref<3x512x128xbf16, #tpu.memory_space<vmem>>, vector<1x512x128xbf16>
    %905 = vector.shape_cast %904 : vector<1x512x128xbf16> to vector<512x128xbf16>
    %cst_383 = arith.constant dense<0.000000e+00> : vector<16x128xf32>
    %906 = tpu.matmul %903, %905, %cst_383 {dimension_numbers = #tpu.dot_dimension_numbers<[1], [0], [0], [1], [0, 0, 1, 1], [], []>} : vector<16x512xbf16>, vector<512x128xbf16>, vector<16x128xf32> -> vector<16x128xf32>
    %c1_384 = arith.constant 1 : index
    %c0_385 = arith.constant 0 : index
    %c0_386 = arith.constant 0 : index
    %907 = vector.load %arg36[%c1_384, %c0_385, %c0_386] : memref<3x1x128xf32, #tpu.memory_space<vmem>>, vector<1x1x128xf32>
    %908 = vector.shape_cast %907 : vector<1x1x128xf32> to vector<1x128xf32>
    %909 = vector.broadcast %908 : vector<1x128xf32> to vector<16x128xf32>
    %910 = arith.addf %906, %909 : vector<16x128xf32>
    %911 = arith.addf %881, %910 : vector<16x128xf32>
    %c1_387 = arith.constant 1 : index
    %c0_388 = arith.constant 0 : index
    %c0_389 = arith.constant 0 : index
    %912 = vector.load %arg37[%c1_387, %c0_388, %c0_389] : memref<3x1x128xf32, #tpu.memory_space<vmem>>, vector<1x1x128xf32>
    %913 = vector.shape_cast %912 : vector<1x1x128xf32> to vector<1x128xf32>
    %c1_390 = arith.constant 1 : index
    %c0_391 = arith.constant 0 : index
    %c0_392 = arith.constant 0 : index
    %914 = vector.load %arg38[%c1_390, %c0_391, %c0_392] : memref<3x1x128xf32, #tpu.memory_space<vmem>>, vector<1x1x128xf32>
    %915 = vector.shape_cast %914 : vector<1x1x128xf32> to vector<1x128xf32>
    %cst_393 = arith.constant dense<0.000000e+00> : vector<16xf32>
    %916 = vector.multi_reduction <add>, %911, %cst_393 [1] : vector<16x128xf32> to vector<16xf32>
    %917 = vector.shape_cast %916 : vector<16xf32> to vector<16x1xf32>
    %cst_394 = arith.constant 1.280000e+02 : f32
    %918 = vector.broadcast %cst_394 : f32 to vector<16x1xf32>
    %919 = arith.divf %917, %918 : vector<16x1xf32>
    %920 = vector.broadcast %919 : vector<16x1xf32> to vector<16x128xf32>
    %921 = arith.subf %911, %920 : vector<16x128xf32>
    %922 = arith.mulf %921, %921 : vector<16x128xf32>
    %cst_395 = arith.constant dense<0.000000e+00> : vector<16xf32>
    %923 = vector.multi_reduction <add>, %922, %cst_395 [1] : vector<16x128xf32> to vector<16xf32>
    %924 = vector.shape_cast %923 : vector<16xf32> to vector<16x1xf32>
    %cst_396 = arith.constant 1.280000e+02 : f32
    %925 = vector.broadcast %cst_396 : f32 to vector<16x1xf32>
    %926 = arith.divf %924, %925 : vector<16x1xf32>
    %cst_397 = arith.constant 9.99999974E-6 : f32
    %927 = vector.broadcast %cst_397 : f32 to vector<16x1xf32>
    %928 = arith.addf %926, %927 : vector<16x1xf32>
    %929 = math.rsqrt %928 : vector<16x1xf32>
    %930 = vector.broadcast %929 : vector<16x1xf32> to vector<16x128xf32>
    %931 = arith.mulf %921, %930 : vector<16x128xf32>
    %932 = vector.broadcast %913 : vector<1x128xf32> to vector<16x128xf32>
    %933 = arith.mulf %931, %932 : vector<16x128xf32>
    %934 = vector.broadcast %915 : vector<1x128xf32> to vector<16x128xf32>
    %935 = arith.addf %933, %934 : vector<16x128xf32>
    %936 = arith.truncf %935 : vector<16x128xf32> to vector<16x128xbf16>
    %c2 = arith.constant 2 : index
    %c0_398 = arith.constant 0 : index
    %c0_399 = arith.constant 0 : index
    %937 = vector.load %arg27[%c2, %c0_398, %c0_399] : memref<3x128x384xbf16, #tpu.memory_space<vmem>>, vector<1x128x384xbf16>
    %938 = vector.shape_cast %937 : vector<1x128x384xbf16> to vector<128x384xbf16>
    %cst_400 = arith.constant dense<0.000000e+00> : vector<16x384xf32>
    %939 = tpu.matmul %936, %938, %cst_400 {dimension_numbers = #tpu.dot_dimension_numbers<[1], [0], [0], [1], [0, 0, 1, 1], [], []>} : vector<16x128xbf16>, vector<128x384xbf16>, vector<16x384xf32> -> vector<16x384xf32>
    %c2_401 = arith.constant 2 : index
    %c0_402 = arith.constant 0 : index
    %c0_403 = arith.constant 0 : index
    %940 = vector.load %arg28[%c2_401, %c0_402, %c0_403] : memref<3x1x384xf32, #tpu.memory_space<vmem>>, vector<1x1x384xf32>
    %941 = vector.shape_cast %940 : vector<1x1x384xf32> to vector<1x384xf32>
    %942 = vector.broadcast %941 : vector<1x384xf32> to vector<16x384xf32>
    %943 = arith.addf %939, %942 : vector<16x384xf32>
    %944 = vector.extract_strided_slice %943 {offsets = [0, 0], sizes = [8, 128], strides = [1, 1]} : vector<16x384xf32> to vector<8x128xf32>
    %945 = arith.truncf %944 : vector<8x128xf32> to vector<8x128xbf16>
    %946 = vector.extract_strided_slice %943 {offsets = [0, 128], sizes = [8, 128], strides = [1, 1]} : vector<16x384xf32> to vector<8x128xf32>
    %947 = vector.extract_strided_slice %943 {offsets = [0, 256], sizes = [8, 128], strides = [1, 1]} : vector<16x384xf32> to vector<8x128xf32>
    %948 = vector.shape_cast %946 : vector<8x128xf32> to vector<1x8x128xf32>
    %949 = vector.shape_cast %948 : vector<1x8x128xf32> to vector<1x8x128xf32>
    %950 = vector.broadcast %949 : vector<1x8x128xf32> to vector<4x8x128xf32>
    %951 = vector.shape_cast %950 : vector<4x8x128xf32> to vector<32x128xf32>
    %952 = arith.mulf %951, %556 : vector<32x128xf32>
    %953 = arith.truncf %952 : vector<32x128xf32> to vector<32x128xbf16>
    %954 = vector.shape_cast %947 : vector<8x128xf32> to vector<1x8x128xf32>
    %955 = vector.shape_cast %954 : vector<1x8x128xf32> to vector<1x8x128xf32>
    %956 = vector.broadcast %955 : vector<1x8x128xf32> to vector<4x8x128xf32>
    %957 = vector.shape_cast %956 : vector<4x8x128xf32> to vector<32x128xf32>
    %958 = arith.mulf %957, %556 : vector<32x128xf32>
    %959 = arith.truncf %958 : vector<32x128xf32> to vector<32x128xbf16>
    %cst_404 = arith.constant dense<0.000000e+00> : vector<8x32xf32>
    %960 = tpu.matmul %945, %953, %cst_404 {dimension_numbers = #tpu.dot_dimension_numbers<[1], [1], [0], [0], [0, 0, 1, 0], [], []>} : vector<8x128xbf16>, vector<32x128xbf16>, vector<8x32xf32> -> vector<8x32xf32>
    %961 = vector.extract_strided_slice %493 {offsets = [0, 0], sizes = [1, 32], strides = [1, 1]} : vector<2x32xf32> to vector<1x32xf32>
    %962 = vector.broadcast %961 : vector<1x32xf32> to vector<8x32xf32>
    %963 = arith.addf %960, %962 : vector<8x32xf32>
    %cst_405 = arith.constant dense<0xFF800000> : vector<8xf32>
    %964 = vector.multi_reduction <maximumf>, %963, %cst_405 [1] : vector<8x32xf32> to vector<8xf32>
    %965 = vector.shape_cast %964 : vector<8xf32> to vector<8x1xf32>
    %966 = vector.broadcast %965 : vector<8x1xf32> to vector<8x32xf32>
    %967 = arith.subf %963, %966 : vector<8x32xf32>
    %968 = math.exp %967 : vector<8x32xf32>
    %cst_406 = arith.constant dense<0.000000e+00> : vector<8x32xf32>
    %969 = tpu.matmul %968, %619, %cst_406 {dimension_numbers = #tpu.dot_dimension_numbers<[1], [0], [0], [1], [0, 0, 1, 1], [], []>} : vector<8x32xf32>, vector<32x32xf32>, vector<8x32xf32> -> vector<8x32xf32>
    %970 = tpu.reciprocal %969 {approx = true} : vector<8x32xf32> -> vector<8x32xf32>
    %971 = arith.mulf %968, %970 : vector<8x32xf32>
    %972 = arith.truncf %971 : vector<8x32xf32> to vector<8x32xbf16>
    %cst_407 = arith.constant dense<0.000000e+00> : vector<8x128xf32>
    %973 = tpu.matmul %972, %959, %cst_407 {dimension_numbers = #tpu.dot_dimension_numbers<[1], [0], [0], [1], [0, 0, 1, 1], [], []>} : vector<8x32xbf16>, vector<32x128xbf16>, vector<8x128xf32> -> vector<8x128xf32>
    %c0_408 = arith.constant 0 : index
    %c0_409 = arith.constant 0 : index
    %974 = vector.load %arg48[%c0_408, %c0_409] : memref<16x128xf32, #tpu.memory_space<vmem>>, vector<8x128xf32>
    tpu.vector_store %arg48[%c0_408, %c0_409], %973 {strides = array<i32>} : memref<16x128xf32, #tpu.memory_space<vmem>>, vector<8x128xf32>,
    %975 = vector.extract_strided_slice %943 {offsets = [8, 0], sizes = [8, 128], strides = [1, 1]} : vector<16x384xf32> to vector<8x128xf32>
    %976 = arith.truncf %975 : vector<8x128xf32> to vector<8x128xbf16>
    %977 = vector.extract_strided_slice %943 {offsets = [8, 128], sizes = [8, 128], strides = [1, 1]} : vector<16x384xf32> to vector<8x128xf32>
    %978 = vector.extract_strided_slice %943 {offsets = [8, 256], sizes = [8, 128], strides = [1, 1]} : vector<16x384xf32> to vector<8x128xf32>
    %979 = vector.shape_cast %977 : vector<8x128xf32> to vector<1x8x128xf32>
    %980 = vector.shape_cast %979 : vector<1x8x128xf32> to vector<1x8x128xf32>
    %981 = vector.broadcast %980 : vector<1x8x128xf32> to vector<4x8x128xf32>
    %982 = vector.shape_cast %981 : vector<4x8x128xf32> to vector<32x128xf32>
    %983 = arith.mulf %982, %556 : vector<32x128xf32>
    %984 = arith.truncf %983 : vector<32x128xf32> to vector<32x128xbf16>
    %985 = vector.shape_cast %978 : vector<8x128xf32> to vector<1x8x128xf32>
    %986 = vector.shape_cast %985 : vector<1x8x128xf32> to vector<1x8x128xf32>
    %987 = vector.broadcast %986 : vector<1x8x128xf32> to vector<4x8x128xf32>
    %988 = vector.shape_cast %987 : vector<4x8x128xf32> to vector<32x128xf32>
    %989 = arith.mulf %988, %556 : vector<32x128xf32>
    %990 = arith.truncf %989 : vector<32x128xf32> to vector<32x128xbf16>
    %cst_410 = arith.constant dense<0.000000e+00> : vector<8x32xf32>
    %991 = tpu.matmul %976, %984, %cst_410 {dimension_numbers = #tpu.dot_dimension_numbers<[1], [1], [0], [0], [0, 0, 1, 0], [], []>} : vector<8x128xbf16>, vector<32x128xbf16>, vector<8x32xf32> -> vector<8x32xf32>
    %992 = vector.extract_strided_slice %493 {offsets = [1, 0], sizes = [1, 32], strides = [1, 1]} : vector<2x32xf32> to vector<1x32xf32>
    %993 = vector.broadcast %992 : vector<1x32xf32> to vector<8x32xf32>
    %994 = arith.addf %991, %993 : vector<8x32xf32>
    %cst_411 = arith.constant dense<0xFF800000> : vector<8xf32>
    %995 = vector.multi_reduction <maximumf>, %994, %cst_411 [1] : vector<8x32xf32> to vector<8xf32>
    %996 = vector.shape_cast %995 : vector<8xf32> to vector<8x1xf32>
    %997 = vector.broadcast %996 : vector<8x1xf32> to vector<8x32xf32>
    %998 = arith.subf %994, %997 : vector<8x32xf32>
    %999 = math.exp %998 : vector<8x32xf32>
    %cst_412 = arith.constant dense<0.000000e+00> : vector<8x32xf32>
    %1000 = tpu.matmul %999, %619, %cst_412 {dimension_numbers = #tpu.dot_dimension_numbers<[1], [0], [0], [1], [0, 0, 1, 1], [], []>} : vector<8x32xf32>, vector<32x32xf32>, vector<8x32xf32> -> vector<8x32xf32>
    %1001 = tpu.reciprocal %1000 {approx = true} : vector<8x32xf32> -> vector<8x32xf32>
    %1002 = arith.mulf %999, %1001 : vector<8x32xf32>
    %1003 = arith.truncf %1002 : vector<8x32xf32> to vector<8x32xbf16>
    %cst_413 = arith.constant dense<0.000000e+00> : vector<8x128xf32>
    %1004 = tpu.matmul %1003, %990, %cst_413 {dimension_numbers = #tpu.dot_dimension_numbers<[1], [0], [0], [1], [0, 0, 1, 1], [], []>} : vector<8x32xbf16>, vector<32x128xbf16>, vector<8x128xf32> -> vector<8x128xf32>
    %c8_414 = arith.constant 8 : index
    %c0_415 = arith.constant 0 : index
    %1005 = vector.load %arg48[%c8_414, %c0_415] : memref<16x128xf32, #tpu.memory_space<vmem>>, vector<8x128xf32>
    tpu.vector_store %arg48[%c8_414, %c0_415], %1004 {strides = array<i32>} : memref<16x128xf32, #tpu.memory_space<vmem>>, vector<8x128xf32>,
    %c0_416 = arith.constant 0 : index
    %c0_417 = arith.constant 0 : index
    %1006 = vector.load %arg48[%c0_416, %c0_417] : memref<16x128xf32, #tpu.memory_space<vmem>>, vector<16x128xf32>
    %1007 = arith.truncf %1006 : vector<16x128xf32> to vector<16x128xbf16>
    %c2_418 = arith.constant 2 : index
    %c0_419 = arith.constant 0 : index
    %c0_420 = arith.constant 0 : index
    %1008 = vector.load %arg29[%c2_418, %c0_419, %c0_420] : memref<3x128x128xbf16, #tpu.memory_space<vmem>>, vector<1x128x128xbf16>
    %1009 = vector.shape_cast %1008 : vector<1x128x128xbf16> to vector<128x128xbf16>
    %cst_421 = arith.constant dense<0.000000e+00> : vector<16x128xf32>
    %1010 = tpu.matmul %1007, %1009, %cst_421 {dimension_numbers = #tpu.dot_dimension_numbers<[1], [0], [0], [1], [0, 0, 1, 1], [], []>} : vector<16x128xbf16>, vector<128x128xbf16>, vector<16x128xf32> -> vector<16x128xf32>
    %c2_422 = arith.constant 2 : index
    %c0_423 = arith.constant 0 : index
    %c0_424 = arith.constant 0 : index
    %1011 = vector.load %arg30[%c2_422, %c0_423, %c0_424] : memref<3x1x128xf32, #tpu.memory_space<vmem>>, vector<1x1x128xf32>
    %1012 = vector.shape_cast %1011 : vector<1x1x128xf32> to vector<1x128xf32>
    %1013 = vector.broadcast %1012 : vector<1x128xf32> to vector<16x128xf32>
    %1014 = arith.addf %1010, %1013 : vector<16x128xf32>
    %1015 = arith.addf %935, %1014 : vector<16x128xf32>
    %c2_425 = arith.constant 2 : index
    %c0_426 = arith.constant 0 : index
    %c0_427 = arith.constant 0 : index
    %1016 = vector.load %arg31[%c2_425, %c0_426, %c0_427] : memref<3x1x128xf32, #tpu.memory_space<vmem>>, vector<1x1x128xf32>
    %1017 = vector.shape_cast %1016 : vector<1x1x128xf32> to vector<1x128xf32>
    %c2_428 = arith.constant 2 : index
    %c0_429 = arith.constant 0 : index
    %c0_430 = arith.constant 0 : index
    %1018 = vector.load %arg32[%c2_428, %c0_429, %c0_430] : memref<3x1x128xf32, #tpu.memory_space<vmem>>, vector<1x1x128xf32>
    %1019 = vector.shape_cast %1018 : vector<1x1x128xf32> to vector<1x128xf32>
    %cst_431 = arith.constant dense<0.000000e+00> : vector<16xf32>
    %1020 = vector.multi_reduction <add>, %1015, %cst_431 [1] : vector<16x128xf32> to vector<16xf32>
    %1021 = vector.shape_cast %1020 : vector<16xf32> to vector<16x1xf32>
    %cst_432 = arith.constant 1.280000e+02 : f32
    %1022 = vector.broadcast %cst_432 : f32 to vector<16x1xf32>
    %1023 = arith.divf %1021, %1022 : vector<16x1xf32>
    %1024 = vector.broadcast %1023 : vector<16x1xf32> to vector<16x128xf32>
    %1025 = arith.subf %1015, %1024 : vector<16x128xf32>
    %1026 = arith.mulf %1025, %1025 : vector<16x128xf32>
    %cst_433 = arith.constant dense<0.000000e+00> : vector<16xf32>
    %1027 = vector.multi_reduction <add>, %1026, %cst_433 [1] : vector<16x128xf32> to vector<16xf32>
    %1028 = vector.shape_cast %1027 : vector<16xf32> to vector<16x1xf32>
    %cst_434 = arith.constant 1.280000e+02 : f32
    %1029 = vector.broadcast %cst_434 : f32 to vector<16x1xf32>
    %1030 = arith.divf %1028, %1029 : vector<16x1xf32>
    %cst_435 = arith.constant 9.99999974E-6 : f32
    %1031 = vector.broadcast %cst_435 : f32 to vector<16x1xf32>
    %1032 = arith.addf %1030, %1031 : vector<16x1xf32>
    %1033 = math.rsqrt %1032 : vector<16x1xf32>
    %1034 = vector.broadcast %1033 : vector<16x1xf32> to vector<16x128xf32>
    %1035 = arith.mulf %1025, %1034 : vector<16x128xf32>
    %1036 = vector.broadcast %1017 : vector<1x128xf32> to vector<16x128xf32>
    %1037 = arith.mulf %1035, %1036 : vector<16x128xf32>
    %1038 = vector.broadcast %1019 : vector<1x128xf32> to vector<16x128xf32>
    %1039 = arith.addf %1037, %1038 : vector<16x128xf32>
    %1040 = arith.truncf %1039 : vector<16x128xf32> to vector<16x128xbf16>
    %c2_436 = arith.constant 2 : index
    %c0_437 = arith.constant 0 : index
    %c0_438 = arith.constant 0 : index
    %1041 = vector.load %arg33[%c2_436, %c0_437, %c0_438] : memref<3x128x512xbf16, #tpu.memory_space<vmem>>, vector<1x128x512xbf16>
    %1042 = vector.shape_cast %1041 : vector<1x128x512xbf16> to vector<128x512xbf16>
    %cst_439 = arith.constant dense<0.000000e+00> : vector<16x512xf32>
    %1043 = tpu.matmul %1040, %1042, %cst_439 {dimension_numbers = #tpu.dot_dimension_numbers<[1], [0], [0], [1], [0, 0, 1, 1], [], []>} : vector<16x128xbf16>, vector<128x512xbf16>, vector<16x512xf32> -> vector<16x512xf32>
    %c2_440 = arith.constant 2 : index
    %c0_441 = arith.constant 0 : index
    %c0_442 = arith.constant 0 : index
    %1044 = vector.load %arg34[%c2_440, %c0_441, %c0_442] : memref<3x1x512xf32, #tpu.memory_space<vmem>>, vector<1x1x512xf32>
    %1045 = vector.shape_cast %1044 : vector<1x1x512xf32> to vector<1x512xf32>
    %1046 = vector.broadcast %1045 : vector<1x512xf32> to vector<16x512xf32>
    %1047 = arith.addf %1043, %1046 : vector<16x512xf32>
    %cst_443 = arith.constant 5.000000e-01 : f32
    %1048 = vector.broadcast %cst_443 : f32 to vector<16x512xf32>
    %1049 = arith.mulf %1048, %1047 : vector<16x512xf32>
    %cst_444 = arith.constant 4.471500e-02 : f32
    %1050 = vector.broadcast %cst_444 : f32 to vector<16x512xf32>
    %1051 = arith.mulf %1050, %1047 : vector<16x512xf32>
    %1052 = arith.mulf %1051, %1047 : vector<16x512xf32>
    %1053 = arith.mulf %1052, %1047 : vector<16x512xf32>
    %1054 = arith.addf %1047, %1053 : vector<16x512xf32>
    %cst_445 = arith.constant 0.797884583 : f32
    %1055 = vector.broadcast %cst_445 : f32 to vector<16x512xf32>
    %1056 = arith.mulf %1055, %1054 : vector<16x512xf32>
    %1057 = math.tanh %1056 : vector<16x512xf32>
    %cst_446 = arith.constant 1.000000e+00 : f32
    %1058 = vector.broadcast %cst_446 : f32 to vector<16x512xf32>
    %1059 = arith.addf %1058, %1057 : vector<16x512xf32>
    %1060 = arith.mulf %1049, %1059 : vector<16x512xf32>
    %1061 = arith.truncf %1060 : vector<16x512xf32> to vector<16x512xbf16>
    %c2_447 = arith.constant 2 : index
    %c0_448 = arith.constant 0 : index
    %c0_449 = arith.constant 0 : index
    %1062 = vector.load %arg35[%c2_447, %c0_448, %c0_449] : memref<3x512x128xbf16, #tpu.memory_space<vmem>>, vector<1x512x128xbf16>
    %1063 = vector.shape_cast %1062 : vector<1x512x128xbf16> to vector<512x128xbf16>
    %cst_450 = arith.constant dense<0.000000e+00> : vector<16x128xf32>
    %1064 = tpu.matmul %1061, %1063, %cst_450 {dimension_numbers = #tpu.dot_dimension_numbers<[1], [0], [0], [1], [0, 0, 1, 1], [], []>} : vector<16x512xbf16>, vector<512x128xbf16>, vector<16x128xf32> -> vector<16x128xf32>
    %c2_451 = arith.constant 2 : index
    %c0_452 = arith.constant 0 : index
    %c0_453 = arith.constant 0 : index
    %1065 = vector.load %arg36[%c2_451, %c0_452, %c0_453] : memref<3x1x128xf32, #tpu.memory_space<vmem>>, vector<1x1x128xf32>
    %1066 = vector.shape_cast %1065 : vector<1x1x128xf32> to vector<1x128xf32>
    %1067 = vector.broadcast %1066 : vector<1x128xf32> to vector<16x128xf32>
    %1068 = arith.addf %1064, %1067 : vector<16x128xf32>
    %1069 = arith.addf %1039, %1068 : vector<16x128xf32>
    %c2_454 = arith.constant 2 : index
    %c0_455 = arith.constant 0 : index
    %c0_456 = arith.constant 0 : index
    %1070 = vector.load %arg37[%c2_454, %c0_455, %c0_456] : memref<3x1x128xf32, #tpu.memory_space<vmem>>, vector<1x1x128xf32>
    %1071 = vector.shape_cast %1070 : vector<1x1x128xf32> to vector<1x128xf32>
    %c2_457 = arith.constant 2 : index
    %c0_458 = arith.constant 0 : index
    %c0_459 = arith.constant 0 : index
    %1072 = vector.load %arg38[%c2_457, %c0_458, %c0_459] : memref<3x1x128xf32, #tpu.memory_space<vmem>>, vector<1x1x128xf32>
    %1073 = vector.shape_cast %1072 : vector<1x1x128xf32> to vector<1x128xf32>
    %cst_460 = arith.constant dense<0.000000e+00> : vector<16xf32>
    %1074 = vector.multi_reduction <add>, %1069, %cst_460 [1] : vector<16x128xf32> to vector<16xf32>
    %1075 = vector.shape_cast %1074 : vector<16xf32> to vector<16x1xf32>
    %cst_461 = arith.constant 1.280000e+02 : f32
    %1076 = vector.broadcast %cst_461 : f32 to vector<16x1xf32>
    %1077 = arith.divf %1075, %1076 : vector<16x1xf32>
    %1078 = vector.broadcast %1077 : vector<16x1xf32> to vector<16x128xf32>
    %1079 = arith.subf %1069, %1078 : vector<16x128xf32>
    %1080 = arith.mulf %1079, %1079 : vector<16x128xf32>
    %cst_462 = arith.constant dense<0.000000e+00> : vector<16xf32>
    %1081 = vector.multi_reduction <add>, %1080, %cst_462 [1] : vector<16x128xf32> to vector<16xf32>
    %1082 = vector.shape_cast %1081 : vector<16xf32> to vector<16x1xf32>
    %cst_463 = arith.constant 1.280000e+02 : f32
    %1083 = vector.broadcast %cst_463 : f32 to vector<16x1xf32>
    %1084 = arith.divf %1082, %1083 : vector<16x1xf32>
    %cst_464 = arith.constant 9.99999974E-6 : f32
    %1085 = vector.broadcast %cst_464 : f32 to vector<16x1xf32>
    %1086 = arith.addf %1084, %1085 : vector<16x1xf32>
    %1087 = math.rsqrt %1086 : vector<16x1xf32>
    %1088 = vector.broadcast %1087 : vector<16x1xf32> to vector<16x128xf32>
    %1089 = arith.mulf %1079, %1088 : vector<16x128xf32>
    %1090 = vector.broadcast %1071 : vector<1x128xf32> to vector<16x128xf32>
    %1091 = arith.mulf %1089, %1090 : vector<16x128xf32>
    %1092 = vector.broadcast %1073 : vector<1x128xf32> to vector<16x128xf32>
    %1093 = arith.addf %1091, %1092 : vector<16x128xf32>
    %c0_465 = arith.constant 0 : index
    %c0_466 = arith.constant 0 : index
    %1094 = vector.load %arg26[%c0_465, %c0_466] : memref<2x8xf32, #tpu.memory_space<vmem>>, vector<2x8xf32>
    %1095 = tpu.iota {dimensions = array<i32: 0>} : vector<2x16xi32>
    %1096 = tpu.iota {dimensions = array<i32: 1>} : vector<2x16xi32>
    %c8_i32_467 = arith.constant 8 : i32
    %1097 = vector.broadcast %c8_i32_467 : i32 to vector<2x16xi32>
    %1098 = arith.muli %1095, %1097 : vector<2x16xi32>
    %1099 = arith.cmpi sge, %1096, %1098 : vector<2x16xi32>
    %c1_i32_468 = arith.constant 1 : i32
    %1100 = vector.broadcast %c1_i32_468 : i32 to vector<2x16xi32>
    %1101 = arith.addi %1095, %1100 : vector<2x16xi32>
    %c8_i32_469 = arith.constant 8 : i32
    %1102 = vector.broadcast %c8_i32_469 : i32 to vector<2x16xi32>
    %1103 = arith.muli %1101, %1102 : vector<2x16xi32>
    %1104 = arith.cmpi slt, %1096, %1103 : vector<2x16xi32>
    %1105 = arith.andi %1099, %1104 : vector<2x16xi1>
    %cst_470 = arith.constant 1.000000e+00 : f32
    %cst_471 = arith.constant 0.000000e+00 : f32
    %1106 = vector.broadcast %cst_470 : f32 to vector<2x16xf32>
    %1107 = vector.broadcast %cst_471 : f32 to vector<2x16xf32>
    %1108 = arith.select %1105, %1106, %1107 : vector<2x16xi1>, vector<2x16xf32>
    %1109 = tpu.concatenate %1094, %1094 in 1 : vector<2x8xf32>, vector<2x8xf32> -> vector<2x16xf32>
    %1110 = arith.mulf %1108, %1109 : vector<2x16xf32>
    %cst_472 = arith.constant dense<0.000000e+00> : vector<2x128xf32>
    %1111 = tpu.matmul %1110, %1093, %cst_472 {dimension_numbers = #tpu.dot_dimension_numbers<[1], [0], [0], [1], [0, 0, 1, 1], [], []>} : vector<2x16xf32>, vector<16x128xf32>, vector<2x128xf32> -> vector<2x128xf32>
    %cst_473 = arith.constant dense<0.000000e+00> : vector<2xf32>
    %1112 = vector.multi_reduction <add>, %1094, %cst_473 [1] : vector<2x8xf32> to vector<2xf32>
    %1113 = vector.shape_cast %1112 : vector<2xf32> to vector<2x1xf32>
    %cst_474 = arith.constant 1.000000e+00 : f32
    %1114 = vector.broadcast %cst_474 : f32 to vector<2x1xf32>
    %1115 = arith.maximumf %1113, %1114 : vector<2x1xf32>
    %1116 = vector.broadcast %1115 : vector<2x1xf32> to vector<2x128xf32>
    %1117 = arith.divf %1111, %1116 : vector<2x128xf32>
    %c0_475 = arith.constant 0 : index
    %c0_476 = arith.constant 0 : index
    %1118 = vector.load %arg47[%c0_475, %c0_476] : memref<2x128xf32, #tpu.memory_space<vmem>>, vector<2x128xf32>
    tpu.vector_store %arg47[%c0_475, %c0_476], %1117 {strides = array<i32>} : memref<2x128xf32, #tpu.memory_space<vmem>>, vector<2x128xf32>,
    %1119 = arith.truncf %456 : vector<2x128xf32> to vector<2x128xbf16>
    %c0_477 = arith.constant 0 : index
    %c0_478 = arith.constant 0 : index
    %1120 = vector.load %arg39[%c0_477, %c0_478] : memref<128x256xbf16, #tpu.memory_space<vmem>>, vector<128x256xbf16>
    %cst_479 = arith.constant dense<0.000000e+00> : vector<2x256xf32>
    %1121 = tpu.matmul %1119, %1120, %cst_479 {dimension_numbers = #tpu.dot_dimension_numbers<[1], [0], [0], [1], [0, 0, 1, 1], [], []>} : vector<2x128xbf16>, vector<128x256xbf16>, vector<2x256xf32> -> vector<2x256xf32>
    %1122 = arith.truncf %1117 : vector<2x128xf32> to vector<2x128xbf16>
    %c0_480 = arith.constant 0 : index
    %c0_481 = arith.constant 0 : index
    %1123 = vector.load %arg40[%c0_480, %c0_481] : memref<128x256xbf16, #tpu.memory_space<vmem>>, vector<128x256xbf16>
    %cst_482 = arith.constant dense<0.000000e+00> : vector<2x256xf32>
    %1124 = tpu.matmul %1122, %1123, %cst_482 {dimension_numbers = #tpu.dot_dimension_numbers<[1], [0], [0], [1], [0, 0, 1, 1], [], []>} : vector<2x128xbf16>, vector<128x256xbf16>, vector<2x256xf32> -> vector<2x256xf32>
    %1125 = arith.addf %1121, %1124 : vector<2x256xf32>
    %c0_483 = arith.constant 0 : index
    %c0_484 = arith.constant 0 : index
    %1126 = vector.load %arg41[%c0_483, %c0_484] : memref<1x256xf32, #tpu.memory_space<vmem>>, vector<1x256xf32>
    %1127 = vector.broadcast %1126 : vector<1x256xf32> to vector<2x256xf32>
    %1128 = arith.addf %1125, %1127 : vector<2x256xf32>
    %c0_485 = arith.constant 0 : index
    %c0_486 = arith.constant 0 : index
    %1129 = vector.load %arg42[%c0_485, %c0_486] : memref<1x256xf32, #tpu.memory_space<vmem>>, vector<1x256xf32>
    %c0_487 = arith.constant 0 : index
    %c0_488 = arith.constant 0 : index
    %1130 = vector.load %arg43[%c0_487, %c0_488] : memref<1x256xf32, #tpu.memory_space<vmem>>, vector<1x256xf32>
    %cst_489 = arith.constant dense<0.000000e+00> : vector<2xf32>
    %1131 = vector.multi_reduction <add>, %1128, %cst_489 [1] : vector<2x256xf32> to vector<2xf32>
    %1132 = vector.shape_cast %1131 : vector<2xf32> to vector<2x1xf32>
    %cst_490 = arith.constant 2.560000e+02 : f32
    %1133 = vector.broadcast %cst_490 : f32 to vector<2x1xf32>
    %1134 = arith.divf %1132, %1133 : vector<2x1xf32>
    %1135 = vector.broadcast %1134 : vector<2x1xf32> to vector<2x256xf32>
    %1136 = arith.subf %1128, %1135 : vector<2x256xf32>
    %1137 = arith.mulf %1136, %1136 : vector<2x256xf32>
    %cst_491 = arith.constant dense<0.000000e+00> : vector<2xf32>
    %1138 = vector.multi_reduction <add>, %1137, %cst_491 [1] : vector<2x256xf32> to vector<2xf32>
    %1139 = vector.shape_cast %1138 : vector<2xf32> to vector<2x1xf32>
    %cst_492 = arith.constant 2.560000e+02 : f32
    %1140 = vector.broadcast %cst_492 : f32 to vector<2x1xf32>
    %1141 = arith.divf %1139, %1140 : vector<2x1xf32>
    %cst_493 = arith.constant 9.99999974E-6 : f32
    %1142 = vector.broadcast %cst_493 : f32 to vector<2x1xf32>
    %1143 = arith.addf %1141, %1142 : vector<2x1xf32>
    %1144 = math.rsqrt %1143 : vector<2x1xf32>
    %1145 = vector.broadcast %1144 : vector<2x1xf32> to vector<2x256xf32>
    %1146 = arith.mulf %1136, %1145 : vector<2x256xf32>
    %1147 = vector.broadcast %1129 : vector<1x256xf32> to vector<2x256xf32>
    %1148 = arith.mulf %1146, %1147 : vector<2x256xf32>
    %1149 = vector.broadcast %1130 : vector<1x256xf32> to vector<2x256xf32>
    %1150 = arith.addf %1148, %1149 : vector<2x256xf32>
    %cst_494 = arith.constant 5.000000e-01 : f32
    %1151 = vector.broadcast %cst_494 : f32 to vector<2x256xf32>
    %1152 = arith.mulf %1151, %1150 : vector<2x256xf32>
    %cst_495 = arith.constant 4.471500e-02 : f32
    %1153 = vector.broadcast %cst_495 : f32 to vector<2x256xf32>
    %1154 = arith.mulf %1153, %1150 : vector<2x256xf32>
    %1155 = arith.mulf %1154, %1150 : vector<2x256xf32>
    %1156 = arith.mulf %1155, %1150 : vector<2x256xf32>
    %1157 = arith.addf %1150, %1156 : vector<2x256xf32>
    %cst_496 = arith.constant 0.797884583 : f32
    %1158 = vector.broadcast %cst_496 : f32 to vector<2x256xf32>
    %1159 = arith.mulf %1158, %1157 : vector<2x256xf32>
    %1160 = math.tanh %1159 : vector<2x256xf32>
    %cst_497 = arith.constant 1.000000e+00 : f32
    %1161 = vector.broadcast %cst_497 : f32 to vector<2x256xf32>
    %1162 = arith.addf %1161, %1160 : vector<2x256xf32>
    %1163 = arith.mulf %1152, %1162 : vector<2x256xf32>
    %1164 = arith.truncf %1163 : vector<2x256xf32> to vector<2x256xbf16>
    %c0_498 = arith.constant 0 : index
    %c0_499 = arith.constant 0 : index
    %1165 = vector.load %arg44[%c0_498, %c0_499] : memref<256x2xbf16, #tpu.memory_space<vmem>>, vector<256x2xbf16>
    %cst_500 = arith.constant dense<0.000000e+00> : vector<2x2xf32>
    %1166 = tpu.matmul %1164, %1165, %cst_500 {dimension_numbers = #tpu.dot_dimension_numbers<[1], [0], [0], [1], [0, 0, 1, 1], [], []>} : vector<2x256xbf16>, vector<256x2xbf16>, vector<2x2xf32> -> vector<2x2xf32>
    %c0_501 = arith.constant 0 : index
    %c0_502 = arith.constant 0 : index
    %1167 = vector.load %arg45[%c0_501, %c0_502] : memref<1x2xf32, #tpu.memory_space<vmem>>, vector<1x2xf32>
    %1168 = vector.broadcast %1167 : vector<1x2xf32> to vector<2x2xf32>
    %1169 = arith.addf %1166, %1168 : vector<2x2xf32>
    %c0_503 = arith.constant 0 : index
    %c0_504 = arith.constant 0 : index
    %1170 = vector.load %arg46[%c0_503, %c0_504] : memref<2x2xf32, #tpu.memory_space<vmem>>, vector<2x2xf32>
    tpu.vector_store %arg46[%c0_503, %c0_504], %1169 {strides = array<i32>} : memref<2x2xf32, #tpu.memory_space<vmem>>, vector<2x2xf32>,
    return
  }
  func.func @transform_0(%arg0: i32) -> (i32, i32) {
    %c0_i32 = arith.constant 0 : i32
    %c0_i32_0 = arith.constant 0 : i32
    %c0_i32_1 = arith.constant 0 : i32
    return %c0_i32, %c0_i32_0 : i32, i32
  }
  func.func @transform_1(%arg0: i32) -> (i32, i32) {
    %c0_i32 = arith.constant 0 : i32
    %c0_i32_0 = arith.constant 0 : i32
    %c0_i32_1 = arith.constant 0 : i32
    return %c0_i32, %c0_i32_0 : i32, i32
  }
  func.func @transform_2(%arg0: i32) -> (i32, i32) {
    %c0_i32 = arith.constant 0 : i32
    %c0_i32_0 = arith.constant 0 : i32
    %c0_i32_1 = arith.constant 0 : i32
    return %c0_i32, %c0_i32_0 : i32, i32
  }
  func.func @transform_3(%arg0: i32) -> (i32, i32) {
    %c0_i32 = arith.constant 0 : i32
    %c0_i32_0 = arith.constant 0 : i32
    %c0_i32_1 = arith.constant 0 : i32
    return %c0_i32, %c0_i32_0 : i32, i32
  }
  func.func @transform_4(%arg0: i32) -> (i32, i32, i32) {
    %c0_i32 = arith.constant 0 : i32
    %c0_i32_0 = arith.constant 0 : i32
    %c0_i32_1 = arith.constant 0 : i32
    %c0_i32_2 = arith.constant 0 : i32
    return %c0_i32, %c0_i32_0, %c0_i32_1 : i32, i32, i32
  }
  func.func @transform_5(%arg0: i32) -> (i32, i32, i32) {
    %c0_i32 = arith.constant 0 : i32
    %c0_i32_0 = arith.constant 0 : i32
    %c0_i32_1 = arith.constant 0 : i32
    %c0_i32_2 = arith.constant 0 : i32
    return %c0_i32, %c0_i32_0, %c0_i32_1 : i32, i32, i32
  }
  func.func @transform_6(%arg0: i32) -> (i32, i32, i32) {
    %c0_i32 = arith.constant 0 : i32
    %c0_i32_0 = arith.constant 0 : i32
    %c0_i32_1 = arith.constant 0 : i32
    %c0_i32_2 = arith.constant 0 : i32
    return %c0_i32, %c0_i32_0, %c0_i32_1 : i32, i32, i32
  }
  func.func @transform_7(%arg0: i32) -> (i32, i32, i32) {
    %c0_i32 = arith.constant 0 : i32
    %c0_i32_0 = arith.constant 0 : i32
    %c0_i32_1 = arith.constant 0 : i32
    %c0_i32_2 = arith.constant 0 : i32
    return %c0_i32, %c0_i32_0, %c0_i32_1 : i32, i32, i32
  }
  func.func @transform_8(%arg0: i32) -> (i32, i32, i32) {
    %c0_i32 = arith.constant 0 : i32
    %c0_i32_0 = arith.constant 0 : i32
    %c0_i32_1 = arith.constant 0 : i32
    %c0_i32_2 = arith.constant 0 : i32
    return %c0_i32, %c0_i32_0, %c0_i32_1 : i32, i32, i32
  }
  func.func @transform_9(%arg0: i32) -> (i32, i32, i32) {
    %c0_i32 = arith.constant 0 : i32
    %c0_i32_0 = arith.constant 0 : i32
    %c0_i32_1 = arith.constant 0 : i32
    %c0_i32_2 = arith.constant 0 : i32
    return %c0_i32, %c0_i32_0, %c0_i32_1 : i32, i32, i32
  }
  func.func @transform_10(%arg0: i32) -> (i32, i32, i32) {
    %c0_i32 = arith.constant 0 : i32
    %c0_i32_0 = arith.constant 0 : i32
    %c0_i32_1 = arith.constant 0 : i32
    %c0_i32_2 = arith.constant 0 : i32
    return %c0_i32, %c0_i32_0, %c0_i32_1 : i32, i32, i32
  }
  func.func @transform_11(%arg0: i32) -> (i32, i32, i32) {
    %c0_i32 = arith.constant 0 : i32
    %c0_i32_0 = arith.constant 0 : i32
    %c0_i32_1 = arith.constant 0 : i32
    %c0_i32_2 = arith.constant 0 : i32
    return %c0_i32, %c0_i32_0, %c0_i32_1 : i32, i32, i32
  }
  func.func @transform_12(%arg0: i32) -> (i32, i32, i32) {
    %c0_i32 = arith.constant 0 : i32
    %c0_i32_0 = arith.constant 0 : i32
    %c0_i32_1 = arith.constant 0 : i32
    %c0_i32_2 = arith.constant 0 : i32
    return %c0_i32, %c0_i32_0, %c0_i32_1 : i32, i32, i32
  }
  func.func @transform_13(%arg0: i32) -> (i32, i32, i32) {
    %c0_i32 = arith.constant 0 : i32
    %c0_i32_0 = arith.constant 0 : i32
    %c0_i32_1 = arith.constant 0 : i32
    %c0_i32_2 = arith.constant 0 : i32
    return %c0_i32, %c0_i32_0, %c0_i32_1 : i32, i32, i32
  }
  func.func @transform_14(%arg0: i32) -> (i32, i32, i32) {
    %c0_i32 = arith.constant 0 : i32
    %c0_i32_0 = arith.constant 0 : i32
    %c0_i32_1 = arith.constant 0 : i32
    %c0_i32_2 = arith.constant 0 : i32
    return %c0_i32, %c0_i32_0, %c0_i32_1 : i32, i32, i32
  }
  func.func @transform_15(%arg0: i32) -> (i32, i32, i32) {
    %c0_i32 = arith.constant 0 : i32
    %c0_i32_0 = arith.constant 0 : i32
    %c0_i32_1 = arith.constant 0 : i32
    %c0_i32_2 = arith.constant 0 : i32
    return %c0_i32, %c0_i32_0, %c0_i32_1 : i32, i32, i32
  }
  func.func @transform_16(%arg0: i32) -> (i32, i32) {
    %c0_i32 = arith.constant 0 : i32
    %c0_i32_0 = arith.constant 0 : i32
    %c0_i32_1 = arith.constant 0 : i32
    return %c0_i32, %c0_i32_0 : i32, i32
  }
  func.func @transform_17(%arg0: i32) -> (i32, i32) {
    %c0_i32 = arith.constant 0 : i32
    %c0_i32_0 = arith.constant 0 : i32
    %c0_i32_1 = arith.constant 0 : i32
    return %c0_i32, %c0_i32_0 : i32, i32
  }
  func.func @transform_18(%arg0: i32) -> (i32, i32) {
    %c0_i32 = arith.constant 0 : i32
    %c0_i32_0 = arith.constant 0 : i32
    %c0_i32_1 = arith.constant 0 : i32
    return %c0_i32, %c0_i32_0 : i32, i32
  }
  func.func @transform_19(%arg0: i32) -> (i32, i32) {
    %c0_i32 = arith.constant 0 : i32
    %c0_i32_0 = arith.constant 0 : i32
    %c0_i32_1 = arith.constant 0 : i32
    return %c0_i32, %c0_i32_0 : i32, i32
  }
  func.func @transform_20(%arg0: i32) -> (i32, i32) {
    %c0_i32 = arith.constant 0 : i32
    %c0_i32_0 = arith.constant 0 : i32
    %c0_i32_1 = arith.constant 0 : i32
    return %c0_i32, %c0_i32_0 : i32, i32
  }
  func.func @transform_21(%arg0: i32) -> (i32, i32) {
    %c0_i32 = arith.constant 0 : i32
    %c0_i32_0 = arith.constant 0 : i32
    %c0_i32_1 = arith.constant 0 : i32
    return %c0_i32, %c0_i32_0 : i32, i32
  }
  func.func @transform_22(%arg0: i32) -> (i32, i32) {
    %c0_i32 = arith.constant 0 : i32
    %c0_i32_0 = arith.constant 0 : i32
    %c0_i32_1 = arith.constant 0 : i32
    return %c0_i32, %c0_i32_0 : i32, i32
  }
  func.func @transform_23(%arg0: i32) -> (i32, i32) {
    %c0_i32 = arith.constant 0 : i32
    %c0_i32_0 = arith.constant 0 : i32
    %c0_i32_1 = arith.constant 0 : i32
    return %c0_i32, %c0_i32_0 : i32, i32
  }
  func.func @transform_24(%arg0: i32) -> (i32, i32) {
    %c0_i32 = arith.constant 0 : i32
    %c0_i32_0 = arith.constant 0 : i32
    %c0_i32_1 = arith.constant 0 : i32
    return %c0_i32, %c0_i32_0 : i32, i32
  }
  func.func @transform_25(%arg0: i32) -> (i32, i32) {
    %c0_i32 = arith.constant 0 : i32
    %c0_i32_0 = arith.constant 0 : i32
    %c0_i32_1 = arith.constant 0 : i32
    return %c0_i32, %c0_i32_0 : i32, i32
  }
  func.func @transform_26(%arg0: i32) -> (i32, i32, i32) {
    %c0_i32 = arith.constant 0 : i32
    %c0_i32_0 = arith.constant 0 : i32
    %c0_i32_1 = arith.constant 0 : i32
    %c0_i32_2 = arith.constant 0 : i32
    return %c0_i32, %c0_i32_0, %c0_i32_1 : i32, i32, i32
  }
  func.func @transform_27(%arg0: i32) -> (i32, i32, i32) {
    %c0_i32 = arith.constant 0 : i32
    %c0_i32_0 = arith.constant 0 : i32
    %c0_i32_1 = arith.constant 0 : i32
    %c0_i32_2 = arith.constant 0 : i32
    return %c0_i32, %c0_i32_0, %c0_i32_1 : i32, i32, i32
  }
  func.func @transform_28(%arg0: i32) -> (i32, i32, i32) {
    %c0_i32 = arith.constant 0 : i32
    %c0_i32_0 = arith.constant 0 : i32
    %c0_i32_1 = arith.constant 0 : i32
    %c0_i32_2 = arith.constant 0 : i32
    return %c0_i32, %c0_i32_0, %c0_i32_1 : i32, i32, i32
  }
  func.func @transform_29(%arg0: i32) -> (i32, i32, i32) {
    %c0_i32 = arith.constant 0 : i32
    %c0_i32_0 = arith.constant 0 : i32
    %c0_i32_1 = arith.constant 0 : i32
    %c0_i32_2 = arith.constant 0 : i32
    return %c0_i32, %c0_i32_0, %c0_i32_1 : i32, i32, i32
  }
  func.func @transform_30(%arg0: i32) -> (i32, i32, i32) {
    %c0_i32 = arith.constant 0 : i32
    %c0_i32_0 = arith.constant 0 : i32
    %c0_i32_1 = arith.constant 0 : i32
    %c0_i32_2 = arith.constant 0 : i32
    return %c0_i32, %c0_i32_0, %c0_i32_1 : i32, i32, i32
  }
  func.func @transform_31(%arg0: i32) -> (i32, i32, i32) {
    %c0_i32 = arith.constant 0 : i32
    %c0_i32_0 = arith.constant 0 : i32
    %c0_i32_1 = arith.constant 0 : i32
    %c0_i32_2 = arith.constant 0 : i32
    return %c0_i32, %c0_i32_0, %c0_i32_1 : i32, i32, i32
  }
  func.func @transform_32(%arg0: i32) -> (i32, i32, i32) {
    %c0_i32 = arith.constant 0 : i32
    %c0_i32_0 = arith.constant 0 : i32
    %c0_i32_1 = arith.constant 0 : i32
    %c0_i32_2 = arith.constant 0 : i32
    return %c0_i32, %c0_i32_0, %c0_i32_1 : i32, i32, i32
  }
  func.func @transform_33(%arg0: i32) -> (i32, i32, i32) {
    %c0_i32 = arith.constant 0 : i32
    %c0_i32_0 = arith.constant 0 : i32
    %c0_i32_1 = arith.constant 0 : i32
    %c0_i32_2 = arith.constant 0 : i32
    return %c0_i32, %c0_i32_0, %c0_i32_1 : i32, i32, i32
  }
  func.func @transform_34(%arg0: i32) -> (i32, i32, i32) {
    %c0_i32 = arith.constant 0 : i32
    %c0_i32_0 = arith.constant 0 : i32
    %c0_i32_1 = arith.constant 0 : i32
    %c0_i32_2 = arith.constant 0 : i32
    return %c0_i32, %c0_i32_0, %c0_i32_1 : i32, i32, i32
  }
  func.func @transform_35(%arg0: i32) -> (i32, i32, i32) {
    %c0_i32 = arith.constant 0 : i32
    %c0_i32_0 = arith.constant 0 : i32
    %c0_i32_1 = arith.constant 0 : i32
    %c0_i32_2 = arith.constant 0 : i32
    return %c0_i32, %c0_i32_0, %c0_i32_1 : i32, i32, i32
  }
  func.func @transform_36(%arg0: i32) -> (i32, i32, i32) {
    %c0_i32 = arith.constant 0 : i32
    %c0_i32_0 = arith.constant 0 : i32
    %c0_i32_1 = arith.constant 0 : i32
    %c0_i32_2 = arith.constant 0 : i32
    return %c0_i32, %c0_i32_0, %c0_i32_1 : i32, i32, i32
  }
  func.func @transform_37(%arg0: i32) -> (i32, i32, i32) {
    %c0_i32 = arith.constant 0 : i32
    %c0_i32_0 = arith.constant 0 : i32
    %c0_i32_1 = arith.constant 0 : i32
    %c0_i32_2 = arith.constant 0 : i32
    return %c0_i32, %c0_i32_0, %c0_i32_1 : i32, i32, i32
  }
  func.func @transform_38(%arg0: i32) -> (i32, i32) {
    %c0_i32 = arith.constant 0 : i32
    %c0_i32_0 = arith.constant 0 : i32
    %c0_i32_1 = arith.constant 0 : i32
    return %c0_i32, %c0_i32_0 : i32, i32
  }
  func.func @transform_39(%arg0: i32) -> (i32, i32) {
    %c0_i32 = arith.constant 0 : i32
    %c0_i32_0 = arith.constant 0 : i32
    %c0_i32_1 = arith.constant 0 : i32
    return %c0_i32, %c0_i32_0 : i32, i32
  }
  func.func @transform_40(%arg0: i32) -> (i32, i32) {
    %c0_i32 = arith.constant 0 : i32
    %c0_i32_0 = arith.constant 0 : i32
    %c0_i32_1 = arith.constant 0 : i32
    return %c0_i32, %c0_i32_0 : i32, i32
  }
  func.func @transform_41(%arg0: i32) -> (i32, i32) {
    %c0_i32 = arith.constant 0 : i32
    %c0_i32_0 = arith.constant 0 : i32
    %c0_i32_1 = arith.constant 0 : i32
    return %c0_i32, %c0_i32_0 : i32, i32
  }
  func.func @transform_42(%arg0: i32) -> (i32, i32) {
    %c0_i32 = arith.constant 0 : i32
    %c0_i32_0 = arith.constant 0 : i32
    %c0_i32_1 = arith.constant 0 : i32
    return %c0_i32, %c0_i32_0 : i32, i32
  }
  func.func @transform_43(%arg0: i32) -> (i32, i32) {
    %c0_i32 = arith.constant 0 : i32
    %c0_i32_0 = arith.constant 0 : i32
    %c0_i32_1 = arith.constant 0 : i32
    return %c0_i32, %c0_i32_0 : i32, i32
  }
  func.func @transform_44(%arg0: i32) -> (i32, i32) {
    %c0_i32 = arith.constant 0 : i32
    %c0_i32_0 = arith.constant 0 : i32
    %c0_i32_1 = arith.constant 0 : i32
    return %c0_i32, %c0_i32_0 : i32, i32
  }
  func.func @transform_45(%arg0: i32) -> (i32, i32) {
    %c0_i32 = arith.constant 0 : i32
    %c0_i32_0 = arith.constant 0 : i32
    %c0_i32_1 = arith.constant 0 : i32
    return %c0_i32, %c0_i32_0 : i32, i32
  }
  func.func @transform_46(%arg0: i32) -> (i32, i32) {
    %c0_i32 = arith.constant 0 : i32
    %c0_i32_0 = arith.constant 0 : i32
    %c0_i32_1 = arith.constant 0 : i32
    return %c0_i32, %c0_i32_0 : i32, i32
  }
}

</mosaic_0001>

<bundles_post_ra>
// kernel: tile.9
= control target key start
LH: loop header
LB: loop body
LE: loop exit
PB: predicated region body
PF: predicated region fallthrough
CT: control target
= control target key end

     0   :  { %s29_s10 = smov 3  ;;  %s10_s11 = smov 3  ;;  %vm12_vm0 = vcmask 64512   ;;  %vm19_vm1 = vcmask 261312   ;;  %vm26_vm2 = vcmask 195712   ;;  %vm33_vm3 = vcmask 130112   ;;  %s67_s0 = inlined_call_operand.vmem [shape: f32[2,4,8], index: 0, kind: input, shape index: {}]   ;;  %s68_s1 = inlined_call_operand.vmem [shape: f32[2,32], index: 1, kind: output, shape index: {}]  }
   0x1   :  { %v41_v0 = vld [vmem:[%s67_s0 + $0x4] sm:$0xf]  ;;  %v8_v1 = vld [vmem:[%s67_s0] sm:$0xf]  ;;  %s15_s0 = smov 3  ;;  %s22_s12 = smov 3 }
   0x2   :  { %7 = vst [vmem:[#allocation1 + $0x8] sm:$0xf] %v41_v0  ;;  %9 = vst [vmem:[#allocation1] sm:$0xf] %v8_v1  ;;  %s45_s13 = smov 24   ;;  %s46_s14 = smov 8  }
   0x3   :  { %s47_s15 = smov 16  }
   0x9   :  { %v16_v2 = vld [vmem:[#allocation1 + $0x3] ss:$8 sm:%s15_s0]   ;;  %v30_v3 = vld [vmem:[#allocation1 + $0x1] ss:$8 sm:%s29_s10]   ;;  %v11_v4 = vld [vmem:[#allocation1] ss:$8 sm:%s10_s11]  }
   0xa   :  { %17 = vrot.lane.b32.xlu0 %v16_v2, %s45_s13  ;;  %31 = vrot.lane.b32.xlu1 %v30_v3, %s46_s14  ;;  %v23_v5 = vld [vmem:[#allocation1 + $0x2] ss:$8 sm:%s22_s12]   ;;  %13 = vst.msk [vmem:[#allocation0] sm:$0x3] %vm12_vm0, %v11_v4  }
   0xe   :  { %24 = vrot.lane.b32.xlu0 %v23_v5, %s47_s15 }
  0x7c   :  { %v18_v6 = vpop.permute.xlu0 %17   ;;  %v32_v7 = vpop.permute.xlu1 %31  }
  0x7d   :  { %20 = vst.msk [vmem:[#allocation0] sm:$0x3] %vm19_vm1, %v18_v6  }
  0x80   :  { %v25_v8 = vpop.permute.xlu0 %24  }
  0x81   :  { %27 = vst.msk [vmem:[#allocation0] sm:$0x3] %vm26_vm2, %v25_v8  }
  0x82   :  { %34 = vst.msk [vmem:[#allocation0] sm:$0x3] %vm33_vm3, %v32_v7  }
  0x89   :  { %v38_v9 = vld [vmem:[#allocation0] sm:$0x3] }
  0x8a   :  { %40 = vst [vmem:[%s68_s1] sm:$0x3] %v38_v9 }

// kernel: transformer_teacher_forward.1
= control target key start
LH: loop header
LB: loop body
LE: loop exit
PB: predicated region body
PF: predicated region fallthrough
CT: control target
= control target key end

     0   :  { %s12117_s6 = smov 1   ;;  %s12118_s10 = smov 2   ;;  %s13730_s0 = inlined_call_operand.smem [shape: u32[47], index: -1, kind: input, shape index: {}] }
   0x1   :  { %s12215_s5 = sld [smem:[%s13730_s0]]   ;;  %s12119_s14 = smov 3  }
   0x2   :  { %s12220_s9 = sld [smem:[%s13730_s0 + %s12117_s6]]   ;;  %s12120_s18 = smov 4  }
   0x3   :  { %s12225_s13 = sld [smem:[%s13730_s0 + %s12118_s10]]   ;;  %s12121_s22 = smov 5  }
   0x4   :  { %s12230_s17 = sld [smem:[%s13730_s0 + %s12119_s14]]   ;;  %s12122_s26 = smov 6  }
   0x5   :  { %s12235_s21 = sld [smem:[%s13730_s0 + %s12120_s18]]   ;;  %s12123_s30 = smov 7  }
   0x6   :  { %s12240_s25 = sld [smem:[%s13730_s0 + %s12121_s22]]   ;;  %s12124_s4 = smov 8  }
   0x7   :  { %13754 = sst [smem:[#allocation55_spill]] %s12215_s5  ;;  %s12125_s10 = smov 9  }
   0x8   :  { %s12245_s29 = sld [smem:[%s13730_s0 + %s12122_s26]]   ;;  %s12126_s15 = smov 10  }
   0x9   :  { %s12250_s3 = sld [smem:[%s13730_s0 + %s12123_s30]]   ;;  %s12127_s20 = smov 11  }
   0xa   :  { %13755 = sst [smem:[#allocation56_spill]] %s12230_s17  ;;  %s12128_s26 = smov 12  }
   0xb   :  { %s12255_s8 = sld [smem:[%s13730_s0 + %s12124_s4]]   ;;  %s12129_s1 = smov 13  }
   0xc   :  { %13756 = sst [smem:[#allocation57_spill]] %s12240_s25  ;;  %s12130_s7 = smov 14  }
   0xd   :  { %s12260_s14 = sld [smem:[%s13730_s0 + %s12125_s10]]   ;;  %s12132_s22 = smov 16  }
   0xe   :  { %s12265_s19 = sld [smem:[%s13730_s0 + %s12126_s15]]   ;;  %s12131_s15 = smov 15  }
   0xf   :  { %13757 = sst [smem:[#allocation58_spill]] %s12250_s3  ;;  %s12133_s28 = smov 17  }
  0x10   :  { %s12270_s24 = sld [smem:[%s13730_s0 + %s12127_s20]]  }
  0x11   :  { %s12275_s30 = sld [smem:[%s13730_s0 + %s12128_s26]]  }
  0x12   :  { %s12280_s6 = sld [smem:[%s13730_s0 + %s12129_s1]]  }
  0x13   :  { %s12285_s12 = sld [smem:[%s13730_s0 + %s12130_s7]]   ;;  %s12134_s7 = smov 18  }
  0x14   :  { %13758 = sst [smem:[#allocation59_spill]] %s12265_s19 }
  0x15   :  { %s12290_s20 = sld [smem:[%s13730_s0 + %s12131_s15]]   ;;  %s12135_s15 = smov 19  }
  0x16   :  { %13759 = sst [smem:[#allocation60_spill]] %s12270_s24 }
  0x17   :  { %s12295_s27 = sld [smem:[%s13730_s0 + %s12132_s22]]   ;;  %s12136_s22 = smov 20  }
  0x18   :  { %s12300_s4 = sld [smem:[%s13730_s0 + %s12133_s28]]   ;;  %s12137_s28 = smov 21  }
  0x19   :  { %13760 = sst [smem:[#allocation61_spill]] %s12285_s12 }
  0x1a   :  { %s12305_s24 = sld [smem:[%s13730_s0 + %s12134_s7]]   ;;  %s12138_s7 = smov 22  }
  0x1b   :  { %s12310_s19 = sld [smem:[%s13730_s0 + %s12135_s15]]   ;;  %s12139_s15 = smov 23  }
  0x1d   :  { %13761 = sst [smem:[#allocation62_spill]] %s12295_s27 }
  0x1e   :  { %13762 = sst [smem:[#allocation63_spill]] %s12300_s4 }
  0x1f   :  { %s12315_s27 = sld [smem:[%s13730_s0 + %s12136_s22]]   ;;  %s12140_s22 = smov 24  }
  0x20   :  { %13763 = sst [smem:[#allocation64_spill]] %s12305_s24 }
  0x21   :  { %13764 = sst [smem:[#allocation65_spill]] %s12310_s19 }
  0x22   :  { %s12320_s4 = sld [smem:[%s13730_s0 + %s12137_s28]]   ;;  %s12141_s28 = smov 25  }
  0x23   :  { %s12325_s24 = sld [smem:[%s13730_s0 + %s12138_s7]]   ;;  %s12142_s7 = smov 26  }
  0x24   :  { %s12330_s19 = sld [smem:[%s13730_s0 + %s12139_s15]]   ;;  %s12143_s15 = smov 27  }
  0x25   :  { %13765 = sst [smem:[#allocation66_spill]] %s12315_s27 }
  0x26   :  { %s12335_s27 = sld [smem:[%s13730_s0 + %s12140_s22]]   ;;  %s12144_s22 = smov 28  }
  0x27   :  { %s12340_s3 = sld [smem:[%s13730_s0 + %s12141_s28]]   ;;  %s12145_s28 = smov 29  }
  0x28   :  { %13766 = sst [smem:[#allocation67_spill]] %s12320_s4 }
  0x29   :  { %13767 = sst [smem:[#allocation68_spill]] %s12325_s24 }
  0x2a   :  { %s12345_s24 = sld [smem:[%s13730_s0 + %s12142_s7]]   ;;  %s12146_s7 = smov 30  }
  0x2b   :  { %s12350_s25 = sld [smem:[%s13730_s0 + %s12143_s15]]   ;;  %s12147_s15 = smov 31  }
  0x2c   :  { %13768 = sst [smem:[#allocation69_spill]] %s12335_s27 }
  0x2d   :  { %13769 = sst [smem:[#allocation70_spill]] %s12340_s3 }
  0x2e   :  { %s12355_s27 = sld [smem:[%s13730_s0 + %s12144_s22]]   ;;  %s12148_s22 = smov 32  }
  0x2f   :  { %s12360_s3 = sld [smem:[%s13730_s0 + %s12145_s28]]   ;;  %s12149_s28 = smov 33  }
  0x30   :  { %13770 = sst [smem:[#allocation71_spill]] %s12345_s24 }
  0x31   :  { %13771 = sst [smem:[#allocation72_spill]] %s12350_s25 }
  0x32   :  { %s12365_s17 = sld [smem:[%s13730_s0 + %s12146_s7]]   ;;  %s12150_s7 = smov 34  }
  0x33   :  { %s12370_s25 = sld [smem:[%s13730_s0 + %s12147_s15]]   ;;  %s12151_s15 = smov 35  }
  0x34   :  { %s12375_s5 = sld [smem:[%s13730_s0 + %s12148_s22]]   ;;  %s12152_s22 = smov 36  }
  0x35   :  { %13772 = sst [smem:[#allocation73_spill]] %s12360_s3 }
  0x36   :  { %s12380_s3 = sld [smem:[%s13730_s0 + %s12149_s28]]   ;;  %s12153_s28 = smov 37  }
  0x38   :  { %13773 = sst [smem:[#allocation74_spill]] %s12365_s17 }
  0x39   :  { %13774 = sst [smem:[#allocation75_spill]] %s12370_s25 }
  0x3a   :  { %13775 = sst [smem:[#allocation76_spill]] %s12375_s5 }
  0x3b   :  { %s12385_s17 = sld [smem:[%s13730_s0 + %s12150_s7]]   ;;  %s12154_s7 = smov 38  }
  0x3c   :  { %13776 = sst [smem:[#allocation77_spill]] %s12380_s3 }
  0x3d   :  { %s12390_s25 = sld [smem:[%s13730_s0 + %s12151_s15]]   ;;  %s12155_s15 = smov 39  }
  0x3e   :  { %s12395_s5 = sld [smem:[%s13730_s0 + %s12152_s22]]   ;;  %s12156_s22 = smov 40  }
  0x3f   :  { %s12400_s3 = sld [smem:[%s13730_s0 + %s12153_s28]]   ;;  %s12157_s28 = smov 41  }
  0x40   :  { %s12405_s24 = sld [smem:[%s13730_s0 + %s12154_s7]]   ;;  %s12158_s7 = smov 42  }
  0x43   :  { %13777 = sst [smem:[#allocation78_spill]] %s12390_s25 }
  0x44   :  { %13778 = sst [smem:[#allocation79_spill]] %s12395_s5 }
  0x45   :  { %13779 = sst [smem:[#allocation80_spill]] %s12400_s3 }
  0x46   :  { %13780 = sst [smem:[#allocation81_spill]] %s12405_s24 }
  0x47   :  { %s12410_s25 = sld [smem:[%s13730_s0 + %s12155_s15]]   ;;  %s12159_s15 = smov 43  }
  0x48   :  { %s12415_s5 = sld [smem:[%s13730_s0 + %s12156_s22]]   ;;  %s12160_s22 = smov 44  }
  0x49   :  { %s12420_s3 = sld [smem:[%s13730_s0 + %s12157_s28]]   ;;  %s12161_s28 = smov 45  }
  0x4a   :  { %s12425_s24 = sld [smem:[%s13730_s0 + %s12158_s7]]   ;;  %s12162_s7 = smov 46  }
  0x4b   :  { %s12430_s4 = sld [smem:[%s13730_s0 + %s12159_s15]]  }
  0x4c   :  { %s12440_s12 = sld [smem:[%s13730_s0 + %s12161_s28]]  }
  0x4e   :  { %13781 = sst [smem:[#allocation82_spill]] %s12415_s5 }
  0x4f   :  { %s12435_s5 = sld [smem:[%s13730_s0 + %s12160_s22]]  }
  0x50   :  { %13782 = sst [smem:[#allocation83_spill]] %s12425_s24 }
  0x51   :  { %s12445_s24 = sld [smem:[%s13730_s0 + %s12162_s7]]  }
  0x52   :  { %99 = vsyncpa [#allocation4], 0 }
  0x53   :  { %100 = vsyncpa [#allocation7], 0 }
  0x54   :  { %101 = vsyncpa [#allocation10], 0 }
  0x55   :  { %102 = vsyncpa [#allocation13], 0 }
  0x56   :  { %103 = vsyncpa [#allocation16], 0 }
  0x57   :  { %104 = vsyncpa [#allocation19], 0 }
  0x58   :  { %105 = vsyncpa [#allocation22], 0 }
  0x59   :  { %106 = vsyncpa [#allocation25], 0 }
  0x5a   :  { %107 = vsyncpa [#allocation28], 0 }
  0x5b   :  { %108 = vsyncpa [#allocation31], 0 }
  0x5c   :  { %109 = vsyncpa [#allocation34], 0 }
  0x5d   :  { %110 = vsyncpa [#allocation37], 0 }
  0x5e   :  { %111 = vsyncpa [#allocation5], 0 }
  0x5f   :  { %112 = vsyncpa [#allocation40], 0  ;;  %s12163_s15 = smov [#allocation6]   ;;  %s12164_s16 = smov [#allocation9]  }
  0x60   :  { %s133_s0 = sshll.u32 %s12163_s15, 4  ;;  %s158_s18 = sshll.u32 %s12164_s16, 4  ;;  %s134_s0 = int_to_ptr.vmem [resolvable:$true] %s133_s0  ;;  %s12447_s18 = int_to_ptr.vmem [resolvable:$true] %s158_s18 }
  0x61   :  { %s11561_s22 = scalar_lea.hbm %s12225_s13, 16 }
  0x62   :  { %p11562_p0 = scmp.ne.s32.totalorder %s12225_s13, %s11561_s22  ;;  %p11565_p1 = scmp.lt.u32.totalorder %s11561_s22, %s12225_s13 }
  0x64   :  { %p11567_p2 = pnand %p11565_p1, %p11562_p0 }
  0x66   :  { %11570 = shalt.err (!%p11567_p2)
}
  0x67   :  { %s11571_s23 = scalar_lea.vmem %s134_s0, 16  ;;  %s11575_s26 = scalar_lea.vmem %s134_s0, 32 }
  0x68   :  { %p11572_p3 = scmp.ne.s32.totalorder %s134_s0, %s11571_s23  ;;  %p11576_p4 = scmp.lt.s32.totalorder %s134_s0, %s134_s0 }
  0x69   :  { %p11577_p5 = scmp.lt.s32.totalorder %s11575_s26, %s11571_s23 }
  0x6b   :  { %p11578_p6 = por %p11577_p5, %p11576_p4 }
  0x6d   :  { %p11579_p7 = pnand %p11578_p6, %p11572_p3 }
  0x6f   :  { %11582 = shalt.err (!%p11579_p7)
}
  0x70   :  { %136 = dma.hbm_to_vmem [thread:$0]  %s12225_s13, 16, %s134_s0, [#allocation7]  }
  0x71   :  { %s11583_s28 = scalar_lea.hbm %s12245_s29, 2048 }
  0x72   :  { %p11584_p8 = scmp.ne.s32.totalorder %s12245_s29, %s11583_s28  ;;  %p11587_p9 = scmp.lt.u32.totalorder %s11583_s28, %s12245_s29 }
  0x74   :  { %p11589_p10 = pnand %p11587_p9, %p11584_p8 }
  0x76   :  { %11592 = shalt.err (!%p11589_p10)
}
  0x77   :  { %s11593_s1 = scalar_lea.vmem %s12447_s18, 2048  ;;  %p11598_p12 = scmp.lt.s32.totalorder %s12447_s18, %s12447_s18 }
  0x78   :  { %p11594_p11 = scmp.ne.s32.totalorder %s12447_s18, %s11593_s1  ;;  %p11599_p13 = scmp.lt.s32.totalorder %s11593_s1, %s11593_s1 }
  0x7a   :  { %p11600_p0 = por %p11599_p13, %p11598_p12 }
  0x7c   :  { %p11601_p1 = pnand %p11600_p0, %p11594_p11 }
  0x7e   :  { %11604 = shalt.err (!%p11601_p1)
}
  0x7f   :  { %s12165_s2 = smov 64   ;;  %s12166_s13 = smov 4  }
  0x80   :  { %164 = dma.hbm_to_vmem [thread:$0]  %s12245_s29, 2048, %s12447_s18, [#allocation10], %s12165_s2, %s12165_s2, %s12166_s13  }
  0x81   :  { %s12167_s7 = smov [#allocation12]   ;;  %s12168_s11 = smov [#allocation15]  }
  0x82   :  { %s184_s10 = sshll.u32 %s12167_s7, 4  ;;  %s212_s15 = sshll.u32 %s12168_s11, 4  ;;  %s185_s10 = int_to_ptr.vmem [resolvable:$true] %s184_s10  ;;  %s12465_s15 = int_to_ptr.vmem [resolvable:$true] %s212_s15 }
  0x83   :  { %s11605_s0 = scalar_lea.hbm %s12260_s14, 32 }
  0x84   :  { %p11606_p2 = scmp.ne.s32.totalorder %s12260_s14, %s11605_s0  ;;  %p11609_p3 = scmp.lt.u32.totalorder %s11605_s0, %s12260_s14 }
  0x86   :  { %p11611_p4 = pnand %p11609_p3, %p11606_p2 }
  0x88   :  { %11614 = shalt.err (!%p11611_p4)
}
  0x89   :  { %s11615_s16 = scalar_lea.vmem %s185_s10, 32  ;;  %p11620_p6 = scmp.lt.s32.totalorder %s185_s10, %s185_s10 }
  0x8a   :  { %p11616_p5 = scmp.ne.s32.totalorder %s185_s10, %s11615_s16  ;;  %p11621_p7 = scmp.lt.s32.totalorder %s11615_s16, %s11615_s16 }
  0x8c   :  { %p11622_p8 = por %p11621_p7, %p11620_p6 }
  0x8e   :  { %p11623_p9 = pnand %p11622_p8, %p11616_p5 }
  0x90   :  { %11626 = shalt.err (!%p11623_p9)
}
  0x91   :  { %s12169_s29 = smov 16   ;;  %s12170_s18 = smov 1  }
  0x92   :  { %190 = dma.hbm_to_vmem [thread:$0]  %s12260_s14, 32, %s185_s10, [#allocation13], %s12169_s29, %s12169_s29, %s12170_s18  }
  0x93   :  { %s11627_s22 = scalar_lea.hbm %s12280_s6, 32 }
  0x94   :  { %p11628_p10 = scmp.ne.s32.totalorder %s12280_s6, %s11627_s22  ;;  %p11631_p11 = scmp.lt.u32.totalorder %s11627_s22, %s12280_s6 }
  0x96   :  { %p11633_p12 = pnand %p11631_p11, %p11628_p10 }
  0x98   :  { %11636 = shalt.err (!%p11633_p12)
}
  0x99   :  { %s11637_s23 = scalar_lea.vmem %s12465_s15, 32  ;;  %p11642_p0 = scmp.lt.s32.totalorder %s12465_s15, %s12465_s15 }
  0x9a   :  { %p11638_p13 = scmp.ne.s32.totalorder %s12465_s15, %s11637_s23  ;;  %p11643_p1 = scmp.lt.s32.totalorder %s11637_s23, %s11637_s23 }
  0x9c   :  { %p11644_p2 = por %p11643_p1, %p11642_p0 }
  0x9e   :  { %p11645_p3 = pnand %p11644_p2, %p11638_p13 }
  0xa0   :  { %11648 = shalt.err (!%p11645_p3)
}
  0xa1   :  { %218 = dma.hbm_to_vmem [thread:$0]  %s12280_s6, 32, %s12465_s15, [#allocation16], %s12169_s29, %s12169_s29, %s12170_s18  }
  0xa2   :  { %s12171_s14 = smov [#allocation18]   ;;  %s12172_s28 = smov [#allocation21]  }
  0xa3   :  { %s236_s26 = sshll.u32 %s12171_s14, 4  ;;  %s271_s1 = sshll.u32 %s12172_s28, 4  ;;  %s237_s26 = int_to_ptr.vmem [resolvable:$true] %s236_s26  ;;  %s272_s1 = int_to_ptr.vmem [resolvable:$true] %s271_s1 }
  0xa4   :  { %s11649_s7 = scalar_lea.hbm %s12290_s20, 32 }
  0xa5   :  { %p11650_p4 = scmp.ne.s32.totalorder %s12290_s20, %s11649_s7  ;;  %p11653_p5 = scmp.lt.u32.totalorder %s11649_s7, %s12290_s20 }
  0xa7   :  { %p11655_p6 = pnand %p11653_p5, %p11650_p4 }
  0xa9   :  { %11658 = shalt.err (!%p11655_p6)
}
  0xaa   :  { %s11659_s10 = scalar_lea.vmem %s237_s26, 32  ;;  %p11664_p8 = scmp.lt.s32.totalorder %s237_s26, %s237_s26 }
  0xab   :  { %p11660_p7 = scmp.ne.s32.totalorder %s237_s26, %s11659_s10  ;;  %p11665_p9 = scmp.lt.s32.totalorder %s11659_s10, %s11659_s10 }
  0xad   :  { %p11666_p10 = por %p11665_p9, %p11664_p8 }
  0xaf   :  { %p11667_p11 = pnand %p11666_p10, %p11660_p7 }
  0xb1   :  { %11670 = shalt.err (!%p11667_p11)
}
  0xb2   :  { %242 = dma.hbm_to_vmem [thread:$0]  %s12290_s20, 32, %s237_s26, [#allocation19], %s12169_s29, %s12169_s29, %s12170_s18  }
  0xb3   :  { %s11671_s6 = scalar_lea.hbm %s12330_s19, 16 }
  0xb4   :  { %p11672_p12 = scmp.ne.s32.totalorder %s12330_s19, %s11671_s6  ;;  %p11675_p13 = scmp.lt.u32.totalorder %s11671_s6, %s12330_s19 }
  0xb6   :  { %p11677_p0 = pnand %p11675_p13, %p11672_p12 }
  0xb8   :  { %11680 = shalt.err (!%p11677_p0)
}
  0xb9   :  { %s11681_s11 = scalar_lea.vmem %s272_s1, 16  ;;  %s11685_s15 = scalar_lea.vmem %s272_s1, 32 }
  0xba   :  { %p11682_p1 = scmp.ne.s32.totalorder %s272_s1, %s11681_s11  ;;  %p11686_p2 = scmp.lt.s32.totalorder %s272_s1, %s272_s1 }
  0xbb   :  { %p11687_p3 = scmp.lt.s32.totalorder %s11685_s15, %s11681_s11 }
  0xbd   :  { %p11688_p4 = por %p11687_p3, %p11686_p2 }
  0xbf   :  { %p11689_p5 = pnand %p11688_p4, %p11682_p1 }
  0xc1   :  { %11692 = shalt.err (!%p11689_p5)
}
  0xc2   :  { %274 = dma.hbm_to_vmem [thread:$0]  %s12330_s19, 16, %s272_s1, [#allocation22]  }
  0xc3   :  { %s12173_s0 = smov [#allocation24]   ;;  %s12174_s16 = smov [#allocation27]  }
  0xc4   :  { %s298_s20 = sshll.u32 %s12173_s0, 4  ;;  %s330_s22 = sshll.u32 %s12174_s16, 4  ;;  %s299_s20 = int_to_ptr.vmem [resolvable:$true] %s298_s20  ;;  %s12497_s22 = int_to_ptr.vmem [resolvable:$true] %s330_s22 }
  0xc5   :  { %s11693_s23 = scalar_lea.hbm %s12355_s27, 3072 }
  0xc6   :  { %p11694_p6 = scmp.ne.s32.totalorder %s12355_s27, %s11693_s23  ;;  %p11697_p7 = scmp.lt.u32.totalorder %s11693_s23, %s12355_s27 }
  0xc8   :  { %p11699_p8 = pnand %p11697_p7, %p11694_p6 }
  0xca   :  { %11702 = shalt.err (!%p11699_p8)
}
  0xcb   :  { %s11703_s14 = scalar_lea.vmem %s299_s20, 3072  ;;  %p11708_p10 = scmp.lt.s32.totalorder %s299_s20, %s299_s20 }
  0xcc   :  { %p11704_p9 = scmp.ne.s32.totalorder %s299_s20, %s11703_s14  ;;  %p11709_p11 = scmp.lt.s32.totalorder %s11703_s14, %s11703_s14 }
  0xce   :  { %p11710_p12 = por %p11709_p11, %p11708_p10 }
  0xd0   :  { %p11711_p13 = pnand %p11710_p12, %p11704_p9 }
  0xd2   :  { %11714 = shalt.err (!%p11711_p13)
}
  0xd3   :  { %304 = dma.hbm_to_vmem [thread:$0]  %s12355_s27, 3072, %s299_s20, [#allocation25], %s12165_s2, %s12165_s2, %s12166_s13  }
  0xd4   :  { %s11715_s19 = scalar_lea.hbm %s12385_s17, 12288 }
  0xd5   :  { %p11716_p0 = scmp.ne.s32.totalorder %s12385_s17, %s11715_s19  ;;  %p11719_p1 = scmp.lt.u32.totalorder %s11715_s19, %s12385_s17 }
  0xd7   :  { %p11721_p2 = pnand %p11719_p1, %p11716_p0 }
  0xd9   :  { %11724 = shalt.err (!%p11721_p2)
}
  0xda   :  { %s11725_s26 = scalar_lea.vmem %s12497_s22, 12288  ;;  %p11730_p4 = scmp.lt.s32.totalorder %s12497_s22, %s12497_s22 }
  0xdb   :  { %p11726_p3 = scmp.ne.s32.totalorder %s12497_s22, %s11725_s26  ;;  %p11731_p5 = scmp.lt.s32.totalorder %s11725_s26, %s11725_s26 }
  0xdd   :  { %p11732_p6 = por %p11731_p5, %p11730_p4 }
  0xdf   :  { %p11733_p7 = pnand %p11732_p6, %p11726_p3 }
  0xe1   :  { %11736 = shalt.err (!%p11733_p7)
}
  0xe2   :  { %336 = dma.hbm_to_vmem [thread:$0]  %s12385_s17, 12288, %s12497_s22, [#allocation28], %s12165_s2, %s12165_s2, %s12166_s13  }
  0xe3   :  { %s12175_s27 = smov [#allocation30]   ;;  %s12176_s1 = smov [#allocation33]  }
  0xe4   :  { %s360_s28 = sshll.u32 %s12175_s27, 4  ;;  %s383_s7 = sshll.u32 %s12176_s1, 4  ;;  %s361_s28 = int_to_ptr.vmem [resolvable:$true] %s360_s28  ;;  %s384_s7 = int_to_ptr.vmem [resolvable:$true] %s383_s7 }
  0xe5   :  { %s11737_s10 = scalar_lea.hbm %s12410_s25, 2048 }
  0xe6   :  { %p11738_p8 = scmp.ne.s32.totalorder %s12410_s25, %s11737_s10  ;;  %p11741_p9 = scmp.lt.u32.totalorder %s11737_s10, %s12410_s25 }
  0xe8   :  { %p11743_p10 = pnand %p11741_p9, %p11738_p8 }
  0xea   :  { %11746 = shalt.err (!%p11743_p10)
}
  0xeb   :  { %s11747_s6 = scalar_lea.vmem %s361_s28, 2048  ;;  %p11752_p12 = scmp.lt.s32.totalorder %s361_s28, %s361_s28 }
  0xec   :  { %p11748_p11 = scmp.ne.s32.totalorder %s361_s28, %s11747_s6  ;;  %p11753_p13 = scmp.lt.s32.totalorder %s11747_s6, %s11747_s6 }
  0xee   :  { %p11754_p0 = por %p11753_p13, %p11752_p12 }
  0xf0   :  { %p11755_p1 = pnand %p11754_p0, %p11748_p11 }
  0xf2   :  { %11758 = shalt.err (!%p11755_p1)
}
  0xf3   :  { %s12177_s11 = smov 128   ;;  %s12178_s17 = smov 8  }
  0xf4   :  { %366 = dma.hbm_to_vmem [thread:$0]  %s12410_s25, 2048, %s361_s28, [#allocation31], %s12177_s11, %s12177_s11, %s12178_s17  }
  0xf5   :  { %s11759_s15 = scalar_lea.hbm %s12420_s3, 32 }
  0xf6   :  { %p11760_p2 = scmp.ne.s32.totalorder %s12420_s3, %s11759_s15  ;;  %p11763_p3 = scmp.lt.u32.totalorder %s11759_s15, %s12420_s3 }
  0xf8   :  { %p11765_p4 = pnand %p11763_p3, %p11760_p2 }
  0xfa   :  { %11768 = shalt.err (!%p11765_p4)
}
  0xfb   :  { %s11769_s0 = scalar_lea.vmem %s384_s7, 32  ;;  %p11774_p6 = scmp.lt.s32.totalorder %s384_s7, %s384_s7 }
  0xfc   :  { %p11770_p5 = scmp.ne.s32.totalorder %s384_s7, %s11769_s0  ;;  %p11775_p7 = scmp.lt.s32.totalorder %s11769_s0, %s11769_s0 }
  0xfe   :  { %p11776_p8 = por %p11775_p7, %p11774_p6 }
 0x100   :  { %p11777_p9 = pnand %p11776_p8, %p11770_p5 }
 0x102   :  { %11780 = shalt.err (!%p11777_p9)
}
 0x103   :  { %386 = dma.hbm_to_vmem [thread:$0]  %s12420_s3, 32, %s384_s7, [#allocation34]  }
 0x104   :  { %s12179_s20 = smov [#allocation3]   ;;  %s12180_s25 = smov [#allocation8]  }
 0x105   :  { %s120_s16 = sshll.u32 %s12179_s20, 4  ;;  %s144_s22 = sshll.u32 %s12180_s25, 4  ;;  %s121_s16 = int_to_ptr.vmem [resolvable:$true] %s120_s16  ;;  %s12529_s22 = int_to_ptr.vmem [resolvable:$true] %s144_s22 }
 0x106   :  { %s11781_s23 = scalar_lea.hbm %s12220_s9, 1536 }
 0x107   :  { %p11782_p10 = scmp.ne.s32.totalorder %s12220_s9, %s11781_s23  ;;  %p11785_p11 = scmp.lt.u32.totalorder %s11781_s23, %s12220_s9 }
 0x109   :  { %p11787_p12 = pnand %p11785_p11, %p11782_p10 }
 0x10b   :  { %11790 = shalt.err (!%p11787_p12)
}
 0x10c   :  { %s11791_s14 = scalar_lea.vmem %s121_s16, 1536  ;;  %p11796_p0 = scmp.lt.s32.totalorder %s121_s16, %s121_s16 }
 0x10d   :  { %p11792_p13 = scmp.ne.s32.totalorder %s121_s16, %s11791_s14  ;;  %p11797_p1 = scmp.lt.s32.totalorder %s11791_s14, %s11791_s14 }
 0x10f   :  { %p11798_p2 = por %p11797_p1, %p11796_p0 }
 0x111   :  { %p11799_p3 = pnand %p11798_p2, %p11792_p13 }
 0x113   :  { %11802 = shalt.err (!%p11799_p3)
}
 0x114   :  { %126 = dma.hbm_to_vmem [thread:$0]  %s12220_s9, 1536, %s121_s16, [#allocation4], %s12177_s11, %s12177_s11, %s12178_s17  }
 0x115   :  { %s11803_s3 = scalar_lea.hbm %s12235_s21, 6144 }
 0x116   :  { %p11804_p4 = scmp.ne.s32.totalorder %s12235_s21, %s11803_s3  ;;  %p11807_p5 = scmp.lt.u32.totalorder %s11803_s3, %s12235_s21 }
 0x118   :  { %p11809_p6 = pnand %p11807_p5, %p11804_p4 }
 0x11a   :  { %11812 = shalt.err (!%p11809_p6)
}
 0x11b   :  { %s11813_s19 = scalar_lea.vmem %s12529_s22, 6144  ;;  %p11818_p8 = scmp.lt.s32.totalorder %s12529_s22, %s12529_s22 }
 0x11c   :  { %p11814_p7 = scmp.ne.s32.totalorder %s12529_s22, %s11813_s19  ;;  %p11819_p9 = scmp.lt.s32.totalorder %s11813_s19, %s11813_s19 }
 0x11e   :  { %p11820_p10 = por %p11819_p9, %p11818_p8 }
 0x120   :  { %p11821_p11 = pnand %p11820_p10, %p11814_p7 }
 0x122   :  { %11824 = shalt.err (!%p11821_p11)
}
 0x123   :  { %s12181_s26 = smov 192   ;;  %s12182_s9 = smov 12  }
 0x124   :  { %150 = dma.hbm_to_vmem [thread:$0]  %s12235_s21, 6144, %s12529_s22, [#allocation7], %s12181_s26, %s12181_s26, %s12182_s9  }
 0x125   :  { %s12183_s27 = smov [#allocation11]   ;;  %s12184_s1 = smov [#allocation14]  }
 0x126   :  { %s172_s28 = sshll.u32 %s12183_s27, 4  ;;  %s200_s7 = sshll.u32 %s12184_s1, 4  ;;  %s173_s28 = int_to_ptr.vmem [resolvable:$true] %s172_s28  ;;  %s12550_s7 = int_to_ptr.vmem [resolvable:$true] %s200_s7 }
 0x127   :  { %s11825_s10 = scalar_lea.hbm %s12255_s8, 32 }
 0x128   :  { %p11826_p12 = scmp.ne.s32.totalorder %s12255_s8, %s11825_s10  ;;  %p11829_p13 = scmp.lt.u32.totalorder %s11825_s10, %s12255_s8 }
 0x12a   :  { %p11831_p0 = pnand %p11829_p13, %p11826_p12 }
 0x12c   :  { %11834 = shalt.err (!%p11831_p0)
}
 0x12d   :  { %s11835_s6 = scalar_lea.vmem %s173_s28, 32  ;;  %p11840_p2 = scmp.lt.s32.totalorder %s173_s28, %s173_s28 }
 0x12e   :  { %p11836_p1 = scmp.ne.s32.totalorder %s173_s28, %s11835_s6  ;;  %p11841_p3 = scmp.lt.s32.totalorder %s11835_s6, %s11835_s6 }
 0x130   :  { %p11842_p4 = por %p11841_p3, %p11840_p2 }
 0x132   :  { %p11843_p5 = pnand %p11842_p4, %p11836_p1 }
 0x134   :  { %11846 = shalt.err (!%p11843_p5)
}
 0x135   :  { %178 = dma.hbm_to_vmem [thread:$0]  %s12255_s8, 32, %s173_s28, [#allocation10], %s12169_s29, %s12169_s29, %s12170_s18  }
 0x136   :  { %s11847_s21 = scalar_lea.hbm %s12275_s30, 4096 }
 0x137   :  { %p11848_p6 = scmp.ne.s32.totalorder %s12275_s30, %s11847_s21  ;;  %p11851_p7 = scmp.lt.u32.totalorder %s11847_s21, %s12275_s30 }
 0x139   :  { %p11853_p8 = pnand %p11851_p7, %p11848_p6 }
 0x13b   :  { %11856 = shalt.err (!%p11853_p8)
}
 0x13c   :  { %s11857_s15 = scalar_lea.vmem %s12550_s7, 4096  ;;  %p11862_p10 = scmp.lt.s32.totalorder %s12550_s7, %s12550_s7 }
 0x13d   :  { %p11858_p9 = scmp.ne.s32.totalorder %s12550_s7, %s11857_s15  ;;  %p11863_p11 = scmp.lt.s32.totalorder %s11857_s15, %s11857_s15 }
 0x13f   :  { %p11864_p12 = por %p11863_p11, %p11862_p10 }
 0x141   :  { %p11865_p13 = pnand %p11864_p12, %p11858_p9 }
 0x143   :  { %11868 = shalt.err (!%p11865_p13)
}
 0x144   :  { %s13783_s8 = sld [smem:[#allocation61_spill]]  ;;  %s12185_s0 = smov [#allocation17]  }
 0x145   :  { %206 = dma.hbm_to_vmem [thread:$0]  %s12275_s30, 4096, %s12550_s7, [#allocation13], %s12165_s2, %s12165_s2, %s12166_s13  }
 0x146   :  { %s224_s20 = sshll.u32 %s12185_s0, 4  ;;  %s12186_s16 = smov [#allocation20]   ;;  %s225_s20 = int_to_ptr.vmem [resolvable:$true] %s224_s20 }
 0x147   :  { %s259_s25 = sshll.u32 %s12186_s16, 4  ;;  %s260_s25 = int_to_ptr.vmem [resolvable:$true] %s259_s25 }
 0x14a   :  { %s11869_s22 = scalar_lea.hbm %s13783_s8, 32 }
 0x14b   :  { %p11870_p0 = scmp.ne.s32.totalorder %s13783_s8, %s11869_s22  ;;  %p11873_p1 = scmp.lt.u32.totalorder %s11869_s22, %s13783_s8 }
 0x14d   :  { %p11875_p2 = pnand %p11873_p1, %p11870_p0 }
 0x14f   :  { %11878 = shalt.err (!%p11875_p2)
}
 0x150   :  { %s11879_s23 = scalar_lea.vmem %s225_s20, 32  ;;  %p11884_p4 = scmp.lt.s32.totalorder %s225_s20, %s225_s20 }
 0x151   :  { %p11880_p3 = scmp.ne.s32.totalorder %s225_s20, %s11879_s23  ;;  %p11885_p5 = scmp.lt.s32.totalorder %s11879_s23, %s11879_s23 }
 0x153   :  { %p11886_p6 = por %p11885_p5, %p11884_p4 }
 0x155   :  { %p11887_p7 = pnand %p11886_p6, %p11880_p3 }
 0x157   :  { %11890 = shalt.err (!%p11887_p7)
}
 0x158   :  { %s13784_s30 = sld [smem:[#allocation67_spill]] }
 0x159   :  { %230 = dma.hbm_to_vmem [thread:$0]  %s13783_s8, 32, %s225_s20, [#allocation16], %s12169_s29, %s12169_s29, %s12170_s18  }
 0x15e   :  { %s11891_s2 = scalar_lea.hbm %s13784_s30, 16 }
 0x15f   :  { %p11892_p8 = scmp.ne.s32.totalorder %s13784_s30, %s11891_s2  ;;  %p11895_p9 = scmp.lt.u32.totalorder %s11891_s2, %s13784_s30 }
 0x161   :  { %p11897_p10 = pnand %p11895_p9, %p11892_p8 }
 0x163   :  { %11900 = shalt.err (!%p11897_p10)
}
 0x164   :  { %s11901_s13 = scalar_lea.vmem %s260_s25, 16  ;;  %s11905_s14 = scalar_lea.vmem %s260_s25, 32 }
 0x165   :  { %p11902_p11 = scmp.ne.s32.totalorder %s260_s25, %s11901_s13  ;;  %p11906_p12 = scmp.lt.s32.totalorder %s260_s25, %s260_s25 }
 0x166   :  { %p11907_p13 = scmp.lt.s32.totalorder %s11905_s14, %s11901_s13 }
 0x168   :  { %p11908_p0 = por %p11907_p13, %p11906_p12 }
 0x16a   :  { %p11909_p1 = pnand %p11908_p0, %p11902_p11 }
 0x16c   :  { %11912 = shalt.err (!%p11909_p1)
}
 0x16d   :  { %s13785_s3 = sld [smem:[#allocation71_spill]]  ;;  %s12187_s19 = smov [#allocation23]  }
 0x16e   :  { %262 = dma.hbm_to_vmem [thread:$0]  %s13784_s30, 16, %s260_s25, [#allocation19]  }
 0x16f   :  { %s284_s18 = sshll.u32 %s12187_s19, 4  ;;  %s12188_s27 = smov [#allocation26]   ;;  %s285_s18 = int_to_ptr.vmem [resolvable:$true] %s284_s18 }
 0x170   :  { %s316_s28 = sshll.u32 %s12188_s27, 4  ;;  %s12582_s28 = int_to_ptr.vmem [resolvable:$true] %s316_s28 }
 0x173   :  { %s11913_s1 = scalar_lea.hbm %s13785_s3, 9216 }
 0x174   :  { %p11914_p2 = scmp.ne.s32.totalorder %s13785_s3, %s11913_s1  ;;  %p11917_p3 = scmp.lt.u32.totalorder %s11913_s1, %s13785_s3 }
 0x176   :  { %p11919_p4 = pnand %p11917_p3, %p11914_p2 }
 0x178   :  { %11922 = shalt.err (!%p11919_p4)
}
 0x179   :  { %s11923_s7 = scalar_lea.vmem %s285_s18, 9216  ;;  %p11928_p6 = scmp.lt.s32.totalorder %s285_s18, %s285_s18 }
 0x17a   :  { %p11924_p5 = scmp.ne.s32.totalorder %s285_s18, %s11923_s7  ;;  %p11929_p7 = scmp.lt.s32.totalorder %s11923_s7, %s11923_s7 }
 0x17c   :  { %p11930_p8 = por %p11929_p7, %p11928_p6 }
 0x17e   :  { %p11931_p9 = pnand %p11930_p8, %p11924_p5 }
 0x180   :  { %11934 = shalt.err (!%p11931_p9)
}
 0x181   :  { %s13786_s10 = sld [smem:[#allocation76_spill]] }
 0x182   :  { %290 = dma.hbm_to_vmem [thread:$0]  %s13785_s3, 9216, %s285_s18, [#allocation22], %s12181_s26, %s12181_s26, %s12182_s9  }
 0x187   :  { %s11935_s6 = scalar_lea.hbm %s13786_s10, 12288 }
 0x188   :  { %p11936_p10 = scmp.ne.s32.totalorder %s13786_s10, %s11935_s6  ;;  %p11939_p11 = scmp.lt.u32.totalorder %s11935_s6, %s13786_s10 }
 0x18a   :  { %p11941_p12 = pnand %p11939_p11, %p11936_p10 }
 0x18c   :  { %11944 = shalt.err (!%p11941_p12)
}
 0x18d   :  { %s11945_s21 = scalar_lea.vmem %s12582_s28, 12288  ;;  %p11950_p0 = scmp.lt.s32.totalorder %s12582_s28, %s12582_s28 }
 0x18e   :  { %p11946_p13 = scmp.ne.s32.totalorder %s12582_s28, %s11945_s21  ;;  %p11951_p1 = scmp.lt.s32.totalorder %s11945_s21, %s11945_s21 }
 0x190   :  { %p11952_p2 = por %p11951_p1, %p11950_p0 }
 0x192   :  { %p11953_p3 = pnand %p11952_p2, %p11946_p13 }
 0x194   :  { %11956 = shalt.err (!%p11953_p3)
}
 0x195   :  { %s12189_s15 = smov 256   ;;  %s13787_s26 = sld [smem:[#allocation81_spill]] }
 0x196   :  { %322 = dma.hbm_to_vmem [thread:$0]  %s13786_s10, 12288, %s12582_s28, [#allocation25], %s12189_s15, %s12189_s15, %s12169_s29  }
 0x197   :  { %s12190_s9 = smov [#allocation29]   ;;  %s12191_s0 = smov [#allocation32]  }
 0x198   :  { %s348_s8 = sshll.u32 %s12190_s9, 4  ;;  %s373_s20 = sshll.u32 %s12191_s0, 4  ;;  %s349_s8 = int_to_ptr.vmem [resolvable:$true] %s348_s8  ;;  %s374_s20 = int_to_ptr.vmem [resolvable:$true] %s373_s20 }
 0x19b   :  { %s11957_s16 = scalar_lea.hbm %s13787_s26, 2048 }
 0x19c   :  { %p11958_p4 = scmp.ne.s32.totalorder %s13787_s26, %s11957_s16  ;;  %p11961_p5 = scmp.lt.u32.totalorder %s11957_s16, %s13787_s26 }
 0x19e   :  { %p11963_p6 = pnand %p11961_p5, %p11958_p4 }
 0x1a0   :  { %11966 = shalt.err (!%p11963_p6)
}
 0x1a1   :  { %s11967_s25 = scalar_lea.vmem %s349_s8, 2048  ;;  %p11972_p8 = scmp.lt.s32.totalorder %s349_s8, %s349_s8 }
 0x1a2   :  { %p11968_p7 = scmp.ne.s32.totalorder %s349_s8, %s11967_s25  ;;  %p11973_p9 = scmp.lt.s32.totalorder %s11967_s25, %s11967_s25 }
 0x1a4   :  { %p11974_p10 = por %p11973_p9, %p11972_p8 }
 0x1a6   :  { %p11975_p11 = pnand %p11974_p10, %p11968_p7 }
 0x1a8   :  { %11978 = shalt.err (!%p11975_p11)
}
 0x1a9   :  { %s13788_s29 = sld [smem:[#allocation82_spill]] }
 0x1aa   :  { %354 = dma.hbm_to_vmem [thread:$0]  %s13787_s26, 2048, %s349_s8, [#allocation28], %s12177_s11, %s12177_s11, %s12178_s17  }
 0x1af   :  { %s11979_s22 = scalar_lea.hbm %s13788_s29, 32 }
 0x1b0   :  { %p11980_p12 = scmp.ne.s32.totalorder %s13788_s29, %s11979_s22  ;;  %p11983_p13 = scmp.lt.u32.totalorder %s11979_s22, %s13788_s29 }
 0x1b2   :  { %p11985_p0 = pnand %p11983_p13, %p11980_p12 }
 0x1b4   :  { %11988 = shalt.err (!%p11985_p0)
}
 0x1b5   :  { %s11989_s23 = scalar_lea.vmem %s374_s20, 32  ;;  %p11994_p2 = scmp.lt.s32.totalorder %s374_s20, %s374_s20 }
 0x1b6   :  { %p11990_p1 = scmp.ne.s32.totalorder %s374_s20, %s11989_s23  ;;  %p11995_p3 = scmp.lt.s32.totalorder %s11989_s23, %s11989_s23 }
 0x1b8   :  { %p11996_p4 = por %p11995_p3, %p11994_p2 }
 0x1ba   :  { %p11997_p5 = pnand %p11996_p4, %p11990_p1 }
 0x1bc   :  { %12000 = shalt.err (!%p11997_p5)
}
 0x1bd   :  { %s13789_s30 = sld [smem:[#allocation83_spill]]  ;;  %s12192_s2 = smov [#allocation35]  }
 0x1be   :  { %376 = dma.hbm_to_vmem [thread:$0]  %s13788_s29, 32, %s374_s20, [#allocation31]  }
 0x1bf   :  { %s393_s11 = sshll.u32 %s12192_s2, 4  ;;  %s12193_s13 = smov [#allocation36]   ;;  %s394_s11 = int_to_ptr.vmem [resolvable:$true] %s393_s11 }
 0x1c0   :  { %s405_s14 = sshll.u32 %s12193_s13, 4  ;;  %s406_s14 = int_to_ptr.vmem [resolvable:$true] %s405_s14 }
 0x1c3   :  { %s12001_s3 = scalar_lea.hbm %s13789_s30, 32 }
 0x1c4   :  { %p12002_p6 = scmp.ne.s32.totalorder %s13789_s30, %s12001_s3  ;;  %p12005_p7 = scmp.lt.u32.totalorder %s12001_s3, %s13789_s30 }
 0x1c6   :  { %p12007_p8 = pnand %p12005_p7, %p12002_p6 }
 0x1c8   :  { %12010 = shalt.err (!%p12007_p8)
}
 0x1c9   :  { %s12011_s19 = scalar_lea.vmem %s394_s11, 32  ;;  %p12016_p10 = scmp.lt.s32.totalorder %s394_s11, %s394_s11 }
 0x1ca   :  { %p12012_p9 = scmp.ne.s32.totalorder %s394_s11, %s12011_s19  ;;  %p12017_p11 = scmp.lt.s32.totalorder %s12011_s19, %s12011_s19 }
 0x1cc   :  { %p12018_p12 = por %p12017_p11, %p12016_p10 }
 0x1ce   :  { %p12019_p13 = pnand %p12018_p12, %p12012_p9 }
 0x1d0   :  { %12022 = shalt.err (!%p12019_p13)
}
 0x1d1   :  { %396 = dma.hbm_to_vmem [thread:$0]  %s13789_s30, 32, %s394_s11, [#allocation34]  }
 0x1d2   :  { %s12023_s18 = scalar_lea.hbm %s12435_s5, 16 }
 0x1d3   :  { %p12024_p0 = scmp.ne.s32.totalorder %s12435_s5, %s12023_s18  ;;  %p12027_p1 = scmp.lt.u32.totalorder %s12023_s18, %s12435_s5 }
 0x1d5   :  { %p12029_p2 = pnand %p12027_p1, %p12024_p0 }
 0x1d7   :  { %12032 = shalt.err (!%p12029_p2)
}
 0x1d8   :  { %s12033_s27 = scalar_lea.vmem %s406_s14, 16  ;;  %s12037_s28 = scalar_lea.vmem %s406_s14, 32 }
 0x1d9   :  { %p12034_p3 = scmp.ne.s32.totalorder %s406_s14, %s12033_s27  ;;  %p12038_p4 = scmp.lt.s32.totalorder %s406_s14, %s406_s14 }
 0x1da   :  { %p12039_p5 = scmp.lt.s32.totalorder %s12037_s28, %s12033_s27 }
 0x1dc   :  { %p12040_p6 = por %p12039_p5, %p12038_p4 }
 0x1de   :  { %p12041_p7 = pnand %p12040_p6, %p12034_p3 }
 0x1e0   :  { %12044 = shalt.err (!%p12041_p7)
}
 0x1e1   :  { %408 = dma.hbm_to_vmem [thread:$0]  %s12435_s5, 16, %s406_s14, [#allocation37]  }
 0x1e2   :  { %12089 = dma.done.wait [#allocation4], 1536  }
 0x1e3   :  { %12090 = vsyncadd [#allocation4], 4294965760 }
 0x1e4   :  { %12091 = dma.done.wait [#allocation7], 6160  }
 0x1e5   :  { %12092 = vsyncadd [#allocation7], 4294961136 }
 0x1e6   :  { %12093 = dma.done.wait [#allocation10], 2080  }
 0x1e7   :  { %12094 = vsyncadd [#allocation10], 4294965216 }
 0x1e8   :  { %12095 = dma.done.wait [#allocation13], 4128  }
 0x1e9   :  { %12096 = vsyncadd [#allocation13], 4294963168 }
 0x1ea   :  { %12097 = dma.done.wait [#allocation16], 64  }
 0x1eb   :  { %12098 = vsyncadd [#allocation16], 4294967232 }
 0x1ec   :  { %12099 = dma.done.wait [#allocation19], 48  }
 0x1ed   :  { %12100 = vsyncadd [#allocation19], 4294967248 }
 0x1ee   :  { %12101 = dma.done.wait [#allocation22], 9232  }
 0x1ef   :  { %12102 = vsyncadd [#allocation22], 4294958064 }
 0x1f0   :  { %12103 = dma.done.wait [#allocation25], 15360  }
 0x1f1   :  { %12104 = vsyncadd [#allocation25], 4294951936 }
 0x1f2   :  { %12105 = dma.done.wait [#allocation28], 14336  }
 0x1f3   :  { %12106 = vsyncadd [#allocation28], 4294952960 }
 0x1f4   :  { %12107 = dma.done.wait [#allocation31], 2080  }
 0x1f5   :  { %12108 = vsyncadd [#allocation31], 4294965216 }
 0x1f6   :  { %12109 = dma.done.wait [#allocation34], 64  }
 0x1f7   :  { %12110 = vsyncadd [#allocation34], 4294967232 }
 0x1f8   :  { %12111 = dma.done.wait [#allocation37], 16  }
 0x1f9   :  { %12112 = vsyncadd [#allocation37], 4294967280  ;;  %s13790_s5 = sld [smem:[#allocation55_spill]]  ;;  %v478_v0 = vld [vmem:[#allocation3] sm:$0xff]  ;;  %v479_v1 = vld [vmem:[#allocation3 + $0x8] sm:$0xff]  ;;  %vm497_vm0 = vcmask 785408   ;;  %v582_v55 = vlaneseq }
 0x1fa   :  { %v480_v2 = vld [vmem:[#allocation3 + $0x10] sm:$0xff]  ;;  %v10619_v3 = vpack.c.bf16 %v479_v1, %v478_v0  ;;  %v481_v4 = vld [vmem:[#allocation3 + $0x18] sm:$0xff]  ;;  %v482_v6 = vld [vmem:[#allocation3 + $0x20] sm:$0xff]  ;;  %v12194_v33 = vmov 0.0   ;;  %s13791_s1 = sld [smem:[#allocation56_spill]]  ;;  %v12195_v45 = vmov 0  }
 0x1fb   :  { %v10623_v5 = vpack.c.bf16 %v481_v4, %v480_v2  ;;  %v483_v7 = vld [vmem:[#allocation3 + $0x28] sm:$0xff]  ;;  %v484_v8 = vld [vmem:[#allocation3 + $0x30] sm:$0xff]  ;;  %v485_v13 = vld [vmem:[#allocation3 + $0x38] sm:$0xff]  ;;  %985 = vmatprep.mubr.bf16.mxu1 %v12195_v45  ;;  %vm12196_vm1 = vmmov 0   ;;  %10812 = vset.pattern.permute.xlu1 %v12195_v45  ;;  %s13792_s7 = sld [smem:[#allocation57_spill]]  ;;  %v12649_v56 = vshrl.u32 %v582_v55, 7 }
 0x1fc   :  { %10620 = vmatprep.subr.bf16.mxu0 %v10619_v3  ;;  %v10627_v10 = vpack.c.bf16 %v483_v7, %v482_v6  ;;  %v10813_v11 = vld [vmem:[#allocation8 + $0x4] ss:$12 sps:$4 sm:$0xff]   ;;  %v10815_v12 = vld [vmem:[#allocation8] ss:$12 sps:$4 sm:$0xff]   ;;  %v10817_v14 = vld [vmem:[#allocation8 + $0x1c] ss:$12 sps:$4 sm:$0xff]   ;;  %v10631_v16 = vpack.c.bf16 %v485_v13, %v484_v8  ;;  %10811 = vset.pattern.permute.xlu0 %v12195_v45 }
 0x1fd   :  { %10622 = vmatpush3.bf16.msra.mxu0 %v10619_v3  ;;  %953 = vmatprep.subr.bf16.mxu1 %v10813_v11  ;;  %v10819_v15 = vld [vmem:[#allocation8 + $0x18] ss:$12 sps:$4 sm:$0xff]   ;;  %v10821_v19 = vld [vmem:[#allocation8 + $0x34] ss:$12 sps:$4 sm:$0xff]   ;;  %v10823_v21 = vld [vmem:[#allocation8 + $0x30] ss:$12 sps:$4 sm:$0xff]  }
 0x1fe   :  { %10624 = vmatprep.subr.bf16.mxu0 %v10623_v5  ;;  %954 = vmatpush1.bf16.msra.mxu1 %v10815_v12  ;;  %v486_v17 = vld [vmem:[#allocation3 + $0x40] sm:$0xff]  ;;  %v487_v18 = vld [vmem:[#allocation3 + $0x48] sm:$0xff]  ;;  %v488_v20 = vld [vmem:[#allocation3 + $0x50] sm:$0xff]  ;;  %v12651_v57 = vand.u32 127, %v582_v55  ;;  %v12654_v58 = vsub.s32 1, %v12649_v56  ;;  %v12662_v61 = vsub.s32 0, %v12649_v56 }
 0x1ff   :  { %v476_v9 = vld [vmem:[%s13790_s5] sm:$0xff]  ;;  %955 = vmatprep.subr.bf16.mxu1 %v10817_v14  ;;  %v10635_v22 = vpack.c.bf16 %v487_v18, %v486_v17  ;;  %v10825_v23 = vld [vmem:[#allocation8 + $0x4c] ss:$12 sps:$4 sm:$0xff]   ;;  %v10827_v25 = vld [vmem:[#allocation8 + $0x48] ss:$12 sps:$4 sm:$0xff]   ;;  %v12665_v62 = vsub.s32 2, %v12649_v56 }
 0x200   :  { %10122 = vmatprep.mubr.msk.f32.mxu0 %vm497_vm0, %v476_v9  ;;  %v489_v24 = vld [vmem:[#allocation3 + $0x58] sm:$0xff]  ;;  %v10829_v27 = vld [vmem:[#allocation8 + $0x64] ss:$12 sps:$4 sm:$0xff]   ;;  %v10831_v28 = vld [vmem:[#allocation8 + $0x60] ss:$12 sps:$4 sm:$0xff]   ;;  %vm631_vm2 = vcmp.ge.s32.totalorder %v12651_v57, 32 }
 0x201   :  { %10626 = vmatpush3.bf16.msra.mxu0 %v10623_v5  ;;  %v10639_v26 = vpack.c.bf16 %v489_v24, %v488_v20  ;;  %v10833_v29 = vld [vmem:[#allocation8 + $0x7c] ss:$12 sps:$4 sm:$0xff]   ;;  %v10835_v32 = vld [vmem:[#allocation8 + $0x78] ss:$12 sps:$4 sm:$0xff]   ;;  %v10820_v34 = vld [vmem:[#allocation8 + $0x20] ss:$12 sps:$4 sm:$0xff]  }
 0x202   :  { %10628 = vmatprep.subr.bf16.mxu0 %v10627_v10  ;;  %956 = vmatpush1.bf16.msra.mxu1 %v10819_v15  ;;  %v477_v30 = vld [vmem:[%s13790_s5 + $0x8] sm:$0xff]  ;;  %v10828_v36 = vld [vmem:[#allocation8 + $0x50] ss:$12 sps:$4 sm:$0xff]   ;;  %v10837_v39 = vld [vmem:[#allocation8 + $0x94] ss:$12 sps:$4 sm:$0xff]   ;;  %vm636_vm3 = vcmp.lt.s32.totalorder %v12651_v57, 64 }
 0x203   :  { %957 = vmatprep.subr.bf16.mxu1 %v10821_v19  ;;  %v10816_v31 = vld [vmem:[#allocation8 + $0x8] ss:$12 sps:$4 sm:$0xff]   ;;  %v10824_v35 = vld [vmem:[#allocation8 + $0x38] ss:$12 sps:$4 sm:$0xff]   ;;  %v10836_v38 = vld [vmem:[#allocation8 + $0x80] ss:$12 sps:$4 sm:$0xff]  }
 0x204   :  { %v10832_v37 = vld [vmem:[#allocation8 + $0x68] ss:$12 sps:$4 sm:$0xff]   ;;  %v10839_v40 = vld [vmem:[#allocation8 + $0x90] ss:$12 sps:$4 sm:$0xff]   ;;  %v10840_v41 = vld [vmem:[#allocation8 + $0x98] ss:$12 sps:$4 sm:$0xff]  }
 0x205   :  { %10630 = vmatpush3.bf16.msra.mxu0 %v10627_v10  ;;  %v10841_v42 = vld [vmem:[#allocation8 + $0xac] ss:$12 sps:$4 sm:$0xff]   ;;  %v10843_v43 = vld [vmem:[#allocation8 + $0xa8] ss:$12 sps:$4 sm:$0xff]   ;;  %v10844_v44 = vld [vmem:[#allocation8 + $0xb0] ss:$12 sps:$4 sm:$0xff]  }
 0x206   :  { %10632 = vmatprep.subr.bf16.mxu0 %v10631_v16  ;;  %958 = vmatpush1.bf16.msra.mxu1 %v10823_v21  ;;  %v9061_v46 = vld [vmem:[#allocation6] ss:$0 sm:$0xff]  ;;  %vm606_vm4 = vcmp.lt.s32.totalorder %v12651_v57, 32  ;;  %vm638_vm5 = vmand %vm631_vm2, %vm636_vm3  ;;  %vm661_vm6 = vcmp.ge.s32.totalorder %v12651_v57, 64  ;;  %vm666_vm7 = vcmp.lt.s32.totalorder %v12651_v57, 96  ;;  %vm691_vm9 = vcmp.ge.s32.totalorder %v12651_v57, 96 }
 0x207   :  { %959 = vmatprep.subr.bf16.mxu1 %v10825_v23  ;;  %v579_v48 = vld [vmem:[%s13791_s1] sm:$0xff]  ;;  %v12672_v1 = vsel %vm606_vm4, 1.0, %v12194_v33  ;;  %v12675_v2 = vsel %vm638_vm5, 1.0, %v12194_v33  ;;  %vm669_vm8 = vmand %vm661_vm6, %vm666_vm7  ;;  %v12694_v19 = vsel %vm691_vm9, 1.0, %v12194_v33  ;;  %vm1090_vm10 = vcmask 261120   ;;  %s13797_s10 = sld [smem:[#allocation58_spill]] }
 0x208   :  { %v808_v59 = vld [vmem:[%s13792_s7] sm:$0x7]  ;;  %v12691_v18 = vsel %vm669_vm8, 1.0, %v12194_v33  ;;  %vm709_vm11 = vcmp.lt.s32.totalorder %v12651_v57, 8  ;;  %vm722_vm12 = vcmp.ge.s32.totalorder %v12651_v57, 8  ;;  %vm727_vm13 = vcmp.lt.s32.totalorder %v12651_v57, 16 }
 0x209   :  { %10634 = vmatpush3.bf16.msra.mxu0 %v10631_v16  ;;  %v817_v60 = vrot.slane %v808_v59, %v12654_v58  ;;  %v813_v8 = vrot.slane %v808_v59, %v12662_v61  ;;  %v821_v9 = vrot.slane %v808_v59, %v12665_v62  ;;  %vm729_vm14 = vmand %vm722_vm12, %vm727_vm13  ;;  %vm740_vm15 = vcmp.ge.s32.totalorder %v12651_v57, 16  ;;  %s13798_s6 = sld [smem:[#allocation59_spill]]  ;;  %s13799_s21 = sld [smem:[#allocation60_spill]] }
 0x20a   :  { %10636 = vmatprep.subr.bf16.mxu0 %v10635_v22  ;;  %960 = vmatpush1.bf16.msra.mxu1 %v10827_v25  ;;  %vm758_vm2 = vcmp.ge.s32.totalorder %v12651_v57, 24  ;;  %vm12710_vm3 = vmpackc.low %vm729_vm14, %vm709_vm11  ;;  %s13800_s15 = sld [smem:[#allocation63_spill]]  ;;  %s13801_s26 = sld [smem:[#allocation64_spill]] }
 0x20b   :  { %961 = vmatprep.subr.bf16.mxu1 %v10829_v27  ;;  %vm766_vm6 = vmand %vm758_vm2, %vm606_vm4  ;;  %s13802_s9 = sld [smem:[#allocation65_spill]]  ;;  %s13807_s8 = sld [smem:[#allocation66_spill]] }
 0x20c   :  { %s13812_s0 = sld [smem:[#allocation62_spill]]  ;;  %s13813_s20 = sld [smem:[#allocation68_spill]] }
 0x20d   :  { %10638 = vmatpush3.bf16.msra.mxu0 %v10635_v22  ;;  %s13814_s16 = sld [smem:[#allocation72_spill]]  ;;  %s13815_s25 = sld [smem:[#allocation69_spill]] }
 0x20e   :  { %10640 = vmatprep.subr.bf16.mxu0 %v10639_v26  ;;  %962 = vmatpush1.bf16.msra.mxu1 %v10831_v28  ;;  %s13816_s29 = sld [smem:[#allocation73_spill]]  ;;  %s13817_s22 = sld [smem:[#allocation74_spill]] }
 0x20f   :  { %963 = vmatprep.subr.bf16.mxu1 %v10833_v29  ;;  %s13818_s23 = sld [smem:[#allocation75_spill]]  ;;  %s13819_s30 = sld [smem:[#allocation77_spill]] }
 0x210   :  { %s13820_s2 = sld [smem:[#allocation78_spill]]  ;;  %s13821_s11 = sld [smem:[#allocation79_spill]] }
 0x211   :  { %10642 = vmatpush3.bf16.msra.mxu0 %v10639_v26  ;;  %s13822_s13 = sld [smem:[#allocation80_spill]]  ;;  %s13823_s14 = sld [smem:[#allocation70_spill]] }
 0x212   :  { %10125 = vmatprep.subr.bf16.mxu0 %v12194_v33  ;;  %964 = vmatpush1.bf16.msra.mxu1 %v10835_v32  ;;  %v12198_v32 = vmov 1.0|1.0  }
 0x213   :  { %965 = vmatprep.subr.bf16.mxu1 %v10837_v39 }
 0x214   :  { %10123 = vmatmul.mubr.msk.f32.vlgmr.msra.gmra.mrb[0].mxu0 %vm497_vm0, %v477_v30  ;;  %v12197_v30 = vmov 0.0|0.0   ;;  %vm745_vm0 = vcmp.lt.s32.totalorder %v12651_v57, 24 }
 0x215   :  { %10126 = vmatpush3.bf16.msra.mxu0 %v10816_v31  ;;  %10141 = vmatprep.mubr.msk.bf16.mxu0 %vm12196_vm1, %v12194_v33  ;;  %vm748_vm5 = vmand %vm740_vm15, %vm745_vm0 }
 0x216   :  { %10127 = vmatprep.subr.bf16.mxu0 %v12194_v33  ;;  %966 = vmatpush1.bf16.msra.mxu1 %v10839_v40  ;;  %vm12724_vm7 = vmpackc.low %vm766_vm6, %vm748_vm5 }
 0x217   :  { %967 = vmatprep.subr.bf16.mxu1 %v10841_v42 }
 0x219   :  { %10128 = vmatpush3.bf16.msra.mxu0 %v10820_v34  ;;  %v11249_v34 = vld [vmem:[#allocation24 + $0xa0] sm:$0xff]  }
 0x21a   :  { %10129 = vmatprep.subr.bf16.mxu0 %v12194_v33  ;;  %968 = vmatpush1.bf16.msra.mxu1 %v10843_v43 }
 0x21b   :  { %10145 = vmatprep.subr.bf16.mxu1 %v12194_v33 }
 0x21d   :  { %10130 = vmatpush3.bf16.msra.mxu0 %v10824_v35 }
 0x21e   :  { %10131 = vmatprep.subr.bf16.mxu0 %v12194_v33 }
 0x221   :  { %10132 = vmatpush3.bf16.msra.mxu0 %v10828_v36 }
 0x222   :  { %10133 = vmatprep.subr.bf16.mxu0 %v12194_v33 }
 0x225   :  { %10134 = vmatpush3.bf16.msra.mxu0 %v10832_v37 }
 0x226   :  { %10135 = vmatprep.subr.bf16.mxu0 %v12194_v33 }
 0x229   :  { %10136 = vmatpush3.bf16.msra.mxu0 %v10836_v38 }
 0x22a   :  { %10137 = vmatprep.subr.bf16.mxu0 %v12194_v33 }
 0x22d   :  { %10138 = vmatpush3.bf16.msra.mxu0 %v10840_v41 }
 0x22e   :  { %10139 = vmatprep.subr.bf16.mxu0 %v12194_v33 }
 0x231   :  { %10140 = vmatpush3.bf16.msra.mxu0 %v10844_v44 }
 0x232   :  { %10649 = vmatprep.subr.bf16.mxu0 %v12197_v30 }
 0x2e7   :  { %v10124_v47 = vpop.f32.mrb[0].mxu0 }
 0x2e8   :  { %v576_v49 = vadd.f32 %v10124_v47, %v9061_v46  ;;  %v570_v50 = vpop.f32.mrb[1].mxu0 }
 0x2e9   :  { %v571_v51 = vadd.f32 %v9061_v46, %v570_v50 }
 0x2ea   :  { %v12639_v52 = vadd.f32 %v579_v48, %v576_v49 }
 0x2eb   :  { %v12641_v53 = vadd.f32 %v579_v48, %v571_v51 }
 0x2ed   :  { %v775_v54 = vpack.c.bf16 %v12639_v52, %v12641_v53 }
 0x2ef   :  { %986 = vmatmul.mubr.bf16.vlgmr.msra.gmra.mrb[0].mxu1 %v775_v54  ;;  %10142 = vmatmul.mubr.bf16.vlgmr.msra.gmra.mrb[4].mxu0 %v775_v54 }
 0x2f0   :  { %10149 = vmatprep.mubr.msk.bf16.mxu1 %vm12196_vm1, %v12194_v33  ;;  %10188 = vmatprep.mubr.msk.f32.mxu0 %vm12196_vm1, %v12194_v33 }
 0x2f1   :  { %10651 = vmatpush3.bf16.msk.msra.mxu0 %vm12710_vm3, %v12198_v32 }
 0x2f2   :  { %10652 = vmatprep.subr.bf16.mxu0 %v12197_v30 }
 0x2f5   :  { %10654 = vmatpush3.bf16.msk.msra.mxu0 %vm12724_vm7, %v12198_v32 }
 0x2f6   :  { %10191 = vmatprep.subr.bf16.mxu0 %v12194_v33 }
 0x3c2   :  { %v987_v63 = vpop.f32.mrb[0].mxu1  ;;  %v12667_v0 = vpop.f32.mrb[4].mxu0 }
 0x3c3   :  { %v989_v3 = vpop.f32.mrb[1].mxu1  ;;  %v10143_v4 = vpop.f32.mrb[5].mxu0  ;;  %v988_v23 = vadd.f32 %v987_v63, %v813_v8  ;;  %v1031_v38 = vadd.f32 %v12667_v0, %v821_v9 }
 0x3c4   :  { %v990_v5 = vadd.f32 %v989_v3, %v817_v60  ;;  %v991_v6 = vpop.f32.mrb[2].mxu1  ;;  %v1033_v7 = vpop.f32.mrb[6].mxu0 }
 0x3c5   :  { %v993_v10 = vpop.f32.mrb[3].mxu1  ;;  %v10144_v11 = vpop.f32.mrb[7].mxu0  ;;  %v12684_v14 = vadd.f32 %v991_v6, %v813_v8  ;;  %v12686_v15 = vadd.f32 %v1033_v7, %v821_v9  ;;  %v1037_v24 = vpack.c.bf16 %v988_v23, %v988_v23  ;;  %v1044_v39 = vmul.f32 %v1031_v38, %v12672_v1 }
 0x3c6   :  { %v1038_v12 = vmul.f32 %v990_v5, %v12672_v1  ;;  %v1039_v13 = vmul.f32 %v990_v5, %v12675_v2  ;;  %v12688_v16 = vadd.f32 %v993_v10, %v817_v60  ;;  %v1040_v20 = vmul.f32 %v990_v5, %v12691_v18 }
 0x3c7   :  { %v1041_v21 = vmul.f32 %v990_v5, %v12694_v19  ;;  %v1045_v40 = vmul.f32 %v1031_v38, %v12675_v2  ;;  %v1046_v42 = vmul.f32 %v1031_v38, %v12691_v18  ;;  %v1047_v43 = vmul.f32 %v1031_v38, %v12694_v19 }
 0x3c8   :  { %v1042_v17 = vpack.c.bf16 %v1039_v13, %v1038_v12  ;;  %v1218_v50 = vmul.f32 %v12688_v16, %v12672_v1  ;;  %v1219_v51 = vmul.f32 %v12688_v16, %v12675_v2  ;;  %v1220_v60 = vmul.f32 %v12688_v16, %v12691_v18 }
 0x3c9   :  { %v1043_v22 = vpack.c.bf16 %v1041_v21, %v1040_v20  ;;  %v1048_v44 = vpack.c.bf16 %v1045_v40, %v1044_v39  ;;  %v1049_v46 = vpack.c.bf16 %v1047_v43, %v1046_v42  ;;  %v1221_v63 = vmul.f32 %v12688_v16, %v12694_v19  ;;  %v10852_v42 = vld [vmem:[#allocation9 + $0x38] sm:$0xff]  }
 0x3ca   :  { %10146 = vmatpush3.bf16.xpose.msra.mxu1 %v1042_v17  ;;  %v1222_v59 = vpack.c.bf16 %v1219_v51, %v1218_v50  ;;  %v1217_v3 = vpack.c.bf16 %v12684_v14, %v12684_v14  ;;  %v1224_v14 = vmul.f32 %v12686_v15, %v12672_v1  ;;  %v1225_v20 = vmul.f32 %v12686_v15, %v12675_v2 }
 0x3cb   :  { %10147 = vmatprep.subr.bf16.mxu1 %v12194_v33  ;;  %v1223_v0 = vpack.c.bf16 %v1221_v63, %v1220_v60  ;;  %v1227_v23 = vmul.f32 %v12686_v15, %v12694_v19 }
 0x3d2   :  { %10148 = vmatpush3.bf16.xpose.msra.mxu1 %v1043_v22  ;;  %v1226_v22 = vmul.f32 %v12686_v15, %v12691_v18  ;;  %v10848_v15 = vld [vmem:[#allocation9 + $0x18] sm:$0xff]  }
 0x3d3   :  { %10643 = vmatprep.subr.bf16.mxu1 %v12197_v30 }
 0x3d9   :  { %10150 = vmatmul.mubr.bf16.vlgmr.msra.gmra.mrb[4].mxu1 %v1037_v24  ;;  %v1228_v24 = vpack.c.bf16 %v1225_v20, %v1224_v14  ;;  %v10862_v14 = vld [vmem:[%s13798_s6 + $0x30] ss:$8 sps:$4 sm:$0xff]   ;;  %v10867_v20 = vld [vmem:[%s13798_s6 + $0x44] ss:$8 sps:$4 sm:$0xff]  }
 0x3da   :  { %10161 = vmatprep.mubr.msk.f32.mxu1 %vm12196_vm1, %v12194_v33  ;;  %10645 = vmatpush3.bf16.msk.msra.mxu1 %vm12710_vm3, %v12198_v32 }
 0x3db   :  { %10646 = vmatprep.subr.bf16.mxu1 %v12197_v30 }
 0x3de   :  { %10648 = vmatpush3.bf16.msk.msra.mxu1 %vm12724_vm7, %v12198_v32 }
 0x3df   :  { %10164 = vmatprep.subr.bf16.mxu1 %v12194_v33 }
 0x4ac   :  { %v1084_v25 = vpop.f32.mrb[4].mxu1 }
 0x4ad   :  { %v10151_v26 = vpop.f32.mrb[5].mxu1  ;;  %v1091_v27 = vsel %vm1090_vm10, %v1084_v25, -inf }
 0x4ae   :  { %1092 = vmax.xlane.f32.xlu0 %v1091_v27  ;;  %v1087_v28 = vpop.f32.mrb[6].mxu1  ;;  %v10845_v26 = vld [vmem:[#allocation9] sm:$0xff]   ;;  %v10846_v27 = vld [vmem:[#allocation9 + $0x8] sm:$0xff]  }
 0x4af   :  { %v10152_v29 = vpop.f32.mrb[7].mxu1  ;;  %v10847_v28 = vld [vmem:[#allocation9 + $0x10] sm:$0xff]  }
 0x4b0   :  { %v10849_v29 = vld [vmem:[#allocation9 + $0x20] sm:$0xff]  }
 0x53b   :  { %v1093_v35 = vpop.xlane.xlu0 %1092 }
 0x53c   :  { %v1094_v36 = vsub.f32 %v1084_v25, %v1093_v35  ;;  %v1229_v25 = vpack.c.bf16 %v1227_v23, %v1226_v22  ;;  %v10850_v35 = vld [vmem:[#allocation9 + $0x28] sm:$0xff]   ;;  %v10870_v22 = vld [vmem:[%s13798_s6 + $0x54] ss:$8 sps:$4 sm:$0xff]  }
 0x53d   :  { %v10868_v23 = vld [vmem:[%s13798_s6 + $0x50] ss:$8 sps:$4 sm:$0xff]  }
 0x53e   :  { %v1095_v37 = vmul.f32 1.442695, %v1094_v36  ;;  %v10851_v36 = vld [vmem:[#allocation9 + $0x30] sm:$0xff]  }
 0x540   :  { %11397 = vpow2.f32 %v1095_v37 }
 0x54a   :  { %v11398_v41 = vpop.eup %11397 }
 0x54b   :  { %10162 = vmatmul.mubr.msk.f32.vlgmr.msra.gmra.mrb[8].mxu1 %vm1090_vm10, %v11398_v41 }
 0x54c   :  { %10165 = vmatpush3.bf16.msra.mxu1 %v1048_v44  ;;  %10168 = vmatprep.mubr.msk.bf16.mxu1 %vm12196_vm1, %v12194_v33 }
 0x54d   :  { %10166 = vmatprep.subr.bf16.mxu1 %v12194_v33 }
 0x550   :  { %10167 = vmatpush3.bf16.msra.mxu1 %v1049_v46 }
 0x551   :  { %10172 = vmatprep.subr.bf16.mxu1 %v12194_v33 }
 0x61e   :  { %v1166_v47 = vpop.f32.mrb[8].mxu1 }
 0x61f   :  { %11399 = vrcp.f32 %v1166_v47  ;;  %v10163_v48 = vpop.f32.mrb[9].mxu1 }
 0x629   :  { %v11400_v49 = vpop.eup %11399 }
 0x62a   :  { %v1171_v54 = vmul.f32 %v11400_v49, %v11398_v41  ;;  %v9100_v49 = vld [vmem:[%s13797_s10] ss:$0 sm:$0xff] }
 0x62c   :  { %v1172_v55 = vpack.c.bf16 %v1171_v54, %v1171_v54 }
 0x62e   :  { %10169 = vmatmul.mubr.msk.bf16.vlgmr.msra.gmra.mrb[12].mxu1 %vm1090_vm10, %v1172_v55 }
 0x62f   :  { %10173 = vmatpush3.bf16.xpose.msra.mxu1 %v1222_v59  ;;  %10176 = vmatprep.mubr.msk.bf16.mxu1 %vm12196_vm1, %v12194_v33 }
 0x630   :  { %10174 = vmatprep.subr.bf16.mxu1 %v12194_v33 }
 0x637   :  { %10175 = vmatpush3.bf16.xpose.msra.mxu1 %v1223_v0 }
 0x638   :  { %10199 = vmatprep.subr.bf16.mxu1 %v12194_v33 }
 0x63e   :  { %10177 = vmatmul.mubr.bf16.vlgmr.msra.gmra.mrb[16].mxu1 %v1217_v3  ;;  %v10853_v3 = vld [vmem:[%s13798_s6] ss:$8 sps:$4 sm:$0xff]  }
 0x63f   :  { %10215 = vmatprep.mubr.msk.bf16.mxu1 %vm12196_vm1, %v12194_v33  ;;  %10200 = vmatpush3.bf16.msra.mxu1 %v10845_v26  ;;  %v10876_v26 = vld [vmem:[%s13798_s6 + $0x74] ss:$8 sps:$4 sm:$0xff]  }
 0x640   :  { %10201 = vmatprep.subr.bf16.mxu1 %v12194_v33 }
 0x643   :  { %10202 = vmatpush3.bf16.msra.mxu1 %v10846_v27  ;;  %v10874_v27 = vld [vmem:[%s13798_s6 + $0x70] ss:$8 sps:$4 sm:$0xff]  }
 0x644   :  { %10203 = vmatprep.subr.bf16.mxu1 %v12194_v33 }
 0x647   :  { %10204 = vmatpush3.bf16.msra.mxu1 %v10847_v28 }
 0x648   :  { %10205 = vmatprep.subr.bf16.mxu1 %v12194_v33 }
 0x64b   :  { %10206 = vmatpush3.bf16.msra.mxu1 %v10848_v15 }
 0x64c   :  { %10207 = vmatprep.subr.bf16.mxu1 %v12194_v33 }
 0x64f   :  { %10208 = vmatpush3.bf16.msra.mxu1 %v10849_v29 }
 0x650   :  { %10209 = vmatprep.subr.bf16.mxu1 %v12194_v33 }
 0x653   :  { %10210 = vmatpush3.bf16.msra.mxu1 %v10850_v35 }
 0x654   :  { %10211 = vmatprep.subr.bf16.mxu1 %v12194_v33 }
 0x657   :  { %10212 = vmatpush3.bf16.msra.mxu1 %v10851_v36 }
 0x658   :  { %10213 = vmatprep.subr.bf16.mxu1 %v12194_v33 }
 0x65b   :  { %10214 = vmatpush3.bf16.msra.mxu1 %v10852_v42 }
 0x701   :  { %v1210_v4 = vpop.f32.mrb[12].mxu1 }
 0x702   :  { %v10170_v5 = vpop.f32.mrb[13].mxu1 }
 0x703   :  { %v1213_v6 = vpop.f32.mrb[14].mxu1  ;;  %v10858_v5 = vld [vmem:[%s13798_s6 + $0x14] ss:$8 sps:$4 sm:$0xff]  }
 0x704   :  { %v10171_v7 = vpop.f32.mrb[15].mxu1  ;;  %v10856_v6 = vld [vmem:[%s13798_s6 + $0x10] ss:$8 sps:$4 sm:$0xff]  }
 0x711   :  { %v1264_v8 = vpop.f32.mrb[16].mxu1 }
 0x712   :  { %v10178_v9 = vpop.f32.mrb[17].mxu1  ;;  %v1270_v10 = vsel %vm1090_vm10, %v1264_v8, -inf }
 0x713   :  { %1271 = vmax.xlane.f32.xlu0 %v1270_v10  ;;  %v1267_v11 = vpop.f32.mrb[18].mxu1 }
 0x714   :  { %v10179_v12 = vpop.f32.mrb[19].mxu1 }
 0x7a0   :  { %v1272_v13 = vpop.xlane.xlu0 %1271 }
 0x7a1   :  { %v1273_v16 = vsub.f32 %v1264_v8, %v1272_v13  ;;  %v10861_v13 = vld [vmem:[%s13798_s6 + $0x24] ss:$8 sps:$4 sm:$0xff]  }
 0x7a3   :  { %v1274_v17 = vmul.f32 1.442695, %v1273_v16  ;;  %v10859_v16 = vld [vmem:[%s13798_s6 + $0x20] ss:$8 sps:$4 sm:$0xff]  }
 0x7a5   :  { %11401 = vpow2.f32 %v1274_v17  ;;  %v10864_v17 = vld [vmem:[%s13798_s6 + $0x34] ss:$8 sps:$4 sm:$0xff]  }
 0x7af   :  { %v11402_v21 = vpop.eup %11401 }
 0x7b0   :  { %10189 = vmatmul.mubr.msk.f32.vlgmr.msra.gmra.mrb[2].mxu0 %vm1090_vm10, %v11402_v21 }
 0x7b1   :  { %10192 = vmatpush3.bf16.msra.mxu0 %v1228_v24  ;;  %10195 = vmatprep.mubr.msk.bf16.mxu0 %vm12196_vm1, %v12194_v33  ;;  %v10871_v24 = vld [vmem:[%s13798_s6 + $0x60] ss:$8 sps:$4 sm:$0xff]  }
 0x7b2   :  { %10193 = vmatprep.subr.bf16.mxu0 %v12194_v33 }
 0x7b5   :  { %10194 = vmatpush3.bf16.msra.mxu0 %v1229_v25  ;;  %v10873_v25 = vld [vmem:[%s13798_s6 + $0x64] ss:$8 sps:$4 sm:$0xff]  }
 0x883   :  { %v1345_v37 = vpop.f32.mrb[2].mxu0 }
 0x884   :  { %11403 = vrcp.f32 %v1345_v37  ;;  %v10190_v38 = vpop.f32.mrb[3].mxu0 }
 0x88e   :  { %v11404_v39 = vpop.eup %11403 }
 0x88f   :  { %v1350_v40 = vmul.f32 %v11404_v39, %v11402_v21  ;;  %v10865_v21 = vld [vmem:[%s13798_s6 + $0x40] ss:$8 sps:$4 sm:$0xff]  }
 0x891   :  { %v1351_v41 = vpack.c.bf16 %v1350_v40, %v1350_v40  ;;  %v9109_v40 = vld [vmem:[#allocation11] ss:$0 sm:$0xff] }
 0x893   :  { %10196 = vmatmul.mubr.msk.bf16.vlgmr.msra.gmra.mrb[8].mxu0 %vm1090_vm10, %v1351_v41 }
 0x894   :  { %1695 = vmatprep.mubr.bf16.mxu0 %v12195_v45 }
 0x966   :  { %v1389_v43 = vpop.f32.mrb[8].mxu0 }
 0x967   :  { %v1398_v44 = vpack.c.bf16 %v1389_v43, %v1210_v4  ;;  %v10197_v46 = vpop.f32.mrb[9].mxu0  ;;  %v10855_v4 = vld [vmem:[%s13798_s6 + $0x4] ss:$8 sps:$4 sm:$0xff]  }
 0x968   :  { %v1392_v47 = vpop.f32.mrb[10].mxu0  ;;  %1663 = vmatprep.subr.bf16.mxu0 %v10855_v4  ;;  %v10886_v4 = vld [vmem:[#allocation14 + $0x20] sm:$0xff]  }
 0x969   :  { %v10198_v48 = vpop.f32.mrb[11].mxu0  ;;  %10216 = vmatmul.mubr.bf16.vlgmr.msra.gmra.mrb[20].mxu1 %v1398_v44  ;;  %1664 = vmatpush1.bf16.msra.mxu0 %v10853_v3  ;;  %v9110_v44 = vld [vmem:[#allocation12] ss:$0 sm:$0xff]  ;;  %v10885_v3 = vld [vmem:[#allocation14 + $0x60] sm:$0xff]  }
 0x96a   :  { %1665 = vmatprep.subr.bf16.mxu0 %v10858_v5  ;;  %v10887_v5 = vld [vmem:[#allocation14 + $0x68] sm:$0xff]  }
 0x96d   :  { %1666 = vmatpush1.bf16.msra.mxu0 %v10856_v6  ;;  %v10888_v6 = vld [vmem:[#allocation14 + $0x28] sm:$0xff]  }
 0x96e   :  { %1667 = vmatprep.subr.bf16.mxu0 %v10861_v13 }
 0x971   :  { %1668 = vmatpush1.bf16.msra.mxu0 %v10859_v16 }
 0x972   :  { %1669 = vmatprep.subr.bf16.mxu0 %v10864_v17 }
 0x975   :  { %1670 = vmatpush1.bf16.msra.mxu0 %v10862_v14 }
 0x976   :  { %1671 = vmatprep.subr.bf16.mxu0 %v10867_v20 }
 0x979   :  { %1672 = vmatpush1.bf16.msra.mxu0 %v10865_v21 }
 0x97a   :  { %1673 = vmatprep.subr.bf16.mxu0 %v10870_v22 }
 0x97d   :  { %1674 = vmatpush1.bf16.msra.mxu0 %v10868_v23 }
 0x97e   :  { %1675 = vmatprep.subr.bf16.mxu0 %v10873_v25 }
 0x981   :  { %1676 = vmatpush1.bf16.msra.mxu0 %v10871_v24 }
 0x982   :  { %1677 = vmatprep.subr.bf16.mxu0 %v10876_v26 }
 0x985   :  { %1678 = vmatpush1.bf16.msra.mxu0 %v10874_v27 }
 0xa3c   :  { %v1504_v50 = vpop.f32.mrb[20].mxu1 }
 0xa3d   :  { %v1505_v51 = vadd.f32 %v9100_v49, %v1504_v50  ;;  %v10217_v54 = vpop.f32.mrb[21].mxu1  ;;  %v10877_v50 = vld [vmem:[#allocation14 + $0x40] sm:$0xff]  }
 0xa3e   :  { %v1507_v55 = vpop.f32.mrb[22].mxu1  ;;  %9728 = vmatprep.subr.bf16.mxu1 %v10877_v50  ;;  %v10879_v54 = vld [vmem:[#allocation14 + $0x48] sm:$0xff]  }
 0xa3f   :  { %v1508_v59 = vadd.f32 %v9100_v49, %v1507_v55  ;;  %v10218_v60 = vpop.f32.mrb[23].mxu1  ;;  %v1511_v63 = vadd.f32 %v1505_v51, %v12641_v53  ;;  %v10878_v51 = vld [vmem:[#allocation14] sm:$0xff]   ;;  %v10880_v55 = vld [vmem:[#allocation14 + $0x8] sm:$0xff]  }
 0xa40   :  { %9729 = vmatpush3.bf16.msra.mxu1 %v10878_v51  ;;  %v10882_v60 = vld [vmem:[#allocation14 + $0x10] sm:$0xff]  }
 0xa41   :  { %1515 = vadd.xlane.f32.xlu1 %v1511_v63  ;;  %v1512_v0 = vadd.f32 %v1508_v59, %v12639_v52  ;;  %9730 = vmatprep.subr.bf16.mxu1 %v10879_v54  ;;  %v10881_v59 = vld [vmem:[#allocation14 + $0x50] sm:$0xff]  }
 0xa44   :  { %9731 = vmatpush3.bf16.msra.mxu1 %v10880_v55 }
 0xa45   :  { %1517 = vadd.xlane.f32.xlu1 %v1512_v0  ;;  %9732 = vmatprep.subr.bf16.mxu1 %v10881_v59 }
 0xa48   :  { %9733 = vmatpush3.bf16.msra.mxu1 %v10882_v60 }
 0xace   :  { %v1516_v7 = vpop.xlane.xlu1 %1515 }
 0xacf   :  { %v1520_v8 = vmul.f32 0.0078125, %v1516_v7  ;;  %v10889_v7 = vld [vmem:[#allocation14 + $0x70] sm:$0xff]  }
 0xad1   :  { %v1522_v9 = vsub.f32 %v1511_v63, %v1520_v8  ;;  %v10883_v63 = vld [vmem:[#allocation14 + $0x58] sm:$0xff]   ;;  %v10890_v8 = vld [vmem:[#allocation14 + $0x30] sm:$0xff]  }
 0xad2   :  { %v1518_v53 = vpop.xlane.xlu1 %1517  ;;  %9734 = vmatprep.subr.bf16.mxu1 %v10883_v63 }
 0xad3   :  { %v1521_v52 = vmul.f32 0.0078125, %v1518_v53  ;;  %v1524_v10 = vmul.f32 %v1522_v9, %v1522_v9  ;;  %v10892_v53 = vld [vmem:[#allocation14 + $0x38] sm:$0xff]  }
 0xad5   :  { %v1523_v11 = vsub.f32 %v1512_v0, %v1521_v52  ;;  %1526 = vadd.xlane.f32.xlu0 %v1524_v10  ;;  %v10884_v0 = vld [vmem:[#allocation14 + $0x18] sm:$0xff]  }
 0xad6   :  { %9735 = vmatpush3.bf16.msra.mxu1 %v10884_v0  ;;  %v1571_v52 = vld [vmem:[%s13799_s21] sm:$0x3] }
 0xad7   :  { %v1525_v12 = vmul.f32 %v1523_v11, %v1523_v11  ;;  %9736 = vmatprep.subr.bf16.mxu1 %v10885_v3  ;;  %v1576_v10 = vrot.slane %v1571_v52, %v12662_v61 }
 0xad9   :  { %1528 = vadd.xlane.f32.xlu1 %v1525_v12 }
 0xada   :  { %9737 = vmatpush3.bf16.msra.mxu1 %v10886_v4 }
 0xadb   :  { %9738 = vmatprep.subr.bf16.mxu1 %v10887_v5 }
 0xade   :  { %9739 = vmatpush3.bf16.msra.mxu1 %v10888_v6 }
 0xadf   :  { %9740 = vmatprep.subr.bf16.mxu1 %v10889_v7 }
 0xae2   :  { %9741 = vmatpush3.bf16.msra.mxu1 %v10890_v8 }
 0xb62   :  { %v1527_v28 = vpop.xlane.xlu0 %1526 }
 0xb63   :  { %v1530_v15 = vmul.f32 0.0078125, %v1527_v28 }
 0xb65   :  { %v1532_v29 = vadd.f32 1e-05, %v1530_v15 }
 0xb66   :  { %v1529_v35 = vpop.xlane.xlu1 %1528 }
 0xb67   :  { %11405 = vrsqrt.f32 %v1532_v29  ;;  %v1531_v36 = vmul.f32 0.0078125, %v1529_v35 }
 0xb69   :  { %v1533_v37 = vadd.f32 1e-05, %v1531_v36 }
 0xb6b   :  { %11407 = vrsqrt.f32 %v1533_v37 }
 0xb71   :  { %v11406_v38 = vpop.eup %11405 }
 0xb72   :  { %v1536_v39 = vmul.f32 %v11406_v38, %v1522_v9  ;;  %v10891_v9 = vld [vmem:[#allocation14 + $0x78] sm:$0xff]  }
 0xb73   :  { %9742 = vmatprep.subr.bf16.mxu1 %v10891_v9 }
 0xb74   :  { %v1544_v43 = vmul.f32 %v9109_v40, %v1536_v39  ;;  %9743 = vmatpush3.bf16.msra.mxu1 %v10892_v53 }
 0xb75   :  { %v11408_v41 = vpop.eup %11407  ;;  %10219 = vmatprep.subr.bf16.mxu1 %v12194_v33 }
 0xb76   :  { %v1537_v42 = vmul.f32 %v11408_v41, %v1523_v11  ;;  %v12804_v47 = vadd.f32 %v9110_v44, %v1544_v43  ;;  %v1580_v11 = vrot.slane %v1571_v52, %v12654_v58 }
 0xb78   :  { %v1545_v46 = vmul.f32 %v9109_v40, %v1537_v42 }
 0xb7a   :  { %v12806_v48 = vadd.f32 %v9110_v44, %v1545_v46 }
 0xb7c   :  { %v1554_v49 = vpack.c.bf16 %v12806_v48, %v12804_v47 }
 0xb7e   :  { %1696 = vmatmul.mubr.bf16.vlgmr.msra.gmra.mrb[12].mxu0 %v1554_v49 }
 0xb7f   :  { %2174 = vmatprep.mubr.bf16.mxu0 %v12195_v45 }
 0xc51   :  { %v1697_v12 = vpop.f32.mrb[12].mxu0 }
 0xc52   :  { %v1698_v13 = vadd.f32 %v1697_v12, %v1576_v10  ;;  %v1699_v16 = vpop.f32.mrb[13].mxu0  ;;  %v9127_v12 = vld [vmem:[#allocation15] ss:$0 sm:$0xff] }
 0xc53   :  { %v1700_v17 = vadd.f32 %v1699_v16, %v1580_v11  ;;  %v1701_v14 = vpop.f32.mrb[14].mxu0 }
 0xc54   :  { %v1710_v20 = vmul.f32 0.044715, %v1698_v13  ;;  %v1702_v21 = vadd.f32 %v1701_v14, %v1576_v10  ;;  %v1703_v22 = vpop.f32.mrb[15].mxu0  ;;  %v1706_v63 = vmul.f32 0.5, %v1698_v13 }
 0xc55   :  { %v1711_v23 = vmul.f32 0.044715, %v1700_v17  ;;  %v1704_v24 = vadd.f32 %v1703_v22, %v1580_v11  ;;  %v1707_v4 = vmul.f32 0.5, %v1700_v17 }
 0xc56   :  { %v1714_v25 = vmul.f32 %v1710_v20, %v1698_v13  ;;  %v1712_v26 = vmul.f32 0.044715, %v1702_v21  ;;  %v1708_v0 = vmul.f32 0.5, %v1702_v21 }
 0xc57   :  { %v1715_v27 = vmul.f32 %v1711_v23, %v1700_v17  ;;  %v1713_v28 = vmul.f32 0.044715, %v1704_v24  ;;  %v1709_v5 = vmul.f32 0.5, %v1704_v24 }
 0xc58   :  { %v1718_v15 = vmul.f32 %v1714_v25, %v1698_v13  ;;  %v1716_v29 = vmul.f32 %v1712_v26, %v1702_v21  ;;  %v10893_v25 = vld [vmem:[#allocation8 + $0xc0] ss:$12 sps:$4 sm:$0xff]   ;;  %v10895_v26 = vld [vmem:[#allocation8 + $0xc4] ss:$12 sps:$4 sm:$0xff]  }
 0xc59   :  { %v1719_v35 = vmul.f32 %v1715_v27, %v1700_v17  ;;  %v1717_v36 = vmul.f32 %v1713_v28, %v1704_v24  ;;  %v10896_v27 = vld [vmem:[#allocation8 + $0xc8] ss:$12 sps:$4 sm:$0xff]   ;;  %2142 = vmatprep.subr.bf16.mxu0 %v10895_v26 }
 0xc5a   :  { %v1722_v37 = vadd.f32 %v1718_v15, %v1698_v13  ;;  %v1720_v38 = vmul.f32 %v1716_v29, %v1702_v21  ;;  %v10899_v28 = vld [vmem:[#allocation8 + $0xdc] ss:$12 sps:$4 sm:$0xff]   ;;  %v10900_v15 = vld [vmem:[#allocation8 + $0xe0] ss:$12 sps:$4 sm:$0xff]   ;;  %2143 = vmatpush1.bf16.msra.mxu0 %v10893_v25  ;;  %v10897_v29 = vld [vmem:[#allocation8 + $0xd8] ss:$12 sps:$4 sm:$0xff]  }
 0xc5b   :  { %v1721_v39 = vmul.f32 %v1717_v36, %v1704_v24  ;;  %v1723_v40 = vadd.f32 %v1719_v35, %v1700_v17  ;;  %2144 = vmatprep.subr.bf16.mxu0 %v10899_v28  ;;  %v9146_v25 = vld [vmem:[%s13792_s7 + $0x3] sm:$0x7] }
 0xc5c   :  { %v1726_v41 = vmul.f32 0.7978846, %v1722_v37  ;;  %v1724_v42 = vadd.f32 %v1720_v38, %v1702_v21  ;;  %v2006_v26 = vrot.slane %v9146_v25, %v12654_v58 }
 0xc5d   :  { %v1725_v43 = vadd.f32 %v1721_v39, %v1704_v24  ;;  %v1727_v44 = vmul.f32 0.7978846, %v1723_v40 }
 0xc5e   :  { %11409 = vtanh.f32 %v1726_v41  ;;  %v1728_v46 = vmul.f32 0.7978846, %v1724_v42  ;;  %2145 = vmatpush1.bf16.msra.mxu0 %v10897_v29  ;;  %v10903_v41 = vld [vmem:[#allocation8 + $0xf4] ss:$12 sps:$4 sm:$0xff]   ;;  %v10901_v42 = vld [vmem:[#allocation8 + $0xf0] ss:$12 sps:$4 sm:$0xff]  }
 0xc5f   :  { %v1729_v49 = vmul.f32 0.7978846, %v1725_v43  ;;  %11411 = vtanh.f32 %v1727_v44  ;;  %v10904_v43 = vld [vmem:[#allocation8 + $0xf8] ss:$12 sps:$4 sm:$0xff]   ;;  %2146 = vmatprep.subr.bf16.mxu0 %v10903_v41 }
 0xc60   :  { %11413 = vtanh.f32 %v1728_v46  ;;  %v10907_v44 = vld [vmem:[#allocation8 + $0x10c] ss:$12 sps:$4 sm:$0xff]   ;;  %v10905_v46 = vld [vmem:[#allocation8 + $0x108] ss:$12 sps:$4 sm:$0xff]  }
 0xc61   :  { %11415 = vtanh.f32 %v1729_v49  ;;  %v10908_v49 = vld [vmem:[#allocation8 + $0x110] ss:$12 sps:$4 sm:$0xff]  }
 0xc62   :  { %2147 = vmatpush1.bf16.msra.mxu0 %v10901_v42 }
 0xc63   :  { %2148 = vmatprep.subr.bf16.mxu0 %v10907_v44 }
 0xc66   :  { %2149 = vmatpush1.bf16.msra.mxu0 %v10905_v46 }
 0xc68   :  { %v11410_v50 = vpop.eup %11409 }
 0xc69   :  { %v11412_v51 = vpop.eup %11411  ;;  %v1734_v54 = vadd.f32 1.0, %v11410_v50  ;;  %v10911_v50 = vld [vmem:[#allocation8 + $0x124] ss:$12 sps:$4 sm:$0xff]  }
 0xc6a   :  { %v11414_v55 = vpop.eup %11413  ;;  %v1735_v59 = vadd.f32 1.0, %v11412_v51  ;;  %v10909_v51 = vld [vmem:[#allocation8 + $0x120] ss:$12 sps:$4 sm:$0xff]   ;;  %2150 = vmatprep.subr.bf16.mxu0 %v10911_v50 }
 0xc6b   :  { %v11416_v60 = vpop.eup %11415  ;;  %v1736_v3 = vadd.f32 1.0, %v11414_v55  ;;  %v1738_v7 = vmul.f32 %v1734_v54, %v1706_v63  ;;  %v10912_v54 = vld [vmem:[#allocation8 + $0x128] ss:$12 sps:$4 sm:$0xff]   ;;  %2151 = vmatpush1.bf16.msra.mxu0 %v10909_v51  ;;  %v10917_v63 = vld [vmem:[#allocation8 + $0x150] ss:$12 sps:$4 sm:$0xff]  }
 0xc6c   :  { %v1737_v6 = vadd.f32 1.0, %v11416_v60  ;;  %v1739_v9 = vmul.f32 %v1735_v59, %v1707_v4  ;;  %v10915_v55 = vld [vmem:[#allocation8 + $0x13c] ss:$12 sps:$4 sm:$0xff]   ;;  %v10913_v59 = vld [vmem:[#allocation8 + $0x138] ss:$12 sps:$4 sm:$0xff]  }
 0xc6d   :  { %v1740_v8 = vmul.f32 %v1736_v3, %v1708_v0  ;;  %v10916_v60 = vld [vmem:[#allocation8 + $0x140] ss:$12 sps:$4 sm:$0xff]   ;;  %2152 = vmatprep.subr.bf16.mxu0 %v10915_v55  ;;  %v10920_v3 = vld [vmem:[#allocation8 + $0x158] ss:$12 sps:$4 sm:$0xff]  }
 0xc6e   :  { %v1741_v53 = vmul.f32 %v1737_v6, %v1709_v5  ;;  %v10919_v0 = vld [vmem:[#allocation8 + $0x154] ss:$12 sps:$4 sm:$0xff]   ;;  %v10923_v4 = vld [vmem:[#allocation8 + $0x16c] ss:$12 sps:$4 sm:$0xff]   ;;  %v10924_v6 = vld [vmem:[#allocation8 + $0x170] ss:$12 sps:$4 sm:$0xff]  }
 0xc6f   :  { %v1742_v52 = vpack.c.bf16 %v1740_v8, %v1738_v7  ;;  %2153 = vmatpush1.bf16.msra.mxu0 %v10913_v59  ;;  %v10921_v5 = vld [vmem:[#allocation8 + $0x168] ss:$12 sps:$4 sm:$0xff]  }
 0xc70   :  { %v1743_v10 = vpack.c.bf16 %v1741_v53, %v1739_v9  ;;  %2154 = vmatprep.subr.bf16.mxu0 %v10919_v0 }
 0xc72   :  { %1911 = vmatprep.mubr.bf16.mxu1 %v1743_v10 }
 0xc73   :  { %1912 = vmatmul.mubr.bf16.vlgmr.msra.gmra.mrb[24].mxu1 %v1742_v52  ;;  %2155 = vmatpush1.bf16.msra.mxu0 %v10917_v63 }
 0xc74   :  { %10235 = vmatprep.mubr.msk.bf16.mxu1 %vm12196_vm1, %v12194_v33  ;;  %10220 = vmatpush3.bf16.msra.mxu1 %v10896_v27 }
 0xc75   :  { %10221 = vmatprep.subr.bf16.mxu1 %v12194_v33  ;;  %2156 = vmatprep.subr.bf16.mxu0 %v10923_v4 }
 0xc77   :  { %2157 = vmatpush1.bf16.msra.mxu0 %v10921_v5 }
 0xc78   :  { %10222 = vmatpush3.bf16.msra.mxu1 %v10900_v15  ;;  %10239 = vmatprep.subr.bf16.mxu0 %v12194_v33 }
 0xc79   :  { %10223 = vmatprep.subr.bf16.mxu1 %v12194_v33 }
 0xc7c   :  { %10224 = vmatpush3.bf16.msra.mxu1 %v10904_v43 }
 0xc7d   :  { %10225 = vmatprep.subr.bf16.mxu1 %v12194_v33 }
 0xc80   :  { %10226 = vmatpush3.bf16.msra.mxu1 %v10908_v49 }
 0xc81   :  { %10227 = vmatprep.subr.bf16.mxu1 %v12194_v33 }
 0xc84   :  { %10228 = vmatpush3.bf16.msra.mxu1 %v10912_v54  ;;  %v2002_v54 = vrot.slane %v9146_v25, %v12662_v61 }
 0xc85   :  { %10229 = vmatprep.subr.bf16.mxu1 %v12194_v33 }
 0xc88   :  { %10230 = vmatpush3.bf16.msra.mxu1 %v10916_v60 }
 0xc89   :  { %10231 = vmatprep.subr.bf16.mxu1 %v12194_v33 }
 0xc8c   :  { %10232 = vmatpush3.bf16.msra.mxu1 %v10920_v3 }
 0xc8d   :  { %10233 = vmatprep.subr.bf16.mxu1 %v12194_v33 }
 0xc90   :  { %10234 = vmatpush3.bf16.msra.mxu1 %v10924_v6 }
 0xc91   :  { %10266 = vmatprep.subr.bf16.mxu1 %v12194_v33 }
 0xd46   :  { %v9744_v11 = vpop.f32.mrb[24].mxu1 }
 0xd47   :  { %v9745_v16 = vpop.f32.mrb[25].mxu1 }
 0xd48   :  { %v9746_v13 = vadd.f32 %v9745_v16, %v9744_v11  ;;  %v9747_v14 = vpop.f32.mrb[26].mxu1 }
 0xd49   :  { %v9748_v20 = vpop.f32.mrb[27].mxu1 }
 0xd4a   :  { %v1914_v17 = vadd.f32 %v9746_v13, %v9127_v12  ;;  %v9749_v21 = vadd.f32 %v9748_v20, %v9747_v14 }
 0xd4c   :  { %v1917_v22 = vadd.f32 %v9749_v21, %v9127_v12  ;;  %v1920_v23 = vadd.f32 %v1914_v17, %v12804_v47  ;;  %v9144_v12 = vld [vmem:[#allocation17] ss:$0 sm:$0xff]  ;;  %v9145_v17 = vld [vmem:[#allocation18] ss:$0 sm:$0xff] }
 0xd4e   :  { %1924 = vadd.xlane.f32.xlu0 %v1920_v23  ;;  %v1921_v24 = vadd.f32 %v1917_v22, %v12806_v48 }
 0xd50   :  { %1926 = vadd.xlane.f32.xlu1 %v1921_v24 }
 0xddb   :  { %v1925_v47 = vpop.xlane.xlu0 %1924 }
 0xddc   :  { %v1928_v35 = vmul.f32 0.0078125, %v1925_v47 }
 0xddd   :  { %v1927_v48 = vpop.xlane.xlu1 %1926 }
 0xdde   :  { %v1930_v36 = vsub.f32 %v1920_v23, %v1928_v35  ;;  %v1929_v37 = vmul.f32 0.0078125, %v1927_v48 }
 0xde0   :  { %v1931_v38 = vsub.f32 %v1921_v24, %v1929_v37  ;;  %v1932_v39 = vmul.f32 %v1930_v36, %v1930_v36 }
 0xde2   :  { %1934 = vadd.xlane.f32.xlu0 %v1932_v39  ;;  %v1933_v40 = vmul.f32 %v1931_v38, %v1931_v38 }
 0xde4   :  { %1936 = vadd.xlane.f32.xlu1 %v1933_v40 }
 0xe6f   :  { %v1935_v7 = vpop.xlane.xlu0 %1934 }
 0xe70   :  { %v1938_v8 = vmul.f32 0.0078125, %v1935_v7 }
 0xe71   :  { %v1937_v9 = vpop.xlane.xlu1 %1936 }
 0xe72   :  { %v1940_v53 = vadd.f32 1e-05, %v1938_v8  ;;  %v1939_v52 = vmul.f32 0.0078125, %v1937_v9 }
 0xe74   :  { %11417 = vrsqrt.f32 %v1940_v53  ;;  %v1941_v10 = vadd.f32 1e-05, %v1939_v52 }
 0xe76   :  { %11419 = vrsqrt.f32 %v1941_v10 }
 0xe7e   :  { %v11418_v11 = vpop.eup %11417 }
 0xe7f   :  { %v1944_v16 = vmul.f32 %v11418_v11, %v1930_v36  ;;  %v2010_v36 = vrot.slane %v9146_v25, %v12665_v62 }
 0xe80   :  { %v11420_v13 = vpop.eup %11419 }
 0xe81   :  { %v1945_v14 = vmul.f32 %v11420_v13, %v1931_v38  ;;  %v1952_v20 = vmul.f32 %v9144_v12, %v1944_v16 }
 0xe83   :  { %v1953_v21 = vmul.f32 %v9144_v12, %v1945_v14  ;;  %v12828_v22 = vadd.f32 %v9145_v17, %v1952_v20 }
 0xe85   :  { %v12830_v23 = vadd.f32 %v9145_v17, %v1953_v21 }
 0xe87   :  { %v1962_v24 = vpack.c.bf16 %v12830_v23, %v12828_v22 }
 0xe89   :  { %2175 = vmatmul.mubr.bf16.vlgmr.msra.gmra.mrb[16].mxu0 %v1962_v24  ;;  %10236 = vmatmul.mubr.bf16.vlgmr.msra.gmra.mrb[28].mxu1 %v1962_v24 }
 0xe8a   :  { %10243 = vmatprep.mubr.msk.bf16.mxu0 %vm12196_vm1, %v12194_v33  ;;  %10270 = vmatprep.mubr.msk.bf16.mxu1 %vm12196_vm1, %v12194_v33 }
 0xf5c   :  { %v2176_v27 = vpop.f32.mrb[16].mxu0  ;;  %v2219_v28 = vpop.f32.mrb[28].mxu1 }
 0xf5d   :  { %v2178_v15 = vpop.f32.mrb[17].mxu0  ;;  %v10237_v29 = vpop.f32.mrb[29].mxu1  ;;  %v2177_v63 = vadd.f32 %v2176_v27, %v2002_v54  ;;  %v2220_v17 = vadd.f32 %v2219_v28, %v2010_v36 }
 0xf5e   :  { %v2179_v47 = vadd.f32 %v2178_v15, %v2006_v26  ;;  %v2180_v35 = vpop.f32.mrb[18].mxu0  ;;  %v2222_v48 = vpop.f32.mrb[30].mxu1 }
 0xf5f   :  { %v2182_v37 = vpop.f32.mrb[19].mxu0  ;;  %v10238_v38 = vpop.f32.mrb[31].mxu1  ;;  %v12843_v41 = vadd.f32 %v2222_v48, %v2010_v36  ;;  %v2226_v3 = vpack.c.bf16 %v2177_v63, %v2177_v63  ;;  %v2181_v4 = vadd.f32 %v2180_v35, %v2002_v54  ;;  %v2233_v21 = vmul.f32 %v2220_v17, %v12672_v1  ;;  %v10926_v54 = vld [vmem:[#allocation9 + $0x48] sm:$0xff]   ;;  %v10931_v63 = vld [vmem:[#allocation9 + $0x70] sm:$0xff]  }
 0xf60   :  { %v2227_v39 = vmul.f32 %v2179_v47, %v12672_v1  ;;  %v2228_v40 = vmul.f32 %v2179_v47, %v12675_v2  ;;  %v2183_v42 = vadd.f32 %v2182_v37, %v2006_v26  ;;  %v2229_v49 = vmul.f32 %v2179_v47, %v12691_v18 }
 0xf61   :  { %v2230_v50 = vmul.f32 %v2179_v47, %v12694_v19  ;;  %v2405_v5 = vpack.c.bf16 %v2181_v4, %v2181_v4  ;;  %v2234_v24 = vmul.f32 %v2220_v17, %v12675_v2  ;;  %v2235_v26 = vmul.f32 %v2220_v17, %v12691_v18 }
 0xf62   :  { %v2231_v43 = vpack.c.bf16 %v2228_v40, %v2227_v39  ;;  %v2406_v44 = vmul.f32 %v2183_v42, %v12672_v1  ;;  %v2407_v46 = vmul.f32 %v2183_v42, %v12675_v2  ;;  %v2408_v55 = vmul.f32 %v2183_v42, %v12691_v18 }
 0xf63   :  { %v2409_v59 = vmul.f32 %v2183_v42, %v12694_v19  ;;  %v2232_v60 = vpack.c.bf16 %v2230_v50, %v2229_v49  ;;  %v2236_v27 = vmul.f32 %v2220_v17, %v12694_v19  ;;  %v2237_v15 = vpack.c.bf16 %v2234_v24, %v2233_v21 }
 0xf64   :  { %10240 = vmatpush3.bf16.xpose.msra.mxu0 %v2231_v43  ;;  %v2410_v51 = vpack.c.bf16 %v2407_v46, %v2406_v44  ;;  %v2412_v40 = vmul.f32 %v12843_v41, %v12672_v1  ;;  %v2413_v42 = vmul.f32 %v12843_v41, %v12675_v2  ;;  %v2414_v44 = vmul.f32 %v12843_v41, %v12691_v18 }
 0xf65   :  { %10241 = vmatprep.subr.bf16.mxu0 %v12194_v33  ;;  %v2411_v0 = vpack.c.bf16 %v2409_v59, %v2408_v55  ;;  %v2238_v29 = vpack.c.bf16 %v2236_v27, %v2235_v26  ;;  %v2415_v46 = vmul.f32 %v12843_v41, %v12694_v19  ;;  %v10927_v55 = vld [vmem:[#allocation9 + $0x50] sm:$0xff]   ;;  %v10928_v41 = vld [vmem:[#allocation9 + $0x58] sm:$0xff]   ;;  %v10929_v59 = vld [vmem:[#allocation9 + $0x60] sm:$0xff]  }
 0xf66   :  { %10267 = vmatpush3.bf16.xpose.msra.mxu1 %v2410_v51  ;;  %v2416_v49 = vpack.c.bf16 %v2413_v42, %v2412_v40  ;;  %v10925_v51 = vld [vmem:[#allocation9 + $0x40] sm:$0xff]  }
 0xf67   :  { %10268 = vmatprep.subr.bf16.mxu1 %v12194_v33  ;;  %v2417_v50 = vpack.c.bf16 %v2415_v46, %v2414_v44  ;;  %v10941_v42 = vld [vmem:[%s13798_s6 + $0xa4] ss:$8 sps:$4 sm:$0xff]   ;;  %v10944_v44 = vld [vmem:[%s13798_s6 + $0xb4] ss:$8 sps:$4 sm:$0xff]   ;;  %v10942_v46 = vld [vmem:[%s13798_s6 + $0xb0] ss:$8 sps:$4 sm:$0xff]  }
 0xf6c   :  { %10242 = vmatpush3.bf16.xpose.msra.mxu0 %v2232_v60  ;;  %v10930_v60 = vld [vmem:[#allocation9 + $0x68] sm:$0xff]  }
 0xf6d   :  { %10655 = vmatprep.subr.bf16.mxu0 %v12197_v30 }
 0xf6e   :  { %10269 = vmatpush3.bf16.xpose.msra.mxu1 %v2411_v0 }
 0xf6f   :  { %10293 = vmatprep.subr.bf16.mxu1 %v12194_v33 }
 0xf73   :  { %10244 = vmatmul.mubr.bf16.vlgmr.msra.gmra.mrb[20].mxu0 %v2226_v3 }
 0xf74   :  { %10657 = vmatpush3.bf16.msk.msra.mxu0 %vm12710_vm3, %v12198_v32  ;;  %10255 = vmatprep.mubr.msk.f32.mxu0 %vm12196_vm1, %v12194_v33 }
 0xf75   :  { %10658 = vmatprep.subr.bf16.mxu0 %v12197_v30  ;;  %10271 = vmatmul.mubr.bf16.vlgmr.msra.gmra.mrb[32].mxu1 %v2405_v5 }
 0xf76   :  { %10309 = vmatprep.mubr.msk.bf16.mxu1 %vm12196_vm1, %v12194_v33  ;;  %10294 = vmatpush3.bf16.msra.mxu1 %v10925_v51  ;;  %v10950_v51 = vld [vmem:[%s13798_s6 + $0xd4] ss:$8 sps:$4 sm:$0xff]  }
 0xf77   :  { %10295 = vmatprep.subr.bf16.mxu1 %v12194_v33 }
 0xf78   :  { %10660 = vmatpush3.bf16.msk.msra.mxu0 %vm12724_vm7, %v12198_v32 }
 0xf79   :  { %10258 = vmatprep.subr.bf16.mxu0 %v12194_v33 }
 0xf7a   :  { %10296 = vmatpush3.bf16.msra.mxu1 %v10926_v54  ;;  %v10948_v54 = vld [vmem:[%s13798_s6 + $0xd0] ss:$8 sps:$4 sm:$0xff]  }
 0xf7b   :  { %10297 = vmatprep.subr.bf16.mxu1 %v12194_v33 }
 0xf7e   :  { %10298 = vmatpush3.bf16.msra.mxu1 %v10927_v55  ;;  %v10951_v55 = vld [vmem:[%s13798_s6 + $0xe0] ss:$8 sps:$4 sm:$0xff]  }
 0xf7f   :  { %10299 = vmatprep.subr.bf16.mxu1 %v12194_v33 }
 0xf82   :  { %10300 = vmatpush3.bf16.msra.mxu1 %v10928_v41  ;;  %v10953_v41 = vld [vmem:[%s13798_s6 + $0xe4] ss:$8 sps:$4 sm:$0xff]  }
 0xf83   :  { %10301 = vmatprep.subr.bf16.mxu1 %v12194_v33 }
 0xf86   :  { %10302 = vmatpush3.bf16.msra.mxu1 %v10929_v59  ;;  %v10956_v59 = vld [vmem:[%s13798_s6 + $0xf4] ss:$8 sps:$4 sm:$0xff]  }
 0xf87   :  { %10303 = vmatprep.subr.bf16.mxu1 %v12194_v33 }
 0xf8a   :  { %10304 = vmatpush3.bf16.msra.mxu1 %v10930_v60  ;;  %v10954_v60 = vld [vmem:[%s13798_s6 + $0xf0] ss:$8 sps:$4 sm:$0xff]  }
 0xf8b   :  { %10305 = vmatprep.subr.bf16.mxu1 %v12194_v33 }
 0xf8e   :  { %10306 = vmatpush3.bf16.msra.mxu1 %v10931_v63 }
 0xf8f   :  { %10307 = vmatprep.subr.bf16.mxu1 %v12194_v33 }
0x1046   :  { %v2273_v6 = vpop.f32.mrb[20].mxu0 }
0x1047   :  { %v10245_v7 = vpop.f32.mrb[21].mxu0  ;;  %v2279_v8 = vsel %vm1090_vm10, %v2273_v6, -inf }
0x1048   :  { %2280 = vmax.xlane.f32.xlu0 %v2279_v8  ;;  %v2276_v9 = vpop.f32.mrb[22].mxu0  ;;  %v2452_v52 = vpop.f32.mrb[32].mxu1 }
0x1049   :  { %v10246_v53 = vpop.f32.mrb[23].mxu0  ;;  %v10272_v10 = vpop.f32.mrb[33].mxu1  ;;  %v2458_v11 = vsel %vm1090_vm10, %v2452_v52, -inf }
0x104a   :  { %2459 = vmax.xlane.f32.xlu1 %v2458_v11  ;;  %v2455_v12 = vpop.f32.mrb[34].mxu1 }
0x104b   :  { %v10273_v16 = vpop.f32.mrb[35].mxu1 }
0x10d5   :  { %v2281_v13 = vpop.xlane.xlu0 %2280 }
0x10d6   :  { %v2282_v14 = vsub.f32 %v2273_v6, %v2281_v13 }
0x10d7   :  { %v2460_v35 = vpop.xlane.xlu1 %2459 }
0x10d8   :  { %v2283_v20 = vmul.f32 1.442695, %v2282_v14  ;;  %v2461_v48 = vsub.f32 %v2452_v52, %v2460_v35  ;;  %v10932_v52 = vld [vmem:[#allocation9 + $0x78] sm:$0xff]  }
0x10d9   :  { %10308 = vmatpush3.bf16.msra.mxu1 %v10932_v52  ;;  %v9184_v14 = vld [vmem:[%s13797_s10 + $0x1] ss:$0 sm:$0xff]  ;;  %v10936_v35 = vld [vmem:[%s13798_s6 + $0x90] ss:$8 sps:$4 sm:$0xff]  }
0x10da   :  { %11421 = vpow2.f32 %v2283_v20  ;;  %v2462_v36 = vmul.f32 1.442695, %v2461_v48 }
0x10e4   :  { %v11422_v25 = vpop.eup %11421 }
0x10e5   :  { %10256 = vmatmul.mubr.msk.f32.vlgmr.msra.gmra.mrb[24].mxu0 %vm1090_vm10, %v11422_v25 }
0x10e6   :  { %10259 = vmatpush3.bf16.msra.mxu0 %v2237_v15  ;;  %10262 = vmatprep.mubr.msk.bf16.mxu0 %vm12196_vm1, %v12194_v33 }
0x10e7   :  { %10260 = vmatprep.subr.bf16.mxu0 %v12194_v33 }
0x10ea   :  { %10261 = vmatpush3.bf16.msra.mxu0 %v2238_v29  ;;  %v10933_v29 = vld [vmem:[%s13798_s6 + $0x80] ss:$8 sps:$4 sm:$0xff]  }
0x10eb   :  { %10661 = vmatprep.subr.bf16.mxu0 %v12197_v30 }
0x11b8   :  { %v2354_v28 = vpop.f32.mrb[24].mxu0 }
0x11b9   :  { %11423 = vrcp.f32 %v2354_v28  ;;  %v10257_v47 = vpop.f32.mrb[25].mxu0  ;;  %v10935_v28 = vld [vmem:[%s13798_s6 + $0x84] ss:$8 sps:$4 sm:$0xff]  }
0x11ba   :  { %11425 = vpow2.f32 %v2462_v36  ;;  %v10938_v47 = vld [vmem:[%s13798_s6 + $0x94] ss:$8 sps:$4 sm:$0xff]  }
0x11c3   :  { %v11424_v37 = vpop.eup %11423 }
0x11c4   :  { %v2359_v38 = vmul.f32 %v11424_v37, %v11422_v25  ;;  %v11426_v43 = vpop.eup %11425 }
0x11c6   :  { %v2360_v39 = vpack.c.bf16 %v2359_v38, %v2359_v38 }
0x11c8   :  { %10263 = vmatmul.mubr.msk.bf16.vlgmr.msra.gmra.mrb[28].mxu0 %vm1090_vm10, %v2360_v39 }
0x11c9   :  { %10663 = vmatpush3.bf16.msk.msra.mxu0 %vm12710_vm3, %v12198_v32  ;;  %10282 = vmatprep.mubr.msk.f32.mxu0 %vm12196_vm1, %v12194_v33 }
0x11ca   :  { %10664 = vmatprep.subr.bf16.mxu0 %v12197_v30 }
0x11cd   :  { %10666 = vmatpush3.bf16.msk.msra.mxu0 %vm12724_vm7, %v12198_v32 }
0x11ce   :  { %10285 = vmatprep.subr.bf16.mxu0 %v12194_v33 }
0x11d0   :  { %10283 = vmatmul.mubr.msk.f32.vlgmr.msra.gmra.mrb[26].mxu0 %vm1090_vm10, %v11426_v43 }
0x11d1   :  { %10286 = vmatpush3.bf16.msra.mxu0 %v2416_v49  ;;  %10289 = vmatprep.mubr.msk.bf16.mxu0 %vm12196_vm1, %v12194_v33  ;;  %v10947_v49 = vld [vmem:[%s13798_s6 + $0xc4] ss:$8 sps:$4 sm:$0xff]  }
0x11d2   :  { %10287 = vmatprep.subr.bf16.mxu0 %v12194_v33 }
0x11d5   :  { %10288 = vmatpush3.bf16.msra.mxu0 %v2417_v50  ;;  %v10945_v50 = vld [vmem:[%s13798_s6 + $0xc0] ss:$8 sps:$4 sm:$0xff]  }
0x11d6   :  { %2856 = vmatprep.subr.bf16.mxu0 %v10935_v28  ;;  %v10966_v28 = vld [vmem:[#allocation14 + $0xa0] sm:$0xff]  }
0x129b   :  { %v2398_v0 = vpop.f32.mrb[28].mxu0 }
0x129c   :  { %v10264_v3 = vpop.f32.mrb[29].mxu0 }
0x129d   :  { %v2401_v4 = vpop.f32.mrb[30].mxu0 }
0x129e   :  { %v10265_v5 = vpop.f32.mrb[31].mxu0 }
0x12a3   :  { %v2533_v6 = vpop.f32.mrb[26].mxu0 }
0x12a4   :  { %11427 = vrcp.f32 %v2533_v6  ;;  %v10284_v7 = vpop.f32.mrb[27].mxu0 }
0x12ae   :  { %v11428_v8 = vpop.eup %11427 }
0x12af   :  { %v2538_v9 = vmul.f32 %v11428_v8, %v11426_v43  ;;  %v10939_v43 = vld [vmem:[%s13798_s6 + $0xa0] ss:$8 sps:$4 sm:$0xff]  }
0x12b0   :  { %v9193_v8 = vld [vmem:[#allocation11 + $0x1] ss:$0 sm:$0xff] }
0x12b1   :  { %v2539_v53 = vpack.c.bf16 %v2538_v9, %v2538_v9 }
0x12b3   :  { %10290 = vmatmul.mubr.msk.bf16.vlgmr.msra.gmra.mrb[32].mxu0 %vm1090_vm10, %v2539_v53 }
0x12b4   :  { %2888 = vmatprep.mubr.bf16.mxu0 %v12195_v45  ;;  %2857 = vmatpush1.bf16.msra.mxu0 %v10933_v29  ;;  %v10965_v29 = vld [vmem:[#allocation14 + $0xe0] sm:$0xff]  }
0x12b5   :  { %2858 = vmatprep.subr.bf16.mxu0 %v10938_v47  ;;  %v10967_v47 = vld [vmem:[#allocation14 + $0xe8] sm:$0xff]  }
0x12b8   :  { %2859 = vmatpush1.bf16.msra.mxu0 %v10936_v35  ;;  %v10968_v35 = vld [vmem:[#allocation14 + $0xa8] sm:$0xff]  }
0x12b9   :  { %2860 = vmatprep.subr.bf16.mxu0 %v10941_v42 }
0x12bc   :  { %2861 = vmatpush1.bf16.msra.mxu0 %v10939_v43 }
0x12bd   :  { %2862 = vmatprep.subr.bf16.mxu0 %v10944_v44 }
0x12c0   :  { %2863 = vmatpush1.bf16.msra.mxu0 %v10942_v46 }
0x12c1   :  { %2864 = vmatprep.subr.bf16.mxu0 %v10947_v49 }
0x12c4   :  { %2865 = vmatpush1.bf16.msra.mxu0 %v10945_v50 }
0x12c5   :  { %2866 = vmatprep.subr.bf16.mxu0 %v10950_v51 }
0x12c8   :  { %2867 = vmatpush1.bf16.msra.mxu0 %v10948_v54 }
0x12c9   :  { %2868 = vmatprep.subr.bf16.mxu0 %v10953_v41 }
0x12cc   :  { %2869 = vmatpush1.bf16.msra.mxu0 %v10951_v55 }
0x12cd   :  { %2870 = vmatprep.subr.bf16.mxu0 %v10956_v59 }
0x12d0   :  { %2871 = vmatpush1.bf16.msra.mxu0 %v10954_v60 }
0x12d1   :  { %10667 = vmatprep.subr.bf16.mxu0 %v12197_v30 }
0x1386   :  { %v2577_v10 = vpop.f32.mrb[32].mxu0 }
0x1387   :  { %v2586_v11 = vpack.c.bf16 %v2577_v10, %v2398_v0  ;;  %v10291_v12 = vpop.f32.mrb[33].mxu0 }
0x1388   :  { %v2580_v16 = vpop.f32.mrb[34].mxu0 }
0x1389   :  { %v10292_v13 = vpop.f32.mrb[35].mxu0  ;;  %10310 = vmatmul.mubr.bf16.vlgmr.msra.gmra.mrb[36].mxu1 %v2586_v11  ;;  %v9194_v11 = vld [vmem:[#allocation12 + $0x1] ss:$0 sm:$0xff] }
0x145c   :  { %v2694_v20 = vpop.f32.mrb[36].mxu1 }
0x145d   :  { %v2695_v17 = vadd.f32 %v9184_v14, %v2694_v20  ;;  %v10311_v21 = vpop.f32.mrb[37].mxu1  ;;  %v10957_v20 = vld [vmem:[#allocation14 + $0xc0] sm:$0xff]  }
0x145e   :  { %v2697_v24 = vpop.f32.mrb[38].mxu1  ;;  %9790 = vmatprep.subr.bf16.mxu1 %v10957_v20  ;;  %v10959_v21 = vld [vmem:[#allocation14 + $0xc8] sm:$0xff]  }
0x145f   :  { %v2698_v25 = vadd.f32 %v9184_v14, %v2697_v24  ;;  %v10312_v26 = vpop.f32.mrb[39].mxu1  ;;  %v2701_v27 = vadd.f32 %v2695_v17, %v12828_v22  ;;  %v10958_v17 = vld [vmem:[#allocation14 + $0x80] sm:$0xff]   ;;  %v10960_v24 = vld [vmem:[#allocation14 + $0x88] sm:$0xff]  }
0x1460   :  { %9791 = vmatpush3.bf16.msra.mxu1 %v10958_v17  ;;  %v10962_v26 = vld [vmem:[#allocation14 + $0x90] sm:$0xff]  }
0x1461   :  { %2707 = vadd.xlane.f32.xlu0 %v2701_v27  ;;  %v2702_v15 = vadd.f32 %v2698_v25, %v12830_v23  ;;  %9792 = vmatprep.subr.bf16.mxu1 %v10959_v21  ;;  %v10961_v25 = vld [vmem:[#allocation14 + $0xd0] sm:$0xff]  }
0x1463   :  { %2709 = vadd.xlane.f32.xlu1 %v2702_v15 }
0x1464   :  { %9793 = vmatpush3.bf16.msra.mxu1 %v10960_v24 }
0x1465   :  { %9794 = vmatprep.subr.bf16.mxu1 %v10961_v25 }
0x1468   :  { %9795 = vmatpush3.bf16.msra.mxu1 %v10962_v26 }
0x14ee   :  { %v2708_v48 = vpop.xlane.xlu0 %2707 }
0x14ef   :  { %v2711_v36 = vmul.f32 0.0078125, %v2708_v48  ;;  %v10969_v48 = vld [vmem:[#allocation14 + $0xf0] sm:$0xff]  }
0x14f0   :  { %v2710_v37 = vpop.xlane.xlu1 %2709 }
0x14f1   :  { %v2713_v22 = vsub.f32 %v2701_v27, %v2711_v36  ;;  %v2712_v23 = vmul.f32 0.0078125, %v2710_v37  ;;  %v10963_v27 = vld [vmem:[#allocation14 + $0xd8] sm:$0xff]   ;;  %v10970_v36 = vld [vmem:[#allocation14 + $0xb0] sm:$0xff]  }
0x14f2   :  { %9796 = vmatprep.subr.bf16.mxu1 %v10963_v27  ;;  %v10971_v37 = vld [vmem:[#allocation14 + $0xf8] sm:$0xff]  }
0x14f3   :  { %v2714_v38 = vsub.f32 %v2702_v15, %v2712_v23  ;;  %v2715_v39 = vmul.f32 %v2713_v22, %v2713_v22  ;;  %v10964_v15 = vld [vmem:[#allocation14 + $0x98] sm:$0xff]  }
0x14f4   :  { %9797 = vmatpush3.bf16.msra.mxu1 %v10964_v15  ;;  %v9211_v23 = vld [vmem:[%s13799_s21 + $0x2] sm:$0x3] }
0x14f5   :  { %2717 = vadd.xlane.f32.xlu0 %v2715_v39  ;;  %v2716_v40 = vmul.f32 %v2714_v38, %v2714_v38  ;;  %9798 = vmatprep.subr.bf16.mxu1 %v10965_v29  ;;  %v2773_v39 = vrot.slane %v9211_v23, %v12654_v58 }
0x14f7   :  { %2719 = vadd.xlane.f32.xlu1 %v2716_v40 }
0x14f8   :  { %9799 = vmatpush3.bf16.msra.mxu1 %v10966_v28 }
0x14f9   :  { %9800 = vmatprep.subr.bf16.mxu1 %v10967_v47 }
0x14fc   :  { %9801 = vmatpush3.bf16.msra.mxu1 %v10968_v35 }
0x14fd   :  { %9802 = vmatprep.subr.bf16.mxu1 %v10969_v48 }
0x1500   :  { %9803 = vmatpush3.bf16.msra.mxu1 %v10970_v36 }
0x1501   :  { %9804 = vmatprep.subr.bf16.mxu1 %v10971_v37 }
0x1582   :  { %v2718_v63 = vpop.xlane.xlu0 %2717 }
0x1583   :  { %v2721_v0 = vmul.f32 0.0078125, %v2718_v63 }
0x1584   :  { %v2720_v3 = vpop.xlane.xlu1 %2719 }
0x1585   :  { %v2723_v4 = vadd.f32 1e-05, %v2721_v0  ;;  %v2722_v5 = vmul.f32 0.0078125, %v2720_v3 }
0x1587   :  { %11429 = vrsqrt.f32 %v2723_v4  ;;  %v2724_v6 = vadd.f32 1e-05, %v2722_v5 }
0x1589   :  { %11431 = vrsqrt.f32 %v2724_v6 }
0x1591   :  { %v11430_v7 = vpop.eup %11429 }
0x1592   :  { %v2727_v9 = vmul.f32 %v11430_v7, %v2713_v22  ;;  %v10972_v22 = vld [vmem:[#allocation14 + $0xb8] sm:$0xff]  }
0x1593   :  { %v11432_v53 = vpop.eup %11431  ;;  %9805 = vmatpush3.bf16.msra.mxu1 %v10972_v22 }
0x1594   :  { %v2728_v52 = vmul.f32 %v11432_v53, %v2714_v38  ;;  %v2735_v10 = vmul.f32 %v9193_v8, %v2727_v9  ;;  %10330 = vmatprep.subr.bf16.mxu1 %v12194_v33  ;;  %v2769_v38 = vrot.slane %v9211_v23, %v12662_v61 }
0x1596   :  { %v2736_v12 = vmul.f32 %v9193_v8, %v2728_v52  ;;  %v12931_v16 = vadd.f32 %v9194_v11, %v2735_v10 }
0x1598   :  { %v12933_v13 = vadd.f32 %v9194_v11, %v2736_v12 }
0x159a   :  { %v2745_v14 = vpack.c.bf16 %v12933_v13, %v12931_v16 }
0x159c   :  { %2889 = vmatmul.mubr.bf16.vlgmr.msra.gmra.mrb[36].mxu0 %v2745_v14 }
0x159d   :  { %10317 = vmatprep.mubr.msk.f32.mxu0 %vm12196_vm1, %v12194_v33 }
0x166f   :  { %v2890_v40 = vpop.f32.mrb[36].mxu0 }
0x1670   :  { %v2891_v42 = vadd.f32 %v2890_v40, %v2769_v38  ;;  %v2892_v43 = vpop.f32.mrb[37].mxu0  ;;  %v9228_v40 = vld [vmem:[#allocation15 + $0x1] ss:$0 sm:$0xff] }
0x1671   :  { %v2893_v44 = vadd.f32 %v2892_v43, %v2773_v39  ;;  %v2894_v46 = vpop.f32.mrb[38].mxu0 }
0x1672   :  { %v2903_v49 = vmul.f32 0.044715, %v2891_v42  ;;  %v2895_v50 = vadd.f32 %v2894_v46, %v2769_v38  ;;  %v2896_v51 = vpop.f32.mrb[39].mxu0  ;;  %v2899_v27 = vmul.f32 0.5, %v2891_v42 }
0x1673   :  { %v2904_v54 = vmul.f32 0.044715, %v2893_v44  ;;  %v2897_v55 = vadd.f32 %v2896_v51, %v2773_v39  ;;  %v2900_v28 = vmul.f32 0.5, %v2893_v44 }
0x1674   :  { %v2907_v41 = vmul.f32 %v2903_v49, %v2891_v42  ;;  %v2905_v59 = vmul.f32 0.044715, %v2895_v50  ;;  %v2901_v15 = vmul.f32 0.5, %v2895_v50 }
0x1675   :  { %v2908_v60 = vmul.f32 %v2904_v54, %v2893_v44  ;;  %v2906_v63 = vmul.f32 0.044715, %v2897_v55  ;;  %v2902_v47 = vmul.f32 0.5, %v2897_v55 }
0x1676   :  { %v2911_v0 = vmul.f32 %v2907_v41, %v2891_v42  ;;  %v2909_v3 = vmul.f32 %v2905_v59, %v2895_v50  ;;  %v3241_v41 = vld [vmem:[%s13800_s15 + $0x8] sm:$0xff]  ;;  %v3240_v59 = vld [vmem:[%s13800_s15] sm:$0xff] }
0x1677   :  { %v2912_v4 = vmul.f32 %v2908_v60, %v2893_v44  ;;  %v2910_v5 = vmul.f32 %v2906_v63, %v2897_v55 }
0x1678   :  { %v2915_v6 = vadd.f32 %v2911_v0, %v2891_v42  ;;  %v2913_v7 = vmul.f32 %v2909_v3, %v2895_v50 }
0x1679   :  { %v2914_v8 = vmul.f32 %v2910_v5, %v2897_v55  ;;  %v2916_v9 = vadd.f32 %v2912_v4, %v2893_v44 }
0x167a   :  { %v2919_v53 = vmul.f32 0.7978846, %v2915_v6  ;;  %v2917_v52 = vadd.f32 %v2913_v7, %v2895_v50  ;;  %v9248_v7 = vld [vmem:[%s13801_s26] ss:$0 sm:$0xff] }
0x167b   :  { %v2918_v10 = vadd.f32 %v2914_v8, %v2897_v55  ;;  %v2920_v11 = vmul.f32 0.7978846, %v2916_v9  ;;  %v9249_v9 = vld [vmem:[%s13802_s9] ss:$0 sm:$0xff] }
0x167c   :  { %11433 = vtanh.f32 %v2919_v53  ;;  %v2921_v12 = vmul.f32 0.7978846, %v2917_v52 }
0x167d   :  { %v2922_v14 = vmul.f32 0.7978846, %v2918_v10  ;;  %11435 = vtanh.f32 %v2920_v11 }
0x167e   :  { %11437 = vtanh.f32 %v2921_v12 }
0x167f   :  { %11439 = vtanh.f32 %v2922_v14 }
0x1686   :  { %v11434_v20 = vpop.eup %11433 }
0x1687   :  { %v11436_v17 = vpop.eup %11435  ;;  %v2927_v21 = vadd.f32 1.0, %v11434_v20 }
0x1688   :  { %v11438_v24 = vpop.eup %11437  ;;  %v2928_v25 = vadd.f32 1.0, %v11436_v17 }
0x1689   :  { %v11440_v26 = vpop.eup %11439  ;;  %v2929_v29 = vadd.f32 1.0, %v11438_v24  ;;  %v2931_v48 = vmul.f32 %v2927_v21, %v2899_v27 }
0x168a   :  { %v2930_v35 = vadd.f32 1.0, %v11440_v26  ;;  %v2932_v37 = vmul.f32 %v2928_v25, %v2900_v28 }
0x168b   :  { %v2933_v36 = vmul.f32 %v2929_v29, %v2901_v15 }
0x168c   :  { %v2934_v22 = vmul.f32 %v2930_v35, %v2902_v47 }
0x168d   :  { %v2935_v23 = vpack.c.bf16 %v2933_v36, %v2931_v48  ;;  %v12199_v48 = vmov 2102212464  }
0x168e   :  { %v2936_v38 = vpack.c.bf16 %v2934_v22, %v2932_v37  ;;  %v12200_v37 = vmov 920167782  }
0x1690   :  { %3106 = vmatprep.mubr.bf16.mxu1 %v2936_v38 }
0x1691   :  { %3107 = vmatmul.mubr.bf16.vlgmr.msra.gmra.mrb[40].mxu1 %v2935_v23 }
0x1692   :  { %10346 = vmatprep.mubr.msk.bf16.mxu1 %vm12196_vm1, %v12194_v33 }
0x1764   :  { %v9806_v39 = vpop.f32.mrb[40].mxu1 }
0x1765   :  { %v9807_v42 = vpop.f32.mrb[41].mxu1 }
0x1766   :  { %v9808_v43 = vadd.f32 %v9807_v42, %v9806_v39  ;;  %v9809_v44 = vpop.f32.mrb[42].mxu1  ;;  %v12201_v39 = vmov 1326507024  }
0x1767   :  { %v9810_v46 = vpop.f32.mrb[43].mxu1 }
0x1768   :  { %v3109_v49 = vadd.f32 %v9808_v43, %v9228_v40  ;;  %v9811_v50 = vadd.f32 %v9810_v46, %v9809_v44  ;;  %v12202_v44 = vmov 683565275  }
0x176a   :  { %v3112_v51 = vadd.f32 %v9811_v50, %v9228_v40  ;;  %v3115_v54 = vadd.f32 %v3109_v49, %v12931_v16  ;;  %v12203_v49 = vmov 2475754826  }
0x176c   :  { %3121 = vadd.xlane.f32.xlu0 %v3115_v54  ;;  %v3116_v55 = vadd.f32 %v3112_v51, %v12933_v13 }
0x176e   :  { %3123 = vadd.xlane.f32.xlu1 %v3116_v55 }
0x177f   :  { %3250 = vperm.xlu1 %10812, %v3241_v41  }
0x1782   :  { %3245 = vperm.xlu0 %10811, %v3240_v59  }
0x17f9   :  { %v3122_v60 = vpop.xlane.xlu0 %3121 }
0x17fa   :  { %v3125_v63 = vmul.f32 0.0078125, %v3122_v60 }
0x17fb   :  { %v3124_v0 = vpop.xlane.xlu1 %3123 }
0x17fc   :  { %v12949_v3 = vsub.f32 %v3115_v54, %v3125_v63  ;;  %v3126_v4 = vmul.f32 0.0078125, %v3124_v0  ;;  %v12204_v54 = vmov 2131351028  }
0x17fe   :  { %v12951_v5 = vsub.f32 %v3116_v55, %v3126_v4  ;;  %v3129_v16 = vmul.f32 %v12949_v3, %v12949_v3 }
0x17ff   :  { %v12962_v53 = vpop.permute.xlu1 %3250 }
0x1800   :  { %3131 = vadd.xlane.f32.xlu1 %v3129_v16  ;;  %v3130_v13 = vmul.f32 %v12951_v5, %v12951_v5  ;;  %v3260_v10 = vmul.f32 %v9248_v7, %v12962_v53 }
0x1801   :  { %v12957_v6 = vpop.permute.xlu0 %3245 }
0x1802   :  { %3133 = vadd.xlane.f32.xlu0 %v3130_v13  ;;  %v3259_v8 = vmul.f32 %v9248_v7, %v12957_v6  ;;  %v12968_v12 = vadd.f32 %v9249_v9, %v3260_v10 }
0x1804   :  { %v12964_v52 = vadd.f32 %v9249_v9, %v3259_v8  ;;  %v3377_v20 = vand.u32 2139095040, %v12968_v12  ;;  %v3374_v63 = vand.u32 2147483647, %v12968_v12 }
0x1806   :  { %v3273_v11 = vand.u32 2139095040, %v12964_v52  ;;  %v3378_v21 = vshrl.u32 %v3377_v20, 23  ;;  %v3270_v47 = vand.u32 2147483647, %v12964_v52 }
0x1808   :  { %v3274_v14 = vshrl.u32 %v3273_v11, 23  ;;  %v9254_v25 = vadd.s32 4294967169, %v3378_v21  ;;  %v3277_v42 = vand.u32 8388607, %v3270_v47 }
0x180a   :  { %v9250_v17 = vadd.s32 4294967169, %v3274_v14  ;;  %v3384_v26 = vadd.s32 1, %v9254_v25  ;;  %v3278_v4 = vor.u32 8388608, %v3277_v42 }
0x180c   :  { %v3280_v24 = vadd.s32 1, %v9250_v17  ;;  %vm3385_vm8 = vcmp.gt.s32.totalorder %v3384_v26, 0  ;;  %v3318_v42 = vshll.u32 %v3278_v4, 8 }
0x180d   :  { %v3386_v29 = vsel %vm3385_vm8, %v3384_v26, 0 }
0x180e   :  { %vm3281_vm4 = vcmp.gt.s32.totalorder %v3280_v24, 0  ;;  %v3388_v35 = vand.u32 31, %v3386_v29  ;;  %v12988_v16 = vshrl.u32 %v3386_v29, 5 }
0x180f   :  { %v3282_v27 = vsel %vm3281_vm4, %v3280_v24, 0 }
0x1810   :  { %v3284_v15 = vand.u32 31, %v3282_v27  ;;  %v12975_v23 = vshrl.u32 %v3282_v27, 5  ;;  %v12980_v43 = vsub.s32 32, %v3388_v35  ;;  %v3391_v13 = vshll.u32 %v12202_v44, %v3388_v35 }
0x1811   :  { %v3400_v7 = vshll.u32 %v12199_v48, %v3388_v35  ;;  %v3403_v8 = vshll.u32 %v12200_v37, %v3388_v35  ;;  %v3394_v24 = vshll.u32 %v12203_v49, %v3388_v35  ;;  %v3381_v27 = vand.u32 8388607, %v3374_v63 }
0x1812   :  { %v12971_v28 = vsub.s32 32, %v3284_v15  ;;  %v3296_v36 = vshll.u32 %v12199_v48, %v3284_v15  ;;  %v3299_v38 = vshll.u32 %v12200_v37, %v3284_v15  ;;  %v3287_v46 = vshll.u32 %v12202_v44, %v3284_v15 }
0x1813   :  { %v3290_v51 = vshll.u32 %v12203_v49, %v3284_v15  ;;  %v3293_v41 = vshll.u32 %v12204_v54, %v3284_v15  ;;  %vm3305_vm9 = vcmp.lt.s32.totalorder %v12975_v23, 4  ;;  %v3401_v9 = vshrl.u32 %v12200_v37, %v12980_v43 }
0x1814   :  { %v3297_v22 = vshrl.u32 %v12200_v37, %v12971_v28  ;;  %v3300_v40 = vshrl.u32 %v12201_v39, %v12971_v28  ;;  %v3288_v50 = vshrl.u32 %v12203_v49, %v12971_v28  ;;  %v3291_v55 = vshrl.u32 %v12204_v54, %v12971_v28 }
0x1815   :  { %v3294_v59 = vshrl.u32 %v12199_v48, %v12971_v28  ;;  %v3404_v20 = vshrl.u32 %v12201_v39, %v12980_v43  ;;  %vm3302_vm11 = vcmp.lt.s32.totalorder %v12975_v23, 1  ;;  %vm3304_vm12 = vcmp.lt.s32.totalorder %v12975_v23, 3 }
0x1816   :  { %v3298_v60 = vor.u32 %v3297_v22, %v3296_v36  ;;  %v3301_v0 = vor.u32 %v3300_v40, %v3299_v38  ;;  %v3289_v10 = vor.u32 %v3288_v50, %v3287_v46  ;;  %v3292_v11 = vor.u32 %v3291_v55, %v3290_v51 }
0x1817   :  { %v3295_v14 = vor.u32 %v3294_v59, %v3293_v41  ;;  %v3392_v21 = vshrl.u32 %v12203_v49, %v12980_v43  ;;  %v3395_v25 = vshrl.u32 %v12204_v54, %v12980_v43  ;;  %v3397_v15 = vshll.u32 %v12204_v54, %v3388_v35 }
0x1818   :  { %v3311_v17 = vsel %vm3305_vm9, %v3298_v60, 920167782  ;;  %v3315_v26 = vsel %vm3305_vm9, %v3301_v0, 1326507024  ;;  %v3398_v29 = vshrl.u32 %v12199_v48, %v12980_v43  ;;  %v3402_v36 = vor.u32 %v3401_v9, %v3400_v7 }
0x1819   :  { %vm3303_vm13 = vcmp.lt.s32.totalorder %v12975_v23, 2  ;;  %v3310_v37 = vsel %vm3302_vm11, %v3289_v10, %v3292_v11  ;;  %v3312_v22 = vsel %vm3304_vm12, %v3295_v14, %v3311_v17  ;;  %v3405_v38 = vor.u32 %v3404_v20, %v3403_v8 }
0x181a   :  { %vm3409_vm14 = vcmp.lt.s32.totalorder %v12988_v16, 4  ;;  %v3314_v39 = vsel %vm3302_vm11, %v3292_v11, %v3295_v14  ;;  %v3316_v35 = vsel %vm3304_vm12, %v3298_v60, %v3315_v26  ;;  %v3393_v40 = vor.u32 %v3392_v21, %v3391_v13 }
0x181b   :  { %v3396_v48 = vor.u32 %v3395_v25, %v3394_v24  ;;  %v3399_v46 = vor.u32 %v3398_v29, %v3397_v15  ;;  %vm3406_vm15 = vcmp.lt.s32.totalorder %v12988_v16, 1  ;;  %v3313_v49 = vsel %vm3303_vm13, %v3310_v37, %v3312_v22 }
0x181c   :  { %vm3408_vm0 = vcmp.lt.s32.totalorder %v12988_v16, 3  ;;  %v3415_v50 = vsel %vm3409_vm14, %v3402_v36, 920167782  ;;  %v3317_v51 = vsel %vm3303_vm13, %v3314_v39, %v3316_v35  ;;  %v3382_v54 = vor.u32 8388608, %v3381_v27 }
0x181d   :  { %v3419_v55 = vsel %vm3409_vm14, %v3405_v38, 1326507024  ;;  %vm3407_vm2 = vcmp.lt.s32.totalorder %v12988_v16, 2  ;;  %v3414_v41 = vsel %vm3406_vm15, %v3393_v40, %v3396_v48  ;;  %v3416_v0 = vsel %vm3408_vm0, %v3399_v46, %v3415_v50 }
0x181e   :  { %v13027_v59 = vmul.u32.u64.low %v3318_v42, %v3313_v49  ;;  %v13028_v60 = vmul.u32.u64.high %v3318_v42, %v3313_v49, %v13027_v59  ;;  %v3286_v4 = vshrl.u32 %v12202_v44, %v12971_v28  ;;  %v3418_v8 = vsel %vm3406_vm15, %v3396_v48, %v3399_v46 }
0x181f   :  { %v13034_v13 = vmul.u32.u64.low %v3318_v42, %v3317_v51  ;;  %v13035_v7 = vmul.u32.u64.high %v3318_v42, %v3317_v51, %v13034_v13  ;;  %v3420_v9 = vsel %vm3408_vm0, %v3402_v36, %v3419_v55  ;;  %v3307_v20 = vsel %vm3305_vm9, %v3295_v14, 2102212464 }
0x1820   :  { %v3422_v17 = vshll.u32 %v3382_v54, 8  ;;  %v3417_v21 = vsel %vm3407_vm2, %v3414_v41, %v3416_v0  ;;  %v3421_v24 = vsel %vm3407_vm2, %v3418_v8, %v3420_v9  ;;  %v3306_v28 = vsel %vm3302_vm11, %v3286_v4, %v3289_v10 }
0x1821   :  { %v3308_v25 = vsel %vm3304_vm12, %v3292_v11, %v3307_v20  ;;  %v3390_v26 = vshrl.u32 %v12202_v44, %v12980_v43  ;;  %v3328_v37 = vadd.s32 1, %v13028_v60  ;;  %v3411_v10 = vsel %vm3409_vm14, %v3399_v46, 2102212464 }
0x1822   :  { %v13053_v27 = vmul.u32.u64.low %v3422_v17, %v3417_v21  ;;  %v13054_v15 = vmul.u32.u64.high %v3422_v17, %v3417_v21, %v13053_v27  ;;  %v13056_v14 = vmul.u32.u64.low %v3422_v17, %v3421_v24  ;;  %v13057_v29 = vmul.u32.u64.high %v3422_v17, %v3421_v24, %v13056_v14 }
0x1823   :  { %v3309_v36 = vsel %vm3303_vm13, %v3306_v28, %v3308_v25  ;;  %vm3327_vm5 = vc.u32 %v13035_v7, %v13027_v59  ;;  %v3410_v43 = vsel %vm3406_vm15, %v3390_v26, %v3393_v40  ;;  %v3412_v44 = vsel %vm3408_vm0, %v3396_v48, %v3411_v10 }
0x1824   :  { %v3325_v11 = vmul.u32 %v3318_v42, %v3309_v36  ;;  %v3329_v22 = vsel %vm3327_vm5, %v3328_v37, %v13028_v60  ;;  %v3413_v23 = vsel %vm3407_vm2, %v3410_v43, %v3412_v44  ;;  %v3432_v38 = vadd.s32 1, %v13054_v15 }
0x1825   :  { %vm3431_vm6 = vc.u32 %v13057_v29, %v13053_v27  ;;  %v3429_v35 = vmul.u32 %v3422_v17, %v3413_v23  ;;  %v3326_v28 = vadd.s32 %v13027_v59, %v13035_v7  ;;  %v3430_v10 = vadd.s32 %v13053_v27, %v13057_v29 }
0x1826   :  { %v3330_v39 = vadd.s32 %v3329_v22, %v3325_v11  ;;  %v3433_v46 = vsel %vm3431_vm6, %v3432_v38, %v13054_v15  ;;  %vm3272_vm9 = vcmp.lt.s32.totalorder %v12964_v52, 0  ;;  %vm13083_vm11 = vcmp.le.f32.partialorder %v3270_v47, 0.7853982 }
0x1827   :  { %v3434_v49 = vadd.s32 %v3433_v46, %v3429_v35  ;;  %vm3376_vm12 = vcmp.lt.s32.totalorder %v12968_v12, 0  ;;  %vm13099_vm13 = vcmp.le.f32.partialorder %v3374_v63, 0.7853982  ;;  %vm3497_vm2 = vcmask 1042432  }
0x1828   :  { %v3331_v42 = vadd.s32 536870912, %v3330_v39 }
0x1829   :  { %v3435_v40 = vadd.s32 536870912, %v3434_v49 }
0x182a   :  { %v3332_v50 = vshrl.u32 %v3331_v42, 30 }
0x182b   :  { %v13075_v54 = vshrl.u32 %v3435_v40, 30 }
0x182c   :  { %v3333_v51 = vshll.u32 %v3332_v50, 30 }
0x182d   :  { %v3437_v55 = vshll.u32 %v13075_v54, 30 }
0x182e   :  { %v3334_v48 = vsub.s32 %v3330_v39, %v3333_v51 }
0x182f   :  { %v3438_v41 = vsub.s32 %v3434_v49, %v3437_v55 }
0x1830   :  { %v3336_v16 = vsub.s32 0, %v3334_v48 }
0x1831   :  { %v3440_v0 = vsub.s32 0, %v3438_v41 }
0x1832   :  { %v9251_v60 = vmin.u32 %v3336_v16, %v3334_v48 }
0x1833   :  { %v9255_v13 = vmin.u32 %v3440_v0, %v3438_v41 }
0x1834   :  { %v3338_v4 = vclz %v9251_v60 }
0x1835   :  { %v3442_v9 = vclz %v9255_v13 }
0x1836   :  { %v9252_v8 = vadd.s32 4294967294, %v3338_v4 }
0x1837   :  { %v9256_v20 = vadd.s32 4294967294, %v3442_v9 }
0x1838   :  { %vm9253_vm4 = vcmp.lt.s32.totalorder %v9252_v8, 0 }
0x1839   :  { %v3341_v17 = vsel %vm9253_vm4, 0, %v9252_v8  ;;  %vm9257_vm8 = vcmp.lt.s32.totalorder %v9256_v20, 0  ;;  %v3356_v8 = vsub.s32 4, %v3332_v50  ;;  %vm13753_vm4 = vcmask 130048  }
0x183a   :  { %v3346_v21 = vsub.s32 4294967266, %v3341_v17  ;;  %v3445_v24 = vsel %vm9257_vm8, 0, %v9256_v20  ;;  %v3342_v25 = vsub.s32 32, %v3341_v17  ;;  %v3343_v14 = vshll.u32 %v3334_v48, %v3341_v17  ;;  %v10975_v17 = vld [vmem:[#allocation23 + $0x4] ss:$12 sps:$4 sm:$0xff]  }
0x183b   :  { %v3450_v15 = vsub.s32 4294967266, %v3445_v24  ;;  %v3446_v11 = vsub.s32 32, %v3445_v24  ;;  %v3447_v23 = vshll.u32 %v3438_v41, %v3445_v24  ;;  %v3357_v20 = vsel %vm3272_vm9, %v3356_v8, %v3332_v50  ;;  %v9245_v50 = vld [vmem:[#allocation17 + $0x1] ss:$0 sm:$0xff] }
0x183c   :  { %v3347_v26 = vadd.s32 127, %v3346_v21  ;;  %v3344_v36 = vshrl.u32 %v3326_v28, %v3342_v25  ;;  %v3161_v21 = vadd.s32 1, %v12649_v56  ;;  %v3359_v24 = vsel %vm13083_vm11, 0, %v3357_v20  ;;  %v3479_v41 = vld [vmem:[%s13812_s0 + $0x8] sm:$0xff] }
0x183d   :  { %v3451_v43 = vadd.s32 127, %v3450_v15  ;;  %v3448_v38 = vshrl.u32 %v3430_v10, %v3446_v11  ;;  %v3460_v28 = vsub.s32 4, %v13075_v54  ;;  %v3159_v15 = vmul.u32 8, %v12649_v56 }
0x183e   :  { %v3348_v37 = vshll.u32 %v3347_v26, 23  ;;  %v3345_v44 = vor.u32 %v3344_v36, %v3343_v14  ;;  %v3162_v14 = vmul.u32 8, %v3161_v21  ;;  %v3363_v36 = vadd.s32 3, %v3359_v24  ;;  %v10973_v21 = vld [vmem:[#allocation23] ss:$12 sps:$4 sm:$0xff]  }
0x183f   :  { %v3452_v39 = vshll.u32 %v3451_v43, 23  ;;  %v3449_v42 = vor.u32 %v3448_v38, %v3447_v23  ;;  %v3461_v10 = vsel %vm3376_vm12, %v3460_v28, %v13075_v54  ;;  %vm13117_vm14 = vcmp.ge.s32.totalorder %v12651_v57, %v3159_v15  ;;  %v10976_v24 = vld [vmem:[#allocation23 + $0x8] ss:$12 sps:$4 sm:$0xff]   ;;  %v10984_v15 = vld [vmem:[#allocation23 + $0x38] ss:$12 sps:$4 sm:$0xff]  }
0x1840   :  { %v3349_v22 = vor.u32 4788187, %v3348_v37  ;;  %v3352_v46 = vcvt.s32.f32 %v3345_v44  ;;  %vm13122_vm15 = vcmp.lt.s32.totalorder %v12651_v57, %v3162_v14  ;;  %v3364_v54 = vand.u32 3, %v3363_v36  ;;  %v3480_v57 = vld [vmem:[%s13807_s8] sm:$0x7]  ;;  %10331 = vmatpush3.bf16.msra.mxu1 %v10976_v24 }
0x1841   :  { %v3453_v49 = vor.u32 4788187, %v3452_v39  ;;  %v3456_v40 = vcvt.s32.f32 %v3449_v42  ;;  %vm3164_vm0 = vmand %vm13117_vm14, %vm13122_vm15  ;;  %vm3490_vm8 = vcmask 23552   ;;  %v10979_v28 = vld [vmem:[#allocation23 + $0x1c] ss:$12 sps:$4 sm:$0xff]   ;;  %10332 = vmatprep.subr.bf16.mxu1 %v12194_v33 }
0x1842   :  { %v3350_v35 = vand.u32 2147483647, %v3349_v22  ;;  %v9246_v22 = vld [vmem:[#allocation18 + $0x1] ss:$0 sm:$0xff]  ;;  %vm3366_vm5 = vcmp.eq.s32.totalorder %v3364_v54, 0  ;;  %vm3369_vm6 = vcmp.eq.s32.totalorder %v3364_v54, 2 }
0x1843   :  { %v3454_v7 = vand.u32 2147483647, %v3453_v49  ;;  %v10985_v14 = vld [vmem:[#allocation23 + $0x48] ss:$12 sps:$4 sm:$0xff]   ;;  %v10988_v36 = vld [vmem:[#allocation23 + $0x50] ss:$12 sps:$4 sm:$0xff]  }
0x1844   :  { %v3353_v59 = vmul.f32 %v3352_v46, %v3350_v35  ;;  %v11365_v23 = vld [vmem:[#allocation30 + $0x24] ss:$8 sps:$4 sm:$0xff]   ;;  %v11368_v39 = vld [vmem:[#allocation30 + $0x34] ss:$8 sps:$4 sm:$0xff]  }
0x1845   :  { %v3457_v27 = vmul.f32 %v3456_v40, %v3454_v7 }
0x1846   :  { %v3354_v51 = vxor.u32 2147483648, %v3353_v59 }
0x1847   :  { %v3458_v13 = vxor.u32 2147483648, %v3457_v27 }
0x1848   :  { %v3355_v0 = vsel %vm3272_vm9, %v3354_v51, %v3353_v59  ;;  %v3165_v51 = vsel %vm3164_vm0, 0.125, %v12194_v33  ;;  %vm3365_vm9 = vcmp.lt.s32.totalorder %v3364_v54, 2  ;;  %v11000_v54 = vld [vmem:[#allocation23 + $0x98] ss:$12 sps:$4 sm:$0xff]  }
0x1849   :  { %v3358_v9 = vsel %vm13083_vm11, %v12964_v52, %v3355_v0  ;;  %v3459_v47 = vsel %vm3376_vm12, %v3458_v13, %v3457_v27  ;;  %vm3584_vm11 = vcmask 1046528   ;;  %vm3362_vm12 = vweird.f32 %v12964_v52 }
0x184a   :  { %v3462_v25 = vsel %vm13099_vm13, %v12968_v12, %v3459_v47 }
0x188d   :  { %v3132_v48 = vpop.xlane.xlu1 %3131 }
0x188e   :  { %v3135_v55 = vmul.f32 0.0078125, %v3132_v48 }
0x188f   :  { %v3134_v29 = vpop.xlane.xlu0 %3133 }
0x1890   :  { %v3137_v16 = vadd.f32 1e-05, %v3135_v55  ;;  %v3136_v60 = vmul.f32 0.0078125, %v3134_v29  ;;  %v3478_v55 = vld [vmem:[%s13812_s0] sm:$0xff] }
0x1892   :  { %11441 = vrsqrt.f32 %v3137_v16  ;;  %v3138_v4 = vadd.f32 1e-05, %v3136_v60  ;;  %v3576_v60 = vld [vmem:[%s13813_s20] sm:$0x7f] }
0x1894   :  { %11443 = vrsqrt.f32 %v3138_v4 }
0x1895   :  { %11445 = vcosq.f32 %v3358_v9 }
0x1896   :  { %11447 = vsinq.f32 %v3358_v9 }
0x1897   :  { %11449 = vcosq.f32 %v3462_v25 }
0x1898   :  { %11451 = vsinq.f32 %v3462_v25  ;;  %v10977_v25 = vld [vmem:[#allocation23 + $0x18] ss:$12 sps:$4 sm:$0xff]  }
0x189c   :  { %v11442_v26 = vpop.eup %11441 }
0x189d   :  { %v3141_v63 = vmul.f32 %v11442_v26, %v12949_v3  ;;  %v10980_v26 = vld [vmem:[#allocation23 + $0x20] ss:$12 sps:$4 sm:$0xff]  }
0x189e   :  { %v11444_v37 = vpop.eup %11443  ;;  %10333 = vmatpush3.bf16.msra.mxu1 %v10980_v26 }
0x189f   :  { %v3142_v11 = vmul.f32 %v11444_v37, %v12951_v5  ;;  %v3149_v43 = vmul.f32 %v9245_v50, %v3141_v63  ;;  %v11446_v44 = vpop.eup %11445  ;;  %v3463_v5 = vsel %vm13099_vm13, 0, %v3461_v10  ;;  %vm3577_vm13 = vcmask 56320   ;;  %10334 = vmatprep.subr.bf16.mxu1 %v12194_v33  ;;  %v10987_v63 = vld [vmem:[#allocation23 + $0x4c] ss:$12 sps:$4 sm:$0xff]   ;;  %v10991_v37 = vld [vmem:[#allocation23 + $0x64] ss:$12 sps:$4 sm:$0xff]  }
0x18a0   :  { %v11448_v3 = vpop.eup %11447  ;;  %v3370_v49 = vxor.u32 2147483648, %v11446_v44  ;;  %v3467_v59 = vadd.s32 3, %v3463_v5  ;;  %v10989_v10 = vld [vmem:[#allocation23 + $0x60] ss:$12 sps:$4 sm:$0xff]  }
0x18a1   :  { %v3150_v38 = vmul.f32 %v9245_v50, %v3142_v11  ;;  %v3157_v35 = vadd.f32 %v9246_v22, %v3149_v43  ;;  %v3367_v42 = vxor.u32 2147483648, %v11448_v3  ;;  %v11450_v40 = vpop.eup %11449  ;;  %v10981_v50 = vld [vmem:[#allocation23 + $0x30] ss:$12 sps:$4 sm:$0xff]   ;;  %v10992_v11 = vld [vmem:[#allocation23 + $0x68] ss:$12 sps:$4 sm:$0xff]  }
0x18a2   :  { %v11452_v48 = vpop.eup %11451  ;;  %v3371_v29 = vsel %vm3369_vm6, %v3370_v49, %v11448_v3  ;;  %v3468_v16 = vand.u32 3, %v3467_v59  ;;  %v3474_v13 = vxor.u32 2147483648, %v11450_v40  ;;  %10335 = vmatpush3.bf16.msra.mxu1 %v10984_v15  ;;  %v10995_v43 = vld [vmem:[#allocation23 + $0x7c] ss:$12 sps:$4 sm:$0xff]   ;;  %v10999_v3 = vld [vmem:[#allocation23 + $0x94] ss:$12 sps:$4 sm:$0xff]  }
0x18a3   :  { %v3158_v46 = vadd.f32 %v9246_v22, %v3150_v38  ;;  %v3368_v27 = vsel %vm3366_vm5, %v11446_v44, %v3367_v42  ;;  %v3471_v4 = vxor.u32 2147483648, %v11452_v48  ;;  %10336 = vmatprep.subr.bf16.mxu1 %v12194_v33  ;;  %v10993_v44 = vld [vmem:[#allocation23 + $0x78] ss:$12 sps:$4 sm:$0xff]   ;;  %v10996_v22 = vld [vmem:[#allocation23 + $0x80] ss:$12 sps:$4 sm:$0xff]  }
0x18a4   :  { %v3372_v0 = vsel %vm3365_vm9, %v3368_v27, %v3371_v29  ;;  %vm3470_vm5 = vcmp.eq.s32.totalorder %v3468_v16, 0  ;;  %vm3473_vm6 = vcmp.eq.s32.totalorder %v3468_v16, 2  ;;  %v10997_v38 = vld [vmem:[#allocation23 + $0x90] ss:$12 sps:$4 sm:$0xff]   ;;  %v11003_v5 = vld [vmem:[#allocation23 + $0xac] ss:$12 sps:$4 sm:$0xff]  }
0x18a5   :  { %v10668_v7 = vpack.c.bf16 %v3158_v46, %v3157_v35  ;;  %v3373_v8 = vsel %vm3362_vm12, nan, %v3372_v0  ;;  %v3472_v9 = vsel %vm3470_vm5, %v11450_v40, %v3471_v4  ;;  %v3475_v47 = vsel %vm3473_vm6, %v3474_v13, %v11452_v48  ;;  %v11001_v35 = vld [vmem:[#allocation23 + $0xa8] ss:$12 sps:$4 sm:$0xff]   ;;  %v11004_v46 = vld [vmem:[#allocation23 + $0xb0] ss:$12 sps:$4 sm:$0xff]  }
0x18a6   :  { %10337 = vmatpush3.bf16.msra.mxu1 %v10988_v36  ;;  %v9258_v59 = vld [vmem:[#allocation20] ss:$0 sm:$0xff] }
0x18a7   :  { %10669 = vmatpush3.bf16.msra.mxu0 %v10668_v7  ;;  %10338 = vmatprep.subr.bf16.mxu1 %v12194_v33  ;;  %v3489_v7 = vmul.f32 %v9258_v59, %v12962_v53 }
0x18a8   :  { %10320 = vmatprep.subr.msk.mxu0 %vm3497_vm2, %v3480_v57 }
0x18aa   :  { %10318 = vmatmul.mubr.msk.f32.vlgmr.msra.gmra.mrb[40].mxu0 %vm13753_vm4, %v3165_v51  ;;  %vm3466_vm4 = vweird.f32 %v12968_v12  ;;  %v10983_v12 = vld [vmem:[#allocation23 + $0x34] ss:$12 sps:$4 sm:$0xff]   ;;  %10339 = vmatpush3.bf16.msra.mxu1 %v10992_v11  ;;  %v9265_v51 = vld [vmem:[#allocation21] ss:$0 sm:$0xff] }
0x18ab   :  { %10321 = vmatpush3.msk.msra.mxu0 %vm3497_vm2, %v3480_v57  ;;  %10322 = vmatprep.mubr.msk.f32.mxu0 %vm3490_vm8, %v3478_v55  ;;  %vm3469_vm2 = vcmp.lt.s32.totalorder %v3468_v16, 2  ;;  %v3488_v57 = vmul.f32 %v9258_v59, %v12957_v6 }
0x18ac   :  { %10325 = vmatprep.subr.msk.mxu0 %vm3584_vm11, %v3576_v60  ;;  %v3476_v52 = vsel %vm3469_vm2, %v3472_v9, %v3475_v47  ;;  %10340 = vmatprep.subr.bf16.mxu1 %v12194_v33 }
0x18ad   :  { %v3477_v20 = vsel %vm3466_vm4, nan, %v3476_v52 }
0x18ae   :  { %10323 = vmatmul.mubr.msk.f32.vlgmr.msra.gmra.mrb[42].mxu0 %vm3490_vm8, %v3479_v41  ;;  %10341 = vmatpush3.bf16.msra.mxu1 %v10996_v22 }
0x18af   :  { %10327 = vmatprep.mubr.msk.f32.mxu0 %vm3577_vm13, %v3373_v8  ;;  %10326 = vmatpush3.msk.msra.mxu0 %vm3584_vm11, %v3576_v60 }
0x18b0   :  { %3871 = vmatprep.subr.bf16.mxu0 %v10975_v17  ;;  %10342 = vmatprep.subr.bf16.mxu1 %v12194_v33 }
0x18b2   :  { %10343 = vmatpush3.bf16.msra.mxu1 %v11000_v54 }
0x18b3   :  { %10344 = vmatprep.subr.bf16.mxu1 %v12194_v33 }
0x18b6   :  { %10328 = vmatmul.mubr.msk.f32.vlgmr.msra.gmra.mrb[42].mxu0 %vm3577_vm13, %v3477_v20  ;;  %10345 = vmatpush3.bf16.msra.mxu1 %v11004_v46 }
0x18b7   :  { %3903 = vmatprep.mubr.bf16.mxu0 %v12195_v45  ;;  %3872 = vmatpush1.bf16.msra.mxu0 %v10973_v21 }
0x18b8   :  { %3873 = vmatprep.subr.bf16.mxu0 %v10979_v28  ;;  %10670 = vmatprep.subr.bf16.mxu1 %v12197_v30 }
0x18bb   :  { %3874 = vmatpush1.bf16.msra.mxu0 %v10977_v25 }
0x18bc   :  { %3875 = vmatprep.subr.bf16.mxu0 %v10983_v12 }
0x18bf   :  { %3876 = vmatpush1.bf16.msra.mxu0 %v10981_v50  ;;  %v3726_v50 = vld [vmem:[%s13814_s16] sm:$0x7] }
0x18c0   :  { %3877 = vmatprep.subr.bf16.mxu0 %v10987_v63  ;;  %v3735_v15 = vrot.slane %v3726_v50, %v12654_v58  ;;  %v3739_v22 = vrot.slane %v3726_v50, %v12665_v62 }
0x18c3   :  { %3878 = vmatpush1.bf16.msra.mxu0 %v10985_v14 }
0x18c4   :  { %3879 = vmatprep.subr.bf16.mxu0 %v10991_v37 }
0x18c7   :  { %3880 = vmatpush1.bf16.msra.mxu0 %v10989_v10 }
0x18c8   :  { %3881 = vmatprep.subr.bf16.mxu0 %v10995_v43 }
0x18cb   :  { %3882 = vmatpush1.bf16.msra.mxu0 %v10993_v44  ;;  %v3731_v44 = vrot.slane %v3726_v50, %v12662_v61 }
0x18cc   :  { %3883 = vmatprep.subr.bf16.mxu0 %v10999_v3 }
0x18cf   :  { %3884 = vmatpush1.bf16.msra.mxu0 %v10997_v38 }
0x18d0   :  { %3885 = vmatprep.subr.bf16.mxu0 %v11003_v5 }
0x18d3   :  { %3886 = vmatpush1.bf16.msra.mxu0 %v11001_v35 }
0x18d4   :  { %10350 = vmatprep.subr.bf16.mxu0 %v12194_v33 }
0x197d   :  { %v13161_v42 = vpop.f32.mrb[40].mxu0 }
0x197e   :  { %v10319_v49 = vpop.f32.mrb[41].mxu0 }
0x1989   :  { %v10329_v40 = vpop.f32.mrb[42].mxu0 }
0x198a   :  { %v10709_v48 = vadd.f32 %v10329_v40, %v3489_v7  ;;  %v3654_v55 = vpop.f32.mrb[43].mxu0 }
0x198b   :  { %v10710_v27 = vadd.f32 %v3654_v55, %v3488_v57 }
0x198c   :  { %v3673_v29 = vadd.f32 %v10709_v48, %v9265_v51 }
0x198d   :  { %v3672_v16 = vadd.f32 %v10710_v27, %v9265_v51 }
0x198e   :  { %v3677_v60 = vmul.f32 0.044715, %v3673_v29  ;;  %v3675_v17 = vmul.f32 0.5, %v3673_v29 }
0x198f   :  { %v3676_v41 = vmul.f32 0.044715, %v3672_v16  ;;  %v3674_v24 = vmul.f32 0.5, %v3672_v16 }
0x1990   :  { %v3679_v0 = vmul.f32 %v3677_v60, %v3673_v29 }
0x1991   :  { %v3678_v4 = vmul.f32 %v3676_v41, %v3672_v16 }
0x1992   :  { %v3681_v13 = vmul.f32 %v3679_v0, %v3673_v29 }
0x1993   :  { %v3680_v8 = vmul.f32 %v3678_v4, %v3672_v16  ;;  %v3692_v4 = vld [vmem:[%s13815_s25] sm:$0x3] }
0x1994   :  { %v3683_v9 = vadd.f32 %v3681_v13, %v3673_v29  ;;  %v13205_v13 = vrot.slane %v3692_v4, %v12662_v61 }
0x1995   :  { %v3682_v47 = vadd.f32 %v3680_v8, %v3672_v16 }
0x1996   :  { %v3685_v52 = vmul.f32 0.7978846, %v3683_v9 }
0x1997   :  { %v3684_v20 = vmul.f32 0.7978846, %v3682_v47 }
0x1998   :  { %11453 = vtanh.f32 %v3685_v52 }
0x1999   :  { %11455 = vtanh.f32 %v3684_v20 }
0x19a2   :  { %v11454_v6 = vpop.eup %11453 }
0x19a3   :  { %v11456_v53 = vpop.eup %11455  ;;  %v3689_v21 = vadd.f32 1.0, %v11454_v6 }
0x19a4   :  { %v3688_v28 = vadd.f32 1.0, %v11456_v53 }
0x19a5   :  { %v13165_v25 = vmul.f32 %v3689_v21, %v3675_v17 }
0x19a6   :  { %v13167_v26 = vmul.f32 %v3688_v28, %v3674_v24 }
0x19a8   :  { %v3693_v12 = vpack.c.bf16 %v13165_v25, %v13167_v26 }
0x19aa   :  { %3904 = vmatmul.mubr.bf16.vlgmr.msra.gmra.mrb[44].mxu0 %v3693_v12  ;;  %10347 = vmatmul.mubr.bf16.vlgmr.msra.gmra.mrb[44].mxu1 %v3693_v12 }
0x19ab   :  { %10354 = vmatprep.mubr.msk.bf16.mxu0 %vm12196_vm1, %v12194_v33  ;;  %10672 = vmatpush3.bf16.msk.msra.mxu1 %vm12710_vm3, %v12198_v32 }
0x19ac   :  { %10673 = vmatprep.subr.bf16.mxu1 %v12197_v30  ;;  %10366 = vmatprep.mubr.msk.f32.mxu1 %vm12196_vm1, %v12194_v33 }
0x19af   :  { %10675 = vmatpush3.bf16.msk.msra.mxu1 %vm12724_vm7, %v12198_v32 }
0x19b0   :  { %10377 = vmatprep.subr.bf16.mxu1 %v12194_v33 }
0x1a7d   :  { %v3905_v63 = vpop.f32.mrb[44].mxu0  ;;  %v3948_v14 = vpop.f32.mrb[44].mxu1 }
0x1a7e   :  { %v3907_v36 = vpop.f32.mrb[45].mxu0  ;;  %v10348_v37 = vpop.f32.mrb[45].mxu1  ;;  %v3949_v40 = vadd.f32 %v3948_v14, %v3739_v22  ;;  %v3906_v48 = vadd.f32 %v3905_v63, %v3731_v44 }
0x1a7f   :  { %v3908_v10 = vadd.f32 %v3907_v36, %v3735_v15  ;;  %v3909_v11 = vpop.f32.mrb[46].mxu0  ;;  %v3951_v43 = vpop.f32.mrb[46].mxu1 }
0x1a80   :  { %v3911_v3 = vpop.f32.mrb[47].mxu0  ;;  %v10349_v38 = vpop.f32.mrb[47].mxu1  ;;  %v3910_v35 = vadd.f32 %v3909_v11, %v3731_v44  ;;  %v13189_v46 = vadd.f32 %v3951_v43, %v3739_v22  ;;  %v3962_v55 = vmul.f32 %v3949_v40, %v12672_v1  ;;  %v3963_v27 = vmul.f32 %v3949_v40, %v12675_v2 }
0x1a81   :  { %v3956_v54 = vmul.f32 %v3908_v10, %v12672_v1  ;;  %v3957_v5 = vmul.f32 %v3908_v10, %v12675_v2  ;;  %v3912_v49 = vadd.f32 %v3911_v3, %v3735_v15  ;;  %v3958_v7 = vmul.f32 %v3908_v10, %v12691_v18 }
0x1a82   :  { %v3959_v57 = vmul.f32 %v3908_v10, %v12694_v19  ;;  %v3955_v29 = vpack.c.bf16 %v3906_v48, %v3906_v48  ;;  %v3964_v16 = vmul.f32 %v3949_v40, %v12691_v18  ;;  %v3965_v60 = vmul.f32 %v3949_v40, %v12694_v19 }
0x1a83   :  { %v3960_v59 = vpack.c.bf16 %v3957_v5, %v3956_v54  ;;  %v3966_v41 = vpack.c.bf16 %v3963_v27, %v3962_v55  ;;  %v4139_v24 = vmul.f32 %v3912_v49, %v12672_v1  ;;  %v4140_v28 = vmul.f32 %v3912_v49, %v12675_v2 }
0x1a84   :  { %v3961_v51 = vpack.c.bf16 %v3959_v57, %v3958_v7  ;;  %v3967_v0 = vpack.c.bf16 %v3965_v60, %v3964_v16  ;;  %v4141_v15 = vmul.f32 %v3912_v49, %v12691_v18  ;;  %v4142_v63 = vmul.f32 %v3912_v49, %v12694_v19 }
0x1a85   :  { %10351 = vmatpush3.bf16.xpose.msra.mxu0 %v3960_v59  ;;  %v4143_v50 = vpack.c.bf16 %v4140_v28, %v4139_v24  ;;  %v4138_v36 = vpack.c.bf16 %v3910_v35, %v3910_v35  ;;  %v13221_v44 = vrot.slane %v3692_v4, %v12654_v58  ;;  %v4145_v40 = vmul.f32 %v13189_v46, %v12672_v1 }
0x1a86   :  { %10352 = vmatprep.subr.bf16.mxu0 %v12194_v33  ;;  %v4144_v14 = vpack.c.bf16 %v4142_v63, %v4141_v15  ;;  %v4147_v55 = vmul.f32 %v13189_v46, %v12691_v18  ;;  %v4148_v27 = vmul.f32 %v13189_v46, %v12694_v19 }
0x1a88   :  { %v4150_v16 = vpack.c.bf16 %v4148_v27, %v4147_v55 }
0x1a8d   :  { %10353 = vmatpush3.bf16.xpose.msra.mxu0 %v3961_v51  ;;  %v4146_v51 = vmul.f32 %v13189_v46, %v12675_v2  ;;  %v11007_v46 = vld [vmem:[#allocation24 + $0x10] sm:$0xff]  }
0x1a8e   :  { %10369 = vmatprep.subr.bf16.mxu0 %v12194_v33 }
0x1a94   :  { %10355 = vmatmul.mubr.bf16.vlgmr.msra.gmra.mrb[48].mxu0 %v3955_v29  ;;  %v4149_v29 = vpack.c.bf16 %v4146_v51, %v4145_v40  ;;  %v11024_v40 = vld [vmem:[#allocation26 + $0x2c] ss:$16 sps:$4 sm:$0xff]   ;;  %v11019_v51 = vld [vmem:[#allocation26 + $0x20] ss:$16 sps:$4 sm:$0xff]  }
0x1a95   :  { %10370 = vmatpush3.bf16.msra.mxu0 %v3966_v41  ;;  %10373 = vmatprep.mubr.msk.bf16.mxu0 %vm12196_vm1, %v12194_v33 }
0x1a96   :  { %10371 = vmatprep.subr.bf16.mxu0 %v12194_v33 }
0x1a99   :  { %10372 = vmatpush3.bf16.msra.mxu0 %v3967_v0 }
0x1a9a   :  { %10676 = vmatprep.subr.bf16.mxu0 %v12197_v30 }
0x1b67   :  { %v4006_v8 = vpop.f32.mrb[48].mxu0 }
0x1b68   :  { %v4007_v9 = vadd.f32 %v4006_v8, %v13205_v13  ;;  %v10356_v47 = vpop.f32.mrb[49].mxu0  ;;  %v11005_v8 = vld [vmem:[#allocation24] sm:$0xff]  }
0x1b69   :  { %v4009_v52 = vpop.f32.mrb[50].mxu0  ;;  %v11008_v47 = vld [vmem:[#allocation24 + $0x18] sm:$0xff]  }
0x1b6a   :  { %v10357_v20 = vpop.f32.mrb[51].mxu0  ;;  %v4012_v6 = vsel %vm1090_vm10, %v4007_v9, -inf  ;;  %v11009_v52 = vld [vmem:[#allocation24 + $0x20] sm:$0xff]  }
0x1b6b   :  { %4013 = vmax.xlane.f32.xlu1 %v4012_v6  ;;  %v11010_v20 = vld [vmem:[#allocation24 + $0x28] sm:$0xff]   ;;  %v11011_v6 = vld [vmem:[#allocation24 + $0x30] sm:$0xff]  }
0x1bf8   :  { %v4014_v53 = vpop.xlane.xlu1 %4013 }
0x1bf9   :  { %v4015_v17 = vsub.f32 %v4007_v9, %v4014_v53  ;;  %v11006_v9 = vld [vmem:[#allocation24 + $0x8] sm:$0xff]  }
0x1bfb   :  { %v4016_v21 = vmul.f32 1.442695, %v4015_v17 }
0x1bfd   :  { %11457 = vpow2.f32 %v4016_v21 }
0x1c07   :  { %v11458_v12 = vpop.eup %11457 }
0x1c08   :  { %10367 = vmatmul.mubr.msk.f32.vlgmr.msra.gmra.mrb[10].mxu1 %vm1090_vm10, %v11458_v12 }
0x1c09   :  { %10378 = vmatpush3.bf16.xpose.msra.mxu1 %v4143_v50  ;;  %10381 = vmatprep.mubr.msk.bf16.mxu1 %vm12196_vm1, %v12194_v33 }
0x1c0a   :  { %10379 = vmatprep.subr.bf16.mxu1 %v12194_v33 }
0x1c11   :  { %10380 = vmatpush3.bf16.xpose.msra.mxu1 %v4144_v14 }
0x1c12   :  { %10404 = vmatprep.subr.bf16.mxu1 %v12194_v33 }
0x1c18   :  { %10382 = vmatmul.mubr.bf16.vlgmr.msra.gmra.mrb[48].mxu1 %v4138_v36 }
0x1c19   :  { %10420 = vmatprep.mubr.msk.bf16.mxu1 %vm12196_vm1, %v12194_v33  ;;  %10405 = vmatpush3.bf16.msra.mxu1 %v11005_v8  ;;  %v11025_v8 = vld [vmem:[#allocation26 + $0x40] ss:$16 sps:$4 sm:$0xff]  }
0x1c1a   :  { %10406 = vmatprep.subr.bf16.mxu1 %v12194_v33 }
0x1c1d   :  { %10407 = vmatpush3.bf16.msra.mxu1 %v11006_v9  ;;  %v11028_v9 = vld [vmem:[#allocation26 + $0x48] ss:$16 sps:$4 sm:$0xff]  }
0x1c1e   :  { %10408 = vmatprep.subr.bf16.mxu1 %v12194_v33 }
0x1c21   :  { %10409 = vmatpush3.bf16.msra.mxu1 %v11007_v46  ;;  %v11033_v46 = vld [vmem:[#allocation26 + $0x64] ss:$16 sps:$4 sm:$0xff]  }
0x1c22   :  { %10410 = vmatprep.subr.bf16.mxu1 %v12194_v33 }
0x1c25   :  { %10411 = vmatpush3.bf16.msra.mxu1 %v11008_v47  ;;  %v11036_v47 = vld [vmem:[#allocation26 + $0x6c] ss:$16 sps:$4 sm:$0xff]  }
0x1c26   :  { %10412 = vmatprep.subr.bf16.mxu1 %v12194_v33 }
0x1c29   :  { %10413 = vmatpush3.bf16.msra.mxu1 %v11009_v52  ;;  %v11031_v52 = vld [vmem:[#allocation26 + $0x60] ss:$16 sps:$4 sm:$0xff]  }
0x1c2a   :  { %10414 = vmatprep.subr.bf16.mxu1 %v12194_v33 }
0x1c2d   :  { %10415 = vmatpush3.bf16.msra.mxu1 %v11010_v20  ;;  %v11034_v20 = vld [vmem:[#allocation26 + $0x68] ss:$16 sps:$4 sm:$0xff]  }
0x1c2e   :  { %10416 = vmatprep.subr.bf16.mxu1 %v12194_v33 }
0x1c31   :  { %10417 = vmatpush3.bf16.msra.mxu1 %v11011_v6  ;;  %v11039_v6 = vld [vmem:[#allocation26 + $0x84] ss:$16 sps:$4 sm:$0xff]  }
0x1c32   :  { %10418 = vmatprep.subr.bf16.mxu1 %v12194_v33 }
0x1cdb   :  { %v4087_v37 = vpop.f32.mrb[10].mxu1 }
0x1cdc   :  { %11459 = vrcp.f32 %v4087_v37  ;;  %v10368_v10 = vpop.f32.mrb[11].mxu1  ;;  %v9302_v37 = vld [vmem:[%s13816_s29] ss:$0 sm:$0xff] }
0x1ce6   :  { %v11460_v11 = vpop.eup %11459 }
0x1ce7   :  { %v4092_v43 = vmul.f32 %v11460_v11, %v11458_v12  ;;  %v11012_v12 = vld [vmem:[#allocation24 + $0x38] sm:$0xff]  }
0x1ce8   :  { %10419 = vmatpush3.bf16.msra.mxu1 %v11012_v12  ;;  %v11043_v12 = vld [vmem:[#allocation26 + $0xa0] ss:$16 sps:$4 sm:$0xff]  }
0x1ce9   :  { %v4093_v22 = vpack.c.bf16 %v4092_v43, %v4092_v43 }
0x1ceb   :  { %v4189_v3 = vpop.f32.mrb[48].mxu1  ;;  %10374 = vmatmul.mubr.msk.bf16.vlgmr.msra.gmra.mrb[52].mxu0 %vm1090_vm10, %v4093_v22 }
0x1cec   :  { %v4190_v38 = vadd.f32 %v4189_v3, %v13221_v44  ;;  %v10383_v54 = vpop.f32.mrb[49].mxu1  ;;  %10678 = vmatpush3.bf16.msk.msra.mxu0 %vm12710_vm3, %v12198_v32  ;;  %10393 = vmatprep.mubr.msk.f32.mxu0 %vm12196_vm1, %v12194_v33 }
0x1ced   :  { %v4192_v5 = vpop.f32.mrb[50].mxu1  ;;  %10679 = vmatprep.subr.bf16.mxu0 %v12197_v30 }
0x1cee   :  { %v10384_v35 = vpop.f32.mrb[51].mxu1  ;;  %v4195_v49 = vsel %vm1090_vm10, %v4190_v38, -inf }
0x1cef   :  { %4196 = vmax.xlane.f32.xlu1 %v4195_v49  ;;  %v11013_v35 = vld [vmem:[#allocation26] ss:$16 sps:$4 sm:$0xff]   ;;  %v11015_v49 = vld [vmem:[#allocation26 + $0x4] ss:$16 sps:$4 sm:$0xff]  }
0x1cf0   :  { %10681 = vmatpush3.bf16.msk.msra.mxu0 %vm12724_vm7, %v12198_v32 }
0x1cf1   :  { %10396 = vmatprep.subr.bf16.mxu0 %v12194_v33 }
0x1d7c   :  { %v4197_v59 = vpop.xlane.xlu1 %4196 }
0x1d7d   :  { %v4198_v7 = vsub.f32 %v4190_v38, %v4197_v59  ;;  %v11016_v59 = vld [vmem:[#allocation26 + $0x8] ss:$16 sps:$4 sm:$0xff]  }
0x1d7f   :  { %v4199_v57 = vmul.f32 1.442695, %v4198_v7  ;;  %v11018_v7 = vld [vmem:[#allocation26 + $0xc] ss:$16 sps:$4 sm:$0xff]  }
0x1d80   :  { %4736 = vmatprep.subr.bf16.mxu1 %v11018_v7  ;;  %v9311_v7 = vld [vmem:[%s13817_s22] ss:$0 sm:$0xff] }
0x1d81   :  { %11461 = vpow2.f32 %v4199_v57  ;;  %v11021_v57 = vld [vmem:[#allocation26 + $0x24] ss:$16 sps:$4 sm:$0xff]  }
0x1d8b   :  { %v11462_v48 = vpop.eup %11461 }
0x1d8c   :  { %10394 = vmatmul.mubr.msk.f32.vlgmr.msra.gmra.mrb[56].mxu0 %vm1090_vm10, %v11462_v48 }
0x1d8d   :  { %10397 = vmatpush3.bf16.msra.mxu0 %v4149_v29  ;;  %10400 = vmatprep.mubr.msk.bf16.mxu0 %vm12196_vm1, %v12194_v33 }
0x1d8e   :  { %10398 = vmatprep.subr.bf16.mxu0 %v12194_v33 }
0x1d91   :  { %10399 = vmatpush3.bf16.msra.mxu0 %v4150_v16 }
0x1d92   :  { %4693 = vmatprep.subr.bf16.mxu0 %v11015_v49 }
0x1dbe   :  { %v4131_v60 = vpop.f32.mrb[52].mxu0 }
0x1dbf   :  { %v10375_v41 = vpop.f32.mrb[53].mxu0 }
0x1dc0   :  { %v4134_v0 = vpop.f32.mrb[54].mxu0 }
0x1dc1   :  { %v10376_v4 = vpop.f32.mrb[55].mxu0  ;;  %v11027_v0 = vld [vmem:[#allocation26 + $0x44] ss:$16 sps:$4 sm:$0xff]  }
0x1dc2   :  { %v11030_v4 = vld [vmem:[#allocation26 + $0x4c] ss:$16 sps:$4 sm:$0xff]  }
0x1e5f   :  { %v4270_v53 = vpop.f32.mrb[56].mxu0 }
0x1e60   :  { %11463 = vrcp.f32 %v4270_v53  ;;  %v10395_v17 = vpop.f32.mrb[57].mxu0  ;;  %v11042_v53 = vld [vmem:[#allocation26 + $0x8c] ss:$16 sps:$4 sm:$0xff]  }
0x1e61   :  { %v11037_v17 = vld [vmem:[#allocation26 + $0x80] ss:$16 sps:$4 sm:$0xff]  }
0x1e6a   :  { %v11464_v21 = vpop.eup %11463 }
0x1e6b   :  { %v4275_v24 = vmul.f32 %v11464_v21, %v11462_v48  ;;  %v11022_v48 = vld [vmem:[#allocation26 + $0x28] ss:$16 sps:$4 sm:$0xff]  }
0x1e6c   :  { %v11040_v21 = vld [vmem:[#allocation26 + $0x88] ss:$16 sps:$4 sm:$0xff]  }
0x1e6d   :  { %v4276_v28 = vpack.c.bf16 %v4275_v24, %v4275_v24  ;;  %v11045_v24 = vld [vmem:[#allocation26 + $0xa4] ss:$16 sps:$4 sm:$0xff]  }
0x1e6f   :  { %10401 = vmatmul.mubr.msk.bf16.vlgmr.msra.gmra.mrb[60].mxu0 %vm1090_vm10, %v4276_v28  ;;  %v11048_v28 = vld [vmem:[#allocation26 + $0xac] ss:$16 sps:$4 sm:$0xff]  }
0x1e70   :  { %4725 = vmatprep.mubr.bf16.mxu0 %v12195_v45  ;;  %4694 = vmatpush1.bf16.msra.mxu0 %v11013_v35 }
0x1e71   :  { %4695 = vmatprep.subr.bf16.mxu0 %v11021_v57 }
0x1e74   :  { %4696 = vmatpush1.bf16.msra.mxu0 %v11019_v51 }
0x1e75   :  { %4697 = vmatprep.subr.bf16.mxu0 %v11027_v0  ;;  %v11063_v0 = vld [vmem:[#allocation27] sm:$0xff]  }
0x1e78   :  { %4698 = vmatpush1.bf16.msra.mxu0 %v11025_v8  ;;  %v11067_v8 = vld [vmem:[#allocation27 + $0x8] sm:$0xff]  }
0x1e79   :  { %4699 = vmatprep.subr.bf16.mxu0 %v11033_v46  ;;  %v11069_v46 = vld [vmem:[#allocation27 + $0x50] sm:$0xff]  }
0x1e7c   :  { %4700 = vmatpush1.bf16.msra.mxu0 %v11031_v52  ;;  %v11071_v52 = vld [vmem:[#allocation27 + $0x10] sm:$0xff]  }
0x1e7d   :  { %4701 = vmatprep.subr.bf16.mxu0 %v11039_v6  ;;  %v11073_v6 = vld [vmem:[#allocation27 + $0x58] sm:$0xff]  }
0x1e80   :  { %4702 = vmatpush1.bf16.msra.mxu0 %v11037_v17  ;;  %v11075_v17 = vld [vmem:[#allocation27 + $0x18] sm:$0xff]  }
0x1e81   :  { %4703 = vmatprep.subr.bf16.mxu0 %v11045_v24  ;;  %v11077_v24 = vld [vmem:[#allocation27 + $0x60] sm:$0xff]  }
0x1e84   :  { %4704 = vmatpush1.bf16.msra.mxu0 %v11043_v12  ;;  %v11079_v12 = vld [vmem:[#allocation27 + $0x20] sm:$0xff]  }
0x1f42   :  { %v4314_v50 = vpop.f32.mrb[60].mxu0 }
0x1f43   :  { %v4323_v15 = vpack.c.bf16 %v4314_v50, %v4131_v60  ;;  %v10402_v63 = vpop.f32.mrb[61].mxu0  ;;  %v11046_v50 = vld [vmem:[#allocation26 + $0xa8] ss:$16 sps:$4 sm:$0xff]  }
0x1f44   :  { %v4317_v14 = vpop.f32.mrb[62].mxu0  ;;  %v11051_v63 = vld [vmem:[#allocation26 + $0xc4] ss:$16 sps:$4 sm:$0xff]  }
0x1f45   :  { %v10403_v36 = vpop.f32.mrb[63].mxu0  ;;  %10421 = vmatmul.mubr.bf16.vlgmr.msra.gmra.mrb[52].mxu1 %v4323_v15  ;;  %v11049_v15 = vld [vmem:[#allocation26 + $0xc0] ss:$16 sps:$4 sm:$0xff]   ;;  %v11052_v14 = vld [vmem:[#allocation26 + $0xc8] ss:$16 sps:$4 sm:$0xff]   ;;  %4705 = vmatprep.subr.bf16.mxu0 %v11051_v63 }
0x1f46   :  { %4768 = vmatprep.mubr.bf16.mxu1 %v12195_v45  ;;  %4737 = vmatpush1.bf16.msra.mxu1 %v11016_v59  ;;  %v11054_v36 = vld [vmem:[#allocation26 + $0xcc] ss:$16 sps:$4 sm:$0xff]  }
0x1f47   :  { %4738 = vmatprep.subr.bf16.mxu1 %v11024_v40  ;;  %4706 = vmatpush1.bf16.msra.mxu0 %v11049_v15  ;;  %v11081_v15 = vld [vmem:[#allocation27 + $0x68] sm:$0xff]  }
0x1f48   :  { %v11082_v63 = vld [vmem:[#allocation27 + $0xe8] sm:$0xff]  }
0x1f4a   :  { %4739 = vmatpush1.bf16.msra.mxu1 %v11022_v48  ;;  %v9312_v48 = vld [vmem:[%s13818_s23] ss:$0 sm:$0xff] }
0x1f4b   :  { %4740 = vmatprep.subr.bf16.mxu1 %v11030_v4  ;;  %v11066_v4 = vld [vmem:[#allocation27 + $0xc8] sm:$0xff]  }
0x1f4e   :  { %4741 = vmatpush1.bf16.msra.mxu1 %v11028_v9  ;;  %v11068_v9 = vld [vmem:[#allocation27 + $0x88] sm:$0xff]  }
0x1f4f   :  { %4742 = vmatprep.subr.bf16.mxu1 %v11036_v47  ;;  %v11070_v47 = vld [vmem:[#allocation27 + $0xd0] sm:$0xff]  }
0x1f52   :  { %4743 = vmatpush1.bf16.msra.mxu1 %v11034_v20  ;;  %v11072_v20 = vld [vmem:[#allocation27 + $0x90] sm:$0xff]  }
0x1f53   :  { %4744 = vmatprep.subr.bf16.mxu1 %v11042_v53  ;;  %v11074_v53 = vld [vmem:[#allocation27 + $0xd8] sm:$0xff]  }
0x1f56   :  { %4745 = vmatpush1.bf16.msra.mxu1 %v11040_v21  ;;  %v11076_v21 = vld [vmem:[#allocation27 + $0x98] sm:$0xff]  }
0x1f57   :  { %4746 = vmatprep.subr.bf16.mxu1 %v11048_v28  ;;  %v11078_v28 = vld [vmem:[#allocation27 + $0xe0] sm:$0xff]  }
0x1f5a   :  { %4747 = vmatpush1.bf16.msra.mxu1 %v11046_v50  ;;  %v11080_v50 = vld [vmem:[#allocation27 + $0xa0] sm:$0xff]  }
0x1f5b   :  { %4748 = vmatprep.subr.bf16.mxu1 %v11054_v36  ;;  %v11084_v36 = vld [vmem:[#allocation27 + $0xa8] sm:$0xff]  }
0x1f5e   :  { %4749 = vmatpush1.bf16.msra.mxu1 %v11052_v14  ;;  %v11083_v14 = vld [vmem:[#allocation27 + $0x28] sm:$0xff]  }
0x2018   :  { %v4429_v10 = vpop.f32.mrb[52].mxu1 }
0x2019   :  { %v4430_v11 = vadd.f32 %v9302_v37, %v4429_v10  ;;  %v10422_v43 = vpop.f32.mrb[53].mxu1  ;;  %v11060_v10 = vld [vmem:[#allocation26 + $0xec] ss:$16 sps:$4 sm:$0xff]  }
0x201a   :  { %v4432_v22 = vpop.f32.mrb[54].mxu1  ;;  %v11058_v43 = vld [vmem:[#allocation26 + $0xe8] ss:$16 sps:$4 sm:$0xff]   ;;  %4750 = vmatprep.subr.bf16.mxu1 %v11060_v10  ;;  %v11086_v10 = vld [vmem:[#allocation27 + $0xf0] sm:$0xff]  }
0x201b   :  { %v4433_v3 = vadd.f32 %v9302_v37, %v4432_v22  ;;  %v10423_v38 = vpop.f32.mrb[55].mxu1  ;;  %v4436_v54 = vadd.f32 %v4430_v11, %v13167_v26  ;;  %v11057_v37 = vld [vmem:[#allocation26 + $0xe4] ss:$16 sps:$4 sm:$0xff]   ;;  %v11055_v11 = vld [vmem:[#allocation26 + $0xe0] ss:$16 sps:$4 sm:$0xff]   ;;  %4751 = vmatpush1.bf16.msra.mxu1 %v11058_v43 }
0x201c   :  { %4707 = vmatprep.subr.bf16.mxu0 %v11057_v37  ;;  %v11085_v37 = vld [vmem:[#allocation27 + $0x70] sm:$0xff]  }
0x201d   :  { %4440 = vadd.xlane.f32.xlu1 %v4436_v54  ;;  %v4437_v5 = vadd.f32 %v4433_v3, %v13165_v25  ;;  %4708 = vmatpush1.bf16.msra.mxu0 %v11055_v11  ;;  %v11087_v11 = vld [vmem:[#allocation27 + $0x30] sm:$0xff]  }
0x201e   :  { %v11088_v43 = vld [vmem:[#allocation27 + $0xb0] sm:$0xff]  }
0x2021   :  { %4442 = vadd.xlane.f32.xlu1 %v4437_v5 }
0x20aa   :  { %v4441_v26 = vpop.xlane.xlu1 %4440 }
0x20ab   :  { %v4444_v55 = vmul.f32 0.0078125, %v4441_v26 }
0x20ad   :  { %v13261_v25 = vsub.f32 %v4436_v54, %v4444_v55 }
0x20ae   :  { %v4443_v27 = vpop.xlane.xlu1 %4442 }
0x20af   :  { %v4445_v29 = vmul.f32 0.0078125, %v4443_v27  ;;  %v4448_v16 = vmul.f32 %v13261_v25, %v13261_v25 }
0x20b1   :  { %v13265_v60 = vsub.f32 %v4437_v5, %v4445_v29  ;;  %4450 = vadd.xlane.f32.xlu1 %v4448_v16  ;;  %v11061_v16 = vld [vmem:[#allocation27 + $0x40] sm:$0xff]  }
0x20b2   :  { %9861 = vmatprep.subr.bf16.mxu0 %v11061_v16 }
0x20b3   :  { %v4449_v41 = vmul.f32 %v13265_v60, %v13265_v60 }
0x20b5   :  { %4452 = vadd.xlane.f32.xlu1 %v4449_v41  ;;  %v11062_v41 = vld [vmem:[#allocation27 + $0xc0] sm:$0xff]  }
0x20b6   :  { %9883 = vmatprep.subr.bf16.mxu1 %v11062_v41 }
0x213e   :  { %v4451_v22 = vpop.xlane.xlu1 %4450 }
0x213f   :  { %v4454_v3 = vmul.f32 0.0078125, %v4451_v22  ;;  %v11089_v22 = vld [vmem:[#allocation27 + $0x78] sm:$0xff]  }
0x2141   :  { %v4456_v38 = vadd.f32 1e-05, %v4454_v3  ;;  %v11090_v3 = vld [vmem:[#allocation27 + $0xf8] sm:$0xff]  }
0x2142   :  { %v4453_v54 = vpop.xlane.xlu1 %4452 }
0x2143   :  { %11465 = vrsqrt.f32 %v4456_v38  ;;  %v4455_v5 = vmul.f32 0.0078125, %v4453_v54  ;;  %v11091_v38 = vld [vmem:[#allocation27 + $0x38] sm:$0xff]  }
0x2144   :  { %v11092_v54 = vld [vmem:[#allocation27 + $0xb8] sm:$0xff]  }
0x2145   :  { %v4457_v35 = vadd.f32 1e-05, %v4455_v5  ;;  %v4511_v5 = vld [vmem:[%s13819_s30] sm:$0xf] }
0x2147   :  { %11467 = vrsqrt.f32 %v4457_v35  ;;  %v13282_v35 = vsub.s32 3, %v12649_v56 }
0x214d   :  { %v11466_v49 = vpop.eup %11465 }
0x214e   :  { %v4460_v59 = vmul.f32 %v11466_v49, %v13261_v25  ;;  %v11064_v25 = vld [vmem:[#allocation27 + $0x80] sm:$0xff]   ;;  %v4516_v49 = vrot.slane %v4511_v5, %v12662_v61 }
0x2150   :  { %v4468_v51 = vmul.f32 %v9311_v7, %v4460_v59  ;;  %v4524_v59 = vrot.slane %v4511_v5, %v12665_v62 }
0x2151   :  { %v11468_v57 = vpop.eup %11467 }
0x2152   :  { %v4461_v40 = vmul.f32 %v11468_v57, %v13265_v60  ;;  %v13273_v55 = vadd.f32 %v9312_v48, %v4468_v51  ;;  %v11065_v60 = vld [vmem:[#allocation27 + $0x48] sm:$0xff]   ;;  %v4528_v57 = vrot.slane %v4511_v5, %v13282_v35 }
0x2154   :  { %v4469_v26 = vmul.f32 %v9311_v7, %v4461_v40  ;;  %v4520_v7 = vrot.slane %v4511_v5, %v12654_v58 }
0x2156   :  { %v13275_v27 = vadd.f32 %v9312_v48, %v4469_v26 }
0x2158   :  { %v4478_v29 = vpack.c.bf16 %v13275_v27, %v13273_v55 }
0x215a   :  { %4726 = vmatmul.mubr.bf16.vlgmr.msra.gmra.mrb[64].mxu0 %v4478_v29  ;;  %4769 = vmatmul.mubr.bf16.vlgmr.msra.gmra.mrb[56].mxu1 %v4478_v29 }
0x215b   :  { %9862 = vmatpush3.bf16.msra.mxu0 %v11063_v0  ;;  %9884 = vmatpush3.bf16.msra.mxu1 %v11064_v25 }
0x215c   :  { %9863 = vmatprep.subr.bf16.mxu0 %v11065_v60  ;;  %9885 = vmatprep.subr.bf16.mxu1 %v11066_v4 }
0x215f   :  { %9864 = vmatpush3.bf16.msra.mxu0 %v11067_v8  ;;  %9886 = vmatpush3.bf16.msra.mxu1 %v11068_v9 }
0x2160   :  { %9865 = vmatprep.subr.bf16.mxu0 %v11069_v46  ;;  %9887 = vmatprep.subr.bf16.mxu1 %v11070_v47 }
0x2163   :  { %9866 = vmatpush3.bf16.msra.mxu0 %v11071_v52  ;;  %9888 = vmatpush3.bf16.msra.mxu1 %v11072_v20 }
0x2164   :  { %9867 = vmatprep.subr.bf16.mxu0 %v11073_v6  ;;  %9889 = vmatprep.subr.bf16.mxu1 %v11074_v53 }
0x2167   :  { %9868 = vmatpush3.bf16.msra.mxu0 %v11075_v17  ;;  %9890 = vmatpush3.bf16.msra.mxu1 %v11076_v21 }
0x2168   :  { %9869 = vmatprep.subr.bf16.mxu0 %v11077_v24  ;;  %9891 = vmatprep.subr.bf16.mxu1 %v11078_v28 }
0x216b   :  { %9870 = vmatpush3.bf16.msra.mxu0 %v11079_v12  ;;  %9892 = vmatpush3.bf16.msra.mxu1 %v11080_v50 }
0x216c   :  { %9871 = vmatprep.subr.bf16.mxu0 %v11081_v15  ;;  %9893 = vmatprep.subr.bf16.mxu1 %v11082_v63 }
0x216f   :  { %9872 = vmatpush3.bf16.msra.mxu0 %v11083_v14  ;;  %9894 = vmatpush3.bf16.msra.mxu1 %v11084_v36 }
0x2170   :  { %9873 = vmatprep.subr.bf16.mxu0 %v11085_v37  ;;  %9895 = vmatprep.subr.bf16.mxu1 %v11086_v10 }
0x2173   :  { %9874 = vmatpush3.bf16.msra.mxu0 %v11087_v11  ;;  %9896 = vmatpush3.bf16.msra.mxu1 %v11088_v43 }
0x2174   :  { %9875 = vmatprep.subr.bf16.mxu0 %v11089_v22  ;;  %9897 = vmatprep.subr.bf16.mxu1 %v11090_v3 }
0x2177   :  { %9876 = vmatpush3.bf16.msra.mxu0 %v11091_v38  ;;  %9898 = vmatpush3.bf16.msra.mxu1 %v11092_v54 }
0x2178   :  { %10424 = vmatprep.subr.bf16.mxu1 %v12194_v33 }
0x222d   :  { %v4727_v40 = vpop.f32.mrb[64].mxu0  ;;  %v4770_v51 = vpop.f32.mrb[56].mxu1 }
0x222e   :  { %v13288_v48 = vadd.f32 %v4727_v40, %v4516_v49  ;;  %v13290_v26 = vadd.f32 %v4770_v51, %v4524_v59  ;;  %v4729_v29 = vpop.f32.mrb[65].mxu0  ;;  %v4772_v16 = vpop.f32.mrb[57].mxu1 }
0x222f   :  { %v13292_v41 = vadd.f32 %v4729_v29, %v4520_v7  ;;  %v13294_v56 = vadd.f32 %v4772_v16, %v4528_v57  ;;  %v4731_v0 = vpop.f32.mrb[66].mxu0  ;;  %v4774_v25 = vpop.f32.mrb[58].mxu1 }
0x2230   :  { %v4787_v60 = vmul.f32 0.044715, %v13288_v48  ;;  %v4789_v4 = vmul.f32 0.044715, %v13290_v26  ;;  %v4732_v8 = vadd.f32 %v4731_v0, %v4516_v49  ;;  %v4775_v9 = vadd.f32 %v4774_v25, %v4524_v59  ;;  %v4733_v46 = vpop.f32.mrb[67].mxu0  ;;  %v4776_v47 = vpop.f32.mrb[59].mxu1 }
0x2231   :  { %v4788_v52 = vmul.f32 0.044715, %v13292_v41  ;;  %v4790_v20 = vmul.f32 0.044715, %v13294_v56  ;;  %v13300_v6 = vadd.f32 %v4733_v46, %v4520_v7  ;;  %v13302_v53 = vadd.f32 %v4776_v47, %v4528_v57 }
0x2232   :  { %v4795_v17 = vmul.f32 %v4787_v60, %v13288_v48  ;;  %v4797_v21 = vmul.f32 %v4789_v4, %v13290_v26  ;;  %v4791_v24 = vmul.f32 0.044715, %v4732_v8  ;;  %v4793_v28 = vmul.f32 0.044715, %v4775_v9 }
0x2233   :  { %v4796_v12 = vmul.f32 %v4788_v52, %v13292_v41  ;;  %v4798_v50 = vmul.f32 %v4790_v20, %v13294_v56  ;;  %v4792_v15 = vmul.f32 0.044715, %v13300_v6  ;;  %v4794_v63 = vmul.f32 0.044715, %v13302_v53 }
0x2234   :  { %v4803_v14 = vmul.f32 %v4795_v17, %v13288_v48  ;;  %v4805_v36 = vmul.f32 %v4797_v21, %v13290_v26  ;;  %v4799_v37 = vmul.f32 %v4791_v24, %v4732_v8  ;;  %v4801_v10 = vmul.f32 %v4793_v28, %v4775_v9 }
0x2235   :  { %v4804_v11 = vmul.f32 %v4796_v12, %v13292_v41  ;;  %v4806_v43 = vmul.f32 %v4798_v50, %v13294_v56  ;;  %v4800_v22 = vmul.f32 %v4792_v15, %v13300_v6  ;;  %v4802_v3 = vmul.f32 %v4794_v63, %v13302_v53 }
0x2236   :  { %v4811_v38 = vadd.f32 %v4803_v14, %v13288_v48  ;;  %v4813_v54 = vadd.f32 %v4805_v36, %v13290_v26  ;;  %v4807_v5 = vmul.f32 %v4799_v37, %v4732_v8  ;;  %v4809_v49 = vmul.f32 %v4801_v10, %v4775_v9 }
0x2237   :  { %v4808_v59 = vmul.f32 %v4800_v22, %v13300_v6  ;;  %v4810_v7 = vmul.f32 %v4802_v3, %v13302_v53  ;;  %v4812_v16 = vadd.f32 %v4804_v11, %v13292_v41  ;;  %v4814_v4 = vadd.f32 %v4806_v43, %v13294_v56 }
0x2238   :  { %v4819_v57 = vmul.f32 0.7978846, %v4811_v38  ;;  %v4821_v40 = vmul.f32 0.7978846, %v4813_v54  ;;  %v4815_v51 = vadd.f32 %v4807_v5, %v4732_v8  ;;  %v4817_v29 = vadd.f32 %v4809_v49, %v4775_v9 }
0x2239   :  { %v4816_v0 = vadd.f32 %v4808_v59, %v13300_v6  ;;  %v4820_v46 = vmul.f32 0.7978846, %v4812_v16  ;;  %v4818_v52 = vadd.f32 %v4810_v7, %v13302_v53  ;;  %v4822_v20 = vmul.f32 0.7978846, %v4814_v4 }
0x223a   :  { %11469 = vtanh.f32 %v4819_v57  ;;  %v4823_v25 = vmul.f32 0.7978846, %v4815_v51  ;;  %v4825_v60 = vmul.f32 0.7978846, %v4817_v29  ;;  %v4779_v63 = vmul.f32 0.5, %v13288_v48 }
0x223b   :  { %11471 = vtanh.f32 %v4821_v40  ;;  %v4824_v47 = vmul.f32 0.7978846, %v4816_v0  ;;  %v4826_v17 = vmul.f32 0.7978846, %v4818_v52  ;;  %v4783_v14 = vmul.f32 0.5, %v4732_v8 }
0x223c   :  { %11473 = vtanh.f32 %v4823_v25  ;;  %v4781_v10 = vmul.f32 0.5, %v13290_v26  ;;  %v4785_v11 = vmul.f32 0.5, %v4775_v9  ;;  %v4780_v3 = vmul.f32 0.5, %v13292_v41 }
0x223d   :  { %11475 = vtanh.f32 %v4825_v60  ;;  %v4784_v59 = vmul.f32 0.5, %v13300_v6  ;;  %v4782_v8 = vmul.f32 0.5, %v13294_v56  ;;  %v4786_v51 = vmul.f32 0.5, %v13302_v53  ;;  %v9345_v53 = vld [vmem:[%s13820_s2] ss:$0 sm:$0xff] }
0x223e   :  { %11477 = vtanh.f32 %v4820_v46 }
0x223f   :  { %11479 = vtanh.f32 %v4824_v47 }
0x2240   :  { %11481 = vtanh.f32 %v4822_v20 }
0x2241   :  { %11483 = vtanh.f32 %v4826_v17 }
0x2244   :  { %v11470_v21 = vpop.eup %11469 }
0x2245   :  { %v11472_v24 = vpop.eup %11471  ;;  %v4835_v28 = vadd.f32 1.0, %v11470_v21 }
0x2246   :  { %v11474_v12 = vpop.eup %11473  ;;  %v4837_v50 = vadd.f32 1.0, %v11472_v24 }
0x2247   :  { %v11476_v15 = vpop.eup %11475  ;;  %v4839_v36 = vadd.f32 1.0, %v11474_v12  ;;  %v4843_v54 = vmul.f32 %v4835_v28, %v4779_v63 }
0x2248   :  { %v11478_v37 = vpop.eup %11477  ;;  %v4841_v43 = vadd.f32 1.0, %v11476_v15  ;;  %v4845_v57 = vmul.f32 %v4837_v50, %v4781_v10 }
0x2249   :  { %v11480_v22 = vpop.eup %11479  ;;  %v4836_v38 = vadd.f32 1.0, %v11478_v37  ;;  %v4847_v5 = vmul.f32 %v4839_v36, %v4783_v14 }
0x224a   :  { %v11482_v49 = vpop.eup %11481  ;;  %v4840_v7 = vadd.f32 1.0, %v11480_v22  ;;  %v4849_v40 = vmul.f32 %v4841_v43, %v4785_v11  ;;  %v11093_v43 = vld [vmem:[#allocation23 + $0xc0] ss:$12 sps:$4 sm:$0xff]   ;;  %v11095_v22 = vld [vmem:[#allocation23 + $0xc4] ss:$12 sps:$4 sm:$0xff]  }
0x224b   :  { %v11484_v48 = vpop.eup %11483  ;;  %v4838_v26 = vadd.f32 1.0, %v11482_v49  ;;  %v4851_v9 = vpack.c.bf16 %v4847_v5, %v4843_v54  ;;  %v4844_v29 = vmul.f32 %v4836_v38, %v4780_v3  ;;  %v11096_v3 = vld [vmem:[#allocation23 + $0xc8] ss:$12 sps:$4 sm:$0xff]   ;;  %5422 = vmatprep.subr.bf16.mxu0 %v11095_v22  ;;  %v11100_v54 = vld [vmem:[#allocation23 + $0xe0] ss:$12 sps:$4 sm:$0xff]  }
0x224c   :  { %v4848_v16 = vmul.f32 %v4840_v7, %v4784_v59  ;;  %v4842_v41 = vadd.f32 1.0, %v11484_v48  ;;  %v4853_v0 = vpack.c.bf16 %v4849_v40, %v4845_v57  ;;  %v11099_v38 = vld [vmem:[#allocation23 + $0xdc] ss:$12 sps:$4 sm:$0xff]   ;;  %v11097_v5 = vld [vmem:[#allocation23 + $0xd8] ss:$12 sps:$4 sm:$0xff]  }
0x224d   :  { %v4846_v60 = vmul.f32 %v4838_v26, %v4782_v8  ;;  %v11103_v8 = vld [vmem:[#allocation23 + $0xf4] ss:$12 sps:$4 sm:$0xff]   ;;  %v11104_v26 = vld [vmem:[#allocation23 + $0xf8] ss:$12 sps:$4 sm:$0xff]  }
0x224e   :  { %v4852_v25 = vpack.c.bf16 %v4848_v16, %v4844_v29  ;;  %v4850_v4 = vmul.f32 %v4842_v41, %v4786_v51  ;;  %v11101_v51 = vld [vmem:[#allocation23 + $0xf0] ss:$12 sps:$4 sm:$0xff]   ;;  %v11105_v29 = vld [vmem:[#allocation23 + $0x108] ss:$12 sps:$4 sm:$0xff]   ;;  %v11109_v41 = vld [vmem:[#allocation23 + $0x120] ss:$12 sps:$4 sm:$0xff]  }
0x224f   :  { %v11108_v16 = vld [vmem:[#allocation23 + $0x110] ss:$12 sps:$4 sm:$0xff]  }
0x2250   :  { %5150 = vmatprep.mubr.bf16.mxu0 %v4852_v25  ;;  %v4854_v6 = vpack.c.bf16 %v4850_v4, %v4846_v60  ;;  %v11112_v25 = vld [vmem:[#allocation23 + $0x128] ss:$12 sps:$4 sm:$0xff]   ;;  %v11113_v4 = vld [vmem:[#allocation23 + $0x138] ss:$12 sps:$4 sm:$0xff]  }
0x2251   :  { %5151 = vmatmul.mubr.bf16.vlgmr.msra.gmra.mrb[68].mxu0 %v4851_v9  ;;  %v11107_v9 = vld [vmem:[#allocation23 + $0x10c] ss:$12 sps:$4 sm:$0xff]   ;;  %v11115_v60 = vld [vmem:[#allocation23 + $0x13c] ss:$12 sps:$4 sm:$0xff]  }
0x2252   :  { %5191 = vmatprep.mubr.bf16.mxu1 %v4854_v6  ;;  %5454 = vmatprep.mubr.bf16.mxu0 %v12195_v45  ;;  %v11116_v6 = vld [vmem:[#allocation23 + $0x140] ss:$12 sps:$4 sm:$0xff]  }
0x2253   :  { %5192 = vmatmul.mubr.bf16.vlgmr.msra.gmra.mrb[60].mxu1 %v4853_v0  ;;  %5423 = vmatpush1.bf16.msra.mxu0 %v11093_v43  ;;  %v11111_v0 = vld [vmem:[#allocation23 + $0x124] ss:$12 sps:$4 sm:$0xff]  }
0x2254   :  { %10440 = vmatprep.mubr.msk.bf16.mxu1 %vm12196_vm1, %v12194_v33  ;;  %10425 = vmatpush3.bf16.msra.mxu1 %v11096_v3 }
0x2255   :  { %10426 = vmatprep.subr.bf16.mxu1 %v12194_v33  ;;  %5424 = vmatprep.subr.bf16.mxu0 %v11099_v38 }
0x2257   :  { %5425 = vmatpush1.bf16.msra.mxu0 %v11097_v5 }
0x2258   :  { %10427 = vmatpush3.bf16.msra.mxu1 %v11100_v54  ;;  %5426 = vmatprep.subr.bf16.mxu0 %v11103_v8  ;;  %v9380_v54 = vld [vmem:[%s13814_s16 + $0x3] sm:$0x7] }
0x2259   :  { %10428 = vmatprep.subr.bf16.mxu1 %v12194_v33  ;;  %v5286_v5 = vrot.slane %v9380_v54, %v12654_v58 }
0x225b   :  { %5427 = vmatpush1.bf16.msra.mxu0 %v11101_v51 }
0x225c   :  { %10429 = vmatpush3.bf16.msra.mxu1 %v11104_v26  ;;  %5428 = vmatprep.subr.bf16.mxu0 %v11107_v9 }
0x225d   :  { %10430 = vmatprep.subr.bf16.mxu1 %v12194_v33 }
0x225f   :  { %5429 = vmatpush1.bf16.msra.mxu0 %v11105_v29 }
0x2260   :  { %10431 = vmatpush3.bf16.msra.mxu1 %v11108_v16  ;;  %5430 = vmatprep.subr.bf16.mxu0 %v11111_v0 }
0x2261   :  { %10432 = vmatprep.subr.bf16.mxu1 %v12194_v33 }
0x2263   :  { %5431 = vmatpush1.bf16.msra.mxu0 %v11109_v41 }
0x2264   :  { %10433 = vmatpush3.bf16.msra.mxu1 %v11112_v25  ;;  %5432 = vmatprep.subr.bf16.mxu0 %v11115_v60 }
0x2265   :  { %10434 = vmatprep.subr.bf16.mxu1 %v12194_v33 }
0x2267   :  { %5433 = vmatpush1.bf16.msra.mxu0 %v11113_v4 }
0x2268   :  { %10435 = vmatpush3.bf16.msra.mxu1 %v11116_v6 }
0x2269   :  { %10436 = vmatprep.subr.bf16.mxu1 %v12194_v33 }
0x2324   :  { %v9877_v56 = vpop.f32.mrb[68].mxu0 }
0x2325   :  { %v9878_v46 = vpop.f32.mrb[69].mxu0 }
0x2326   :  { %v9899_v47 = vpop.f32.mrb[60].mxu1  ;;  %v9879_v52 = vadd.f32 %v9878_v46, %v9877_v56  ;;  %v9880_v20 = vpop.f32.mrb[70].mxu0  ;;  %v11119_v56 = vld [vmem:[#allocation23 + $0x154] ss:$12 sps:$4 sm:$0xff]   ;;  %v11120_v46 = vld [vmem:[#allocation23 + $0x158] ss:$12 sps:$4 sm:$0xff]  }
0x2327   :  { %v9900_v17 = vpop.f32.mrb[61].mxu1  ;;  %v9881_v21 = vpop.f32.mrb[71].mxu0  ;;  %5434 = vmatprep.subr.bf16.mxu0 %v11119_v56  ;;  %10437 = vmatpush3.bf16.msra.mxu1 %v11120_v46  ;;  %v5282_v56 = vrot.slane %v9380_v54, %v12662_v61 }
0x2328   :  { %v5153_v24 = vadd.f32 %v9879_v52, %v9345_v53  ;;  %v9901_v28 = vadd.f32 %v9900_v17, %v9899_v47  ;;  %v9902_v12 = vpop.f32.mrb[62].mxu1  ;;  %v9882_v50 = vadd.f32 %v9881_v21, %v9880_v20  ;;  %v11123_v47 = vld [vmem:[#allocation23 + $0x16c] ss:$12 sps:$4 sm:$0xff]   ;;  %v11121_v52 = vld [vmem:[#allocation23 + $0x168] ss:$12 sps:$4 sm:$0xff]   ;;  %10438 = vmatprep.subr.bf16.mxu1 %v12194_v33 }
0x2329   :  { %v9903_v15 = vpop.f32.mrb[63].mxu1  ;;  %v11124_v20 = vld [vmem:[#allocation23 + $0x170] ss:$12 sps:$4 sm:$0xff]  }
0x232a   :  { %v5194_v63 = vadd.f32 %v9901_v28, %v5153_v24  ;;  %v5156_v14 = vadd.f32 %v9882_v50, %v9345_v53  ;;  %v9904_v36 = vadd.f32 %v9903_v15, %v9902_v12  ;;  %v11117_v53 = vld [vmem:[#allocation23 + $0x150] ss:$12 sps:$4 sm:$0xff]  }
0x232b   :  { %5435 = vmatpush1.bf16.msra.mxu0 %v11117_v53  ;;  %10439 = vmatpush3.bf16.msra.mxu1 %v11124_v20 }
0x232c   :  { %v5197_v37 = vadd.f32 %v9904_v36, %v5156_v14  ;;  %v5200_v10 = vadd.f32 %v5194_v63, %v13273_v55  ;;  %5436 = vmatprep.subr.bf16.mxu0 %v11123_v47  ;;  %10471 = vmatprep.subr.bf16.mxu1 %v12194_v33  ;;  %v9378_v63 = vld [vmem:[%s13821_s11] ss:$0 sm:$0xff] }
0x232e   :  { %5204 = vadd.xlane.f32.xlu0 %v5200_v10  ;;  %v5201_v11 = vadd.f32 %v5197_v37, %v13275_v27 }
0x232f   :  { %5437 = vmatpush1.bf16.msra.mxu0 %v11121_v52 }
0x2330   :  { %5206 = vadd.xlane.f32.xlu1 %v5201_v11  ;;  %10444 = vmatprep.subr.bf16.mxu0 %v12194_v33 }
0x23bb   :  { %v5205_v55 = vpop.xlane.xlu0 %5204 }
0x23bc   :  { %v5208_v49 = vmul.f32 0.0078125, %v5205_v55 }
0x23bd   :  { %v5207_v27 = vpop.xlane.xlu1 %5206 }
0x23be   :  { %v5210_v59 = vsub.f32 %v5200_v10, %v5208_v49  ;;  %v5209_v7 = vmul.f32 0.0078125, %v5207_v27 }
0x23c0   :  { %v5211_v57 = vsub.f32 %v5201_v11, %v5209_v7  ;;  %v5212_v40 = vmul.f32 %v5210_v59, %v5210_v59  ;;  %v9379_v11 = vld [vmem:[%s13822_s13] ss:$0 sm:$0xff] }
0x23c2   :  { %5214 = vadd.xlane.f32.xlu0 %v5212_v40  ;;  %v5213_v48 = vmul.f32 %v5211_v57, %v5211_v57 }
0x23c4   :  { %5216 = vadd.xlane.f32.xlu1 %v5213_v48  ;;  %v5290_v48 = vrot.slane %v9380_v54, %v12665_v62 }
0x244f   :  { %v5215_v17 = vpop.xlane.xlu0 %5214 }
0x2450   :  { %v5218_v21 = vmul.f32 0.0078125, %v5215_v17 }
0x2451   :  { %v5217_v24 = vpop.xlane.xlu1 %5216 }
0x2452   :  { %v5220_v28 = vadd.f32 1e-05, %v5218_v21  ;;  %v5219_v12 = vmul.f32 0.0078125, %v5217_v24 }
0x2454   :  { %11485 = vrsqrt.f32 %v5220_v28  ;;  %v5221_v50 = vadd.f32 1e-05, %v5219_v12 }
0x2456   :  { %11487 = vrsqrt.f32 %v5221_v50 }
0x245e   :  { %v11486_v15 = vpop.eup %11485 }
0x245f   :  { %v5224_v14 = vmul.f32 %v11486_v15, %v5210_v59 }
0x2460   :  { %v11488_v36 = vpop.eup %11487 }
0x2461   :  { %v5225_v37 = vmul.f32 %v11488_v36, %v5211_v57  ;;  %v5232_v10 = vmul.f32 %v9378_v63, %v5224_v14 }
0x2463   :  { %v5233_v43 = vmul.f32 %v9378_v63, %v5225_v37  ;;  %v13347_v22 = vadd.f32 %v9379_v11, %v5232_v10 }
0x2465   :  { %v13349_v3 = vadd.f32 %v9379_v11, %v5233_v43 }
0x2467   :  { %v5242_v38 = vpack.c.bf16 %v13349_v3, %v13347_v22 }
0x2469   :  { %5455 = vmatmul.mubr.bf16.vlgmr.msra.gmra.mrb[72].mxu0 %v5242_v38  ;;  %10441 = vmatmul.mubr.bf16.vlgmr.msra.gmra.mrb[64].mxu1 %v5242_v38 }
0x246a   :  { %10448 = vmatprep.mubr.msk.bf16.mxu0 %vm12196_vm1, %v12194_v33  ;;  %10475 = vmatprep.mubr.msk.bf16.mxu1 %vm12196_vm1, %v12194_v33 }
0x253c   :  { %v5456_v55 = vpop.f32.mrb[72].mxu0  ;;  %v5499_v49 = vpop.f32.mrb[64].mxu1 }
0x253d   :  { %v5458_v27 = vpop.f32.mrb[73].mxu0  ;;  %v10442_v59 = vpop.f32.mrb[65].mxu1  ;;  %v5457_v52 = vadd.f32 %v5456_v55, %v5282_v56 }
0x253e   :  { %v5459_v7 = vadd.f32 %v5458_v27, %v5286_v5  ;;  %v5460_v57 = vpop.f32.mrb[74].mxu0  ;;  %v5502_v40 = vpop.f32.mrb[66].mxu1  ;;  %v5500_v27 = vadd.f32 %v5499_v49, %v5290_v48 }
0x253f   :  { %v5462_v8 = vpop.f32.mrb[75].mxu0  ;;  %v10443_v51 = vpop.f32.mrb[67].mxu1  ;;  %v13362_v29 = vadd.f32 %v5502_v40, %v5290_v48  ;;  %v5506_v17 = vpack.c.bf16 %v5457_v52, %v5457_v52  ;;  %v5461_v21 = vadd.f32 %v5460_v57, %v5282_v56 }
0x2540   :  { %v5507_v26 = vmul.f32 %v5459_v7, %v12672_v1  ;;  %v5508_v9 = vmul.f32 %v5459_v7, %v12675_v2  ;;  %v5463_v16 = vadd.f32 %v5462_v8, %v5286_v5  ;;  %v5509_v60 = vmul.f32 %v5459_v7, %v12691_v18 }
0x2541   :  { %v5510_v4 = vmul.f32 %v5459_v7, %v12694_v19  ;;  %v5685_v24 = vpack.c.bf16 %v5461_v21, %v5461_v21  ;;  %v5513_v59 = vmul.f32 %v5500_v27, %v12672_v1  ;;  %v5514_v7 = vmul.f32 %v5500_v27, %v12675_v2  ;;  %v11127_v21 = vld [vmem:[#allocation24 + $0x50] sm:$0xff]  }
0x2542   :  { %v5511_v41 = vpack.c.bf16 %v5508_v9, %v5507_v26  ;;  %v5686_v0 = vmul.f32 %v5463_v16, %v12672_v1  ;;  %v5687_v25 = vmul.f32 %v5463_v16, %v12675_v2  ;;  %v5688_v53 = vmul.f32 %v5463_v16, %v12691_v18 }
0x2543   :  { %v5689_v46 = vmul.f32 %v5463_v16, %v12694_v19  ;;  %v5512_v47 = vpack.c.bf16 %v5510_v4, %v5509_v60  ;;  %v5515_v40 = vmul.f32 %v5500_v27, %v12691_v18  ;;  %v5516_v8 = vmul.f32 %v5500_v27, %v12694_v19 }
0x2544   :  { %10445 = vmatpush3.bf16.xpose.msra.mxu0 %v5511_v41  ;;  %v5690_v6 = vpack.c.bf16 %v5687_v25, %v5686_v0  ;;  %v5517_v51 = vpack.c.bf16 %v5514_v7, %v5513_v59  ;;  %v5692_v4 = vmul.f32 %v13362_v29, %v12672_v1  ;;  %v9418_v7 = vld [vmem:[%s13816_s29 + $0x1] ss:$0 sm:$0xff] }
0x2545   :  { %10446 = vmatprep.subr.bf16.mxu0 %v12194_v33  ;;  %v5691_v20 = vpack.c.bf16 %v5689_v46, %v5688_v53  ;;  %v5518_v26 = vpack.c.bf16 %v5516_v8, %v5515_v40  ;;  %v5694_v53 = vmul.f32 %v13362_v29, %v12691_v18  ;;  %v5695_v46 = vmul.f32 %v13362_v29, %v12694_v19 }
0x2546   :  { %10472 = vmatpush3.bf16.xpose.msra.mxu1 %v5690_v6  ;;  %v5693_v6 = vmul.f32 %v13362_v29, %v12675_v2  ;;  %v11128_v29 = vld [vmem:[#allocation24 + $0x58] sm:$0xff]  }
0x2547   :  { %10473 = vmatprep.subr.bf16.mxu1 %v12194_v33  ;;  %v5697_v52 = vpack.c.bf16 %v5695_v46, %v5694_v53 }
0x254c   :  { %10447 = vmatpush3.bf16.xpose.msra.mxu0 %v5512_v47  ;;  %v5696_v47 = vpack.c.bf16 %v5693_v6, %v5692_v4  ;;  %v11144_v4 = vld [vmem:[#allocation26 + $0x12c] ss:$16 sps:$4 sm:$0xff]   ;;  %v11139_v6 = vld [vmem:[#allocation26 + $0x120] ss:$16 sps:$4 sm:$0xff]  }
0x254d   :  { %10682 = vmatprep.subr.bf16.mxu0 %v12197_v30 }
0x254e   :  { %10474 = vmatpush3.bf16.xpose.msra.mxu1 %v5691_v20  ;;  %v11125_v20 = vld [vmem:[#allocation24 + $0x40] sm:$0xff]  }
0x254f   :  { %10498 = vmatprep.subr.bf16.mxu1 %v12194_v33 }
0x2553   :  { %10449 = vmatmul.mubr.bf16.vlgmr.msra.gmra.mrb[76].mxu0 %v5506_v17  ;;  %v11126_v17 = vld [vmem:[#allocation24 + $0x48] sm:$0xff]  }
0x2554   :  { %10684 = vmatpush3.bf16.msk.msra.mxu0 %vm12710_vm3, %v12198_v32  ;;  %10460 = vmatprep.mubr.msk.f32.mxu0 %vm12196_vm1, %v12194_v33 }
0x2555   :  { %10685 = vmatprep.subr.bf16.mxu0 %v12197_v30  ;;  %10476 = vmatmul.mubr.bf16.vlgmr.msra.gmra.mrb[68].mxu1 %v5685_v24  ;;  %v11129_v24 = vld [vmem:[#allocation24 + $0x60] sm:$0xff]  }
0x2556   :  { %10514 = vmatprep.mubr.msk.bf16.mxu1 %vm12196_vm1, %v12194_v33  ;;  %10499 = vmatpush3.bf16.msra.mxu1 %v11125_v20 }
0x2557   :  { %10500 = vmatprep.subr.bf16.mxu1 %v12194_v33 }
0x2558   :  { %10687 = vmatpush3.bf16.msk.msra.mxu0 %vm12724_vm7, %v12198_v32 }
0x2559   :  { %10463 = vmatprep.subr.bf16.mxu0 %v12194_v33 }
0x255a   :  { %10501 = vmatpush3.bf16.msra.mxu1 %v11126_v17 }
0x255b   :  { %10502 = vmatprep.subr.bf16.mxu1 %v12194_v33 }
0x255e   :  { %10503 = vmatpush3.bf16.msra.mxu1 %v11127_v21  ;;  %v11147_v21 = vld [vmem:[#allocation26 + $0x144] ss:$16 sps:$4 sm:$0xff]  }
0x255f   :  { %10504 = vmatprep.subr.bf16.mxu1 %v12194_v33 }
0x2562   :  { %10505 = vmatpush3.bf16.msra.mxu1 %v11128_v29  ;;  %v11150_v29 = vld [vmem:[#allocation26 + $0x14c] ss:$16 sps:$4 sm:$0xff]  }
0x2563   :  { %10506 = vmatprep.subr.bf16.mxu1 %v12194_v33 }
0x2566   :  { %10507 = vmatpush3.bf16.msra.mxu1 %v11129_v24  ;;  %v11145_v24 = vld [vmem:[#allocation26 + $0x140] ss:$16 sps:$4 sm:$0xff]  }
0x2567   :  { %10508 = vmatprep.subr.bf16.mxu1 %v12194_v33 }
0x2626   :  { %v5553_v28 = vpop.f32.mrb[76].mxu0 }
0x2627   :  { %v5554_v12 = vadd.f32 %v5553_v28, %v13205_v13  ;;  %v10450_v50 = vpop.f32.mrb[77].mxu0  ;;  %v11130_v28 = vld [vmem:[#allocation24 + $0x68] sm:$0xff]  }
0x2628   :  { %v5556_v15 = vpop.f32.mrb[78].mxu0  ;;  %v5732_v36 = vpop.f32.mrb[68].mxu1  ;;  %10509 = vmatpush3.bf16.msra.mxu1 %v11130_v28  ;;  %v11148_v28 = vld [vmem:[#allocation26 + $0x148] ss:$16 sps:$4 sm:$0xff]  }
0x2629   :  { %v10451_v63 = vpop.f32.mrb[79].mxu0  ;;  %v5559_v14 = vsel %vm1090_vm10, %v5554_v12, -inf  ;;  %v5733_v37 = vadd.f32 %v5732_v36, %v13221_v44  ;;  %v10477_v10 = vpop.f32.mrb[69].mxu1  ;;  %10510 = vmatprep.subr.bf16.mxu1 %v12194_v33 }
0x262a   :  { %5560 = vmax.xlane.f32.xlu0 %v5559_v14  ;;  %v5735_v11 = vpop.f32.mrb[70].mxu1 }
0x262b   :  { %v10478_v43 = vpop.f32.mrb[71].mxu1  ;;  %v5738_v38 = vsel %vm1090_vm10, %v5733_v37, -inf }
0x262c   :  { %5739 = vmax.xlane.f32.xlu1 %v5738_v38  ;;  %v11132_v38 = vld [vmem:[#allocation24 + $0x78] sm:$0xff]  }
0x26b7   :  { %v5561_v54 = vpop.xlane.xlu0 %5560 }
0x26b8   :  { %v5562_v5 = vsub.f32 %v5554_v12, %v5561_v54  ;;  %v11131_v12 = vld [vmem:[#allocation24 + $0x70] sm:$0xff]  }
0x26b9   :  { %v5740_v9 = vpop.xlane.xlu1 %5739  ;;  %10511 = vmatpush3.bf16.msra.mxu1 %v11131_v12  ;;  %v11153_v12 = vld [vmem:[#allocation26 + $0x164] ss:$16 sps:$4 sm:$0xff]  }
0x26ba   :  { %v5563_v55 = vmul.f32 1.442695, %v5562_v5  ;;  %v5741_v16 = vsub.f32 %v5733_v37, %v5740_v9  ;;  %10512 = vmatprep.subr.bf16.mxu1 %v12194_v33 }
0x26bc   :  { %11489 = vpow2.f32 %v5563_v55  ;;  %v5742_v41 = vmul.f32 1.442695, %v5741_v16  ;;  %v11133_v16 = vld [vmem:[#allocation26 + $0x100] ss:$16 sps:$4 sm:$0xff]  }
0x26bd   :  { %10513 = vmatpush3.bf16.msra.mxu1 %v11132_v38  ;;  %v11163_v38 = vld [vmem:[#allocation26 + $0x1a0] ss:$16 sps:$4 sm:$0xff]  }
0x26c6   :  { %v11490_v57 = vpop.eup %11489 }
0x26c7   :  { %10461 = vmatmul.mubr.msk.f32.vlgmr.msra.gmra.mrb[58].mxu0 %vm1090_vm10, %v11490_v57 }
0x26c8   :  { %10464 = vmatpush3.bf16.msra.mxu0 %v5517_v51  ;;  %10467 = vmatprep.mubr.msk.bf16.mxu0 %vm12196_vm1, %v12194_v33 }
0x26c9   :  { %10465 = vmatprep.subr.bf16.mxu0 %v12194_v33 }
0x26cc   :  { %10466 = vmatpush3.bf16.msra.mxu0 %v5518_v26 }
0x26cd   :  { %10688 = vmatprep.subr.bf16.mxu0 %v12197_v30 }
0x279a   :  { %v5634_v49 = vpop.f32.mrb[58].mxu0 }
0x279b   :  { %11491 = vrcp.f32 %v5634_v49  ;;  %v10462_v48 = vpop.f32.mrb[59].mxu0 }
0x279c   :  { %11493 = vpow2.f32 %v5742_v41  ;;  %v11135_v41 = vld [vmem:[#allocation26 + $0x104] ss:$16 sps:$4 sm:$0xff]  }
0x27a5   :  { %v11492_v0 = vpop.eup %11491 }
0x27a6   :  { %v5639_v25 = vmul.f32 %v11492_v0, %v11490_v57  ;;  %v11494_v56 = vpop.eup %11493  ;;  %v11136_v0 = vld [vmem:[#allocation26 + $0x108] ss:$16 sps:$4 sm:$0xff]  }
0x27a8   :  { %v5640_v60 = vpack.c.bf16 %v5639_v25, %v5639_v25  ;;  %v11138_v25 = vld [vmem:[#allocation26 + $0x10c] ss:$16 sps:$4 sm:$0xff]  }
0x27a9   :  { %6285 = vmatprep.subr.bf16.mxu1 %v11138_v25 }
0x27aa   :  { %10468 = vmatmul.mubr.msk.bf16.vlgmr.msra.gmra.mrb[80].mxu0 %vm1090_vm10, %v5640_v60  ;;  %v11141_v60 = vld [vmem:[#allocation26 + $0x124] ss:$16 sps:$4 sm:$0xff]  }
0x27ab   :  { %10690 = vmatpush3.bf16.msk.msra.mxu0 %vm12710_vm3, %v12198_v32  ;;  %10487 = vmatprep.mubr.msk.f32.mxu0 %vm12196_vm1, %v12194_v33 }
0x27ac   :  { %10691 = vmatprep.subr.bf16.mxu0 %v12197_v30 }
0x27af   :  { %10693 = vmatpush3.bf16.msk.msra.mxu0 %vm12724_vm7, %v12198_v32 }
0x27b0   :  { %10490 = vmatprep.subr.bf16.mxu0 %v12194_v33 }
0x27b2   :  { %10488 = vmatmul.mubr.msk.f32.vlgmr.msra.gmra.mrb[84].mxu0 %vm1090_vm10, %v11494_v56 }
0x27b3   :  { %10491 = vmatpush3.bf16.msra.mxu0 %v5696_v47  ;;  %10494 = vmatprep.mubr.msk.bf16.mxu0 %vm12196_vm1, %v12194_v33 }
0x27b4   :  { %10492 = vmatprep.subr.bf16.mxu0 %v12194_v33 }
0x27b7   :  { %10493 = vmatpush3.bf16.msra.mxu0 %v5697_v52 }
0x27b8   :  { %6242 = vmatprep.subr.bf16.mxu0 %v11135_v41 }
0x287d   :  { %v5678_v50 = vpop.f32.mrb[80].mxu0 }
0x287e   :  { %v10469_v15 = vpop.f32.mrb[81].mxu0 }
0x287f   :  { %v5681_v63 = vpop.f32.mrb[82].mxu0  ;;  %v11151_v15 = vld [vmem:[#allocation26 + $0x160] ss:$16 sps:$4 sm:$0xff]  }
0x2880   :  { %v10470_v14 = vpop.f32.mrb[83].mxu0  ;;  %v11154_v63 = vld [vmem:[#allocation26 + $0x168] ss:$16 sps:$4 sm:$0xff]  }
0x2881   :  { %v11157_v14 = vld [vmem:[#allocation26 + $0x180] ss:$16 sps:$4 sm:$0xff]  }
0x2885   :  { %v5813_v36 = vpop.f32.mrb[84].mxu0 }
0x2886   :  { %11495 = vrcp.f32 %v5813_v36  ;;  %v10489_v37 = vpop.f32.mrb[85].mxu0  ;;  %v11159_v36 = vld [vmem:[#allocation26 + $0x184] ss:$16 sps:$4 sm:$0xff]  }
0x2887   :  { %v11160_v37 = vld [vmem:[#allocation26 + $0x188] ss:$16 sps:$4 sm:$0xff]  }
0x2890   :  { %v11496_v10 = vpop.eup %11495 }
0x2891   :  { %v5818_v11 = vmul.f32 %v11496_v10, %v11494_v56  ;;  %v11142_v56 = vld [vmem:[#allocation26 + $0x128] ss:$16 sps:$4 sm:$0xff]   ;;  %v11162_v10 = vld [vmem:[#allocation26 + $0x18c] ss:$16 sps:$4 sm:$0xff]  }
0x2893   :  { %v5819_v43 = vpack.c.bf16 %v5818_v11, %v5818_v11  ;;  %v11165_v11 = vld [vmem:[#allocation26 + $0x1a4] ss:$16 sps:$4 sm:$0xff]  }
0x2895   :  { %10495 = vmatmul.mubr.msk.bf16.vlgmr.msra.gmra.mrb[88].mxu0 %vm1090_vm10, %v5819_v43  ;;  %v11168_v43 = vld [vmem:[#allocation26 + $0x1ac] ss:$16 sps:$4 sm:$0xff]  }
0x2896   :  { %6274 = vmatprep.mubr.bf16.mxu0 %v12195_v45  ;;  %6243 = vmatpush1.bf16.msra.mxu0 %v11133_v16 }
0x2897   :  { %6244 = vmatprep.subr.bf16.mxu0 %v11141_v60 }
0x289a   :  { %6245 = vmatpush1.bf16.msra.mxu0 %v11139_v6 }
0x289b   :  { %6246 = vmatprep.subr.bf16.mxu0 %v11147_v21  ;;  %v11183_v21 = vld [vmem:[#allocation27 + $0x100] sm:$0xff]  }
0x289e   :  { %6247 = vmatpush1.bf16.msra.mxu0 %v11145_v24  ;;  %v11187_v24 = vld [vmem:[#allocation27 + $0x108] sm:$0xff]  }
0x289f   :  { %6248 = vmatprep.subr.bf16.mxu0 %v11153_v12  ;;  %v11189_v12 = vld [vmem:[#allocation27 + $0x150] sm:$0xff]  }
0x28a2   :  { %6249 = vmatpush1.bf16.msra.mxu0 %v11151_v15  ;;  %v11191_v15 = vld [vmem:[#allocation27 + $0x110] sm:$0xff]  }
0x28a3   :  { %6250 = vmatprep.subr.bf16.mxu0 %v11159_v36  ;;  %v11194_v36 = vld [vmem:[#allocation27 + $0x1d8] sm:$0xff]  }
0x28a6   :  { %6251 = vmatpush1.bf16.msra.mxu0 %v11157_v14  ;;  %v11193_v14 = vld [vmem:[#allocation27 + $0x158] sm:$0xff]  }
0x28a7   :  { %6252 = vmatprep.subr.bf16.mxu0 %v11165_v11  ;;  %v11197_v11 = vld [vmem:[#allocation27 + $0x160] sm:$0xff]  }
0x28aa   :  { %6253 = vmatpush1.bf16.msra.mxu0 %v11163_v38  ;;  %v11199_v38 = vld [vmem:[#allocation27 + $0x120] sm:$0xff]  }
0x2968   :  { %v5857_v54 = vpop.f32.mrb[88].mxu0 }
0x2969   :  { %v5866_v5 = vpack.c.bf16 %v5857_v54, %v5678_v50  ;;  %v10496_v55 = vpop.f32.mrb[89].mxu0  ;;  %v11156_v50 = vld [vmem:[#allocation26 + $0x16c] ss:$16 sps:$4 sm:$0xff]   ;;  %v11166_v54 = vld [vmem:[#allocation26 + $0x1a8] ss:$16 sps:$4 sm:$0xff]  }
0x296a   :  { %v5860_v27 = vpop.f32.mrb[90].mxu0  ;;  %v11174_v55 = vld [vmem:[#allocation26 + $0x1cc] ss:$16 sps:$4 sm:$0xff]  }
0x296b   :  { %v10497_v59 = vpop.f32.mrb[91].mxu0  ;;  %10515 = vmatmul.mubr.bf16.vlgmr.msra.gmra.mrb[72].mxu1 %v5866_v5  ;;  %v11171_v5 = vld [vmem:[#allocation26 + $0x1c4] ss:$16 sps:$4 sm:$0xff]   ;;  %v11169_v27 = vld [vmem:[#allocation26 + $0x1c0] ss:$16 sps:$4 sm:$0xff]  }
0x296c   :  { %6317 = vmatprep.mubr.bf16.mxu1 %v12195_v45  ;;  %6286 = vmatpush1.bf16.msra.mxu1 %v11136_v0  ;;  %v11172_v59 = vld [vmem:[#allocation26 + $0x1c8] ss:$16 sps:$4 sm:$0xff]   ;;  %v9429_v0 = vld [vmem:[%s13817_s22 + $0x1] ss:$0 sm:$0xff] }
0x296d   :  { %6287 = vmatprep.subr.bf16.mxu1 %v11144_v4  ;;  %6254 = vmatprep.subr.bf16.mxu0 %v11171_v5  ;;  %v11201_v5 = vld [vmem:[#allocation27 + $0x168] sm:$0xff]  }
0x296e   :  { %6255 = vmatpush1.bf16.msra.mxu0 %v11169_v27  ;;  %v11203_v27 = vld [vmem:[#allocation27 + $0x128] sm:$0xff]  }
0x2970   :  { %6288 = vmatpush1.bf16.msra.mxu1 %v11142_v56  ;;  %v9430_v56 = vld [vmem:[%s13818_s23 + $0x1] ss:$0 sm:$0xff] }
0x2971   :  { %6289 = vmatprep.subr.bf16.mxu1 %v11150_v29  ;;  %v11184_v29 = vld [vmem:[#allocation27 + $0x180] sm:$0xff]  }
0x2974   :  { %6290 = vmatpush1.bf16.msra.mxu1 %v11148_v28  ;;  %v11188_v28 = vld [vmem:[#allocation27 + $0x188] sm:$0xff]  }
0x2975   :  { %6291 = vmatprep.subr.bf16.mxu1 %v11156_v50  ;;  %v11190_v50 = vld [vmem:[#allocation27 + $0x1d0] sm:$0xff]  }
0x2978   :  { %6292 = vmatpush1.bf16.msra.mxu1 %v11154_v63  ;;  %v11192_v63 = vld [vmem:[#allocation27 + $0x190] sm:$0xff]  }
0x2979   :  { %6293 = vmatprep.subr.bf16.mxu1 %v11162_v10  ;;  %v11196_v10 = vld [vmem:[#allocation27 + $0x198] sm:$0xff]  }
0x297c   :  { %6294 = vmatpush1.bf16.msra.mxu1 %v11160_v37  ;;  %v11195_v37 = vld [vmem:[#allocation27 + $0x118] sm:$0xff]  }
0x297d   :  { %6295 = vmatprep.subr.bf16.mxu1 %v11168_v43  ;;  %v11198_v43 = vld [vmem:[#allocation27 + $0x1e0] sm:$0xff]  }
0x2980   :  { %6296 = vmatpush1.bf16.msra.mxu1 %v11166_v54  ;;  %v11200_v54 = vld [vmem:[#allocation27 + $0x1a0] sm:$0xff]  }
0x2981   :  { %6297 = vmatprep.subr.bf16.mxu1 %v11174_v55  ;;  %v11202_v55 = vld [vmem:[#allocation27 + $0x1e8] sm:$0xff]  }
0x2984   :  { %6298 = vmatpush1.bf16.msra.mxu1 %v11172_v59  ;;  %v11204_v59 = vld [vmem:[#allocation27 + $0x1a8] sm:$0xff]  }
0x2a3e   :  { %v5974_v57 = vpop.f32.mrb[72].mxu1 }
0x2a3f   :  { %v5975_v40 = vadd.f32 %v9418_v7, %v5974_v57  ;;  %v10516_v8 = vpop.f32.mrb[73].mxu1  ;;  %v11180_v57 = vld [vmem:[#allocation26 + $0x1ec] ss:$16 sps:$4 sm:$0xff]  }
0x2a40   :  { %v5977_v51 = vpop.f32.mrb[74].mxu1  ;;  %v11178_v8 = vld [vmem:[#allocation26 + $0x1e8] ss:$16 sps:$4 sm:$0xff]   ;;  %6299 = vmatprep.subr.bf16.mxu1 %v11180_v57  ;;  %v11206_v57 = vld [vmem:[#allocation27 + $0x1f0] sm:$0xff]  }
0x2a41   :  { %v5978_v26 = vadd.f32 %v9418_v7, %v5977_v51  ;;  %v10517_v49 = vpop.f32.mrb[75].mxu1  ;;  %v5981_v48 = vadd.f32 %v5975_v40, %v13347_v22  ;;  %v11177_v7 = vld [vmem:[#allocation26 + $0x1e4] ss:$16 sps:$4 sm:$0xff]   ;;  %v11175_v40 = vld [vmem:[#allocation26 + $0x1e0] ss:$16 sps:$4 sm:$0xff]   ;;  %6300 = vmatpush1.bf16.msra.mxu1 %v11178_v8 }
0x2a42   :  { %6256 = vmatprep.subr.bf16.mxu0 %v11177_v7  ;;  %v11205_v7 = vld [vmem:[#allocation27 + $0x170] sm:$0xff]  }
0x2a43   :  { %5987 = vadd.xlane.f32.xlu0 %v5981_v48  ;;  %v5982_v9 = vadd.f32 %v5978_v26, %v13349_v3  ;;  %6257 = vmatpush1.bf16.msra.mxu0 %v11175_v40  ;;  %v11207_v40 = vld [vmem:[#allocation27 + $0x130] sm:$0xff]  }
0x2a44   :  { %v11208_v8 = vld [vmem:[#allocation27 + $0x1b0] sm:$0xff]  }
0x2a45   :  { %5989 = vadd.xlane.f32.xlu1 %v5982_v9 }
0x2ad0   :  { %v5988_v22 = vpop.xlane.xlu0 %5987 }
0x2ad1   :  { %v5991_v53 = vmul.f32 0.0078125, %v5988_v22 }
0x2ad2   :  { %v5990_v3 = vpop.xlane.xlu1 %5989 }
0x2ad3   :  { %v13436_v46 = vsub.f32 %v5981_v48, %v5991_v53  ;;  %v5992_v47 = vmul.f32 0.0078125, %v5990_v3 }
0x2ad5   :  { %v13438_v52 = vsub.f32 %v5982_v9, %v5992_v47  ;;  %v5995_v20 = vmul.f32 %v13436_v46, %v13436_v46 }
0x2ad7   :  { %5997 = vadd.xlane.f32.xlu0 %v5995_v20  ;;  %v5996_v17 = vmul.f32 %v13438_v52, %v13438_v52  ;;  %v11181_v20 = vld [vmem:[#allocation27 + $0x140] sm:$0xff]  }
0x2ad8   :  { %9945 = vmatprep.subr.bf16.mxu0 %v11181_v20 }
0x2ad9   :  { %5999 = vadd.xlane.f32.xlu1 %v5996_v17  ;;  %v11182_v17 = vld [vmem:[#allocation27 + $0x1c0] sm:$0xff]  }
0x2ada   :  { %9967 = vmatprep.subr.bf16.mxu1 %v11182_v17 }
0x2b64   :  { %v5998_v51 = vpop.xlane.xlu0 %5997 }
0x2b65   :  { %v6001_v26 = vmul.f32 0.0078125, %v5998_v51  ;;  %v11209_v51 = vld [vmem:[#allocation27 + $0x178] sm:$0xff]  }
0x2b66   :  { %v6000_v49 = vpop.xlane.xlu1 %5999 }
0x2b67   :  { %v6003_v48 = vadd.f32 1e-05, %v6001_v26  ;;  %v6002_v9 = vmul.f32 0.0078125, %v6000_v49  ;;  %v11210_v26 = vld [vmem:[#allocation27 + $0x1f8] sm:$0xff]  }
0x2b68   :  { %v11211_v49 = vld [vmem:[#allocation27 + $0x138] sm:$0xff]  }
0x2b69   :  { %11497 = vrsqrt.f32 %v6003_v48  ;;  %v6004_v16 = vadd.f32 1e-05, %v6002_v9  ;;  %v11212_v48 = vld [vmem:[#allocation27 + $0x1b8] sm:$0xff]   ;;  %v9431_v9 = vld [vmem:[%s13819_s30 + $0x4] sm:$0xf] }
0x2b6b   :  { %11499 = vrsqrt.f32 %v6004_v16  ;;  %v6065_v16 = vrot.slane %v9431_v9, %v12662_v61 }
0x2b73   :  { %v11498_v41 = vpop.eup %11497 }
0x2b74   :  { %v6007_v25 = vmul.f32 %v11498_v41, %v13436_v46  ;;  %v11185_v46 = vld [vmem:[#allocation27 + $0x148] sm:$0xff]   ;;  %v6073_v41 = vrot.slane %v9431_v9, %v12665_v62 }
0x2b75   :  { %v11500_v60 = vpop.eup %11499 }
0x2b76   :  { %v6008_v4 = vmul.f32 %v11500_v60, %v13438_v52  ;;  %v6015_v6 = vmul.f32 %v9429_v0, %v6007_v25  ;;  %v11186_v52 = vld [vmem:[#allocation27 + $0x1c8] sm:$0xff]   ;;  %v6077_v25 = vrot.slane %v9431_v9, %v13282_v35 }
0x2b78   :  { %v6016_v22 = vmul.f32 %v9429_v0, %v6008_v4  ;;  %v13448_v53 = vadd.f32 %v9430_v56, %v6015_v6  ;;  %v6069_v0 = vrot.slane %v9431_v9, %v12654_v58 }
0x2b7a   :  { %v13450_v3 = vadd.f32 %v9430_v56, %v6016_v22 }
0x2b7c   :  { %v6025_v47 = vpack.c.bf16 %v13450_v3, %v13448_v53 }
0x2b7e   :  { %6275 = vmatmul.mubr.bf16.vlgmr.msra.gmra.mrb[92].mxu0 %v6025_v47  ;;  %6318 = vmatmul.mubr.bf16.vlgmr.msra.gmra.mrb[76].mxu1 %v6025_v47 }
0x2b7f   :  { %9946 = vmatpush3.bf16.msra.mxu0 %v11183_v21  ;;  %9968 = vmatpush3.bf16.msra.mxu1 %v11184_v29 }
0x2b80   :  { %9947 = vmatprep.subr.bf16.mxu0 %v11185_v46  ;;  %9969 = vmatprep.subr.bf16.mxu1 %v11186_v52 }
0x2b83   :  { %9948 = vmatpush3.bf16.msra.mxu0 %v11187_v24  ;;  %9970 = vmatpush3.bf16.msra.mxu1 %v11188_v28 }
0x2b84   :  { %9949 = vmatprep.subr.bf16.mxu0 %v11189_v12  ;;  %9971 = vmatprep.subr.bf16.mxu1 %v11190_v50 }
0x2b87   :  { %9950 = vmatpush3.bf16.msra.mxu0 %v11191_v15  ;;  %9972 = vmatpush3.bf16.msra.mxu1 %v11192_v63 }
0x2b88   :  { %9951 = vmatprep.subr.bf16.mxu0 %v11193_v14  ;;  %9973 = vmatprep.subr.bf16.mxu1 %v11194_v36 }
0x2b8b   :  { %9952 = vmatpush3.bf16.msra.mxu0 %v11195_v37  ;;  %9974 = vmatpush3.bf16.msra.mxu1 %v11196_v10 }
0x2b8c   :  { %9953 = vmatprep.subr.bf16.mxu0 %v11197_v11  ;;  %9975 = vmatprep.subr.bf16.mxu1 %v11198_v43 }
0x2b8f   :  { %9954 = vmatpush3.bf16.msra.mxu0 %v11199_v38  ;;  %9976 = vmatpush3.bf16.msra.mxu1 %v11200_v54 }
0x2b90   :  { %9955 = vmatprep.subr.bf16.mxu0 %v11201_v5  ;;  %9977 = vmatprep.subr.bf16.mxu1 %v11202_v55 }
0x2b93   :  { %9956 = vmatpush3.bf16.msra.mxu0 %v11203_v27  ;;  %9978 = vmatpush3.bf16.msra.mxu1 %v11204_v59 }
0x2b94   :  { %9957 = vmatprep.subr.bf16.mxu0 %v11205_v7  ;;  %9979 = vmatprep.subr.bf16.mxu1 %v11206_v57 }
0x2b97   :  { %9958 = vmatpush3.bf16.msra.mxu0 %v11207_v40  ;;  %9980 = vmatpush3.bf16.msra.mxu1 %v11208_v8 }
0x2b98   :  { %9959 = vmatprep.subr.bf16.mxu0 %v11209_v51  ;;  %9981 = vmatprep.subr.bf16.mxu1 %v11210_v26 }
0x2b9b   :  { %9960 = vmatpush3.bf16.msra.mxu0 %v11211_v49  ;;  %9982 = vmatpush3.bf16.msra.mxu1 %v11212_v48 }
0x2b9c   :  { %10518 = vmatprep.subr.bf16.mxu1 %v12194_v33 }
0x2c51   :  { %v6276_v60 = vpop.f32.mrb[92].mxu0  ;;  %v6319_v4 = vpop.f32.mrb[76].mxu1 }
0x2c52   :  { %v13460_v6 = vadd.f32 %v6276_v60, %v6065_v16  ;;  %v13462_v56 = vadd.f32 %v6319_v4, %v6073_v41  ;;  %v6278_v22 = vpop.f32.mrb[93].mxu0  ;;  %v6321_v47 = vpop.f32.mrb[77].mxu1 }
0x2c53   :  { %v13464_v20 = vadd.f32 %v6278_v22, %v6069_v0  ;;  %v13466_v17 = vadd.f32 %v6321_v47, %v6077_v25  ;;  %v6280_v21 = vpop.f32.mrb[94].mxu0  ;;  %v6323_v29 = vpop.f32.mrb[78].mxu1 }
0x2c54   :  { %v6336_v46 = vmul.f32 0.044715, %v13460_v6  ;;  %v6338_v52 = vmul.f32 0.044715, %v13462_v56  ;;  %v6281_v24 = vadd.f32 %v6280_v21, %v6065_v16  ;;  %v6324_v28 = vadd.f32 %v6323_v29, %v6073_v41  ;;  %v6282_v12 = vpop.f32.mrb[95].mxu0  ;;  %v6325_v50 = vpop.f32.mrb[79].mxu1 }
0x2c55   :  { %v6337_v15 = vmul.f32 0.044715, %v13464_v20  ;;  %v6339_v63 = vmul.f32 0.044715, %v13466_v17  ;;  %v13472_v14 = vadd.f32 %v6282_v12, %v6069_v0  ;;  %v13474_v36 = vadd.f32 %v6325_v50, %v6077_v25 }
0x2c56   :  { %v6344_v37 = vmul.f32 %v6336_v46, %v13460_v6  ;;  %v6346_v10 = vmul.f32 %v6338_v52, %v13462_v56  ;;  %v6340_v11 = vmul.f32 0.044715, %v6281_v24  ;;  %v6342_v43 = vmul.f32 0.044715, %v6324_v28 }
0x2c57   :  { %v6345_v38 = vmul.f32 %v6337_v15, %v13464_v20  ;;  %v6347_v54 = vmul.f32 %v6339_v63, %v13466_v17  ;;  %v6341_v5 = vmul.f32 0.044715, %v13472_v14  ;;  %v6343_v55 = vmul.f32 0.044715, %v13474_v36 }
0x2c58   :  { %v6352_v27 = vmul.f32 %v6344_v37, %v13460_v6  ;;  %v6354_v59 = vmul.f32 %v6346_v10, %v13462_v56  ;;  %v6348_v7 = vmul.f32 %v6340_v11, %v6281_v24  ;;  %v6350_v57 = vmul.f32 %v6342_v43, %v6324_v28 }
0x2c59   :  { %v6353_v40 = vmul.f32 %v6345_v38, %v13464_v20  ;;  %v6355_v8 = vmul.f32 %v6347_v54, %v13466_v17  ;;  %v6349_v51 = vmul.f32 %v6341_v5, %v13472_v14  ;;  %v6351_v26 = vmul.f32 %v6343_v55, %v13474_v36 }
0x2c5a   :  { %v6360_v49 = vadd.f32 %v6352_v27, %v13460_v6  ;;  %v6362_v48 = vadd.f32 %v6354_v59, %v13462_v56  ;;  %v6356_v9 = vmul.f32 %v6348_v7, %v6281_v24  ;;  %v6358_v16 = vmul.f32 %v6350_v57, %v6324_v28 }
0x2c5b   :  { %v6357_v41 = vmul.f32 %v6349_v51, %v13472_v14  ;;  %v6359_v0 = vmul.f32 %v6351_v26, %v13474_v36  ;;  %v6361_v47 = vadd.f32 %v6353_v40, %v13464_v20  ;;  %v6363_v52 = vadd.f32 %v6355_v8, %v13466_v17 }
0x2c5c   :  { %v6368_v25 = vmul.f32 0.7978846, %v6360_v49  ;;  %v6370_v60 = vmul.f32 0.7978846, %v6362_v48  ;;  %v6364_v4 = vadd.f32 %v6356_v9, %v6281_v24  ;;  %v6366_v22 = vadd.f32 %v6358_v16, %v6324_v28 }
0x2c5d   :  { %v6365_v21 = vadd.f32 %v6357_v41, %v13472_v14  ;;  %v6369_v12 = vmul.f32 0.7978846, %v6361_v47  ;;  %v6367_v15 = vadd.f32 %v6359_v0, %v13474_v36  ;;  %v6371_v63 = vmul.f32 0.7978846, %v6363_v52 }
0x2c5e   :  { %11501 = vtanh.f32 %v6368_v25  ;;  %v6372_v29 = vmul.f32 0.7978846, %v6364_v4  ;;  %v6374_v46 = vmul.f32 0.7978846, %v6366_v22  ;;  %v6328_v55 = vmul.f32 0.5, %v13460_v6 }
0x2c5f   :  { %11503 = vtanh.f32 %v6370_v60  ;;  %v6373_v50 = vmul.f32 0.7978846, %v6365_v21  ;;  %v6375_v37 = vmul.f32 0.7978846, %v6367_v15  ;;  %v6332_v27 = vmul.f32 0.5, %v6281_v24 }
0x2c60   :  { %11505 = vtanh.f32 %v6372_v29  ;;  %v6330_v57 = vmul.f32 0.5, %v13462_v56  ;;  %v6334_v40 = vmul.f32 0.5, %v6324_v28  ;;  %v6329_v26 = vmul.f32 0.5, %v13464_v20 }
0x2c61   :  { %11507 = vtanh.f32 %v6374_v46  ;;  %v6333_v41 = vmul.f32 0.5, %v13472_v14  ;;  %v6331_v24 = vmul.f32 0.5, %v13466_v17  ;;  %v6335_v4 = vmul.f32 0.5, %v13474_v36  ;;  %v9465_v36 = vld [vmem:[%s13820_s2 + $0x1] ss:$0 sm:$0xff] }
0x2c62   :  { %11509 = vtanh.f32 %v6369_v12 }
0x2c63   :  { %11511 = vtanh.f32 %v6373_v50 }
0x2c64   :  { %11513 = vtanh.f32 %v6371_v63 }
0x2c65   :  { %11515 = vtanh.f32 %v6375_v37 }
0x2c68   :  { %v11502_v10 = vpop.eup %11501 }
0x2c69   :  { %v11504_v11 = vpop.eup %11503  ;;  %v6384_v43 = vadd.f32 1.0, %v11502_v10 }
0x2c6a   :  { %v11506_v38 = vpop.eup %11505  ;;  %v6386_v54 = vadd.f32 1.0, %v11504_v11 }
0x2c6b   :  { %v11508_v5 = vpop.eup %11507  ;;  %v6388_v59 = vadd.f32 1.0, %v11506_v38  ;;  %v6392_v48 = vmul.f32 %v6384_v43, %v6328_v55 }
0x2c6c   :  { %v11510_v7 = vpop.eup %11509  ;;  %v6390_v8 = vadd.f32 1.0, %v11508_v5  ;;  %v6394_v25 = vmul.f32 %v6386_v54, %v6330_v57 }
0x2c6d   :  { %v11512_v51 = vpop.eup %11511  ;;  %v6385_v49 = vadd.f32 1.0, %v11510_v7  ;;  %v6396_v9 = vmul.f32 %v6388_v59, %v6332_v27 }
0x2c6e   :  { %v11514_v16 = vpop.eup %11513  ;;  %v6389_v0 = vadd.f32 1.0, %v11512_v51  ;;  %v6398_v60 = vmul.f32 %v6390_v8, %v6334_v40  ;;  %v11213_v8 = vld [vmem:[#allocation23 + $0x180] ss:$12 sps:$4 sm:$0xff]   ;;  %v11215_v51 = vld [vmem:[#allocation23 + $0x184] ss:$12 sps:$4 sm:$0xff]  }
0x2c6f   :  { %v11516_v6 = vpop.eup %11515  ;;  %v6387_v56 = vadd.f32 1.0, %v11514_v16  ;;  %v6400_v28 = vpack.c.bf16 %v6396_v9, %v6392_v48  ;;  %v6393_v22 = vmul.f32 %v6385_v49, %v6329_v26  ;;  %v11216_v26 = vld [vmem:[#allocation23 + $0x188] ss:$12 sps:$4 sm:$0xff]   ;;  %6975 = vmatprep.subr.bf16.mxu0 %v11215_v51  ;;  %v11220_v48 = vld [vmem:[#allocation23 + $0x1a0] ss:$12 sps:$4 sm:$0xff]  }
0x2c70   :  { %v6397_v47 = vmul.f32 %v6389_v0, %v6333_v41  ;;  %v6391_v20 = vadd.f32 1.0, %v11516_v6  ;;  %v6402_v21 = vpack.c.bf16 %v6398_v60, %v6394_v25  ;;  %v11219_v49 = vld [vmem:[#allocation23 + $0x19c] ss:$12 sps:$4 sm:$0xff]   ;;  %v11217_v9 = vld [vmem:[#allocation23 + $0x198] ss:$12 sps:$4 sm:$0xff]  }
0x2c71   :  { %v6395_v46 = vmul.f32 %v6387_v56, %v6331_v24  ;;  %v11223_v24 = vld [vmem:[#allocation23 + $0x1b4] ss:$12 sps:$4 sm:$0xff]   ;;  %v11224_v56 = vld [vmem:[#allocation23 + $0x1b8] ss:$12 sps:$4 sm:$0xff]  }
0x2c72   :  { %v6401_v29 = vpack.c.bf16 %v6397_v47, %v6393_v22  ;;  %v6399_v52 = vmul.f32 %v6391_v20, %v6335_v4  ;;  %v11221_v4 = vld [vmem:[#allocation23 + $0x1b0] ss:$12 sps:$4 sm:$0xff]   ;;  %v11225_v22 = vld [vmem:[#allocation23 + $0x1c8] ss:$12 sps:$4 sm:$0xff]   ;;  %v11229_v20 = vld [vmem:[#allocation23 + $0x1e0] ss:$12 sps:$4 sm:$0xff]  }
0x2c73   :  { %v11228_v47 = vld [vmem:[#allocation23 + $0x1d0] ss:$12 sps:$4 sm:$0xff]  }
0x2c74   :  { %6701 = vmatprep.mubr.bf16.mxu0 %v6401_v29  ;;  %v6403_v14 = vpack.c.bf16 %v6399_v52, %v6395_v46  ;;  %v11232_v29 = vld [vmem:[#allocation23 + $0x1e8] ss:$12 sps:$4 sm:$0xff]   ;;  %v11233_v52 = vld [vmem:[#allocation23 + $0x1f8] ss:$12 sps:$4 sm:$0xff]  }
0x2c75   :  { %6702 = vmatmul.mubr.bf16.vlgmr.msra.gmra.mrb[96].mxu0 %v6400_v28  ;;  %v11227_v28 = vld [vmem:[#allocation23 + $0x1cc] ss:$12 sps:$4 sm:$0xff]   ;;  %v11235_v46 = vld [vmem:[#allocation23 + $0x1fc] ss:$12 sps:$4 sm:$0xff]  }
0x2c76   :  { %6742 = vmatprep.mubr.bf16.mxu1 %v6403_v14  ;;  %7007 = vmatprep.mubr.bf16.mxu0 %v12195_v45  ;;  %v11236_v14 = vld [vmem:[#allocation23 + $0x200] ss:$12 sps:$4 sm:$0xff]  }
0x2c77   :  { %6743 = vmatmul.mubr.bf16.vlgmr.msra.gmra.mrb[80].mxu1 %v6402_v21  ;;  %6976 = vmatpush1.bf16.msra.mxu0 %v11213_v8  ;;  %v11231_v21 = vld [vmem:[#allocation23 + $0x1e4] ss:$12 sps:$4 sm:$0xff]  }
0x2c78   :  { %10534 = vmatprep.mubr.msk.bf16.mxu1 %vm12196_vm1, %v12194_v33  ;;  %10519 = vmatpush3.bf16.msra.mxu1 %v11216_v26 }
0x2c79   :  { %10520 = vmatprep.subr.bf16.mxu1 %v12194_v33  ;;  %6977 = vmatprep.subr.bf16.mxu0 %v11219_v49 }
0x2c7b   :  { %6978 = vmatpush1.bf16.msra.mxu0 %v11217_v9 }
0x2c7c   :  { %10521 = vmatpush3.bf16.msra.mxu1 %v11220_v48  ;;  %6979 = vmatprep.subr.bf16.mxu0 %v11223_v24  ;;  %v9502_v48 = vld [vmem:[%s13814_s16 + $0x6] sm:$0x7] }
0x2c7d   :  { %10522 = vmatprep.subr.bf16.mxu1 %v12194_v33  ;;  %v6839_v9 = vrot.slane %v9502_v48, %v12654_v58 }
0x2c7f   :  { %6980 = vmatpush1.bf16.msra.mxu0 %v11221_v4 }
0x2c80   :  { %10523 = vmatpush3.bf16.msra.mxu1 %v11224_v56  ;;  %6981 = vmatprep.subr.bf16.mxu0 %v11227_v28 }
0x2c81   :  { %10524 = vmatprep.subr.bf16.mxu1 %v12194_v33 }
0x2c83   :  { %6982 = vmatpush1.bf16.msra.mxu0 %v11225_v22 }
0x2c84   :  { %10525 = vmatpush3.bf16.msra.mxu1 %v11228_v47  ;;  %6983 = vmatprep.subr.bf16.mxu0 %v11231_v21 }
0x2c85   :  { %10526 = vmatprep.subr.bf16.mxu1 %v12194_v33 }
0x2c87   :  { %6984 = vmatpush1.bf16.msra.mxu0 %v11229_v20 }
0x2c88   :  { %10527 = vmatpush3.bf16.msra.mxu1 %v11232_v29  ;;  %6985 = vmatprep.subr.bf16.mxu0 %v11235_v46 }
0x2c89   :  { %10528 = vmatprep.subr.bf16.mxu1 %v12194_v33 }
0x2c8b   :  { %6986 = vmatpush1.bf16.msra.mxu0 %v11233_v52 }
0x2c8c   :  { %10529 = vmatpush3.bf16.msra.mxu1 %v11236_v14 }
0x2c8d   :  { %10530 = vmatprep.subr.bf16.mxu1 %v12194_v33 }
0x2d48   :  { %v9961_v17 = vpop.f32.mrb[96].mxu0 }
0x2d49   :  { %v9962_v12 = vpop.f32.mrb[97].mxu0 }
0x2d4a   :  { %v9983_v50 = vpop.f32.mrb[80].mxu1  ;;  %v9963_v15 = vadd.f32 %v9962_v12, %v9961_v17  ;;  %v9964_v63 = vpop.f32.mrb[98].mxu0  ;;  %v11239_v17 = vld [vmem:[#allocation23 + $0x214] ss:$12 sps:$4 sm:$0xff]   ;;  %v11240_v12 = vld [vmem:[#allocation23 + $0x218] ss:$12 sps:$4 sm:$0xff]  }
0x2d4b   :  { %v9984_v37 = vpop.f32.mrb[81].mxu1  ;;  %v9965_v10 = vpop.f32.mrb[99].mxu0  ;;  %6987 = vmatprep.subr.bf16.mxu0 %v11239_v17  ;;  %10531 = vmatpush3.bf16.msra.mxu1 %v11240_v12  ;;  %v6835_v17 = vrot.slane %v9502_v48, %v12662_v61 }
0x2d4c   :  { %v6704_v11 = vadd.f32 %v9963_v15, %v9465_v36  ;;  %v9985_v43 = vadd.f32 %v9984_v37, %v9983_v50  ;;  %v9986_v38 = vpop.f32.mrb[82].mxu1  ;;  %v9966_v54 = vadd.f32 %v9965_v10, %v9964_v63  ;;  %v11243_v50 = vld [vmem:[#allocation23 + $0x22c] ss:$12 sps:$4 sm:$0xff]   ;;  %v11241_v15 = vld [vmem:[#allocation23 + $0x228] ss:$12 sps:$4 sm:$0xff]   ;;  %10532 = vmatprep.subr.bf16.mxu1 %v12194_v33 }
0x2d4d   :  { %v9987_v5 = vpop.f32.mrb[83].mxu1  ;;  %v11244_v63 = vld [vmem:[#allocation23 + $0x230] ss:$12 sps:$4 sm:$0xff]  }
0x2d4e   :  { %v6745_v55 = vadd.f32 %v9985_v43, %v6704_v11  ;;  %v6707_v27 = vadd.f32 %v9966_v54, %v9465_v36  ;;  %v9988_v59 = vadd.f32 %v9987_v5, %v9986_v38  ;;  %v11237_v36 = vld [vmem:[#allocation23 + $0x210] ss:$12 sps:$4 sm:$0xff]  }
0x2d4f   :  { %6988 = vmatpush1.bf16.msra.mxu0 %v11237_v36  ;;  %10533 = vmatpush3.bf16.msra.mxu1 %v11244_v63 }
0x2d50   :  { %v6748_v7 = vadd.f32 %v9988_v59, %v6707_v27  ;;  %v6751_v57 = vadd.f32 %v6745_v55, %v13448_v53  ;;  %6989 = vmatprep.subr.bf16.mxu0 %v11243_v50  ;;  %10565 = vmatprep.subr.bf16.mxu1 %v12194_v33  ;;  %v9500_v55 = vld [vmem:[%s13821_s11 + $0x1] ss:$0 sm:$0xff] }
0x2d52   :  { %6757 = vadd.xlane.f32.xlu0 %v6751_v57  ;;  %v6752_v40 = vadd.f32 %v6748_v7, %v13450_v3 }
0x2d53   :  { %6990 = vmatpush1.bf16.msra.mxu0 %v11241_v15 }
0x2d54   :  { %6759 = vadd.xlane.f32.xlu1 %v6752_v40  ;;  %10538 = vmatprep.subr.bf16.mxu0 %v12194_v33 }
0x2ddf   :  { %v6758_v53 = vpop.xlane.xlu0 %6757 }
0x2de0   :  { %v6761_v16 = vmul.f32 0.0078125, %v6758_v53 }
0x2de1   :  { %v6760_v3 = vpop.xlane.xlu1 %6759 }
0x2de2   :  { %v6763_v41 = vsub.f32 %v6751_v57, %v6761_v16  ;;  %v6762_v0 = vmul.f32 0.0078125, %v6760_v3 }
0x2de4   :  { %v6764_v25 = vsub.f32 %v6752_v40, %v6762_v0  ;;  %v6765_v60 = vmul.f32 %v6763_v41, %v6763_v41  ;;  %v9501_v40 = vld [vmem:[%s13822_s13 + $0x1] ss:$0 sm:$0xff] }
0x2de6   :  { %6767 = vadd.xlane.f32.xlu0 %v6765_v60  ;;  %v6766_v6 = vmul.f32 %v6764_v25, %v6764_v25 }
0x2de8   :  { %6769 = vadd.xlane.f32.xlu1 %v6766_v6  ;;  %v6843_v6 = vrot.slane %v9502_v48, %v12665_v62 }
0x2e73   :  { %v6768_v37 = vpop.xlane.xlu0 %6767 }
0x2e74   :  { %v6771_v10 = vmul.f32 0.0078125, %v6768_v37 }
0x2e75   :  { %v6770_v11 = vpop.xlane.xlu1 %6769 }
0x2e76   :  { %v6773_v43 = vadd.f32 1e-05, %v6771_v10  ;;  %v6772_v38 = vmul.f32 0.0078125, %v6770_v11 }
0x2e78   :  { %11517 = vrsqrt.f32 %v6773_v43  ;;  %v6774_v54 = vadd.f32 1e-05, %v6772_v38 }
0x2e7a   :  { %11519 = vrsqrt.f32 %v6774_v54 }
0x2e82   :  { %v11518_v5 = vpop.eup %11517 }
0x2e83   :  { %v6777_v27 = vmul.f32 %v11518_v5, %v6763_v41 }
0x2e84   :  { %v11520_v59 = vpop.eup %11519 }
0x2e85   :  { %v6778_v7 = vmul.f32 %v11520_v59, %v6764_v25  ;;  %v6785_v57 = vmul.f32 %v9500_v55, %v6777_v27 }
0x2e87   :  { %v6786_v8 = vmul.f32 %v9500_v55, %v6778_v7  ;;  %v13519_v51 = vadd.f32 %v9501_v40, %v6785_v57 }
0x2e89   :  { %v13521_v26 = vadd.f32 %v9501_v40, %v6786_v8 }
0x2e8b   :  { %v6795_v49 = vpack.c.bf16 %v13521_v26, %v13519_v51 }
0x2e8d   :  { %7008 = vmatmul.mubr.bf16.vlgmr.msra.gmra.mrb[100].mxu0 %v6795_v49  ;;  %10535 = vmatmul.mubr.bf16.vlgmr.msra.gmra.mrb[84].mxu1 %v6795_v49 }
0x2e8e   :  { %10542 = vmatprep.mubr.msk.bf16.mxu0 %vm12196_vm1, %v12194_v33  ;;  %10569 = vmatprep.mubr.msk.bf16.mxu1 %vm12196_vm1, %v12194_v33 }
0x2f60   :  { %v7009_v53 = vpop.f32.mrb[100].mxu0  ;;  %v7052_v16 = vpop.f32.mrb[84].mxu1 }
0x2f61   :  { %v7011_v3 = vpop.f32.mrb[101].mxu0  ;;  %v10536_v41 = vpop.f32.mrb[85].mxu1  ;;  %v7010_v15 = vadd.f32 %v7009_v53, %v6835_v17 }
0x2f62   :  { %v7012_v0 = vadd.f32 %v7011_v3, %v6839_v9  ;;  %v7013_v25 = vpop.f32.mrb[102].mxu0  ;;  %v7055_v60 = vpop.f32.mrb[86].mxu1 }
0x2f63   :  { %v7015_v24 = vpop.f32.mrb[103].mxu0  ;;  %v10537_v4 = vpop.f32.mrb[87].mxu1  ;;  %v13534_v22 = vadd.f32 %v7055_v60, %v6843_v6  ;;  %v7059_v37 = vpack.c.bf16 %v7010_v15, %v7010_v15  ;;  %v7014_v10 = vadd.f32 %v7013_v25, %v6835_v17 }
0x2f64   :  { %v7060_v56 = vmul.f32 %v7012_v0, %v12672_v1  ;;  %v7061_v28 = vmul.f32 %v7012_v0, %v12675_v2  ;;  %v7016_v47 = vadd.f32 %v7015_v24, %v6839_v9  ;;  %v7062_v46 = vmul.f32 %v7012_v0, %v12691_v18 }
0x2f65   :  { %v7063_v52 = vmul.f32 %v7012_v0, %v12694_v19  ;;  %v7238_v11 = vpack.c.bf16 %v7014_v10, %v7014_v10  ;;  %v7247_v31 = vmul.f32 %v13534_v22, %v12691_v18 }
0x2f66   :  { %v7064_v20 = vpack.c.bf16 %v7061_v28, %v7060_v56  ;;  %v7239_v21 = vmul.f32 %v7016_v47, %v12672_v1  ;;  %v7240_v29 = vmul.f32 %v7016_v47, %v12675_v2  ;;  %v7241_v36 = vmul.f32 %v7016_v47, %v12691_v18 }
0x2f67   :  { %v7242_v12 = vmul.f32 %v7016_v47, %v12694_v19  ;;  %v7065_v50 = vpack.c.bf16 %v7063_v52, %v7062_v46  ;;  %v7246_v46 = vmul.f32 %v13534_v22, %v12675_v2 }
0x2f68   :  { %10539 = vmatpush3.bf16.xpose.msra.mxu0 %v7064_v20  ;;  %v7243_v14 = vpack.c.bf16 %v7240_v29, %v7239_v21  ;;  %v7245_v29 = vmul.f32 %v13534_v22, %v12672_v1 }
0x2f69   :  { %10540 = vmatprep.subr.bf16.mxu0 %v12194_v33  ;;  %v7244_v63 = vpack.c.bf16 %v7242_v12, %v7241_v36  ;;  %v11251_v36 = vld [vmem:[#allocation24 + $0xb0] sm:$0xff]  }
0x2f6a   :  { %10566 = vmatpush3.bf16.xpose.msra.mxu1 %v7243_v14  ;;  %v7248_v14 = vmul.f32 %v13534_v22, %v12694_v19  ;;  %v7249_v17 = vpack.c.bf16 %v7246_v46, %v7245_v29  ;;  %v11250_v22 = vld [vmem:[#allocation24 + $0xa8] sm:$0xff]   ;;  %v11267_v29 = vld [vmem:[#allocation26 + $0x244] ss:$16 sps:$4 sm:$0xff]  }
0x2f6b   :  { %10567 = vmatprep.subr.bf16.mxu1 %v12194_v33  ;;  %v11270_v46 = vld [vmem:[#allocation26 + $0x24c] ss:$16 sps:$4 sm:$0xff]  }
0x2f70   :  { %10541 = vmatpush3.bf16.xpose.msra.mxu0 %v7065_v50 }
0x2f71   :  { %10694 = vmatprep.subr.bf16.mxu0 %v12197_v30 }
0x2f72   :  { %10568 = vmatpush3.bf16.xpose.msra.mxu1 %v7244_v63 }
0x2f73   :  { %10592 = vmatprep.subr.bf16.mxu1 %v12194_v33 }
0x2f77   :  { %10543 = vmatmul.mubr.bf16.vlgmr.msra.gmra.mrb[104].mxu0 %v7059_v37 }
0x2f78   :  { %10696 = vmatpush3.bf16.msk.msra.mxu0 %vm12710_vm3, %v12198_v32  ;;  %10554 = vmatprep.mubr.msk.f32.mxu0 %vm12196_vm1, %v12194_v33 }
0x2f79   :  { %10697 = vmatprep.subr.bf16.mxu0 %v12197_v30  ;;  %10570 = vmatmul.mubr.bf16.vlgmr.msra.gmra.mrb[88].mxu1 %v7238_v11 }
0x2f7a   :  { %10608 = vmatprep.mubr.msk.bf16.mxu1 %vm12196_vm1, %v12194_v33 }
0x2f7c   :  { %10699 = vmatpush3.bf16.msk.msra.mxu0 %vm12724_vm7, %v12198_v32 }
0x2f7d   :  { %10557 = vmatprep.subr.bf16.mxu0 %v12194_v33 }
0x304a   :  { %v7106_v43 = vpop.f32.mrb[104].mxu0 }
0x304b   :  { %v7107_v38 = vadd.f32 %v7106_v43, %v13205_v13  ;;  %v10544_v54 = vpop.f32.mrb[105].mxu0  ;;  %v7053_v13 = vadd.f32 %v7052_v16, %v6843_v6 }
0x304c   :  { %v7109_v5 = vpop.f32.mrb[106].mxu0  ;;  %v7285_v59 = vpop.f32.mrb[88].mxu1  ;;  %v11252_v54 = vld [vmem:[#allocation24 + $0xb8] sm:$0xff]  }
0x304d   :  { %v10545_v55 = vpop.f32.mrb[107].mxu0  ;;  %v7112_v27 = vsel %vm1090_vm10, %v7107_v38, -inf  ;;  %v7286_v7 = vadd.f32 %v7285_v59, %v13221_v44  ;;  %v10571_v57 = vpop.f32.mrb[89].mxu1  ;;  %v7066_v3 = vmul.f32 %v7053_v13, %v12672_v1  ;;  %v7067_v41 = vmul.f32 %v7053_v13, %v12675_v2  ;;  %v11245_v2 = vld [vmem:[#allocation24 + $0x80] sm:$0xff]  }
0x304e   :  { %7113 = vmax.xlane.f32.xlu0 %v7112_v27  ;;  %v7288_v40 = vpop.f32.mrb[90].mxu1  ;;  %v7068_v25 = vmul.f32 %v7053_v13, %v12691_v18  ;;  %v7069_v44 = vmul.f32 %v7053_v13, %v12694_v19  ;;  %v7250_v1 = vpack.c.bf16 %v7248_v14, %v7247_v31  ;;  %10593 = vmatpush3.bf16.msra.mxu1 %v11245_v2  ;;  %v11247_v18 = vld [vmem:[#allocation24 + $0x90] sm:$0xff]   ;;  %v11248_v19 = vld [vmem:[#allocation24 + $0x98] sm:$0xff]  }
0x304f   :  { %v10572_v8 = vpop.f32.mrb[91].mxu1  ;;  %v7291_v49 = vsel %vm1090_vm10, %v7286_v7, -inf  ;;  %v7070_v60 = vpack.c.bf16 %v7067_v41, %v7066_v3  ;;  %10594 = vmatprep.subr.bf16.mxu1 %v12194_v33  ;;  %v9540_v57 = vld [vmem:[%s13816_s29 + $0x2] ss:$0 sm:$0xff]  ;;  %v11268_v31 = vld [vmem:[#allocation26 + $0x248] ss:$16 sps:$4 sm:$0xff]  }
0x3050   :  { %7292 = vmax.xlane.f32.xlu1 %v7291_v49  ;;  %v7071_v24 = vpack.c.bf16 %v7069_v44, %v7068_v25  ;;  %v11253_v41 = vld [vmem:[#allocation26 + $0x200] ss:$16 sps:$4 sm:$0xff]   ;;  %v11256_v25 = vld [vmem:[#allocation26 + $0x208] ss:$16 sps:$4 sm:$0xff]   ;;  %v11258_v44 = vld [vmem:[#allocation26 + $0x20c] ss:$16 sps:$4 sm:$0xff]  }
0x3051   :  { %v11273_v14 = vld [vmem:[#allocation26 + $0x264] ss:$16 sps:$4 sm:$0xff]   ;;  %v11274_v2 = vld [vmem:[#allocation26 + $0x268] ss:$16 sps:$4 sm:$0xff]  }
0x30db   :  { %v7114_v48 = vpop.xlane.xlu0 %7113 }
0x30dc   :  { %v7115_v9 = vsub.f32 %v7107_v38, %v7114_v48 }
0x30dd   :  { %v7293_v4 = vpop.xlane.xlu1 %7292 }
0x30de   :  { %v7116_v53 = vmul.f32 1.442695, %v7115_v9  ;;  %v7294_v56 = vsub.f32 %v7286_v7, %v7293_v4 }
0x30e0   :  { %11521 = vpow2.f32 %v7116_v53  ;;  %v7295_v28 = vmul.f32 1.442695, %v7294_v56 }
0x30ea   :  { %v11522_v0 = vpop.eup %11521 }
0x30eb   :  { %10555 = vmatmul.mubr.msk.f32.vlgmr.msra.gmra.mrb[86].mxu0 %vm1090_vm10, %v11522_v0 }
0x30ec   :  { %10558 = vmatpush3.bf16.msra.mxu0 %v7070_v60  ;;  %10561 = vmatprep.mubr.msk.bf16.mxu0 %vm12196_vm1, %v12194_v33  ;;  %v11261_v60 = vld [vmem:[#allocation26 + $0x224] ss:$16 sps:$4 sm:$0xff]  }
0x30ed   :  { %10559 = vmatprep.subr.bf16.mxu0 %v12194_v33 }
0x30f0   :  { %10560 = vmatpush3.bf16.msra.mxu0 %v7071_v24  ;;  %v11264_v24 = vld [vmem:[#allocation26 + $0x22c] ss:$16 sps:$4 sm:$0xff]  }
0x30f1   :  { %10700 = vmatprep.subr.bf16.mxu0 %v12197_v30 }
0x31be   :  { %v7187_v16 = vpop.f32.mrb[86].mxu0 }
0x31bf   :  { %11523 = vrcp.f32 %v7187_v16  ;;  %v10556_v6 = vpop.f32.mrb[87].mxu0  ;;  %v11259_v16 = vld [vmem:[#allocation26 + $0x220] ss:$16 sps:$4 sm:$0xff]  }
0x31c0   :  { %11525 = vpow2.f32 %v7295_v28  ;;  %v11262_v6 = vld [vmem:[#allocation26 + $0x228] ss:$16 sps:$4 sm:$0xff]  }
0x31c9   :  { %v11524_v47 = vpop.eup %11523 }
0x31ca   :  { %v7192_v20 = vmul.f32 %v11524_v47, %v11522_v0  ;;  %v11526_v52 = vpop.eup %11525  ;;  %v11255_v0 = vld [vmem:[#allocation26 + $0x204] ss:$16 sps:$4 sm:$0xff]  }
0x31cc   :  { %v7193_v21 = vpack.c.bf16 %v7192_v20, %v7192_v20 }
0x31ce   :  { %10562 = vmatmul.mubr.msk.bf16.vlgmr.msra.gmra.mrb[108].mxu0 %vm1090_vm10, %v7193_v21 }
0x31cf   :  { %10702 = vmatpush3.bf16.msk.msra.mxu0 %vm12710_vm3, %v12198_v32  ;;  %10581 = vmatprep.mubr.msk.f32.mxu0 %vm12196_vm1, %v12194_v33  ;;  %vm13824_vm3 = vcmask 130048  }
0x31d0   :  { %10703 = vmatprep.subr.bf16.mxu0 %v12197_v30 }
0x31d3   :  { %10705 = vmatpush3.bf16.msk.msra.mxu0 %vm12724_vm7, %v12198_v32  ;;  %v11246_v32 = vld [vmem:[#allocation24 + $0x88] sm:$0xff]   ;;  %vm8730_vm7 = vcmask 1041408  }
0x31d4   :  { %10584 = vmatprep.subr.bf16.mxu0 %v12194_v33  ;;  %10595 = vmatpush3.bf16.msra.mxu1 %v11246_v32  ;;  %v11277_v32 = vld [vmem:[#allocation26 + $0x280] ss:$16 sps:$4 sm:$0xff]  }
0x31d5   :  { %10596 = vmatprep.subr.bf16.mxu1 %v12194_v33 }
0x31d6   :  { %10582 = vmatmul.mubr.msk.f32.vlgmr.msra.gmra.mrb[112].mxu0 %vm1090_vm10, %v11526_v52 }
0x31d7   :  { %10585 = vmatpush3.bf16.msra.mxu0 %v7249_v17  ;;  %10588 = vmatprep.mubr.msk.bf16.mxu0 %vm12196_vm1, %v12194_v33  ;;  %v11276_v17 = vld [vmem:[#allocation26 + $0x26c] ss:$16 sps:$4 sm:$0xff]  }
0x31d8   :  { %10586 = vmatprep.subr.bf16.mxu0 %v12194_v33  ;;  %10597 = vmatpush3.bf16.msra.mxu1 %v11247_v18  ;;  %v11279_v18 = vld [vmem:[#allocation26 + $0x284] ss:$16 sps:$4 sm:$0xff]  }
0x31d9   :  { %10598 = vmatprep.subr.bf16.mxu1 %v12194_v33 }
0x31db   :  { %10587 = vmatpush3.bf16.msra.mxu0 %v7250_v1  ;;  %v11271_v1 = vld [vmem:[#allocation26 + $0x260] ss:$16 sps:$4 sm:$0xff]  }
0x31dc   :  { %10599 = vmatpush3.bf16.msra.mxu1 %v11248_v19  ;;  %7795 = vmatprep.subr.bf16.mxu0 %v11255_v0  ;;  %v11280_v19 = vld [vmem:[#allocation26 + $0x288] ss:$16 sps:$4 sm:$0xff]  }
0x31dd   :  { %10600 = vmatprep.subr.bf16.mxu1 %v12194_v33 }
0x31e0   :  { %10601 = vmatpush3.bf16.msra.mxu1 %v11249_v34  ;;  %v11282_v34 = vld [vmem:[#allocation26 + $0x28c] ss:$16 sps:$4 sm:$0xff]  }
0x31e1   :  { %10602 = vmatprep.subr.bf16.mxu1 %v12194_v33 }
0x31e4   :  { %10603 = vmatpush3.bf16.msra.mxu1 %v11250_v22  ;;  %v11285_v22 = vld [vmem:[#allocation26 + $0x2a4] ss:$16 sps:$4 sm:$0xff]  }
0x31e5   :  { %10604 = vmatprep.subr.bf16.mxu1 %v12194_v33 }
0x31e8   :  { %10605 = vmatpush3.bf16.msra.mxu1 %v11251_v36  ;;  %v11288_v36 = vld [vmem:[#allocation26 + $0x2ac] ss:$16 sps:$4 sm:$0xff]  }
0x31e9   :  { %10606 = vmatprep.subr.bf16.mxu1 %v12194_v33 }
0x31ec   :  { %10607 = vmatpush3.bf16.msra.mxu1 %v11252_v54  ;;  %v11298_v54 = vld [vmem:[#allocation26 + $0x2e8] ss:$16 sps:$4 sm:$0xff]  }
0x31ed   :  { %7838 = vmatprep.subr.bf16.mxu1 %v11258_v44  ;;  %v11301_v44 = vld [vmem:[#allocation27 + $0x2c0] sm:$0xff]  }
0x32a1   :  { %v7231_v12 = vpop.f32.mrb[108].mxu0 }
0x32a2   :  { %v10563_v50 = vpop.f32.mrb[109].mxu0 }
0x32a3   :  { %v7234_v15 = vpop.f32.mrb[110].mxu0  ;;  %v11286_v50 = vld [vmem:[#allocation26 + $0x2a8] ss:$16 sps:$4 sm:$0xff]  }
0x32a4   :  { %v10564_v63 = vpop.f32.mrb[111].mxu0  ;;  %v11291_v15 = vld [vmem:[#allocation26 + $0x2c4] ss:$16 sps:$4 sm:$0xff]  }
0x32a5   :  { %v11294_v63 = vld [vmem:[#allocation26 + $0x2cc] ss:$16 sps:$4 sm:$0xff]  }
0x32a9   :  { %v7366_v37 = vpop.f32.mrb[112].mxu0 }
0x32aa   :  { %11527 = vrcp.f32 %v7366_v37  ;;  %v10583_v10 = vpop.f32.mrb[113].mxu0  ;;  %v11289_v37 = vld [vmem:[#allocation26 + $0x2c0] ss:$16 sps:$4 sm:$0xff]  }
0x32ab   :  { %v11292_v10 = vld [vmem:[#allocation26 + $0x2c8] ss:$16 sps:$4 sm:$0xff]  }
0x32b4   :  { %v11528_v11 = vpop.eup %11527 }
0x32b5   :  { %v7371_v43 = vmul.f32 %v11528_v11, %v11526_v52  ;;  %v11265_v52 = vld [vmem:[#allocation26 + $0x240] ss:$16 sps:$4 sm:$0xff]   ;;  %v11297_v11 = vld [vmem:[#allocation26 + $0x2e4] ss:$16 sps:$4 sm:$0xff]  }
0x32b7   :  { %v7372_v38 = vpack.c.bf16 %v7371_v43, %v7371_v43  ;;  %v11300_v43 = vld [vmem:[#allocation26 + $0x2ec] ss:$16 sps:$4 sm:$0xff]  }
0x32b9   :  { %10589 = vmatmul.mubr.msk.bf16.vlgmr.msra.gmra.mrb[116].mxu0 %vm1090_vm10, %v7372_v38  ;;  %v11295_v38 = vld [vmem:[#allocation26 + $0x2e0] ss:$16 sps:$4 sm:$0xff]   ;;  %vm8354_vm10 = vcmask 64512  }
0x32ba   :  { %7827 = vmatprep.mubr.bf16.mxu0 %v12195_v45  ;;  %7796 = vmatpush1.bf16.msra.mxu0 %v11253_v41 }
0x32bb   :  { %7797 = vmatprep.subr.bf16.mxu0 %v11261_v60  ;;  %v11302_v60 = vld [vmem:[#allocation27 + $0x240] sm:$0xff]  }
0x32be   :  { %7798 = vmatpush1.bf16.msra.mxu0 %v11259_v16  ;;  %v11304_v16 = vld [vmem:[#allocation27 + $0x200] sm:$0xff]  }
0x32bf   :  { %7799 = vmatprep.subr.bf16.mxu0 %v11267_v29  ;;  %v11314_v29 = vld [vmem:[#allocation27 + $0x258] sm:$0xff]  }
0x32c2   :  { %7800 = vmatpush1.bf16.msra.mxu0 %v11265_v52  ;;  %v11316_v52 = vld [vmem:[#allocation27 + $0x218] sm:$0xff]  }
0x32c3   :  { %7801 = vmatprep.subr.bf16.mxu0 %v11273_v14  ;;  %v11318_v14 = vld [vmem:[#allocation27 + $0x260] sm:$0xff]  }
0x32c6   :  { %7802 = vmatpush1.bf16.msra.mxu0 %v11271_v1  ;;  %v11320_v1 = vld [vmem:[#allocation27 + $0x220] sm:$0xff]  }
0x32c7   :  { %7803 = vmatprep.subr.bf16.mxu0 %v11279_v18  ;;  %v11323_v18 = vld [vmem:[#allocation27 + $0x2a8] sm:$0xff]  }
0x32ca   :  { %7804 = vmatpush1.bf16.msra.mxu0 %v11277_v32  ;;  %v11322_v32 = vld [vmem:[#allocation27 + $0x268] sm:$0xff]  }
0x32cb   :  { %7805 = vmatprep.subr.bf16.mxu0 %v11285_v22  ;;  %v11326_v22 = vld [vmem:[#allocation27 + $0x270] sm:$0xff]  }
0x338c   :  { %v7410_v5 = vpop.f32.mrb[116].mxu0 }
0x338d   :  { %v7419_v55 = vpack.c.bf16 %v7410_v5, %v7231_v12  ;;  %v10590_v27 = vpop.f32.mrb[117].mxu0  ;;  %v11283_v12 = vld [vmem:[#allocation26 + $0x2a0] ss:$16 sps:$4 sm:$0xff]  }
0x338e   :  { %v7413_v59 = vpop.f32.mrb[118].mxu0  ;;  %7806 = vmatpush1.bf16.msra.mxu0 %v11283_v12  ;;  %v11328_v12 = vld [vmem:[#allocation27 + $0x230] sm:$0xff]  }
0x338f   :  { %v10591_v7 = vpop.f32.mrb[119].mxu0  ;;  %10609 = vmatmul.mubr.bf16.vlgmr.msra.gmra.mrb[92].mxu1 %v7419_v55  ;;  %7807 = vmatprep.subr.bf16.mxu0 %v11291_v15  ;;  %v11330_v15 = vld [vmem:[#allocation27 + $0x278] sm:$0xff]  }
0x3390   :  { %7870 = vmatprep.mubr.bf16.mxu1 %v12195_v45  ;;  %7839 = vmatpush1.bf16.msra.mxu1 %v11256_v25 }
0x3391   :  { %7840 = vmatprep.subr.bf16.mxu1 %v11264_v24  ;;  %v11303_v24 = vld [vmem:[#allocation27 + $0x280] sm:$0xff]  }
0x3392   :  { %7808 = vmatpush1.bf16.msra.mxu0 %v11289_v37  ;;  %v11332_v37 = vld [vmem:[#allocation27 + $0x238] sm:$0xff]  }
0x3393   :  { %7809 = vmatprep.subr.bf16.mxu0 %v11297_v11  ;;  %v9553_v11 = vld [vmem:[%s13819_s30 + $0x8] sm:$0xf] }
0x3394   :  { %7841 = vmatpush1.bf16.msra.mxu1 %v11262_v6  ;;  %v11305_v6 = vld [vmem:[#allocation27 + $0x2c8] sm:$0xff]  }
0x3395   :  { %7842 = vmatprep.subr.bf16.mxu1 %v11270_v46  ;;  %v11315_v46 = vld [vmem:[#allocation27 + $0x298] sm:$0xff]  }
0x3396   :  { %7810 = vmatpush1.bf16.msra.mxu0 %v11295_v38  ;;  %v7626_v38 = vrot.slane %v9553_v11, %v12665_v62 }
0x3397   :  { %10029 = vmatprep.subr.bf16.mxu0 %v11302_v60 }
0x3398   :  { %7843 = vmatpush1.bf16.msra.mxu1 %v11268_v31  ;;  %v11317_v31 = vld [vmem:[#allocation27 + $0x2e0] sm:$0xff]  }
0x3399   :  { %7844 = vmatprep.subr.bf16.mxu1 %v11276_v17  ;;  %v11319_v17 = vld [vmem:[#allocation27 + $0x2a0] sm:$0xff]  }
0x339c   :  { %7845 = vmatpush1.bf16.msra.mxu1 %v11274_v2  ;;  %v11321_v2 = vld [vmem:[#allocation27 + $0x2e8] sm:$0xff]  }
0x339d   :  { %7846 = vmatprep.subr.bf16.mxu1 %v11282_v34  ;;  %v11325_v34 = vld [vmem:[#allocation27 + $0x2f0] sm:$0xff]  }
0x33a0   :  { %7847 = vmatpush1.bf16.msra.mxu1 %v11280_v19  ;;  %v11324_v19 = vld [vmem:[#allocation27 + $0x228] sm:$0xff]  }
0x33a1   :  { %7848 = vmatprep.subr.bf16.mxu1 %v11288_v36  ;;  %v11327_v36 = vld [vmem:[#allocation27 + $0x2b0] sm:$0xff]  }
0x33a4   :  { %7849 = vmatpush1.bf16.msra.mxu1 %v11286_v50  ;;  %v11329_v50 = vld [vmem:[#allocation27 + $0x2f8] sm:$0xff]  }
0x33a5   :  { %7850 = vmatprep.subr.bf16.mxu1 %v11294_v63  ;;  %v11331_v63 = vld [vmem:[#allocation27 + $0x2b8] sm:$0xff]  }
0x33a8   :  { %7851 = vmatpush1.bf16.msra.mxu1 %v11292_v10  ;;  %v11335_v10 = vld [vmem:[#allocation29 + $0x4] ss:$8 sps:$4 sm:$0xff]  }
0x33a9   :  { %7852 = vmatprep.subr.bf16.mxu1 %v11300_v43  ;;  %v7618_v43 = vrot.slane %v9553_v11, %v12662_v61 }
0x33ac   :  { %7853 = vmatpush1.bf16.msra.mxu1 %v11298_v54  ;;  %v7622_v54 = vrot.slane %v9553_v11, %v12654_v58 }
0x33ad   :  { %10051 = vmatprep.subr.bf16.mxu1 %v11301_v44 }
0x3462   :  { %v7527_v40 = vpop.f32.mrb[92].mxu1 }
0x3463   :  { %v7528_v8 = vadd.f32 %v9540_v57, %v7527_v40  ;;  %v10610_v49 = vpop.f32.mrb[93].mxu1 }
0x3464   :  { %v7530_v48 = vpop.f32.mrb[94].mxu1 }
0x3465   :  { %v7531_v9 = vadd.f32 %v9540_v57, %v7530_v48  ;;  %v10611_v53 = vpop.f32.mrb[95].mxu1  ;;  %v7534_v13 = vadd.f32 %v7528_v8, %v13519_v51  ;;  %v9551_v8 = vld [vmem:[%s13817_s22 + $0x2] ss:$0 sm:$0xff] }
0x3467   :  { %7540 = vadd.xlane.f32.xlu0 %v7534_v13  ;;  %v7535_v3 = vadd.f32 %v7531_v9, %v13521_v26 }
0x3469   :  { %7542 = vadd.xlane.f32.xlu1 %v7535_v3 }
0x34f4   :  { %v7541_v51 = vpop.xlane.xlu0 %7540 }
0x34f5   :  { %v7544_v4 = vmul.f32 0.0078125, %v7541_v51  ;;  %v11306_v51 = vld [vmem:[#allocation27 + $0x248] sm:$0xff]  }
0x34f6   :  { %v7543_v26 = vpop.xlane.xlu1 %7542 }
0x34f7   :  { %v13608_v56 = vsub.f32 %v7534_v13, %v7544_v4  ;;  %v7545_v28 = vmul.f32 0.0078125, %v7543_v26  ;;  %v9552_v13 = vld [vmem:[%s13818_s23 + $0x2] ss:$0 sm:$0xff]  ;;  %v11307_v4 = vld [vmem:[#allocation27 + $0x288] sm:$0xff]  }
0x34f8   :  { %v11308_v26 = vld [vmem:[#allocation27 + $0x208] sm:$0xff]  }
0x34f9   :  { %v13610_v47 = vsub.f32 %v7535_v3, %v7545_v28  ;;  %v7548_v20 = vmul.f32 %v13608_v56, %v13608_v56  ;;  %v11310_v28 = vld [vmem:[#allocation27 + $0x250] sm:$0xff]  }
0x34fb   :  { %7550 = vadd.xlane.f32.xlu0 %v7548_v20  ;;  %v7549_v21 = vmul.f32 %v13610_v47, %v13610_v47  ;;  %v11312_v20 = vld [vmem:[#allocation27 + $0x210] sm:$0xff]  }
0x34fd   :  { %7552 = vadd.xlane.f32.xlu1 %v7549_v21  ;;  %v11313_v21 = vld [vmem:[#allocation27 + $0x2d8] sm:$0xff]  }
0x3588   :  { %v7551_v5 = vpop.xlane.xlu0 %7550 }
0x3589   :  { %v7554_v55 = vmul.f32 0.0078125, %v7551_v5  ;;  %v7630_v5 = vrot.slane %v9553_v11, %v13282_v35 }
0x358a   :  { %v7553_v27 = vpop.xlane.xlu1 %7552 }
0x358b   :  { %v7556_v59 = vadd.f32 1e-05, %v7554_v55  ;;  %v7555_v7 = vmul.f32 0.0078125, %v7553_v27 }
0x358d   :  { %11529 = vrsqrt.f32 %v7556_v59  ;;  %v7557_v57 = vadd.f32 1e-05, %v7555_v7 }
0x358f   :  { %11531 = vrsqrt.f32 %v7557_v57 }
0x3597   :  { %v11530_v40 = vpop.eup %11529 }
0x3598   :  { %v7560_v49 = vmul.f32 %v11530_v40, %v13608_v56  ;;  %v11309_v56 = vld [vmem:[#allocation27 + $0x2d0] sm:$0xff]  }
0x3599   :  { %v11532_v48 = vpop.eup %11531 }
0x359a   :  { %v7561_v9 = vmul.f32 %v11532_v48, %v13610_v47  ;;  %v7568_v53 = vmul.f32 %v9551_v8, %v7560_v49  ;;  %v11311_v47 = vld [vmem:[#allocation27 + $0x290] sm:$0xff]  }
0x359c   :  { %v7569_v3 = vmul.f32 %v9551_v8, %v7561_v9  ;;  %v13620_v41 = vadd.f32 %v9552_v13, %v7568_v53 }
0x359e   :  { %v13622_v0 = vadd.f32 %v9552_v13, %v7569_v3 }
0x35a0   :  { %v7578_v25 = vpack.c.bf16 %v13622_v0, %v13620_v41 }
0x35a2   :  { %7828 = vmatmul.mubr.bf16.vlgmr.msra.gmra.mrb[120].mxu0 %v7578_v25  ;;  %7871 = vmatmul.mubr.bf16.vlgmr.msra.gmra.mrb[96].mxu1 %v7578_v25 }
0x35a3   :  { %10052 = vmatpush3.bf16.msra.mxu1 %v11303_v24  ;;  %10030 = vmatpush3.bf16.msra.mxu0 %v11304_v16 }
0x35a4   :  { %10053 = vmatprep.subr.bf16.mxu1 %v11305_v6  ;;  %10031 = vmatprep.subr.bf16.mxu0 %v11306_v51 }
0x35a7   :  { %10054 = vmatpush3.bf16.msra.mxu1 %v11307_v4  ;;  %10032 = vmatpush3.bf16.msra.mxu0 %v11308_v26 }
0x35a8   :  { %10055 = vmatprep.subr.bf16.mxu1 %v11309_v56  ;;  %10033 = vmatprep.subr.bf16.mxu0 %v11310_v28 }
0x35ab   :  { %10056 = vmatpush3.bf16.msra.mxu1 %v11311_v47  ;;  %10034 = vmatpush3.bf16.msra.mxu0 %v11312_v20 }
0x35ac   :  { %10057 = vmatprep.subr.bf16.mxu1 %v11313_v21  ;;  %10035 = vmatprep.subr.bf16.mxu0 %v11314_v29 }
0x35af   :  { %10058 = vmatpush3.bf16.msra.mxu1 %v11315_v46  ;;  %10036 = vmatpush3.bf16.msra.mxu0 %v11316_v52 }
0x35b0   :  { %10059 = vmatprep.subr.bf16.mxu1 %v11317_v31  ;;  %10037 = vmatprep.subr.bf16.mxu0 %v11318_v14 }
0x35b3   :  { %10060 = vmatpush3.bf16.msra.mxu1 %v11319_v17  ;;  %10038 = vmatpush3.bf16.msra.mxu0 %v11320_v1 }
0x35b4   :  { %10061 = vmatprep.subr.bf16.mxu1 %v11321_v2  ;;  %10039 = vmatprep.subr.bf16.mxu0 %v11322_v32 }
0x35b7   :  { %10062 = vmatpush3.bf16.msra.mxu1 %v11323_v18  ;;  %10040 = vmatpush3.bf16.msra.mxu0 %v11324_v19 }
0x35b8   :  { %10063 = vmatprep.subr.bf16.mxu1 %v11325_v34  ;;  %10041 = vmatprep.subr.bf16.mxu0 %v11326_v22 }
0x35bb   :  { %10064 = vmatpush3.bf16.msra.mxu1 %v11327_v36  ;;  %10042 = vmatpush3.bf16.msra.mxu0 %v11328_v12 }
0x35bc   :  { %10065 = vmatprep.subr.bf16.mxu1 %v11329_v50  ;;  %10043 = vmatprep.subr.bf16.mxu0 %v11330_v15 }
0x35bf   :  { %10066 = vmatpush3.bf16.msra.mxu1 %v11331_v63  ;;  %10044 = vmatpush3.bf16.msra.mxu0 %v11332_v37 }
0x35c0   :  { %8673 = vmatprep.subr.bf16.mxu1 %v11335_v10  ;;  %10706 = vmatprep.subr.bf16.mxu0 %v12197_v30 }
0x3675   :  { %v7829_v55 = vpop.f32.mrb[120].mxu0  ;;  %v7872_v27 = vpop.f32.mrb[96].mxu1 }
0x3676   :  { %v13632_v59 = vadd.f32 %v7829_v55, %v7618_v43  ;;  %v13634_v7 = vadd.f32 %v7872_v27, %v7626_v38  ;;  %v7831_v57 = vpop.f32.mrb[121].mxu0  ;;  %v7874_v40 = vpop.f32.mrb[97].mxu1 }
0x3677   :  { %v13636_v8 = vadd.f32 %v7831_v57, %v7622_v54  ;;  %v13638_v30 = vadd.f32 %v7874_v40, %v7630_v5  ;;  %v7833_v49 = vpop.f32.mrb[122].mxu0  ;;  %v7876_v48 = vpop.f32.mrb[98].mxu1 }
0x3678   :  { %v7889_v62 = vmul.f32 0.044715, %v13632_v59  ;;  %v7891_v9 = vmul.f32 0.044715, %v13634_v7  ;;  %v7834_v53 = vadd.f32 %v7833_v49, %v7618_v43  ;;  %v7877_v35 = vadd.f32 %v7876_v48, %v7626_v38  ;;  %v7835_v13 = vpop.f32.mrb[123].mxu0  ;;  %v7878_v3 = vpop.f32.mrb[99].mxu1 }
0x3679   :  { %v7890_v25 = vmul.f32 0.044715, %v13636_v8  ;;  %v7892_v44 = vmul.f32 0.044715, %v13638_v30  ;;  %v13644_v60 = vadd.f32 %v7835_v13, %v7622_v54  ;;  %v13646_v24 = vadd.f32 %v7878_v3, %v7630_v5 }
0x367a   :  { %v7897_v16 = vmul.f32 %v7889_v62, %v13632_v59  ;;  %v7899_v6 = vmul.f32 %v7891_v9, %v13634_v7  ;;  %v7893_v51 = vmul.f32 0.044715, %v7834_v53  ;;  %v7895_v4 = vmul.f32 0.044715, %v7877_v35 }
0x367b   :  { %v7898_v26 = vmul.f32 %v7890_v25, %v13636_v8  ;;  %v7900_v56 = vmul.f32 %v7892_v44, %v13638_v30  ;;  %v7894_v28 = vmul.f32 0.044715, %v13644_v60  ;;  %v7896_v47 = vmul.f32 0.044715, %v13646_v24 }
0x367c   :  { %v7905_v20 = vmul.f32 %v7897_v16, %v13632_v59  ;;  %v7907_v21 = vmul.f32 %v7899_v6, %v13634_v7  ;;  %v7901_v29 = vmul.f32 %v7893_v51, %v7834_v53  ;;  %v7903_v46 = vmul.f32 %v7895_v4, %v7877_v35 }
0x367d   :  { %v7906_v52 = vmul.f32 %v7898_v26, %v13636_v8  ;;  %v7908_v31 = vmul.f32 %v7900_v56, %v13638_v30  ;;  %v7902_v14 = vmul.f32 %v7894_v28, %v13644_v60  ;;  %v7904_v17 = vmul.f32 %v7896_v47, %v13646_v24 }
0x367e   :  { %v7913_v1 = vadd.f32 %v7905_v20, %v13632_v59  ;;  %v7915_v2 = vadd.f32 %v7907_v21, %v13634_v7  ;;  %v7909_v32 = vmul.f32 %v7901_v29, %v7834_v53  ;;  %v7911_v18 = vmul.f32 %v7903_v46, %v7877_v35 }
0x367f   :  { %v7910_v19 = vmul.f32 %v7902_v14, %v13644_v60  ;;  %v7912_v34 = vmul.f32 %v7904_v17, %v13646_v24  ;;  %v7914_v15 = vadd.f32 %v7906_v52, %v13636_v8  ;;  %v7916_v11 = vadd.f32 %v7908_v31, %v13638_v30 }
0x3680   :  { %v7921_v22 = vmul.f32 0.7978846, %v7913_v1  ;;  %v7923_v36 = vmul.f32 0.7978846, %v7915_v2  ;;  %v7917_v12 = vadd.f32 %v7909_v32, %v7834_v53  ;;  %v7919_v50 = vadd.f32 %v7911_v18, %v7877_v35 }
0x3681   :  { %v7918_v63 = vadd.f32 %v7910_v19, %v13644_v60  ;;  %v7922_v43 = vmul.f32 0.7978846, %v7914_v15  ;;  %v7920_v54 = vadd.f32 %v7912_v34, %v13646_v24  ;;  %v7924_v5 = vmul.f32 0.7978846, %v7916_v11  ;;  %v11338_v19 = vld [vmem:[#allocation29 + $0x14] ss:$8 sps:$4 sm:$0xff]  }
0x3682   :  { %11533 = vtanh.f32 %v7921_v22  ;;  %v7925_v37 = vmul.f32 0.7978846, %v7917_v12  ;;  %v7927_v10 = vmul.f32 0.7978846, %v7919_v50  ;;  %v7881_v9 = vmul.f32 0.5, %v13632_v59 }
0x3683   :  { %11535 = vtanh.f32 %v7923_v36  ;;  %v7926_v38 = vmul.f32 0.7978846, %v7918_v63  ;;  %v7928_v55 = vmul.f32 0.7978846, %v7920_v54  ;;  %v7885_v13 = vmul.f32 0.5, %v7834_v53 }
0x3684   :  { %11537 = vtanh.f32 %v7925_v37  ;;  %v7883_v44 = vmul.f32 0.5, %v13634_v7  ;;  %v7887_v16 = vmul.f32 0.5, %v7877_v35  ;;  %v7882_v4 = vmul.f32 0.5, %v13636_v8  ;;  %v11339_v34 = vld [vmem:[#allocation29 + $0x20] ss:$8 sps:$4 sm:$0xff]  }
0x3685   :  { %11539 = vtanh.f32 %v7927_v10  ;;  %v7886_v20 = vmul.f32 0.5, %v13644_v60  ;;  %v7884_v53 = vmul.f32 0.5, %v13638_v30  ;;  %v7888_v52 = vmul.f32 0.5, %v13646_v24  ;;  %v11333_v60 = vld [vmem:[#allocation29] ss:$8 sps:$4 sm:$0xff]  }
0x3686   :  { %11541 = vtanh.f32 %v7922_v43  ;;  %v11336_v30 = vld [vmem:[#allocation29 + $0x10] ss:$8 sps:$4 sm:$0xff]   ;;  %v11341_v24 = vld [vmem:[#allocation29 + $0x24] ss:$8 sps:$4 sm:$0xff]   ;;  %v11344_v22 = vld [vmem:[#allocation29 + $0x34] ss:$8 sps:$4 sm:$0xff]  }
0x3687   :  { %11543 = vtanh.f32 %v7926_v38  ;;  %v11342_v36 = vld [vmem:[#allocation29 + $0x30] ss:$8 sps:$4 sm:$0xff]   ;;  %v11347_v12 = vld [vmem:[#allocation29 + $0x44] ss:$8 sps:$4 sm:$0xff]   ;;  %v11345_v50 = vld [vmem:[#allocation29 + $0x40] ss:$8 sps:$4 sm:$0xff]   ;;  %v8438_v38 = vpack.c.bf16 %v13161_v42, %v13161_v42 }
0x3688   :  { %11545 = vtanh.f32 %v7924_v5  ;;  %v11350_v15 = vld [vmem:[#allocation29 + $0x54] ss:$8 sps:$4 sm:$0xff]   ;;  %v11348_v63 = vld [vmem:[#allocation29 + $0x50] ss:$8 sps:$4 sm:$0xff]   ;;  %v11353_v37 = vld [vmem:[#allocation29 + $0x64] ss:$8 sps:$4 sm:$0xff]  }
0x3689   :  { %11547 = vtanh.f32 %v7928_v55  ;;  %v11351_v10 = vld [vmem:[#allocation29 + $0x60] ss:$8 sps:$4 sm:$0xff]   ;;  %v11356_v11 = vld [vmem:[#allocation29 + $0x74] ss:$8 sps:$4 sm:$0xff]   ;;  %v11354_v43 = vld [vmem:[#allocation29 + $0x70] ss:$8 sps:$4 sm:$0xff]  }
0x368a   :  { %v9587_v5 = vld [vmem:[%s13820_s2 + $0x2] ss:$0 sm:$0xff] }
0x368c   :  { %v11534_v27 = vpop.eup %11533 }
0x368d   :  { %v11536_v57 = vpop.eup %11535  ;;  %v7937_v40 = vadd.f32 1.0, %v11534_v27 }
0x368e   :  { %v11538_v49 = vpop.eup %11537  ;;  %v7939_v48 = vadd.f32 1.0, %v11536_v57 }
0x368f   :  { %v11540_v62 = vpop.eup %11539  ;;  %v7941_v3 = vadd.f32 1.0, %v11538_v49  ;;  %v7945_v56 = vmul.f32 %v7937_v40, %v7881_v9 }
0x3690   :  { %v11542_v25 = vpop.eup %11541  ;;  %v7943_v6 = vadd.f32 1.0, %v11540_v62  ;;  %v7947_v29 = vmul.f32 %v7939_v48, %v7883_v44 }
0x3691   :  { %v11544_v51 = vpop.eup %11543  ;;  %v7938_v26 = vadd.f32 1.0, %v11542_v25  ;;  %v7949_v28 = vmul.f32 %v7941_v3, %v7885_v13 }
0x3692   :  { %v11546_v47 = vpop.eup %11545  ;;  %v7942_v21 = vadd.f32 1.0, %v11544_v51  ;;  %v7951_v46 = vmul.f32 %v7943_v6, %v7887_v16 }
0x3693   :  { %v11548_v59 = vpop.eup %11547  ;;  %v7940_v7 = vadd.f32 1.0, %v11546_v47  ;;  %v7953_v35 = vpack.c.bf16 %v7949_v28, %v7945_v56  ;;  %v7946_v31 = vmul.f32 %v7938_v26, %v7882_v4 }
0x3694   :  { %v7950_v14 = vmul.f32 %v7942_v21, %v7886_v20  ;;  %v7944_v17 = vadd.f32 1.0, %v11548_v59  ;;  %v7955_v8 = vpack.c.bf16 %v7951_v46, %v7947_v29 }
0x3695   :  { %v7948_v2 = vmul.f32 %v7940_v7, %v7884_v53 }
0x3696   :  { %v7954_v1 = vpack.c.bf16 %v7950_v14, %v7946_v31  ;;  %v7952_v32 = vmul.f32 %v7944_v17, %v7888_v52 }
0x3698   :  { %8254 = vmatprep.mubr.bf16.mxu0 %v7954_v1  ;;  %v7956_v18 = vpack.c.bf16 %v7952_v32, %v7948_v2  ;;  %v9622_v32 = vld [vmem:[%s13821_s11 + $0x2] ss:$0 sm:$0xff] }
0x3699   :  { %8255 = vmatmul.mubr.bf16.vlgmr.msra.gmra.mrb[124].mxu0 %v7953_v35 }
0x369a   :  { %8295 = vmatprep.mubr.bf16.mxu1 %v7956_v18  ;;  %10616 = vmatprep.mubr.msk.f32.mxu0 %vm12196_vm1, %v12194_v33  ;;  %vm8430_vm1 = vcmask 58368  }
0x369b   :  { %8296 = vmatmul.mubr.bf16.vlgmr.msra.gmra.mrb[100].mxu1 %v7955_v8 }
0x369c   :  { %8674 = vmatpush1.bf16.msra.mxu1 %v11333_v60  ;;  %8705 = vmatprep.mubr.bf16.mxu1 %v12195_v45 }
0x369d   :  { %8675 = vmatprep.subr.bf16.mxu1 %v11338_v19 }
0x36a0   :  { %8676 = vmatpush1.bf16.msra.mxu1 %v11336_v30 }
0x36a1   :  { %8677 = vmatprep.subr.bf16.mxu1 %v11341_v24 }
0x36a4   :  { %8678 = vmatpush1.bf16.msra.mxu1 %v11339_v34  ;;  %v9623_v34 = vld [vmem:[%s13822_s13 + $0x2] ss:$0 sm:$0xff] }
0x36a5   :  { %8679 = vmatprep.subr.bf16.mxu1 %v11344_v22 }
0x36a8   :  { %8680 = vmatpush1.bf16.msra.mxu1 %v11342_v36  ;;  %v8349_v36 = vsel %vm3164_vm0, 1.0, %v12194_v33  ;;  %v11363_v33 = vld [vmem:[#allocation30 + $0x20] ss:$8 sps:$4 sm:$0xff]  }
0x36a9   :  { %8681 = vmatprep.subr.bf16.mxu1 %v11347_v12 }
0x36ac   :  { %8682 = vmatpush1.bf16.msra.mxu1 %v11345_v50 }
0x36ad   :  { %8683 = vmatprep.subr.bf16.mxu1 %v11350_v15 }
0x36b0   :  { %8684 = vmatpush1.bf16.msra.mxu1 %v11348_v63  ;;  %v11359_v63 = vld [vmem:[#allocation30 + $0x4] ss:$8 sps:$4 sm:$0xff]  }
0x36b1   :  { %8685 = vmatprep.subr.bf16.mxu1 %v11353_v37 }
0x36b4   :  { %8686 = vmatpush1.bf16.msra.mxu1 %v11351_v10 }
0x36b5   :  { %8687 = vmatprep.subr.bf16.mxu1 %v11356_v11  ;;  %v11357_v11 = vld [vmem:[#allocation30] ss:$8 sps:$4 sm:$0xff]  }
0x36b8   :  { %8688 = vmatpush1.bf16.msra.mxu1 %v11354_v43  ;;  %v11362_v43 = vld [vmem:[#allocation30 + $0x14] ss:$8 sps:$4 sm:$0xff]  }
0x36bb   :  { %8706 = vmatmul.mubr.bf16.vlgmr.msra.gmra.mrb[104].mxu1 %v8438_v38  ;;  %v11360_v38 = vld [vmem:[#allocation30 + $0x10] ss:$8 sps:$4 sm:$0xff]  }
0x376c   :  { %v10045_v54 = vpop.f32.mrb[124].mxu0 }
0x376d   :  { %v10046_v55 = vpop.f32.mrb[125].mxu0 }
0x376e   :  { %v10067_v27 = vpop.f32.mrb[100].mxu1  ;;  %v10047_v57 = vadd.f32 %v10046_v55, %v10045_v54  ;;  %v10048_v40 = vpop.f32.mrb[126].mxu0  ;;  %v11366_v54 = vld [vmem:[#allocation30 + $0x30] ss:$8 sps:$4 sm:$0xff]   ;;  %v11369_v55 = vld [vmem:[#allocation30 + $0x40] ss:$8 sps:$4 sm:$0xff]  }
0x376f   :  { %v10068_v49 = vpop.f32.mrb[101].mxu1  ;;  %v10049_v48 = vpop.f32.mrb[127].mxu0 }
0x3770   :  { %v8257_v62 = vadd.f32 %v10047_v57, %v9587_v5  ;;  %v10069_v9 = vadd.f32 %v10068_v49, %v10067_v27  ;;  %v10070_v13 = vpop.f32.mrb[102].mxu1  ;;  %v10050_v3 = vadd.f32 %v10049_v48, %v10048_v40  ;;  %v11374_v27 = vld [vmem:[#allocation30 + $0x54] ss:$8 sps:$4 sm:$0xff]   ;;  %v11372_v57 = vld [vmem:[#allocation30 + $0x50] ss:$8 sps:$4 sm:$0xff]  }
0x3771   :  { %v10071_v25 = vpop.f32.mrb[103].mxu1  ;;  %v11377_v40 = vld [vmem:[#allocation30 + $0x64] ss:$8 sps:$4 sm:$0xff]   ;;  %v11378_v49 = vld [vmem:[#allocation30 + $0x70] ss:$8 sps:$4 sm:$0xff]  }
0x3772   :  { %v8298_v44 = vadd.f32 %v10069_v9, %v8257_v62  ;;  %v8260_v16 = vadd.f32 %v10050_v3, %v9587_v5  ;;  %v10072_v6 = vadd.f32 %v10071_v25, %v10070_v13  ;;  %v11371_v5 = vld [vmem:[#allocation30 + $0x44] ss:$8 sps:$4 sm:$0xff]   ;;  %v11380_v48 = vld [vmem:[#allocation30 + $0x74] ss:$8 sps:$4 sm:$0xff]  }
0x3774   :  { %v8301_v51 = vadd.f32 %v10072_v6, %v8260_v16  ;;  %v8304_v42 = vadd.f32 %v8298_v44, %v13620_v41  ;;  %v8714_v6 = vld [vmem:[#allocation32] sm:$0x3] }
0x3776   :  { %8310 = vadd.xlane.f32.xlu0 %v8304_v42  ;;  %v8305_v4 = vadd.f32 %v8301_v51, %v13622_v0  ;;  %v8348_v0 = vld [vmem:[%s13823_s14] sm:$0x3]  ;;  %v8719_v51 = vrot.slane %v8714_v6, %v12662_v61 }
0x3777   :  { %v8431_v7 = vsel %vm8430_vm1, %v8348_v0, 0.0 }
0x3778   :  { %8312 = vadd.xlane.f32.xlu1 %v8305_v4 }
0x378e   :  { %v13682_v26 = vpop.f32.mrb[104].mxu1 }
0x378f   :  { %v13684_v56 = vpop.f32.mrb[105].mxu1 }
0x3790   :  { %v8711_v28 = vpop.f32.mrb[106].mxu1 }
0x3791   :  { %v8712_v47 = vpop.f32.mrb[107].mxu1 }
0x3803   :  { %v8311_v20 = vpop.xlane.xlu0 %8310 }
0x3804   :  { %v8314_v21 = vmul.f32 0.0078125, %v8311_v20 }
0x3805   :  { %v8313_v29 = vpop.xlane.xlu1 %8312 }
0x3806   :  { %v8316_v46 = vsub.f32 %v8304_v42, %v8314_v21  ;;  %v8315_v59 = vmul.f32 0.0078125, %v8313_v29 }
0x3808   :  { %v8317_v53 = vsub.f32 %v8305_v4, %v8315_v59  ;;  %v8318_v52 = vmul.f32 %v8316_v46, %v8316_v46  ;;  %v8723_v4 = vrot.slane %v8714_v6, %v12654_v58 }
0x380a   :  { %8320 = vadd.xlane.f32.xlu0 %v8318_v52  ;;  %v8319_v41 = vmul.f32 %v8317_v53, %v8317_v53 }
0x380c   :  { %8322 = vadd.xlane.f32.xlu1 %v8319_v41 }
0x3810   :  { %8432 = vadd.xlane.f32.xlu1 %v8431_v7 }
0x3820   :  { %8351 = vrot.lane.b32.xlu0 %v8348_v0, %s12178_s17 }
0x3897   :  { %v8321_v35 = vpop.xlane.xlu0 %8320 }
0x3898   :  { %v8324_v31 = vmul.f32 0.0078125, %v8321_v35 }
0x3899   :  { %v8323_v14 = vpop.xlane.xlu1 %8322 }
0x389a   :  { %v8326_v17 = vadd.f32 1e-05, %v8324_v31  ;;  %v8325_v8 = vmul.f32 0.0078125, %v8323_v14 }
0x389b   :  { %v8352_v24 = vpop.permute.xlu0 %8351 }
0x389c   :  { %11549 = vrsqrt.f32 %v8326_v17  ;;  %v8327_v1 = vadd.f32 1e-05, %v8325_v8  ;;  %v8355_v12 = vsel %vm8354_vm10, %v8348_v0, %v8352_v24  ;;  %v11388_v24 = vld [vmem:[%s12430_s4 + $0x18] sm:$0xff]  }
0x389d   :  { %v8356_v10 = vmul.f32 %v8355_v12, %v8349_v36  ;;  %v8433_v62 = vpop.xlane.xlu1 %8432  ;;  %v11391_v36 = vld [vmem:[%s12430_s4 + $0x68] sm:$0xff]  }
0x389e   :  { %11551 = vrsqrt.f32 %v8327_v1  ;;  %v8434_v9 = vmax.f32 %v8433_v62, 1.0  ;;  %v11381_v1 = vld [vmem:[%s12430_s4 + $0x40] sm:$0xff]   ;;  %v11392_v12 = vld [vmem:[%s12430_s4 + $0x28] sm:$0xff]  }
0x38a0   :  { %11553 = vrcp.f32 %v8434_v9 }
0x38a6   :  { %v11550_v2 = vpop.eup %11549 }
0x38a7   :  { %v8330_v18 = vmul.f32 %v11550_v2, %v8316_v46  ;;  %v11382_v2 = vld [vmem:[%s12430_s4] sm:$0xff]  }
0x38a8   :  { %v11552_v60 = vpop.eup %11551 }
0x38a9   :  { %v8331_v19 = vmul.f32 %v11552_v60, %v8317_v53  ;;  %v8338_v30 = vmul.f32 %v9622_v32, %v8330_v18  ;;  %v11384_v18 = vld [vmem:[%s12430_s4 + $0x8] sm:$0xff]   ;;  %v11385_v60 = vld [vmem:[%s12430_s4 + $0x50] sm:$0xff]  }
0x38aa   :  { %v11554_v13 = vpop.eup %11553 }
0x38ab   :  { %v8339_v22 = vmul.f32 %v9622_v32, %v8331_v19  ;;  %v8346_v50 = vadd.f32 %v9623_v34, %v8338_v30  ;;  %v11383_v32 = vld [vmem:[%s12430_s4 + $0x48] sm:$0xff]   ;;  %v11386_v19 = vld [vmem:[%s12430_s4 + $0x10] sm:$0xff]   ;;  %v11387_v30 = vld [vmem:[%s12430_s4 + $0x58] sm:$0xff]  }
0x38ad   :  { %v8347_v15 = vadd.f32 %v9623_v34, %v8339_v22  ;;  %v11389_v34 = vld [vmem:[%s12430_s4 + $0x60] sm:$0xff]  }
0x38ae   :  { %v11390_v22 = vld [vmem:[%s12430_s4 + $0x20] sm:$0xff]  }
0x38af   :  { %v10707_v37 = vpack.c.bf16 %v8347_v15, %v8346_v50  ;;  %v11393_v50 = vld [vmem:[%s12430_s4 + $0x70] sm:$0xff]  }
0x38b0   :  { %v11394_v15 = vld [vmem:[%s12430_s4 + $0x30] sm:$0xff]  }
0x38b1   :  { %10708 = vmatpush3.bf16.msra.mxu0 %v10707_v37  ;;  %v11396_v37 = vld [vmem:[%s12430_s4 + $0x38] sm:$0xff]  }
0x38b2   :  { %8552 = vmatprep.subr.bf16.mxu0 %v11359_v63  ;;  %v11395_v63 = vld [vmem:[%s12430_s4 + $0x78] sm:$0xff]   ;;  %s12205_s4 = smov [#allocation39]  }
0x38b3   :  { %s8991_s17 = sshll.u32 %s12205_s4, 4  ;;  %s8992_s17 = int_to_ptr.vmem [resolvable:$true] %s8991_s17 }
0x38b4   :  { %10617 = vmatmul.mubr.msk.f32.vlgmr.msra.gmra.mrb[114].mxu0 %vm13824_vm3, %v8356_v10  ;;  %s12045_s3 = scalar_lea.vmem %s8992_s17, 32  ;;  %p12050_p9 = scmp.lt.s32.totalorder %s8992_s17, %s8992_s17 }
0x38b5   :  { %8553 = vmatpush1.bf16.msra.mxu0 %v11357_v11  ;;  %8584 = vmatprep.mubr.bf16.mxu0 %v12195_v45  ;;  %v11375_v45 = vld [vmem:[#allocation30 + $0x60] ss:$8 sps:$4 sm:$0xff]   ;;  %p12046_p8 = scmp.ne.s32.totalorder %s8992_s17, %s12045_s3  ;;  %p12051_p10 = scmp.lt.s32.totalorder %s12045_s3, %s12045_s3 }
0x38b6   :  { %8554 = vmatprep.subr.bf16.mxu0 %v11362_v43 }
0x38b7   :  { %p12052_p11 = por %p12051_p10, %p12050_p9 }
0x38b9   :  { %8555 = vmatpush1.bf16.msra.mxu0 %v11360_v38  ;;  %v8728_v38 = vld [vmem:[#allocation33] sm:$0x3]  ;;  %p12053_p12 = pnand %p12052_p11, %p12046_p8 }
0x38ba   :  { %8556 = vmatprep.subr.bf16.mxu0 %v11365_v23  ;;  %v8729_v23 = vld [vmem:[#allocation35] sm:$0x3] }
0x38bd   :  { %8557 = vmatpush1.bf16.msra.mxu0 %v11363_v33  ;;  %v8756_v33 = vrot.slane %v8728_v38, %v12662_v61 }
0x38be   :  { %8558 = vmatprep.subr.bf16.mxu0 %v11368_v39  ;;  %v8760_v39 = vrot.slane %v8728_v38, %v12654_v58 }
0x38c1   :  { %8559 = vmatpush1.bf16.msra.mxu0 %v11366_v54 }
0x38c2   :  { %8560 = vmatprep.subr.bf16.mxu0 %v11371_v5  ;;  %v8769_v5 = vrot.slane %v8729_v23, %v12662_v61 }
0x38c5   :  { %8561 = vmatpush1.bf16.msra.mxu0 %v11369_v55  ;;  %v8773_v55 = vrot.slane %v8729_v23, %v12654_v58 }
0x38c6   :  { %8562 = vmatprep.subr.bf16.mxu0 %v11374_v27 }
0x38c9   :  { %8563 = vmatpush1.bf16.msra.mxu0 %v11372_v57 }
0x38ca   :  { %8564 = vmatprep.subr.bf16.mxu0 %v11377_v40 }
0x38cd   :  { %8565 = vmatpush1.bf16.msra.mxu0 %v11375_v45 }
0x38ce   :  { %8566 = vmatprep.subr.bf16.mxu0 %v11380_v48 }
0x38d1   :  { %8567 = vmatpush1.bf16.msra.mxu0 %v11378_v49 }
0x38d2   :  { %10076 = vmatprep.subr.bf16.mxu0 %v11381_v1 }
0x3987   :  { %v8426_v3 = vpop.f32.mrb[114].mxu0 }
0x3988   :  { %v8436_v25 = vmul.f32 %v11554_v13, %v8426_v3  ;;  %v10618_v44 = vpop.f32.mrb[115].mxu0 }
0x398a   :  { %v8455_v16 = vpack.c.bf16 %v8436_v25, %v8436_v25  ;;  %8437 = vst [vmem:[#allocation39] sm:$0x3] %v8436_v25 }
0x398c   :  { %8585 = vmatmul.mubr.bf16.vlgmr.msra.gmra.mrb[128].mxu0 %v8455_v16 }
0x398d   :  { %10077 = vmatpush3.bf16.msra.mxu0 %v11382_v2 }
0x398e   :  { %10078 = vmatprep.subr.bf16.mxu0 %v11383_v32 }
0x3991   :  { %10079 = vmatpush3.bf16.msra.mxu0 %v11384_v18 }
0x3992   :  { %10080 = vmatprep.subr.bf16.mxu0 %v11385_v60 }
0x3995   :  { %10081 = vmatpush3.bf16.msra.mxu0 %v11386_v19 }
0x3996   :  { %10082 = vmatprep.subr.bf16.mxu0 %v11387_v30 }
0x3999   :  { %10083 = vmatpush3.bf16.msra.mxu0 %v11388_v24 }
0x399a   :  { %10084 = vmatprep.subr.bf16.mxu0 %v11389_v34 }
0x399d   :  { %10085 = vmatpush3.bf16.msra.mxu0 %v11390_v22 }
0x399e   :  { %10086 = vmatprep.subr.bf16.mxu0 %v11391_v36 }
0x39a1   :  { %10087 = vmatpush3.bf16.msra.mxu0 %v11392_v12 }
0x39a2   :  { %10088 = vmatprep.subr.bf16.mxu0 %v11393_v50 }
0x39a5   :  { %10089 = vmatpush3.bf16.msra.mxu0 %v11394_v15 }
0x39a6   :  { %10090 = vmatprep.subr.bf16.mxu0 %v11395_v63 }
0x39a9   :  { %10091 = vmatpush3.bf16.msra.mxu0 %v11396_v37 }
0x3a5f   :  { %v8586_v42 = vpop.f32.mrb[128].mxu0 }
0x3a60   :  { %v8708_v28 = vadd.f32 %v13682_v26, %v8586_v42  ;;  %v8588_v47 = vpop.f32.mrb[129].mxu0 }
0x3a61   :  { %v8710_v20 = vadd.f32 %v13684_v56, %v8588_v47  ;;  %v8590_v21 = vpop.f32.mrb[130].mxu0 }
0x3a62   :  { %v8726_v29 = vadd.f32 %v8719_v51, %v8708_v28  ;;  %v8591_v46 = vpop.f32.mrb[131].mxu0 }
0x3a63   :  { %v8727_v59 = vadd.f32 %v8723_v4, %v8710_v20 }
0x3a64   :  { %v8731_v53 = vsel %vm8730_vm7, %v8726_v29, 0.0 }
0x3a65   :  { %v8732_v52 = vsel %vm8730_vm7, %v8727_v59, 0.0 }
0x3a66   :  { %v8733_v41 = vadd.f32 %v8732_v52, %v8731_v53 }
0x3a68   :  { %8734 = vadd.xlane.f32.xlu1 %v8733_v41 }
0x3af5   :  { %v8735_v0 = vpop.xlane.xlu1 %8734 }
0x3af6   :  { %v8737_v7 = vmul.f32 0.00390625, %v8735_v0 }
0x3af8   :  { %v8738_v26 = vsub.f32 %v8726_v29, %v8737_v7  ;;  %v8739_v35 = vsub.f32 %v8727_v59, %v8737_v7 }
0x3afa   :  { %v8740_v56 = vmul.f32 %v8738_v26, %v8738_v26  ;;  %v8741_v31 = vmul.f32 %v8739_v35, %v8739_v35 }
0x3afc   :  { %v8742_v14 = vsel %vm8730_vm7, %v8740_v56, 0.0  ;;  %v8743_v17 = vsel %vm8730_vm7, %v8741_v31, 0.0 }
0x3afd   :  { %v8744_v8 = vadd.f32 %v8743_v17, %v8742_v14 }
0x3aff   :  { %8745 = vadd.xlane.f32.xlu1 %v8744_v8 }
0x3b8c   :  { %v8746_v10 = vpop.xlane.xlu1 %8745 }
0x3b8d   :  { %v8747_v11 = vmul.f32 0.00390625, %v8746_v10 }
0x3b8f   :  { %v8748_v43 = vadd.f32 1e-05, %v8747_v11 }
0x3b91   :  { %11555 = vrsqrt.f32 %v8748_v43 }
0x3b9b   :  { %v11556_v54 = vpop.eup %11555 }
0x3b9c   :  { %v8750_v27 = vmul.f32 %v11556_v54, %v8738_v26  ;;  %v8751_v57 = vmul.f32 %v11556_v54, %v8739_v35 }
0x3b9e   :  { %v8763_v40 = vmul.f32 %v8756_v33, %v8750_v27  ;;  %v8764_v45 = vmul.f32 %v8760_v39, %v8751_v57 }
0x3ba0   :  { %v8776_v49 = vadd.f32 %v8769_v5, %v8763_v40  ;;  %v8777_v48 = vadd.f32 %v8773_v55, %v8764_v45 }
0x3ba2   :  { %v8781_v62 = vmul.f32 0.044715, %v8777_v48  ;;  %v8780_v9 = vmul.f32 0.044715, %v8776_v49  ;;  %v8779_v4 = vmul.f32 0.5, %v8777_v48  ;;  %v8778_v47 = vmul.f32 0.5, %v8776_v49 }
0x3ba4   :  { %v8783_v13 = vmul.f32 %v8781_v62, %v8777_v48  ;;  %v8782_v3 = vmul.f32 %v8780_v9, %v8776_v49 }
0x3ba6   :  { %v8785_v25 = vmul.f32 %v8783_v13, %v8777_v48  ;;  %v8784_v44 = vmul.f32 %v8782_v3, %v8776_v49 }
0x3ba8   :  { %v8787_v16 = vadd.f32 %v8785_v25, %v8777_v48  ;;  %v8786_v6 = vadd.f32 %v8784_v44, %v8776_v49 }
0x3baa   :  { %v8789_v51 = vmul.f32 0.7978846, %v8787_v16  ;;  %v8788_v42 = vmul.f32 0.7978846, %v8786_v6 }
0x3bac   :  { %11557 = vtanh.f32 %v8789_v51 }
0x3bad   :  { %11559 = vtanh.f32 %v8788_v42 }
0x3bb6   :  { %v11558_v61 = vpop.eup %11557 }
0x3bb7   :  { %v11560_v58 = vpop.eup %11559  ;;  %v8793_v28 = vadd.f32 1.0, %v11558_v61 }
0x3bb8   :  { %v8792_v20 = vadd.f32 1.0, %v11560_v58 }
0x3bb9   :  { %v8795_v21 = vmul.f32 %v8793_v28, %v8779_v4 }
0x3bba   :  { %v8794_v29 = vmul.f32 %v8792_v20, %v8778_v47 }
0x3bbb   :  { %v8797_v46 = vpack.c.bf16 %v8795_v21, %v8795_v21 }
0x3bbc   :  { %v8796_v59 = vpack.c.bf16 %v8794_v29, %v8794_v29 }
0x3bbd   :  { %8965 = vmatprep.mubr.bf16.mxu0 %v8797_v46 }
0x3bbe   :  { %8966 = vmatmul.mubr.bf16.vlgmr.msra.gmra.mrb[132].mxu0 %v8796_v59 }
0x3bbf   :  { %12056 = shalt.err (!%p12053_p12)
}
0x3bc0   :  { %s12057_s19 = scalar_lea.hbm %s12445_s24, 32 }
0x3bc1   :  { %p12058_p13 = scmp.ne.s32.totalorder %s12445_s24, %s12057_s19  ;;  %p12061_p0 = scmp.lt.u32.totalorder %s12057_s19, %s12445_s24 }
0x3bc3   :  { %p12063_p1 = pnand %p12061_p0, %p12058_p13 }
0x3bc5   :  { %12066 = shalt.err (!%p12063_p1)
}
0x3bc6   :  { %8994 = dma.vmem_to_hbm [thread:$0]  %s8992_s17, 32, %s12445_s24, [#allocation40]   ;;  %v9657_v52 = vld [vmem:[#allocation36] ss:$0 sm:$0xff]  ;;  %vm8973_vm14 = vcmask 9216  }
0x3bc7   :  { %s12206_s18 = smov [#allocation38]  }
0x3bc8   :  { %s8981_s27 = sshll.u32 %s12206_s18, 4  ;;  %s8982_s27 = int_to_ptr.vmem [resolvable:$true] %s8981_s27 }
0x3bc9   :  { %s12067_s28 = scalar_lea.vmem %s8982_s27, 32  ;;  %p12072_p3 = scmp.lt.s32.totalorder %s8982_s27, %s8982_s27 }
0x3bca   :  { %p12068_p2 = scmp.ne.s32.totalorder %s8982_s27, %s12067_s28  ;;  %p12073_p4 = scmp.lt.s32.totalorder %s12067_s28, %s12067_s28 }
0x3bcc   :  { %p12074_p5 = por %p12073_p4, %p12072_p3 }
0x3bce   :  { %p12075_p6 = pnand %p12074_p5, %p12068_p2 }
0x3c91   :  { %v10092_v53 = vpop.f32.mrb[132].mxu0 }
0x3c92   :  { %v10093_v41 = vpop.f32.mrb[133].mxu0 }
0x3c93   :  { %v10094_v0 = vadd.f32 %v10093_v41, %v10092_v53  ;;  %v10095_v7 = vpop.f32.mrb[134].mxu0 }
0x3c94   :  { %v10096_v26 = vpop.f32.mrb[135].mxu0 }
0x3c95   :  { %v8968_v35 = vadd.f32 %v10094_v0, %v9657_v52 }
0x3c97   :  { %8974 = vst.msk [vmem:[#allocation38] sm:$0x3] %vm8973_vm14, %v8968_v35 }
0x3c98   :  { %12078 = shalt.err (!%p12075_p6)
}
0x3c99   :  { %s12079_s24 = scalar_lea.hbm %s12440_s12, 32 }
0x3c9a   :  { %p12080_p7 = scmp.ne.s32.totalorder %s12440_s12, %s12079_s24  ;;  %p12083_p8 = scmp.lt.u32.totalorder %s12079_s24, %s12440_s12 }
0x3c9c   :  { %p12085_p9 = pnand %p12083_p8, %p12080_p7 }
0x3c9e   :  { %12088 = shalt.err (!%p12085_p9)
}
0x3c9f   :  { %8984 = dma.vmem_to_hbm [thread:$0]  %s8982_s27, 32, %s12440_s12, [#allocation5]  }
0x3ca0   :  { %12113 = dma.done.wait [#allocation5], 32  }
0x3ca1   :  { %12114 = vsyncadd [#allocation5], 4294967264 }
0x3ca2   :  { %12115 = dma.done.wait [#allocation40], 32  }
0x3ca3   :  { %12116 = vsyncadd [#allocation40], 4294967264 }
0x3ca4   :  { %9001 = vsyncpa [#allocation4], 1 }
0x3ca5   :  { %9002 = vsyncpa [#allocation7], 1 }
0x3ca6   :  { %9003 = vsyncpa [#allocation10], 1 }
0x3ca7   :  { %9004 = vsyncpa [#allocation13], 1 }
0x3ca8   :  { %9005 = vsyncpa [#allocation16], 1 }
0x3ca9   :  { %9006 = vsyncpa [#allocation19], 1 }
0x3caa   :  { %9007 = vsyncpa [#allocation22], 1 }
0x3cab   :  { %9008 = vsyncpa [#allocation25], 1 }
0x3cac   :  { %9009 = vsyncpa [#allocation28], 1 }
0x3cad   :  { %9010 = vsyncpa [#allocation31], 1 }
0x3cae   :  { %9011 = vsyncpa [#allocation34], 1 }
0x3caf   :  { %9012 = vsyncpa [#allocation37], 1 }
0x3cb0   :  { %9013 = vsyncpa [#allocation5], 1 }
0x3cb1   :  { %9014 = vsyncpa [#allocation40], 1 }

</bundles_post_ra>
